<compile_context>
chip_gen: v6e
topology: v6e:2x2x1
jax: 0.10.0
libtpu: 0.0.40
codegen_flags: <defaults>
</compile_context>

<pallas_src>
import functools

import jax
import jax.numpy as jnp
from jax.experimental import pallas as pl
from jax.experimental.pallas import tpu as pltpu

# ---------------- config (small but lane/MXU-friendly shapes) ---------------
T = 256                # tokens (single flattened sequence)
D_MODEL = 256
N_HEADS = 4
N_KV_HEADS = 2
HEAD_DIM = 128
D_FFN = 512
EPS = 1e-6
ROPE_THETA = 10000.0
DTYPE = jnp.bfloat16   # activation / matmul-weight dtype

Q_SIZE = N_HEADS * HEAD_DIM            # 512
KV_SIZE = N_KV_HEADS * HEAD_DIM        # 256
QKV_TOTAL = Q_SIZE + 2 * KV_SIZE       # 1024
GROUP = N_HEADS // N_KV_HEADS          # 2
SCALE = HEAD_DIM ** -0.5

TM = 128               # token tile (mult. of 16 for bf16 sublane packing)
TF = 256               # d_ffn tile (256-aligned for v6e/v7x MXU)
VMEM_LIMIT = 32 * 1024 * 1024


# ======================= K1: pre-attention fused kernel =====================

def _prenorm_qkv_rope_kernel(*refs, add_residual, eps):
    if add_residual:
        (x_ref, r_ref, lnw_ref, qkvw_ref, qnw_ref, knw_ref, cos_ref, sin_ref,
         q_ref, k_ref, v_ref, res_ref, qkv_scr) = refs
    else:
        (x_ref, lnw_ref, qkvw_ref, qnw_ref, knw_ref, cos_ref, sin_ref,
         q_ref, k_ref, v_ref, res_ref, qkv_scr) = refs
        r_ref = None

    x = x_ref[...].astype(jnp.float32)
    z = x + r_ref[...].astype(jnp.float32) if add_residual else x
    res_ref[...] = z.astype(res_ref.dtype)

    # input RMSNorm (full d_model lives inside the block)
    var = jnp.mean(z * z, axis=-1, keepdims=True)
    normed = z * jax.lax.rsqrt(var + eps) * lnw_ref[...].astype(jnp.float32)

    # fused QKV projection: bf16 operands, fp32 MXU accumulation, staged to a
    # VMEM scratch so the (TM, QKV_TOTAL) fp32 result doesn't spill vregs
    # across the per-head epilogue below.
    qkv_scr[...] = jnp.dot(normed.astype(qkvw_ref.dtype), qkvw_ref[...],
                           preferred_element_type=jnp.float32)

    cos = cos_ref[...]           # (TM, HEAD_DIM)  = [ cos | cos ]
    sin = sin_ref[...]           # (TM, HEAD_DIM)  = [-sin | sin ]
    half = HEAD_DIM // 2
    qnw = qnw_ref[...]           # fp32, attention scale already folded in
    knw = knw_ref[...]

    def norm_rope(xh, w):
        hv = jnp.mean(xh * xh, axis=-1, keepdims=True)
        xn = xh * jax.lax.rsqrt(hv + eps) * w
        rot = jnp.concatenate([xn[:, half:], xn[:, :half]], axis=-1)  # [x2|x1]
        return xn * cos + rot * sin

    for hq in range(N_HEADS):
        xh = qkv_scr[:, hq * HEAD_DIM:(hq + 1) * HEAD_DIM]
        q_ref[hq] = norm_rope(xh, qnw).astype(q_ref.dtype)
    for hk in range(N_KV_HEADS):
        base = Q_SIZE + hk * HEAD_DIM
        k_ref[hk] = norm_rope(qkv_scr[:, base:base + HEAD_DIM],
                              knw).astype(k_ref.dtype)
    for hv in range(N_KV_HEADS):
        base = Q_SIZE + KV_SIZE + hv * HEAD_DIM
        v_ref[hv] = qkv_scr[:, base:base + HEAD_DIM].astype(v_ref.dtype)


def fused_prenorm_qkv_rope(x, residual, ln_w, qkv_w, qn_w, kn_w, cos_f, sin_f):
    add = residual is not None
    n_blk = T // TM
    kernel = functools.partial(_prenorm_qkv_rope_kernel,
                               add_residual=add, eps=EPS)
    tok_spec = pl.BlockSpec((TM, D_MODEL), lambda i: (i, 0))

    in_specs = [tok_spec]
    args = [x]
    if add:                         # first layer: skip the residual DMA entirely
        in_specs.append(tok_spec)
        args.append(residual)
    in_specs += [
        pl.BlockSpec((1, D_MODEL), lambda i: (0, 0)),                  # input_ln
        pl.BlockSpec((D_MODEL, QKV_TOTAL), lambda i: (0, 0)),          # qkv_w
        pl.BlockSpec((1, HEAD_DIM), lambda i: (0, 0)),                 # q_norm
        pl.BlockSpec((1, HEAD_DIM), lambda i: (0, 0)),                 # k_norm
        pl.BlockSpec((TM, HEAD_DIM), lambda i: (i, 0)),                # cos
        pl.BlockSpec((TM, HEAD_DIM), lambda i: (i, 0)),                # sin
    ]
    args += [ln_w, qkv_w, qn_w, kn_w, cos_f, sin_f]

    return pl.pallas_call(
        kernel,
        grid=(n_blk,),
        out_shape=(jax.ShapeDtypeStruct((N_HEADS, T, HEAD_DIM), DTYPE),
                   jax.ShapeDtypeStruct((N_KV_HEADS, T, HEAD_DIM), DTYPE),
                   jax.ShapeDtypeStruct((N_KV_HEADS, T, HEAD_DIM), DTYPE),
                   jax.ShapeDtypeStruct((T, D_MODEL), DTYPE)),
        in_specs=in_specs,
        out_specs=(pl.BlockSpec((N_HEADS, TM, HEAD_DIM), lambda i: (0, i, 0)),
                   pl.BlockSpec((N_KV_HEADS, TM, HEAD_DIM), lambda i: (0, i, 0)),
                   pl.BlockSpec((N_KV_HEADS, TM, HEAD_DIM), lambda i: (0, i, 0)),
                   tok_spec),
        scratch_shapes=[pltpu.VMEM((TM, QKV_TOTAL), jnp.float32)],
        # residual stream updated in place when a real residual exists (P8)
        input_output_aliases=({1: 3} if add else {}),
        compiler_params=pltpu.CompilerParams(
            dimension_semantics=("parallel",),
            vmem_limit_bytes=VMEM_LIMIT),
    )(*args)


# ===================== K2: causal GQA attention + o_proj ====================

def _attn_oproj_kernel(q_ref, k_ref, v_ref, ow_ref, o_ref, acc_ref):
    i = pl.program_id(0)          # token (query) block
    h = pl.program_id(1)          # kv head

    @pl.when(h == 0)
    def _():
        acc_ref[...] = jnp.zeros_like(acc_ref)

    group, tm, dh = q_ref.shape
    kv_len = k_ref.shape[1]

    # flatten the query heads of this KV group -> one M=group*tm score matmul
    q = q_ref[...].reshape(group * tm, dh)        # bf16, scale folded upstream
    k = k_ref[0]                                  # (kv_len, dh) bf16
    v = v_ref[0]

    s = jax.lax.dot_general(q, k, (((1,), (1,)), ((), ())),
                            preferred_element_type=jnp.float32)  # (g*tm, kv)

    # cheap causal mask: (tm,1) row iota vs (1,kv) key iota, broadcast over g
    q_pos = i * tm + jax.lax.broadcasted_iota(jnp.int32, (tm, 1), 0)
    k_pos = jax.lax.broadcasted_iota(jnp.int32, (1, kv_len), 1)
    mask = k_pos <= q_pos                                        # (tm, kv)
    s = s.reshape(group, tm, kv_len)
    s = jnp.where(mask[None], s, jnp.float32(-1e30))             # keep fp32!

    m = jnp.max(s, axis=-1, keepdims=True)
    p = jnp.exp(s - m)                                           # unnormalized
    l = jnp.sum(p, axis=-1, keepdims=True)                       # (g, tm, 1)

    p_flat = p.reshape(group * tm, kv_len).astype(v.dtype)
    o = jax.lax.dot_general(p_flat, v, (((1,), (0,)), ((), ())),
                            preferred_element_type=jnp.float32)  # (g*tm, dh)
    o = o.reshape(group, tm, dh) / l                             # normalize after

    # lane-concat group heads -> single K = group*dh o_proj matmul and one
    # fp32 accumulator update per grid step.
    o_cat = jnp.concatenate([o[g] for g in range(group)], axis=-1)  # (tm, g*dh)
    acc_ref[...] += jnp.dot(o_cat.astype(ow_ref.dtype), ow_ref[...],
                            preferred_element_type=jnp.float32)

    @pl.when(h == pl.num_programs(1) - 1)
    def _():
        o_ref[...] = acc_ref[...].astype(o_ref.dtype)


def fused_attn_oproj(q, k, v, o_w):
    n_blk = T // TM
    return pl.pallas_call(
        _attn_oproj_kernel,
        grid=(n_blk, N_KV_HEADS),
        out_shape=jax.ShapeDtypeStruct((T, D_MODEL), DTYPE),
        in_specs=[
            pl.BlockSpec((GROUP, TM, HEAD_DIM), lambda i, h: (h, i, 0)),     # q
            pl.BlockSpec((1, T, HEAD_DIM), lambda i, h: (h, 0, 0)),          # k
            pl.BlockSpec((1, T, HEAD_DIM), lambda i, h: (h, 0, 0)),          # v
            pl.BlockSpec((GROUP * HEAD_DIM, D_MODEL), lambda i, h: (h, 0)),  # o_w
        ],
        out_specs=pl.BlockSpec((TM, D_MODEL), lambda i, h: (i, 0)),
        scratch_shapes=[pltpu.VMEM((TM, D_MODEL), jnp.float32)],
        compiler_params=pltpu.CompilerParams(
            dimension_semantics=("parallel", "arbitrary"),
            vmem_limit_bytes=VMEM_LIMIT),
    )(q, k, v, o_w)


# ============ K3: add-residual + post-norm + merged gate|up MLP =============

def _postnorm_mlp_kernel(attn_ref, r_ref, lnw_ref, guw_ref, dw_ref,
                         out_ref, res_ref, normed_scr, acc_ref, *, eps, tf):
    f = pl.program_id(1)

    @pl.when(f == 0)
    def _():
        # post-attention add-residual + RMSNorm, cached in VMEM so "normed"
        # never round-trips HBM between the norm and the MLP matmuls.
        z = attn_ref[...].astype(jnp.float32) + r_ref[...].astype(jnp.float32)
        res_ref[...] = z.astype(res_ref.dtype)
        var = jnp.mean(z * z, axis=-1, keepdims=True)
        normed = z * jax.lax.rsqrt(var + eps) * lnw_ref[...].astype(jnp.float32)
        normed_scr[...] = normed.astype(normed_scr.dtype)
        acc_ref[...] = jnp.zeros_like(acc_ref)

    x = normed_scr[...]                                     # bf16 (TM, D_MODEL)
    gu = jnp.dot(x, guw_ref[0], preferred_element_type=jnp.float32)  # (TM, 2*TF)
    g = gu[:, :tf]
    u = gu[:, tf:]
    act = (g * jax.lax.logistic(g) * u).astype(dw_ref.dtype)          # SiLU*mul
    acc_ref[...] += jnp.dot(act, dw_ref[...],
                            preferred_element_type=jnp.float32)

    @pl.when(f == pl.num_programs(1) - 1)
    def _():
        out_ref[...] = acc_ref[...].astype(out_ref.dtype)


def fused_postnorm_mlp(attn_out, residual, post_ln, gate_up_tiled, down_w):
    n_m = T // TM
    n_f = D_FFN // TF
    kernel = functools.partial(_postnorm_mlp_kernel, eps=EPS, tf=TF)
    return pl.pallas_call(
        kernel,
        grid=(n_m, n_f),
        out_shape=(jax.ShapeDtypeStruct((T, D_MODEL), DTYPE),
                   jax.ShapeDtypeStruct((T, D_MODEL), DTYPE)),
        in_specs=[
            pl.BlockSpec((TM, D_MODEL), lambda i, f: (i, 0)),           # attn_out
            pl.BlockSpec((TM, D_MODEL), lambda i, f: (i, 0)),           # residual
            pl.BlockSpec((1, D_MODEL), lambda i, f: (0, 0)),            # post_ln
            pl.BlockSpec((1, D_MODEL, 2 * TF), lambda i, f: (f, 0, 0)),  # gate|up
            pl.BlockSpec((TF, D_MODEL), lambda i, f: (f, 0)),           # down
        ],
        out_specs=(pl.BlockSpec((TM, D_MODEL), lambda i, f: (i, 0)),
                   pl.BlockSpec((TM, D_MODEL), lambda i, f: (i, 0))),
        scratch_shapes=[pltpu.VMEM((TM, D_MODEL), DTYPE),        # cached normed
                        pltpu.VMEM((TM, D_MODEL), jnp.float32)],  # down acc
        input_output_aliases={1: 1},     # residual updated in place (P8)
        compiler_params=pltpu.CompilerParams(
            dimension_semantics=("parallel", "arbitrary"),
            vmem_limit_bytes=VMEM_LIMIT),
    )(attn_out, residual, post_ln, gate_up_tiled, down_w)


# ============================== layer glue ===================================

def rope_tables(positions, dim, theta):
    inv_freq = 1.0 / (theta ** (jnp.arange(0, dim, 2, dtype=jnp.float32) / dim))
    freqs = positions.astype(jnp.float32)[:, None] * inv_freq[None, :]  # (T,dim/2)
    cos, sin = jnp.cos(freqs), jnp.sin(freqs)
    cos_f = jnp.concatenate([cos, cos], axis=-1)      # (T, dim)
    sin_f = jnp.concatenate([-sin, sin], axis=-1)     # rotate-half signs
    return cos_f, sin_f


def qwen3_decoder_layer(params, positions, hidden_states, residual=None):
    cos_f, sin_f = rope_tables(positions, HEAD_DIM, ROPE_THETA)
    q, k, v, residual = fused_prenorm_qkv_rope(
        hidden_states, residual, params["input_ln"], params["qkv_w"],
        params["q_norm_scaled"], params["k_norm"], cos_f, sin_f)
    attn_out = fused_attn_oproj(q, k, v, params["o_w"])
    out, residual = fused_postnorm_mlp(
        attn_out, residual, params["post_ln"],
        params["gate_up_tiled"], params["down_w"])
    return out, residual


# ===================== pure-JAX reference (correctness) ======================

def _ref_rmsnorm_f32(zf, w, eps=EPS):
    var = jnp.mean(zf * zf, axis=-1, keepdims=True)
    return zf * jax.lax.rsqrt(var + eps) * w.reshape(1, -1).astype(jnp.float32)


def ref_layer(params, positions, hidden_states, residual=None):
    f32 = jnp.float32
    x = hidden_states.astype(f32)
    zf = x if residual is None else x + residual.astype(f32)
    new_residual = zf.astype(DTYPE)

    h = _ref_rmsnorm_f32(zf, params["input_ln"])
    qkv = jnp.dot(h.astype(DTYPE), params["qkv_w"],
                  preferred_element_type=f32)
    q = qkv[:, :Q_SIZE].reshape(T, N_HEADS, HEAD_DIM)
    k = qkv[:, Q_SIZE:Q_SIZE + KV_SIZE].reshape(T, N_KV_HEADS, HEAD_DIM)
    v = qkv[:, Q_SIZE + KV_SIZE:].reshape(T, N_KV_HEADS, HEAD_DIM).astype(DTYPE)

    def head_rms(xh, w):
        var = jnp.mean(xh * xh, axis=-1, keepdims=True)
        return xh * jax.lax.rsqrt(var + EPS) * w.reshape(1, 1, -1).astype(f32)

    q = head_rms(q, params["q_norm"])
    k = head_rms(k, params["k_norm"])

    inv_freq = 1.0 / (ROPE_THETA ** (jnp.arange(0, HEAD_DIM, 2, dtype=f32) / HEAD_DIM))
    freqs = positions.astype(f32)[:, None] * inv_freq[None, :]
    cos = jnp.cos(freqs)[:, None, :]
    sin = jnp.sin(freqs)[:, None, :]

    def rope(xh):
        x1, x2 = xh[..., :HEAD_DIM // 2], xh[..., HEAD_DIM // 2:]
        return jnp.concatenate([x1 * cos - x2 * sin, x2 * cos + x1 * sin], axis=-1)

    q = (rope(q) * SCALE).astype(DTYPE)      # scaling applied in attention
    k = rope(k).astype(DTYPE)

    qh = q.transpose(1, 0, 2)                                   # (H, T, D)
    kh = jnp.repeat(k.transpose(1, 0, 2), GROUP, axis=0)
    vh = jnp.repeat(v.transpose(1, 0, 2), GROUP, axis=0)
    s = jnp.einsum("hqd,hkd->hqk", qh, kh, preferred_element_type=f32)
    mask = jnp.tril(jnp.ones((T, T), bool))
    s = jnp.where(mask[None], s, jnp.float32(-1e30))
    m = jnp.max(s, axis=-1, keepdims=True)
    p = jnp.exp(s - m)
    l = jnp.sum(p, axis=-1, keepdims=True)
    o = jnp.einsum("hqk,hkd->hqd", p.astype(DTYPE), vh,
                   preferred_element_type=f32) / l
    o = o.transpose(1, 0, 2).reshape(T, Q_SIZE).astype(DTYPE)
    attn_out = jnp.dot(o, params["o_w"], preferred_element_type=f32)

    z2 = attn_out.astype(DTYPE).astype(f32) + new_residual.astype(f32)
    residual2 = z2.astype(DTYPE)
    h2 = _ref_rmsnorm_f32(z2, params["post_ln"]).astype(DTYPE)
    g = jnp.dot(h2, params["gate_w"], preferred_element_type=f32)
    u = jnp.dot(h2, params["up_w"], preferred_element_type=f32)
    act = (g * jax.lax.logistic(g) * u).astype(DTYPE)
    out = jnp.dot(act, params["down_w"], preferred_element_type=f32).astype(DTYPE)
    return out, residual2


# ======================= parameter init & main ===============================

def init_params(key):
    ks = jax.random.split(key, 9)
    std = 0.02

    def w(k, shape):
        return (std * jax.random.normal(k, shape, jnp.float32)).astype(DTYPE)

    gate_w = w(ks[2], (D_MODEL, D_FFN))
    up_w = w(ks[3], (D_MODEL, D_FFN))
    n_f = D_FFN // TF
    # host-side one-time layout: slab f = [gate cols f | up cols f] so K3 does
    # one N=2*TF matmul per ffn block (MergedColumnParallelLinear layout).
    gate_up_tiled = jnp.concatenate(
        [gate_w.reshape(D_MODEL, n_f, TF).transpose(1, 0, 2),
         up_w.reshape(D_MODEL, n_f, TF).transpose(1, 0, 2)], axis=-1)

    q_norm = 1.0 + 0.1 * jax.random.normal(ks[7], (1, HEAD_DIM), jnp.float32)
    return {
        # weights pre-transposed to (in, out) so kernels compute x @ W^T
        "qkv_w": w(ks[0], (D_MODEL, QKV_TOTAL)),
        "o_w": w(ks[1], (Q_SIZE, D_MODEL)),
        "gate_w": gate_w,
        "up_w": up_w,
        "gate_up_tiled": gate_up_tiled,
        "down_w": w(ks[4], (D_FFN, D_MODEL)),
        # RMSNorm weights kept fp32, 2-D (1, d) for TPU-friendly layout
        "input_ln": 1.0 + 0.1 * jax.random.normal(ks[5], (1, D_MODEL), jnp.float32),
        "post_ln": 1.0 + 0.1 * jax.random.normal(ks[6], (1, D_MODEL), jnp.float32),
        "q_norm": q_norm,
        "q_norm_scaled": q_norm * SCALE,   # attention scaling folded in (exact)
        "k_norm": 1.0 + 0.1 * jax.random.normal(ks[8], (1, HEAD_DIM), jnp.float32),
    }


if __name__ == "__main__":
    key = jax.random.PRNGKey(0)
    k_p, k_x = jax.random.split(key)
    params = init_params(k_p)

    positions = jnp.arange(T, dtype=jnp.int32)
    x0 = jax.random.normal(k_x, (T, D_MODEL), jnp.float32).astype(DTYPE)

    fwd = jax.jit(qwen3_decoder_layer)

    # first layer (residual=None path) then a chained second layer
    # (fused add-residual path with in-place residual aliasing).
    out1, res1 = fwd(params, positions, x0, None)
    out2, res2 = fwd(params, positions, out1, res1)
    jax.block_until_ready((out1, res1, out2, res2))

    r_out1, r_res1 = ref_layer(params, positions, x0, None)
    r_out2, r_res2 = ref_layer(params, positions, r_out1, r_res1)

    def check(name, got, want):
        assert got.shape == want.shape == (T, D_MODEL)
        g = got.astype(jnp.float32)
        w_ = want.astype(jnp.float32)
        err = float(jnp.max(jnp.abs(g - w_)))
        scale = float(jnp.max(jnp.abs(w_))) + 1e-6
        assert err <= 3e-2 * scale + 2e-3, f"{name}: max abs err {err} (scale {scale})"

    check("out1", out1, r_out1)
    check("res1", res1, r_res1)
    check("out2", out2, r_out2)
    check("res2", res2, r_res2)

    print("KERNEL_OK")
</pallas_src>

<mosaic_0001>
module attributes {stable_mosaic.version = 11 : i64} {
  func.func @_attn_oproj_kernel(%arg0: i32, %arg1: i32, %arg2: memref<2x128x128xbf16, #tpu.memory_space<vmem>>, %arg3: memref<1x256x128xbf16, #tpu.memory_space<vmem>>, %arg4: memref<1x256x128xbf16, #tpu.memory_space<vmem>>, %arg5: memref<256x256xbf16, #tpu.memory_space<vmem>>, %arg6: memref<128x256xbf16, #tpu.memory_space<vmem>>, %arg7: memref<128x256xf32, #tpu.memory_space<vmem>>) attributes {dimension_semantics = [#tpu.dimension_semantics<parallel>, #tpu.dimension_semantics<arbitrary>], iteration_bounds = array<i64: 2, 2>, scalar_prefetch = 0 : i64, scratch_operands = 1 : i64, tpu.core_type = #tpu.core_type<tc>, window_params = [{transform_indices = @transform_0, window_bounds = array<i64: 2, 128, 128>}, {transform_indices = @transform_1, window_bounds = array<i64: 1, 256, 128>}, {transform_indices = @transform_2, window_bounds = array<i64: 1, 256, 128>}, {transform_indices = @transform_3, window_bounds = array<i64: 256, 256>}, {transform_indices = @transform_4, window_bounds = array<i64: 128, 256>}]} {
    %c0_i32 = arith.constant 0 : i32
    %0 = arith.cmpi eq, %arg1, %c0_i32 : i32
    %1 = arith.extui %0 : i1 to i32
    %c0_i32_0 = arith.constant 0 : i32
    %2 = arith.cmpi ne, %1, %c0_i32_0 : i32
    scf.if %2 {
      %cst_21 = arith.constant 0.000000e+00 : f32
      %51 = vector.broadcast %cst_21 : f32 to vector<128x256xf32>
      %c0_22 = arith.constant 0 : index
      %c0_23 = arith.constant 0 : index
      %52 = vector.load %arg7[%c0_22, %c0_23] : memref<128x256xf32, #tpu.memory_space<vmem>>, vector<128x256xf32>
      tpu.vector_store %arg7[%c0_22, %c0_23], %51 {strides = array<i32>} : memref<128x256xf32, #tpu.memory_space<vmem>>, vector<128x256xf32>,
    } else {
    }
    %c0 = arith.constant 0 : index
    %c0_1 = arith.constant 0 : index
    %c0_2 = arith.constant 0 : index
    %3 = vector.load %arg2[%c0, %c0_1, %c0_2] : memref<2x128x128xbf16, #tpu.memory_space<vmem>>, vector<2x128x128xbf16>
    %4 = vector.shape_cast %3 : vector<2x128x128xbf16> to vector<256x128xbf16>
    %c0_3 = arith.constant 0 : index
    %c0_4 = arith.constant 0 : index
    %c0_5 = arith.constant 0 : index
    %5 = vector.load %arg3[%c0_3, %c0_4, %c0_5] : memref<1x256x128xbf16, #tpu.memory_space<vmem>>, vector<1x256x128xbf16>
    %6 = vector.shape_cast %5 : vector<1x256x128xbf16> to vector<256x128xbf16>
    %c0_6 = arith.constant 0 : index
    %c0_7 = arith.constant 0 : index
    %c0_8 = arith.constant 0 : index
    %7 = vector.load %arg4[%c0_6, %c0_7, %c0_8] : memref<1x256x128xbf16, #tpu.memory_space<vmem>>, vector<1x256x128xbf16>
    %8 = vector.shape_cast %7 : vector<1x256x128xbf16> to vector<256x128xbf16>
    %cst = arith.constant dense<0.000000e+00> : vector<256x256xf32>
    %9 = tpu.matmul %4, %6, %cst {dimension_numbers = #tpu.dot_dimension_numbers<[1], [1], [0], [0], [0, 0, 1, 0], [], []>} : vector<256x128xbf16>, vector<256x128xbf16>, vector<256x256xf32> -> vector<256x256xf32>
    %c128_i32 = arith.constant 128 : i32
    %10 = arith.muli %arg0, %c128_i32 : i32
    %11 = tpu.iota {dimensions = array<i32: 0>} : vector<128x1xi32>
    %12 = vector.broadcast %10 : i32 to vector<128x1xi32>
    %13 = arith.addi %12, %11 : vector<128x1xi32>
    %14 = tpu.iota {dimensions = array<i32: 1>} : vector<1x256xi32>
    %15 = vector.broadcast %14 : vector<1x256xi32> to vector<128x256xi32>
    %16 = vector.broadcast %13 : vector<128x1xi32> to vector<128x256xi32>
    %17 = arith.cmpi sle, %15, %16 : vector<128x256xi32>
    %18 = vector.shape_cast %9 : vector<256x256xf32> to vector<2x128x256xf32>
    %19 = vector.shape_cast %17 : vector<128x256xi1> to vector<1x128x256xi1>
    %cst_9 = arith.constant -1.000000e+30 : f32
    %20 = vector.shape_cast %19 : vector<1x128x256xi1> to vector<1x128x256xi1>
    %21 = vector.broadcast %20 : vector<1x128x256xi1> to vector<2x128x256xi1>
    %22 = vector.broadcast %cst_9 : f32 to vector<2x128x256xf32>
    %23 = arith.select %21, %18, %22 : vector<2x128x256xi1>, vector<2x128x256xf32>
    %cst_10 = arith.constant dense<0xFF800000> : vector<2x128xf32>
    %24 = vector.multi_reduction <maximumf>, %23, %cst_10 [2] : vector<2x128x256xf32> to vector<2x128xf32>
    %25 = vector.shape_cast %24 : vector<2x128xf32> to vector<2x128x1xf32>
    %26 = vector.broadcast %25 : vector<2x128x1xf32> to vector<2x128x256xf32>
    %27 = arith.subf %23, %26 : vector<2x128x256xf32>
    %28 = math.exp %27 : vector<2x128x256xf32>
    %cst_11 = arith.constant dense<0.000000e+00> : vector<2x128xf32>
    %29 = vector.multi_reduction <add>, %28, %cst_11 [2] : vector<2x128x256xf32> to vector<2x128xf32>
    %30 = vector.shape_cast %29 : vector<2x128xf32> to vector<2x128x1xf32>
    %31 = vector.shape_cast %28 : vector<2x128x256xf32> to vector<256x256xf32>
    %32 = arith.truncf %31 : vector<256x256xf32> to vector<256x256xbf16>
    %cst_12 = arith.constant dense<0.000000e+00> : vector<256x128xf32>
    %33 = tpu.matmul %32, %8, %cst_12 {dimension_numbers = #tpu.dot_dimension_numbers<[1], [0], [0], [1], [0, 0, 1, 1], [], []>} : vector<256x256xbf16>, vector<256x128xbf16>, vector<256x128xf32> -> vector<256x128xf32>
    %34 = vector.shape_cast %33 : vector<256x128xf32> to vector<2x128x128xf32>
    %35 = vector.broadcast %30 : vector<2x128x1xf32> to vector<2x128x128xf32>
    %36 = arith.divf %34, %35 : vector<2x128x128xf32>
    %37 = vector.extract_strided_slice %36 {offsets = [0, 0, 0], sizes = [1, 128, 128], strides = [1, 1, 1]} : vector<2x128x128xf32> to vector<1x128x128xf32>
    %38 = vector.shape_cast %37 : vector<1x128x128xf32> to vector<128x128xf32>
    %39 = vector.extract_strided_slice %36 {offsets = [1, 0, 0], sizes = [1, 128, 128], strides = [1, 1, 1]} : vector<2x128x128xf32> to vector<1x128x128xf32>
    %40 = vector.shape_cast %39 : vector<1x128x128xf32> to vector<128x128xf32>
    %41 = tpu.concatenate %38, %40 in 1 : vector<128x128xf32>, vector<128x128xf32> -> vector<128x256xf32>
    %c0_13 = arith.constant 0 : index
    %c0_14 = arith.constant 0 : index
    %42 = vector.load %arg7[%c0_13, %c0_14] : memref<128x256xf32, #tpu.memory_space<vmem>>, vector<128x256xf32>
    %43 = arith.truncf %41 : vector<128x256xf32> to vector<128x256xbf16>
    %c0_15 = arith.constant 0 : index
    %c0_16 = arith.constant 0 : index
    %44 = vector.load %arg5[%c0_15, %c0_16] : memref<256x256xbf16, #tpu.memory_space<vmem>>, vector<256x256xbf16>
    %cst_17 = arith.constant dense<0.000000e+00> : vector<128x256xf32>
    %45 = tpu.matmul %43, %44, %cst_17 {dimension_numbers = #tpu.dot_dimension_numbers<[1], [0], [0], [1], [0, 0, 1, 1], [], []>} : vector<128x256xbf16>, vector<256x256xbf16>, vector<128x256xf32> -> vector<128x256xf32>
    %46 = arith.addf %42, %45 : vector<128x256xf32>
    %c0_18 = arith.constant 0 : index
    %c0_19 = arith.constant 0 : index
    %47 = vector.load %arg7[%c0_18, %c0_19] : memref<128x256xf32, #tpu.memory_space<vmem>>, vector<128x256xf32>
    tpu.vector_store %arg7[%c0_18, %c0_19], %46 {strides = array<i32>} : memref<128x256xf32, #tpu.memory_space<vmem>>, vector<128x256xf32>,
    %c1_i32 = arith.constant 1 : i32
    %48 = arith.cmpi eq, %arg1, %c1_i32 : i32
    %49 = arith.extui %48 : i1 to i32
    %c0_i32_20 = arith.constant 0 : i32
    %50 = arith.cmpi ne, %49, %c0_i32_20 : i32
    scf.if %50 {
      %c0_21 = arith.constant 0 : index
      %c0_22 = arith.constant 0 : index
      %51 = vector.load %arg7[%c0_21, %c0_22] : memref<128x256xf32, #tpu.memory_space<vmem>>, vector<128x256xf32>
      %52 = arith.truncf %51 : vector<128x256xf32> to vector<128x256xbf16>
      %c0_23 = arith.constant 0 : index
      %c0_24 = arith.constant 0 : index
      %53 = vector.load %arg6[%c0_23, %c0_24] : memref<128x256xbf16, #tpu.memory_space<vmem>>, vector<128x256xbf16>
      tpu.vector_store %arg6[%c0_23, %c0_24], %52 {strides = array<i32>} : memref<128x256xbf16, #tpu.memory_space<vmem>>, vector<128x256xbf16>,
    } else {
    }
    return
  }
  func.func @transform_0(%arg0: i32, %arg1: i32) -> (i32, i32, i32) {
    %c0_i32 = arith.constant 0 : i32
    %c0_i32_0 = arith.constant 0 : i32
    return %arg1, %arg0, %c0_i32 : i32, i32, i32
  }
  func.func @transform_1(%arg0: i32, %arg1: i32) -> (i32, i32, i32) {
    %c0_i32 = arith.constant 0 : i32
    %c0_i32_0 = arith.constant 0 : i32
    %c0_i32_1 = arith.constant 0 : i32
    return %arg1, %c0_i32, %c0_i32_0 : i32, i32, i32
  }
  func.func @transform_2(%arg0: i32, %arg1: i32) -> (i32, i32, i32) {
    %c0_i32 = arith.constant 0 : i32
    %c0_i32_0 = arith.constant 0 : i32
    %c0_i32_1 = arith.constant 0 : i32
    return %arg1, %c0_i32, %c0_i32_0 : i32, i32, i32
  }
  func.func @transform_3(%arg0: i32, %arg1: i32) -> (i32, i32) {
    %c0_i32 = arith.constant 0 : i32
    %c0_i32_0 = arith.constant 0 : i32
    return %arg1, %c0_i32 : i32, i32
  }
  func.func @transform_4(%arg0: i32, %arg1: i32) -> (i32, i32) {
    %c0_i32 = arith.constant 0 : i32
    %c0_i32_0 = arith.constant 0 : i32
    return %arg0, %c0_i32 : i32, i32
  }
}

module attributes {stable_mosaic.version = 11 : i64} {
  func.func @_prenorm_qkv_rope_kernel(%arg0: i32, %arg1: memref<128x256xbf16, #tpu.memory_space<vmem>>, %arg2: memref<1x256xf32, #tpu.memory_space<vmem>>, %arg3: memref<256x1024xbf16, #tpu.memory_space<vmem>>, %arg4: memref<1x128xf32, #tpu.memory_space<vmem>>, %arg5: memref<1x128xf32, #tpu.memory_space<vmem>>, %arg6: memref<128x128xf32, #tpu.memory_space<vmem>>, %arg7: memref<128x128xf32, #tpu.memory_space<vmem>>, %arg8: memref<4x128x128xbf16, #tpu.memory_space<vmem>>, %arg9: memref<2x128x128xbf16, #tpu.memory_space<vmem>>, %arg10: memref<2x128x128xbf16, #tpu.memory_space<vmem>>, %arg11: memref<128x256xbf16, #tpu.memory_space<vmem>>, %arg12: memref<128x1024xf32, #tpu.memory_space<vmem>>) attributes {dimension_semantics = [#tpu.dimension_semantics<parallel>], iteration_bounds = array<i64: 2>, scalar_prefetch = 0 : i64, scratch_operands = 1 : i64, tpu.core_type = #tpu.core_type<tc>, window_params = [{transform_indices = @transform_0, window_bounds = array<i64: 128, 256>}, {pipeline_mode = #tpu.pipeline_mode<synchronous>, transform_indices = @transform_1, window_bounds = array<i64: 1, 256>}, {pipeline_mode = #tpu.pipeline_mode<synchronous>, transform_indices = @transform_2, window_bounds = array<i64: 256, 1024>}, {pipeline_mode = #tpu.pipeline_mode<synchronous>, transform_indices = @transform_3, window_bounds = array<i64: 1, 128>}, {pipeline_mode = #tpu.pipeline_mode<synchronous>, transform_indices = @transform_4, window_bounds = array<i64: 1, 128>}, {transform_indices = @transform_5, window_bounds = array<i64: 128, 128>}, {transform_indices = @transform_6, window_bounds = array<i64: 128, 128>}, {transform_indices = @transform_7, window_bounds = array<i64: 4, 128, 128>}, {transform_indices = @transform_8, window_bounds = array<i64: 2, 128, 128>}, {transform_indices = @transform_9, window_bounds = array<i64: 2, 128, 128>}, {transform_indices = @transform_10, window_bounds = array<i64: 128, 256>}]} {
    %c0 = arith.constant 0 : index
    %c0_0 = arith.constant 0 : index
    %0 = vector.load %arg1[%c0, %c0_0] : memref<128x256xbf16, #tpu.memory_space<vmem>>, vector<128x256xbf16>
    %1 = arith.extf %0 : vector<128x256xbf16> to vector<128x256xf32>
    %2 = arith.truncf %1 : vector<128x256xf32> to vector<128x256xbf16>
    %c0_1 = arith.constant 0 : index
    %c0_2 = arith.constant 0 : index
    %3 = vector.load %arg11[%c0_1, %c0_2] : memref<128x256xbf16, #tpu.memory_space<vmem>>, vector<128x256xbf16>
    tpu.vector_store %arg11[%c0_1, %c0_2], %2 {strides = array<i32>} : memref<128x256xbf16, #tpu.memory_space<vmem>>, vector<128x256xbf16>,
    %4 = arith.mulf %1, %1 : vector<128x256xf32>
    %cst = arith.constant dense<0.000000e+00> : vector<128xf32>
    %5 = vector.multi_reduction <add>, %4, %cst [1] : vector<128x256xf32> to vector<128xf32>
    %6 = vector.shape_cast %5 : vector<128xf32> to vector<128x1xf32>
    %cst_3 = arith.constant 2.560000e+02 : f32
    %7 = vector.broadcast %cst_3 : f32 to vector<128x1xf32>
    %8 = arith.divf %6, %7 : vector<128x1xf32>
    %cst_4 = arith.constant 9.99999997E-7 : f32
    %9 = vector.broadcast %cst_4 : f32 to vector<128x1xf32>
    %10 = arith.addf %8, %9 : vector<128x1xf32>
    %11 = math.rsqrt %10 : vector<128x1xf32>
    %12 = vector.broadcast %11 : vector<128x1xf32> to vector<128x256xf32>
    %13 = arith.mulf %1, %12 : vector<128x256xf32>
    %c0_5 = arith.constant 0 : index
    %c0_6 = arith.constant 0 : index
    %14 = vector.load %arg2[%c0_5, %c0_6] : memref<1x256xf32, #tpu.memory_space<vmem>>, vector<1x256xf32>
    %15 = vector.broadcast %14 : vector<1x256xf32> to vector<128x256xf32>
    %16 = arith.mulf %13, %15 : vector<128x256xf32>
    %17 = arith.truncf %16 : vector<128x256xf32> to vector<128x256xbf16>
    %c0_7 = arith.constant 0 : index
    %c0_8 = arith.constant 0 : index
    %18 = vector.load %arg3[%c0_7, %c0_8] : memref<256x1024xbf16, #tpu.memory_space<vmem>>, vector<256x1024xbf16>
    %cst_9 = arith.constant dense<0.000000e+00> : vector<128x1024xf32>
    %19 = tpu.matmul %17, %18, %cst_9 {dimension_numbers = #tpu.dot_dimension_numbers<[1], [0], [0], [1], [0, 0, 1, 1], [], []>} : vector<128x256xbf16>, vector<256x1024xbf16>, vector<128x1024xf32> -> vector<128x1024xf32>
    %c0_10 = arith.constant 0 : index
    %c0_11 = arith.constant 0 : index
    %20 = vector.load %arg12[%c0_10, %c0_11] : memref<128x1024xf32, #tpu.memory_space<vmem>>, vector<128x1024xf32>
    tpu.vector_store %arg12[%c0_10, %c0_11], %19 {strides = array<i32>} : memref<128x1024xf32, #tpu.memory_space<vmem>>, vector<128x1024xf32>,
    %c0_12 = arith.constant 0 : index
    %c0_13 = arith.constant 0 : index
    %21 = vector.load %arg6[%c0_12, %c0_13] : memref<128x128xf32, #tpu.memory_space<vmem>>, vector<128x128xf32>
    %c0_14 = arith.constant 0 : index
    %c0_15 = arith.constant 0 : index
    %22 = vector.load %arg7[%c0_14, %c0_15] : memref<128x128xf32, #tpu.memory_space<vmem>>, vector<128x128xf32>
    %c0_16 = arith.constant 0 : index
    %c0_17 = arith.constant 0 : index
    %23 = vector.load %arg4[%c0_16, %c0_17] : memref<1x128xf32, #tpu.memory_space<vmem>>, vector<1x128xf32>
    %c0_18 = arith.constant 0 : index
    %c0_19 = arith.constant 0 : index
    %24 = vector.load %arg5[%c0_18, %c0_19] : memref<1x128xf32, #tpu.memory_space<vmem>>, vector<1x128xf32>
    %c0_20 = arith.constant 0 : index
    %c0_21 = arith.constant 0 : index
    %25 = vector.load %arg12[%c0_20, %c0_21] : memref<128x1024xf32, #tpu.memory_space<vmem>>, vector<128x128xf32>
    %26 = arith.mulf %25, %25 : vector<128x128xf32>
    %cst_22 = arith.constant dense<0.000000e+00> : vector<128xf32>
    %27 = vector.multi_reduction <add>, %26, %cst_22 [1] : vector<128x128xf32> to vector<128xf32>
    %28 = vector.shape_cast %27 : vector<128xf32> to vector<128x1xf32>
    %cst_23 = arith.constant 1.280000e+02 : f32
    %29 = vector.broadcast %cst_23 : f32 to vector<128x1xf32>
    %30 = arith.divf %28, %29 : vector<128x1xf32>
    %cst_24 = arith.constant 9.99999997E-7 : f32
    %31 = vector.broadcast %cst_24 : f32 to vector<128x1xf32>
    %32 = arith.addf %30, %31 : vector<128x1xf32>
    %33 = math.rsqrt %32 : vector<128x1xf32>
    %34 = vector.broadcast %33 : vector<128x1xf32> to vector<128x128xf32>
    %35 = arith.mulf %25, %34 : vector<128x128xf32>
    %36 = vector.broadcast %23 : vector<1x128xf32> to vector<128x128xf32>
    %37 = arith.mulf %35, %36 : vector<128x128xf32>
    %38 = vector.extract_strided_slice %37 {offsets = [0, 64], sizes = [128, 64], strides = [1, 1]} : vector<128x128xf32> to vector<128x64xf32>
    %39 = vector.extract_strided_slice %37 {offsets = [0, 0], sizes = [128, 64], strides = [1, 1]} : vector<128x128xf32> to vector<128x64xf32>
    %40 = tpu.concatenate %38, %39 in 1 : vector<128x64xf32>, vector<128x64xf32> -> vector<128x128xf32>
    %41 = arith.mulf %37, %21 : vector<128x128xf32>
    %42 = arith.mulf %40, %22 : vector<128x128xf32>
    %43 = arith.addf %41, %42 : vector<128x128xf32>
    %44 = arith.truncf %43 : vector<128x128xf32> to vector<128x128xbf16>
    %c0_25 = arith.constant 0 : index
    %c0_26 = arith.constant 0 : index
    %c0_27 = arith.constant 0 : index
    %45 = vector.load %arg8[%c0_25, %c0_26, %c0_27] : memref<4x128x128xbf16, #tpu.memory_space<vmem>>, vector<1x128x128xbf16>
    %46 = vector.shape_cast %45 : vector<1x128x128xbf16> to vector<128x128xbf16>
    %47 = vector.shape_cast %44 : vector<128x128xbf16> to vector<1x128x128xbf16>
    tpu.vector_store %arg8[%c0_25, %c0_26, %c0_27], %47 {strides = array<i32>} : memref<4x128x128xbf16, #tpu.memory_space<vmem>>, vector<1x128x128xbf16>,
    %c0_28 = arith.constant 0 : index
    %c128 = arith.constant 128 : index
    %48 = vector.load %arg12[%c0_28, %c128] : memref<128x1024xf32, #tpu.memory_space<vmem>>, vector<128x128xf32>
    %49 = arith.mulf %48, %48 : vector<128x128xf32>
    %cst_29 = arith.constant dense<0.000000e+00> : vector<128xf32>
    %50 = vector.multi_reduction <add>, %49, %cst_29 [1] : vector<128x128xf32> to vector<128xf32>
    %51 = vector.shape_cast %50 : vector<128xf32> to vector<128x1xf32>
    %cst_30 = arith.constant 1.280000e+02 : f32
    %52 = vector.broadcast %cst_30 : f32 to vector<128x1xf32>
    %53 = arith.divf %51, %52 : vector<128x1xf32>
    %cst_31 = arith.constant 9.99999997E-7 : f32
    %54 = vector.broadcast %cst_31 : f32 to vector<128x1xf32>
    %55 = arith.addf %53, %54 : vector<128x1xf32>
    %56 = math.rsqrt %55 : vector<128x1xf32>
    %57 = vector.broadcast %56 : vector<128x1xf32> to vector<128x128xf32>
    %58 = arith.mulf %48, %57 : vector<128x128xf32>
    %59 = vector.broadcast %23 : vector<1x128xf32> to vector<128x128xf32>
    %60 = arith.mulf %58, %59 : vector<128x128xf32>
    %61 = vector.extract_strided_slice %60 {offsets = [0, 64], sizes = [128, 64], strides = [1, 1]} : vector<128x128xf32> to vector<128x64xf32>
    %62 = vector.extract_strided_slice %60 {offsets = [0, 0], sizes = [128, 64], strides = [1, 1]} : vector<128x128xf32> to vector<128x64xf32>
    %63 = tpu.concatenate %61, %62 in 1 : vector<128x64xf32>, vector<128x64xf32> -> vector<128x128xf32>
    %64 = arith.mulf %60, %21 : vector<128x128xf32>
    %65 = arith.mulf %63, %22 : vector<128x128xf32>
    %66 = arith.addf %64, %65 : vector<128x128xf32>
    %67 = arith.truncf %66 : vector<128x128xf32> to vector<128x128xbf16>
    %c1 = arith.constant 1 : index
    %c0_32 = arith.constant 0 : index
    %c0_33 = arith.constant 0 : index
    %68 = vector.load %arg8[%c1, %c0_32, %c0_33] : memref<4x128x128xbf16, #tpu.memory_space<vmem>>, vector<1x128x128xbf16>
    %69 = vector.shape_cast %68 : vector<1x128x128xbf16> to vector<128x128xbf16>
    %70 = vector.shape_cast %67 : vector<128x128xbf16> to vector<1x128x128xbf16>
    tpu.vector_store %arg8[%c1, %c0_32, %c0_33], %70 {strides = array<i32>} : memref<4x128x128xbf16, #tpu.memory_space<vmem>>, vector<1x128x128xbf16>,
    %c0_34 = arith.constant 0 : index
    %c256 = arith.constant 256 : index
    %71 = vector.load %arg12[%c0_34, %c256] : memref<128x1024xf32, #tpu.memory_space<vmem>>, vector<128x128xf32>
    %72 = arith.mulf %71, %71 : vector<128x128xf32>
    %cst_35 = arith.constant dense<0.000000e+00> : vector<128xf32>
    %73 = vector.multi_reduction <add>, %72, %cst_35 [1] : vector<128x128xf32> to vector<128xf32>
    %74 = vector.shape_cast %73 : vector<128xf32> to vector<128x1xf32>
    %cst_36 = arith.constant 1.280000e+02 : f32
    %75 = vector.broadcast %cst_36 : f32 to vector<128x1xf32>
    %76 = arith.divf %74, %75 : vector<128x1xf32>
    %cst_37 = arith.constant 9.99999997E-7 : f32
    %77 = vector.broadcast %cst_37 : f32 to vector<128x1xf32>
    %78 = arith.addf %76, %77 : vector<128x1xf32>
    %79 = math.rsqrt %78 : vector<128x1xf32>
    %80 = vector.broadcast %79 : vector<128x1xf32> to vector<128x128xf32>
    %81 = arith.mulf %71, %80 : vector<128x128xf32>
    %82 = vector.broadcast %23 : vector<1x128xf32> to vector<128x128xf32>
    %83 = arith.mulf %81, %82 : vector<128x128xf32>
    %84 = vector.extract_strided_slice %83 {offsets = [0, 64], sizes = [128, 64], strides = [1, 1]} : vector<128x128xf32> to vector<128x64xf32>
    %85 = vector.extract_strided_slice %83 {offsets = [0, 0], sizes = [128, 64], strides = [1, 1]} : vector<128x128xf32> to vector<128x64xf32>
    %86 = tpu.concatenate %84, %85 in 1 : vector<128x64xf32>, vector<128x64xf32> -> vector<128x128xf32>
    %87 = arith.mulf %83, %21 : vector<128x128xf32>
    %88 = arith.mulf %86, %22 : vector<128x128xf32>
    %89 = arith.addf %87, %88 : vector<128x128xf32>
    %90 = arith.truncf %89 : vector<128x128xf32> to vector<128x128xbf16>
    %c2 = arith.constant 2 : index
    %c0_38 = arith.constant 0 : index
    %c0_39 = arith.constant 0 : index
    %91 = vector.load %arg8[%c2, %c0_38, %c0_39] : memref<4x128x128xbf16, #tpu.memory_space<vmem>>, vector<1x128x128xbf16>
    %92 = vector.shape_cast %91 : vector<1x128x128xbf16> to vector<128x128xbf16>
    %93 = vector.shape_cast %90 : vector<128x128xbf16> to vector<1x128x128xbf16>
    tpu.vector_store %arg8[%c2, %c0_38, %c0_39], %93 {strides = array<i32>} : memref<4x128x128xbf16, #tpu.memory_space<vmem>>, vector<1x128x128xbf16>,
    %c0_40 = arith.constant 0 : index
    %c384 = arith.constant 384 : index
    %94 = vector.load %arg12[%c0_40, %c384] : memref<128x1024xf32, #tpu.memory_space<vmem>>, vector<128x128xf32>
    %95 = arith.mulf %94, %94 : vector<128x128xf32>
    %cst_41 = arith.constant dense<0.000000e+00> : vector<128xf32>
    %96 = vector.multi_reduction <add>, %95, %cst_41 [1] : vector<128x128xf32> to vector<128xf32>
    %97 = vector.shape_cast %96 : vector<128xf32> to vector<128x1xf32>
    %cst_42 = arith.constant 1.280000e+02 : f32
    %98 = vector.broadcast %cst_42 : f32 to vector<128x1xf32>
    %99 = arith.divf %97, %98 : vector<128x1xf32>
    %cst_43 = arith.constant 9.99999997E-7 : f32
    %100 = vector.broadcast %cst_43 : f32 to vector<128x1xf32>
    %101 = arith.addf %99, %100 : vector<128x1xf32>
    %102 = math.rsqrt %101 : vector<128x1xf32>
    %103 = vector.broadcast %102 : vector<128x1xf32> to vector<128x128xf32>
    %104 = arith.mulf %94, %103 : vector<128x128xf32>
    %105 = vector.broadcast %23 : vector<1x128xf32> to vector<128x128xf32>
    %106 = arith.mulf %104, %105 : vector<128x128xf32>
    %107 = vector.extract_strided_slice %106 {offsets = [0, 64], sizes = [128, 64], strides = [1, 1]} : vector<128x128xf32> to vector<128x64xf32>
    %108 = vector.extract_strided_slice %106 {offsets = [0, 0], sizes = [128, 64], strides = [1, 1]} : vector<128x128xf32> to vector<128x64xf32>
    %109 = tpu.concatenate %107, %108 in 1 : vector<128x64xf32>, vector<128x64xf32> -> vector<128x128xf32>
    %110 = arith.mulf %106, %21 : vector<128x128xf32>
    %111 = arith.mulf %109, %22 : vector<128x128xf32>
    %112 = arith.addf %110, %111 : vector<128x128xf32>
    %113 = arith.truncf %112 : vector<128x128xf32> to vector<128x128xbf16>
    %c3 = arith.constant 3 : index
    %c0_44 = arith.constant 0 : index
    %c0_45 = arith.constant 0 : index
    %114 = vector.load %arg8[%c3, %c0_44, %c0_45] : memref<4x128x128xbf16, #tpu.memory_space<vmem>>, vector<1x128x128xbf16>
    %115 = vector.shape_cast %114 : vector<1x128x128xbf16> to vector<128x128xbf16>
    %116 = vector.shape_cast %113 : vector<128x128xbf16> to vector<1x128x128xbf16>
    tpu.vector_store %arg8[%c3, %c0_44, %c0_45], %116 {strides = array<i32>} : memref<4x128x128xbf16, #tpu.memory_space<vmem>>, vector<1x128x128xbf16>,
    %c0_46 = arith.constant 0 : index
    %c512 = arith.constant 512 : index
    %117 = vector.load %arg12[%c0_46, %c512] : memref<128x1024xf32, #tpu.memory_space<vmem>>, vector<128x128xf32>
    %118 = arith.mulf %117, %117 : vector<128x128xf32>
    %cst_47 = arith.constant dense<0.000000e+00> : vector<128xf32>
    %119 = vector.multi_reduction <add>, %118, %cst_47 [1] : vector<128x128xf32> to vector<128xf32>
    %120 = vector.shape_cast %119 : vector<128xf32> to vector<128x1xf32>
    %cst_48 = arith.constant 1.280000e+02 : f32
    %121 = vector.broadcast %cst_48 : f32 to vector<128x1xf32>
    %122 = arith.divf %120, %121 : vector<128x1xf32>
    %cst_49 = arith.constant 9.99999997E-7 : f32
    %123 = vector.broadcast %cst_49 : f32 to vector<128x1xf32>
    %124 = arith.addf %122, %123 : vector<128x1xf32>
    %125 = math.rsqrt %124 : vector<128x1xf32>
    %126 = vector.broadcast %125 : vector<128x1xf32> to vector<128x128xf32>
    %127 = arith.mulf %117, %126 : vector<128x128xf32>
    %128 = vector.broadcast %24 : vector<1x128xf32> to vector<128x128xf32>
    %129 = arith.mulf %127, %128 : vector<128x128xf32>
    %130 = vector.extract_strided_slice %129 {offsets = [0, 64], sizes = [128, 64], strides = [1, 1]} : vector<128x128xf32> to vector<128x64xf32>
    %131 = vector.extract_strided_slice %129 {offsets = [0, 0], sizes = [128, 64], strides = [1, 1]} : vector<128x128xf32> to vector<128x64xf32>
    %132 = tpu.concatenate %130, %131 in 1 : vector<128x64xf32>, vector<128x64xf32> -> vector<128x128xf32>
    %133 = arith.mulf %129, %21 : vector<128x128xf32>
    %134 = arith.mulf %132, %22 : vector<128x128xf32>
    %135 = arith.addf %133, %134 : vector<128x128xf32>
    %136 = arith.truncf %135 : vector<128x128xf32> to vector<128x128xbf16>
    %c0_50 = arith.constant 0 : index
    %c0_51 = arith.constant 0 : index
    %c0_52 = arith.constant 0 : index
    %137 = vector.load %arg9[%c0_50, %c0_51, %c0_52] : memref<2x128x128xbf16, #tpu.memory_space<vmem>>, vector<1x128x128xbf16>
    %138 = vector.shape_cast %137 : vector<1x128x128xbf16> to vector<128x128xbf16>
    %139 = vector.shape_cast %136 : vector<128x128xbf16> to vector<1x128x128xbf16>
    tpu.vector_store %arg9[%c0_50, %c0_51, %c0_52], %139 {strides = array<i32>} : memref<2x128x128xbf16, #tpu.memory_space<vmem>>, vector<1x128x128xbf16>,
    %c0_53 = arith.constant 0 : index
    %c640 = arith.constant 640 : index
    %140 = vector.load %arg12[%c0_53, %c640] : memref<128x1024xf32, #tpu.memory_space<vmem>>, vector<128x128xf32>
    %141 = arith.mulf %140, %140 : vector<128x128xf32>
    %cst_54 = arith.constant dense<0.000000e+00> : vector<128xf32>
    %142 = vector.multi_reduction <add>, %141, %cst_54 [1] : vector<128x128xf32> to vector<128xf32>
    %143 = vector.shape_cast %142 : vector<128xf32> to vector<128x1xf32>
    %cst_55 = arith.constant 1.280000e+02 : f32
    %144 = vector.broadcast %cst_55 : f32 to vector<128x1xf32>
    %145 = arith.divf %143, %144 : vector<128x1xf32>
    %cst_56 = arith.constant 9.99999997E-7 : f32
    %146 = vector.broadcast %cst_56 : f32 to vector<128x1xf32>
    %147 = arith.addf %145, %146 : vector<128x1xf32>
    %148 = math.rsqrt %147 : vector<128x1xf32>
    %149 = vector.broadcast %148 : vector<128x1xf32> to vector<128x128xf32>
    %150 = arith.mulf %140, %149 : vector<128x128xf32>
    %151 = vector.broadcast %24 : vector<1x128xf32> to vector<128x128xf32>
    %152 = arith.mulf %150, %151 : vector<128x128xf32>
    %153 = vector.extract_strided_slice %152 {offsets = [0, 64], sizes = [128, 64], strides = [1, 1]} : vector<128x128xf32> to vector<128x64xf32>
    %154 = vector.extract_strided_slice %152 {offsets = [0, 0], sizes = [128, 64], strides = [1, 1]} : vector<128x128xf32> to vector<128x64xf32>
    %155 = tpu.concatenate %153, %154 in 1 : vector<128x64xf32>, vector<128x64xf32> -> vector<128x128xf32>
    %156 = arith.mulf %152, %21 : vector<128x128xf32>
    %157 = arith.mulf %155, %22 : vector<128x128xf32>
    %158 = arith.addf %156, %157 : vector<128x128xf32>
    %159 = arith.truncf %158 : vector<128x128xf32> to vector<128x128xbf16>
    %c1_57 = arith.constant 1 : index
    %c0_58 = arith.constant 0 : index
    %c0_59 = arith.constant 0 : index
    %160 = vector.load %arg9[%c1_57, %c0_58, %c0_59] : memref<2x128x128xbf16, #tpu.memory_space<vmem>>, vector<1x128x128xbf16>
    %161 = vector.shape_cast %160 : vector<1x128x128xbf16> to vector<128x128xbf16>
    %162 = vector.shape_cast %159 : vector<128x128xbf16> to vector<1x128x128xbf16>
    tpu.vector_store %arg9[%c1_57, %c0_58, %c0_59], %162 {strides = array<i32>} : memref<2x128x128xbf16, #tpu.memory_space<vmem>>, vector<1x128x128xbf16>,
    %c0_60 = arith.constant 0 : index
    %c768 = arith.constant 768 : index
    %163 = vector.load %arg12[%c0_60, %c768] : memref<128x1024xf32, #tpu.memory_space<vmem>>, vector<128x128xf32>
    %164 = arith.truncf %163 : vector<128x128xf32> to vector<128x128xbf16>
    %c0_61 = arith.constant 0 : index
    %c0_62 = arith.constant 0 : index
    %c0_63 = arith.constant 0 : index
    %165 = vector.load %arg10[%c0_61, %c0_62, %c0_63] : memref<2x128x128xbf16, #tpu.memory_space<vmem>>, vector<1x128x128xbf16>
    %166 = vector.shape_cast %165 : vector<1x128x128xbf16> to vector<128x128xbf16>
    %167 = vector.shape_cast %164 : vector<128x128xbf16> to vector<1x128x128xbf16>
    tpu.vector_store %arg10[%c0_61, %c0_62, %c0_63], %167 {strides = array<i32>} : memref<2x128x128xbf16, #tpu.memory_space<vmem>>, vector<1x128x128xbf16>,
    %c0_64 = arith.constant 0 : index
    %c896 = arith.constant 896 : index
    %168 = vector.load %arg12[%c0_64, %c896] : memref<128x1024xf32, #tpu.memory_space<vmem>>, vector<128x128xf32>
    %169 = arith.truncf %168 : vector<128x128xf32> to vector<128x128xbf16>
    %c1_65 = arith.constant 1 : index
    %c0_66 = arith.constant 0 : index
    %c0_67 = arith.constant 0 : index
    %170 = vector.load %arg10[%c1_65, %c0_66, %c0_67] : memref<2x128x128xbf16, #tpu.memory_space<vmem>>, vector<1x128x128xbf16>
    %171 = vector.shape_cast %170 : vector<1x128x128xbf16> to vector<128x128xbf16>
    %172 = vector.shape_cast %169 : vector<128x128xbf16> to vector<1x128x128xbf16>
    tpu.vector_store %arg10[%c1_65, %c0_66, %c0_67], %172 {strides = array<i32>} : memref<2x128x128xbf16, #tpu.memory_space<vmem>>, vector<1x128x128xbf16>,
    return
  }
  func.func @transform_0(%arg0: i32) -> (i32, i32) {
    %c0_i32 = arith.constant 0 : i32
    %c0_i32_0 = arith.constant 0 : i32
    return %arg0, %c0_i32 : i32, i32
  }
  func.func @transform_1(%arg0: i32) -> (i32, i32) {
    %c0_i32 = arith.constant 0 : i32
    %c0_i32_0 = arith.constant 0 : i32
    %c0_i32_1 = arith.constant 0 : i32
    return %c0_i32, %c0_i32_0 : i32, i32
  }
  func.func @transform_2(%arg0: i32) -> (i32, i32) {
    %c0_i32 = arith.constant 0 : i32
    %c0_i32_0 = arith.constant 0 : i32
    %c0_i32_1 = arith.constant 0 : i32
    return %c0_i32, %c0_i32_0 : i32, i32
  }
  func.func @transform_3(%arg0: i32) -> (i32, i32) {
    %c0_i32 = arith.constant 0 : i32
    %c0_i32_0 = arith.constant 0 : i32
    %c0_i32_1 = arith.constant 0 : i32
    return %c0_i32, %c0_i32_0 : i32, i32
  }
  func.func @transform_4(%arg0: i32) -> (i32, i32) {
    %c0_i32 = arith.constant 0 : i32
    %c0_i32_0 = arith.constant 0 : i32
    %c0_i32_1 = arith.constant 0 : i32
    return %c0_i32, %c0_i32_0 : i32, i32
  }
  func.func @transform_5(%arg0: i32) -> (i32, i32) {
    %c0_i32 = arith.constant 0 : i32
    %c0_i32_0 = arith.constant 0 : i32
    return %arg0, %c0_i32 : i32, i32
  }
  func.func @transform_6(%arg0: i32) -> (i32, i32) {
    %c0_i32 = arith.constant 0 : i32
    %c0_i32_0 = arith.constant 0 : i32
    return %arg0, %c0_i32 : i32, i32
  }
  func.func @transform_7(%arg0: i32) -> (i32, i32, i32) {
    %c0_i32 = arith.constant 0 : i32
    %c0_i32_0 = arith.constant 0 : i32
    %c0_i32_1 = arith.constant 0 : i32
    return %c0_i32, %arg0, %c0_i32_0 : i32, i32, i32
  }
  func.func @transform_8(%arg0: i32) -> (i32, i32, i32) {
    %c0_i32 = arith.constant 0 : i32
    %c0_i32_0 = arith.constant 0 : i32
    %c0_i32_1 = arith.constant 0 : i32
    return %c0_i32, %arg0, %c0_i32_0 : i32, i32, i32
  }
  func.func @transform_9(%arg0: i32) -> (i32, i32, i32) {
    %c0_i32 = arith.constant 0 : i32
    %c0_i32_0 = arith.constant 0 : i32
    %c0_i32_1 = arith.constant 0 : i32
    return %c0_i32, %arg0, %c0_i32_0 : i32, i32, i32
  }
  func.func @transform_10(%arg0: i32) -> (i32, i32) {
    %c0_i32 = arith.constant 0 : i32
    %c0_i32_0 = arith.constant 0 : i32
    return %arg0, %c0_i32 : i32, i32
  }
}

module attributes {stable_mosaic.version = 11 : i64} {
  func.func @_postnorm_mlp_kernel(%arg0: i32, %arg1: i32, %arg2: memref<128x256xbf16, #tpu.memory_space<vmem>>, %arg3: memref<128x256xbf16, #tpu.memory_space<vmem>>, %arg4: memref<1x256xf32, #tpu.memory_space<vmem>>, %arg5: memref<1x256x512xbf16, #tpu.memory_space<vmem>>, %arg6: memref<256x256xbf16, #tpu.memory_space<vmem>>, %arg7: memref<128x256xbf16, #tpu.memory_space<vmem>>, %arg8: memref<128x256xbf16, #tpu.memory_space<vmem>>, %arg9: memref<128x256xbf16, #tpu.memory_space<vmem>>, %arg10: memref<128x256xf32, #tpu.memory_space<vmem>>) attributes {dimension_semantics = [#tpu.dimension_semantics<parallel>, #tpu.dimension_semantics<arbitrary>], iteration_bounds = array<i64: 2, 2>, scalar_prefetch = 0 : i64, scratch_operands = 2 : i64, tpu.core_type = #tpu.core_type<tc>, window_params = [{transform_indices = @transform_0, window_bounds = array<i64: 128, 256>}, {transform_indices = @transform_1, window_bounds = array<i64: 128, 256>}, {pipeline_mode = #tpu.pipeline_mode<synchronous>, transform_indices = @transform_2, window_bounds = array<i64: 1, 256>}, {transform_indices = @transform_3, window_bounds = array<i64: 1, 256, 512>}, {transform_indices = @transform_4, window_bounds = array<i64: 256, 256>}, {transform_indices = @transform_5, window_bounds = array<i64: 128, 256>}, {transform_indices = @transform_6, window_bounds = array<i64: 128, 256>}]} {
    %c0_i32 = arith.constant 0 : i32
    %0 = arith.cmpi eq, %arg1, %c0_i32 : i32
    %1 = arith.extui %0 : i1 to i32
    %c0_i32_0 = arith.constant 0 : i32
    %2 = arith.cmpi ne, %1, %c0_i32_0 : i32
    scf.if %2 {
      %c0_14 = arith.constant 0 : index
      %c0_15 = arith.constant 0 : index
      %25 = vector.load %arg2[%c0_14, %c0_15] : memref<128x256xbf16, #tpu.memory_space<vmem>>, vector<128x256xbf16>
      %26 = arith.extf %25 : vector<128x256xbf16> to vector<128x256xf32>
      %c0_16 = arith.constant 0 : index
      %c0_17 = arith.constant 0 : index
      %27 = vector.load %arg3[%c0_16, %c0_17] : memref<128x256xbf16, #tpu.memory_space<vmem>>, vector<128x256xbf16>
      %28 = arith.extf %27 : vector<128x256xbf16> to vector<128x256xf32>
      %29 = arith.addf %26, %28 : vector<128x256xf32>
      %30 = arith.truncf %29 : vector<128x256xf32> to vector<128x256xbf16>
      %c0_18 = arith.constant 0 : index
      %c0_19 = arith.constant 0 : index
      %31 = vector.load %arg8[%c0_18, %c0_19] : memref<128x256xbf16, #tpu.memory_space<vmem>>, vector<128x256xbf16>
      tpu.vector_store %arg8[%c0_18, %c0_19], %30 {strides = array<i32>} : memref<128x256xbf16, #tpu.memory_space<vmem>>, vector<128x256xbf16>,
      %32 = arith.mulf %29, %29 : vector<128x256xf32>
      %cst_20 = arith.constant dense<0.000000e+00> : vector<128xf32>
      %33 = vector.multi_reduction <add>, %32, %cst_20 [1] : vector<128x256xf32> to vector<128xf32>
      %34 = vector.shape_cast %33 : vector<128xf32> to vector<128x1xf32>
      %cst_21 = arith.constant 2.560000e+02 : f32
      %35 = vector.broadcast %cst_21 : f32 to vector<128x1xf32>
      %36 = arith.divf %34, %35 : vector<128x1xf32>
      %cst_22 = arith.constant 9.99999997E-7 : f32
      %37 = vector.broadcast %cst_22 : f32 to vector<128x1xf32>
      %38 = arith.addf %36, %37 : vector<128x1xf32>
      %39 = math.rsqrt %38 : vector<128x1xf32>
      %40 = vector.broadcast %39 : vector<128x1xf32> to vector<128x256xf32>
      %41 = arith.mulf %29, %40 : vector<128x256xf32>
      %c0_23 = arith.constant 0 : index
      %c0_24 = arith.constant 0 : index
      %42 = vector.load %arg4[%c0_23, %c0_24] : memref<1x256xf32, #tpu.memory_space<vmem>>, vector<1x256xf32>
      %43 = vector.broadcast %42 : vector<1x256xf32> to vector<128x256xf32>
      %44 = arith.mulf %41, %43 : vector<128x256xf32>
      %45 = arith.truncf %44 : vector<128x256xf32> to vector<128x256xbf16>
      %c0_25 = arith.constant 0 : index
      %c0_26 = arith.constant 0 : index
      %46 = vector.load %arg9[%c0_25, %c0_26] : memref<128x256xbf16, #tpu.memory_space<vmem>>, vector<128x256xbf16>
      tpu.vector_store %arg9[%c0_25, %c0_26], %45 {strides = array<i32>} : memref<128x256xbf16, #tpu.memory_space<vmem>>, vector<128x256xbf16>,
      %cst_27 = arith.constant 0.000000e+00 : f32
      %47 = vector.broadcast %cst_27 : f32 to vector<128x256xf32>
      %c0_28 = arith.constant 0 : index
      %c0_29 = arith.constant 0 : index
      %48 = vector.load %arg10[%c0_28, %c0_29] : memref<128x256xf32, #tpu.memory_space<vmem>>, vector<128x256xf32>
      tpu.vector_store %arg10[%c0_28, %c0_29], %47 {strides = array<i32>} : memref<128x256xf32, #tpu.memory_space<vmem>>, vector<128x256xf32>,
    } else {
    }
    %c0 = arith.constant 0 : index
    %c0_1 = arith.constant 0 : index
    %3 = vector.load %arg9[%c0, %c0_1] : memref<128x256xbf16, #tpu.memory_space<vmem>>, vector<128x256xbf16>
    %c0_2 = arith.constant 0 : index
    %c0_3 = arith.constant 0 : index
    %c0_4 = arith.constant 0 : index
    %4 = vector.load %arg5[%c0_2, %c0_3, %c0_4] : memref<1x256x512xbf16, #tpu.memory_space<vmem>>, vector<1x256x512xbf16>
    %5 = vector.shape_cast %4 : vector<1x256x512xbf16> to vector<256x512xbf16>
    %cst = arith.constant dense<0.000000e+00> : vector<128x512xf32>
    %6 = tpu.matmul %3, %5, %cst {dimension_numbers = #tpu.dot_dimension_numbers<[1], [0], [0], [1], [0, 0, 1, 1], [], []>} : vector<128x256xbf16>, vector<256x512xbf16>, vector<128x512xf32> -> vector<128x512xf32>
    %7 = vector.extract_strided_slice %6 {offsets = [0, 0], sizes = [128, 256], strides = [1, 1]} : vector<128x512xf32> to vector<128x256xf32>
    %8 = vector.extract_strided_slice %6 {offsets = [0, 256], sizes = [128, 256], strides = [1, 1]} : vector<128x512xf32> to vector<128x256xf32>
    %9 = arith.negf %7 : vector<128x256xf32>
    %10 = math.exp %9 : vector<128x256xf32>
    %cst_5 = arith.constant 1.000000e+00 : f32
    %11 = vector.broadcast %cst_5 : f32 to vector<128x256xf32>
    %12 = arith.addf %11, %10 : vector<128x256xf32>
    %13 = arith.divf %11, %12 : vector<128x256xf32>
    %14 = arith.mulf %7, %13 : vector<128x256xf32>
    %15 = arith.mulf %14, %8 : vector<128x256xf32>
    %16 = arith.truncf %15 : vector<128x256xf32> to vector<128x256xbf16>
    %c0_6 = arith.constant 0 : index
    %c0_7 = arith.constant 0 : index
    %17 = vector.load %arg10[%c0_6, %c0_7] : memref<128x256xf32, #tpu.memory_space<vmem>>, vector<128x256xf32>
    %c0_8 = arith.constant 0 : index
    %c0_9 = arith.constant 0 : index
    %18 = vector.load %arg6[%c0_8, %c0_9] : memref<256x256xbf16, #tpu.memory_space<vmem>>, vector<256x256xbf16>
    %cst_10 = arith.constant dense<0.000000e+00> : vector<128x256xf32>
    %19 = tpu.matmul %16, %18, %cst_10 {dimension_numbers = #tpu.dot_dimension_numbers<[1], [0], [0], [1], [0, 0, 1, 1], [], []>} : vector<128x256xbf16>, vector<256x256xbf16>, vector<128x256xf32> -> vector<128x256xf32>
    %20 = arith.addf %17, %19 : vector<128x256xf32>
    %c0_11 = arith.constant 0 : index
    %c0_12 = arith.constant 0 : index
    %21 = vector.load %arg10[%c0_11, %c0_12] : memref<128x256xf32, #tpu.memory_space<vmem>>, vector<128x256xf32>
    tpu.vector_store %arg10[%c0_11, %c0_12], %20 {strides = array<i32>} : memref<128x256xf32, #tpu.memory_space<vmem>>, vector<128x256xf32>,
    %c1_i32 = arith.constant 1 : i32
    %22 = arith.cmpi eq, %arg1, %c1_i32 : i32
    %23 = arith.extui %22 : i1 to i32
    %c0_i32_13 = arith.constant 0 : i32
    %24 = arith.cmpi ne, %23, %c0_i32_13 : i32
    scf.if %24 {
      %c0_14 = arith.constant 0 : index
      %c0_15 = arith.constant 0 : index
      %25 = vector.load %arg10[%c0_14, %c0_15] : memref<128x256xf32, #tpu.memory_space<vmem>>, vector<128x256xf32>
      %26 = arith.truncf %25 : vector<128x256xf32> to vector<128x256xbf16>
      %c0_16 = arith.constant 0 : index
      %c0_17 = arith.constant 0 : index
      %27 = vector.load %arg7[%c0_16, %c0_17] : memref<128x256xbf16, #tpu.memory_space<vmem>>, vector<128x256xbf16>
      tpu.vector_store %arg7[%c0_16, %c0_17], %26 {strides = array<i32>} : memref<128x256xbf16, #tpu.memory_space<vmem>>, vector<128x256xbf16>,
    } else {
    }
    return
  }
  func.func @transform_0(%arg0: i32, %arg1: i32) -> (i32, i32) {
    %c0_i32 = arith.constant 0 : i32
    %c0_i32_0 = arith.constant 0 : i32
    return %arg0, %c0_i32 : i32, i32
  }
  func.func @transform_1(%arg0: i32, %arg1: i32) -> (i32, i32) {
    %c0_i32 = arith.constant 0 : i32
    %c0_i32_0 = arith.constant 0 : i32
    return %arg0, %c0_i32 : i32, i32
  }
  func.func @transform_2(%arg0: i32, %arg1: i32) -> (i32, i32) {
    %c0_i32 = arith.constant 0 : i32
    %c0_i32_0 = arith.constant 0 : i32
    %c0_i32_1 = arith.constant 0 : i32
    return %c0_i32, %c0_i32_0 : i32, i32
  }
  func.func @transform_3(%arg0: i32, %arg1: i32) -> (i32, i32, i32) {
    %c0_i32 = arith.constant 0 : i32
    %c0_i32_0 = arith.constant 0 : i32
    %c0_i32_1 = arith.constant 0 : i32
    return %arg1, %c0_i32, %c0_i32_0 : i32, i32, i32
  }
  func.func @transform_4(%arg0: i32, %arg1: i32) -> (i32, i32) {
    %c0_i32 = arith.constant 0 : i32
    %c0_i32_0 = arith.constant 0 : i32
    return %arg1, %c0_i32 : i32, i32
  }
  func.func @transform_5(%arg0: i32, %arg1: i32) -> (i32, i32) {
    %c0_i32 = arith.constant 0 : i32
    %c0_i32_0 = arith.constant 0 : i32
    return %arg0, %c0_i32 : i32, i32
  }
  func.func @transform_6(%arg0: i32, %arg1: i32) -> (i32, i32) {
    %c0_i32 = arith.constant 0 : i32
    %c0_i32_0 = arith.constant 0 : i32
    return %arg0, %c0_i32 : i32, i32
  }
}

</mosaic_0001>

<bundles_post_ra>
// kernel: qwen3_decoder_layer.4
= control target key start
LH: loop header
LB: loop body
LE: loop exit
PB: predicated region body
PF: predicated region fallthrough
CT: control target
= control target key end

     0   :  { %s3332_s15 = smov 0   ;;  %s3334_s16 = smov 0   ;;  %s4285_s0 = inlined_call_operand.vmem [shape: bf16[4,256,128], index: 0, kind: input, shape index: {}]   ;;  %s4286_s1 = inlined_call_operand.vmem [shape: bf16[2,256,128], index: 1, kind: input, shape index: {}]   ;;  %s4287_s2 = inlined_call_operand.vmem [shape: bf16[2,256,128], index: 2, kind: input, shape index: {}]   ;;  %s4288_s3 = inlined_call_operand.vmem [shape: bf16[512,256], index: 3, kind: input, shape index: {}]   ;;  %s4289_s4 = inlined_call_operand.vmem [shape: bf16[256,256], index: 4, kind: output, shape index: {}]  }
   0x1   :  { %s3336_s17 = smov 0   ;;  %s3338_s18 = smov 0  }
   0x2   :  { %s3340_s19 = smov 0   ;;  %s3342_s20 = smov 0  }
   0x3   :  { %s3344_s21 = smov 0  }
   0x4 LB: > { %s23_s22 = sadd.s32 1, %s3296_s19  ;;  %s26_s23 = sadd.s32 1, %s3300_s20  ;;  %s3304_s21 = sphi %s3344_s21, %s14_s21   ;;  %s3300_s20 = sphi %s3342_s20, %s4358_s20   ;;  %s3296_s19 = sphi %s3340_s19, %s4357_s19   ;;  %s3292_s18 = sphi %s3338_s18, %s4356_s18   ;;  %s3288_s17 = sphi %s3336_s17, %s4355_s17   ;;  %s3284_s16 = sphi %s3334_s16, %s4354_s16   ;;  %s3280_s15 = sphi %s3332_s15, %s4353_s15  }
   0x5   : > { %p24_p0 = scmp.ge.s32.totalorder %s23_s22, 2  ;;  %p42_p1 = scmp.ne.s32.totalorder %s3284_s16, %s3280_s15 }
   0x6   : > { %p43_p2 = scmp.eq.s32.totalorder %s3304_s21, 0  ;;  %s35_s27 = sadd.s32 1, %s3284_s16 }
   0x7   : > { %s4360_s22 = smov (%p24_p0, %s23_s22), 0  ;;  %s4362_s23 = smov (!%p24_p0, %s26_s23), %s3300_s20 }
   0x8   : > { %p44_p3 = por %p43_p2, %p42_p1  ;;  %p28_p4 = scmp.ge.s32.totalorder %s4362_s23, 2 }
   0x9   : > { %s30_s24 = ssub.s32 %s3296_s19, %s4360_s22  ;;  %p2589_p6 = scmp.ge.s32.totalorder %s3304_s21, 4 }
   0xa   : > { %s4364_s23 = smov (%p28_p4, %s4362_s23), 0 }
   0xb   : > { %s31_s25 = ssub.s32 %s3300_s20, %s4364_s23  ;;  %172 = sbr.rel (%p2589_p6) target bundleno = 31 (0x1f), region = 16 }
   0xc   : > { %s32_s26 = sor.u32 %s31_s25, %s30_s24 }
   0xd   : > { %p33_p5 = scmp.eq.s32.totalorder %s32_s26, 0 }
   0xf   : > { %s3383_s28 = scalar_select %p33_p5, %s3284_s16, %s35_s27  }
  0x10   : > { %175 = sbr.rel (!%p44_p3) target bundleno = 31 (0x1f), region = 20  ;;  %s177_s29 = sand.u32 (%p44_p3), 1, %s3284_s16  }
  0x11   : > { %s2592_s30 = sshll.u32 (%p44_p3), %s3300_s20, 4  ;;  %s2590_s5 = sshll.u32 (%p44_p3), %s177_s29, 7 }
  0x12   : > { %s2708_s6 = sshll.u32 (%p44_p3), %s3296_s19, 6  ;;  %s179_s12 = scalar_lea.vmem (%p44_p3), [#allocation3], %s2590_s5 }
  0x13   : > { %s183_s7 = sadd.s32 (%p44_p3), %s2708_s6, %s2592_s30 }
  0x14   : > { %s2594_s8 = sshll.u32 (%p44_p3), %s183_s7, 2 }
  0x15   : > { %s3392_s11 = scalar_lea.vmem %s4285_s0, %s2594_s8 }
  0x16   : > { %v202_v0 = vld [vmem:[%s3392_s11] sm:$0xff]   ;;  %v206_v1 = vld [vmem:[%s3392_s11 + $0x8] sm:$0xff]   ;;  %v210_v2 = vld [vmem:[%s3392_s11 + $0x10] sm:$0xff]  }
  0x17   : > { %203 = vst [vmem:[%s179_s12] sm:$0xff] %v202_v0   ;;  %207 = vst [vmem:[%s179_s12 + $0x8] sm:$0xff] %v206_v1   ;;  %v214_v3 = vld [vmem:[%s3392_s11 + $0x18] sm:$0xff]   ;;  %v218_v4 = vld [vmem:[%s3392_s11 + $0x20] sm:$0xff]  }
  0x18   : > { %211 = vst [vmem:[%s179_s12 + $0x10] sm:$0xff] %v210_v2   ;;  %v222_v5 = vld [vmem:[%s3392_s11 + $0x28] sm:$0xff]   ;;  %215 = vst [vmem:[%s179_s12 + $0x18] sm:$0xff] %v214_v3   ;;  %v226_v6 = vld [vmem:[%s3392_s11 + $0x30] sm:$0xff]  }
  0x19   : > { %219 = vst [vmem:[%s179_s12 + $0x20] sm:$0xff] %v218_v4   ;;  %223 = vst [vmem:[%s179_s12 + $0x28] sm:$0xff] %v222_v5   ;;  %v230_v7 = vld [vmem:[%s3392_s11 + $0x38] sm:$0xff]   ;;  %v234_v8 = vld [vmem:[%s3392_s11 + $0x80] sm:$0xff]  }
  0x1a   : > { %227 = vst [vmem:[%s179_s12 + $0x30] sm:$0xff] %v226_v6   ;;  %231 = vst [vmem:[%s179_s12 + $0x38] sm:$0xff] %v230_v7   ;;  %v238_v9 = vld [vmem:[%s3392_s11 + $0x88] sm:$0xff]   ;;  %v242_v10 = vld [vmem:[%s3392_s11 + $0x90] sm:$0xff]  }
  0x1b   : > { %235 = vst [vmem:[%s179_s12 + $0x40] sm:$0xff] %v234_v8   ;;  %v246_v11 = vld [vmem:[%s3392_s11 + $0x98] sm:$0xff]   ;;  %239 = vst [vmem:[%s179_s12 + $0x48] sm:$0xff] %v238_v9   ;;  %v250_v12 = vld [vmem:[%s3392_s11 + $0xa0] sm:$0xff]  }
  0x1c   : > { %243 = vst [vmem:[%s179_s12 + $0x50] sm:$0xff] %v242_v10   ;;  %247 = vst [vmem:[%s179_s12 + $0x58] sm:$0xff] %v246_v11   ;;  %v254_v13 = vld [vmem:[%s3392_s11 + $0xa8] sm:$0xff]   ;;  %v258_v14 = vld [vmem:[%s3392_s11 + $0xb0] sm:$0xff]  }
  0x1d   : > { %251 = vst [vmem:[%s179_s12 + $0x60] sm:$0xff] %v250_v12   ;;  %255 = vst [vmem:[%s179_s12 + $0x68] sm:$0xff] %v254_v13   ;;  %v262_v15 = vld [vmem:[%s3392_s11 + $0xb8] sm:$0xff]  }
  0x1e   : > { %259 = vst [vmem:[%s179_s12 + $0x70] sm:$0xff] %v258_v14   ;;  %263 = vst [vmem:[%s179_s12 + $0x78] sm:$0xff] %v262_v15  }
  0x1f PF: > { %p2595_p7 = scmp.ge.s32.totalorder %s3304_s21, 1  ;;  %p378_p8 = scmp.lt.s32.totalorder %s3304_s21, 5 }
  0x21   : > { %p379_p9 = pnand %p2595_p7, %p378_p8 }
  0x23   : > { %382 = sbr.rel (%p379_p9) target bundleno = 1047 (0x417), region = 73 }
  0x28   : > { %s385_s13 = sand.u32 1, %s3280_s15   ;;  %p429_p10 = scmp.lt.s32.totalorder %s3288_s17, 1 }
  0x29   : > { %s2596_s14 = sshll.u32 %s385_s13, 7  ;;  %s2601_s24 = sshll.u32 %s3288_s17, 5 }
  0x2a   : > { %p440_p11 = scmp.lt.s32.totalorder %s2601_s24, 63  ;;  %s2604_s27 = sshll.u32 %s3292_s18, 4 }
  0x2b   : > { %s430_s25 = scalar_select %p429_p10, %s3288_s17, 1 }
  0x2c   : > { %s4366_s24 = smov (!%p440_p11, %s2601_s24), 63  ;;  %p447_p12 = scmp.lt.s32.totalorder %s2604_s27, 31 }
  0x2d   : > { %s2709_s26 = sshll.u32 %s430_s25, 7  ;;  %s2711_s9 = sshll.u32 %s4366_s24, 3 }
  0x2e   : > { %s3420_s5 = scalar_lea.vmem %s4286_s1, %s2709_s26  ;;  %s3425_s8 = scalar_lea.vmem %s4287_s2, %s2709_s26 }
  0x2f   : > { %s3430_s11 = scalar_lea.vmem %s4288_s3, %s2711_s9  ;;  %s4368_s27 = smov (!%p447_p12, %s2604_s27), 31 }
  0x30   : > { %s2712_s12 = sshll.u32 %s4368_s27, 3  ;;  %s3437_s30 = scalar_lea.vmem [#allocation3], %s2596_s14 }
  0x31   : > { %s3435_s29 = scalar_lea.vmem %s4289_s4, %s2712_s12  ;;  %p2607_p13 = scmp.ne.s32.totalorder %s3288_s17, 0 }
  0x33   : > { %457 = sbr.rel (%p2607_p13) target bundleno = 73 (0x49), region = 81 }
  0x38   : > { %v3306_v16 = vmov 0.0  }
  0x39   : > { %458 = vst [vmem:[#allocation2 + $0xb0] sm:$0xff] %v3306_v16  ;;  %459 = vst [vmem:[#allocation2] sm:$0xff] %v3306_v16 }
  0x3a   : > { %460 = vst [vmem:[#allocation2 + $0xd8] sm:$0xff] %v3306_v16  ;;  %461 = vst [vmem:[#allocation2 + $0x18] sm:$0xff] %v3306_v16 }
  0x3b   : > { %462 = vst [vmem:[#allocation2 + $0x50] sm:$0xff] %v3306_v16  ;;  %463 = vst [vmem:[#allocation2 + $0x68] sm:$0xff] %v3306_v16 }
  0x3c   : > { %464 = vst [vmem:[#allocation2 + $0x30] sm:$0xff] %v3306_v16  ;;  %465 = vst [vmem:[#allocation2 + $0x48] sm:$0xff] %v3306_v16 }
  0x3d   : > { %466 = vst [vmem:[#allocation2 + $0x80] sm:$0xff] %v3306_v16  ;;  %467 = vst [vmem:[#allocation2 + $0x88] sm:$0xff] %v3306_v16 }
  0x3e   : > { %468 = vst [vmem:[#allocation2 + $0xe8] sm:$0xff] %v3306_v16  ;;  %469 = vst [vmem:[#allocation2 + $0xb8] sm:$0xff] %v3306_v16 }
  0x3f   : > { %470 = vst [vmem:[#allocation2 + $0x60] sm:$0xff] %v3306_v16  ;;  %471 = vst [vmem:[#allocation2 + $0xf0] sm:$0xff] %v3306_v16 }
  0x40   : > { %472 = vst [vmem:[#allocation2 + $0x8] sm:$0xff] %v3306_v16  ;;  %473 = vst [vmem:[#allocation2 + $0x78] sm:$0xff] %v3306_v16 }
  0x41   : > { %474 = vst [vmem:[#allocation2 + $0x38] sm:$0xff] %v3306_v16  ;;  %475 = vst [vmem:[#allocation2 + $0x58] sm:$0xff] %v3306_v16 }
  0x42   : > { %476 = vst [vmem:[#allocation2 + $0x40] sm:$0xff] %v3306_v16  ;;  %477 = vst [vmem:[#allocation2 + $0xc8] sm:$0xff] %v3306_v16 }
  0x43   : > { %478 = vst [vmem:[#allocation2 + $0xe0] sm:$0xff] %v3306_v16  ;;  %479 = vst [vmem:[#allocation2 + $0x90] sm:$0xff] %v3306_v16 }
  0x44   : > { %480 = vst [vmem:[#allocation2 + $0x70] sm:$0xff] %v3306_v16  ;;  %481 = vst [vmem:[#allocation2 + $0xc0] sm:$0xff] %v3306_v16 }
  0x45   : > { %482 = vst [vmem:[#allocation2 + $0xa8] sm:$0xff] %v3306_v16  ;;  %483 = vst [vmem:[#allocation2 + $0xd0] sm:$0xff] %v3306_v16 }
  0x46   : > { %484 = vst [vmem:[#allocation2 + $0x10] sm:$0xff] %v3306_v16  ;;  %485 = vst [vmem:[#allocation2 + $0x28] sm:$0xff] %v3306_v16 }
  0x47   : > { %486 = vst [vmem:[#allocation2 + $0xa0] sm:$0xff] %v3306_v16  ;;  %487 = vst [vmem:[#allocation2 + $0xf8] sm:$0xff] %v3306_v16 }
  0x48   : > { %488 = vst [vmem:[#allocation2 + $0x20] sm:$0xff] %v3306_v16  ;;  %489 = vst [vmem:[#allocation2 + $0x98] sm:$0xff] %v3306_v16 }
  0x49 PF: > { %v2962_v17 = vld [vmem:[%s3420_s5 + $0x78] sm:$0xff]   ;;  %v2964_v19 = vld [vmem:[%s3420_s5 + $0x70] sm:$0xff]   ;;  %v2966_v21 = vld [vmem:[%s3420_s5 + $0x68] sm:$0xff]   ;;  %v972_v54 = vlaneseq  ;;  %s2640_s14 = sshll.u32 %s3292_s18, 7  ;;  %p2689_p0 = scmp.ne.s32.totalorder %s3288_s17, 1 }
  0x4a   : > { %v2963_v18 = vld [vmem:[%s3420_s5 + $0x38] sm:$0xff]   ;;  %2729 = vmatprep.subr.bf16.mxu0 %v2962_v17  ;;  %v2965_v20 = vld [vmem:[%s3420_s5 + $0x30] sm:$0xff]   ;;  %v2967_v22 = vld [vmem:[%s3420_s5 + $0x28] sm:$0xff]   ;;  %v3498_v3 = vstv %s2640_s14 }
  0x4b   : > { %2730 = vmatpush3.bf16.xpose.msra.mxu0 %v2963_v18  ;;  %v2968_v23 = vld [vmem:[%s3420_s5 + $0x60] sm:$0xff]   ;;  %v2970_v26 = vld [vmem:[%s3420_s5 + $0x58] sm:$0xff]   ;;  %v2972_v28 = vld [vmem:[%s3420_s5 + $0x50] sm:$0xff]   ;;  %v3486_v61 = vshrl.u32 %v972_v54, 7  ;;  %v3494_v1 = vand.u32 127, %v972_v54 }
  0x4c   : > { %2731 = vmatprep.subr.bf16.mxu0 %v2964_v19  ;;  %v2978_v24 = vld [vmem:[%s3437_s30] sm:$0xff]   ;;  %v2971_v27 = vld [vmem:[%s3420_s5 + $0x18] sm:$0xff]   ;;  %v2973_v29 = vld [vmem:[%s3420_s5 + $0x10] sm:$0xff]  }
  0x4d   : > { %2745 = vmatprep.mubr.bf16.mxu0 %v2978_v24  ;;  %v2969_v25 = vld [vmem:[%s3420_s5 + $0x20] sm:$0xff]   ;;  %v2974_v30 = vld [vmem:[%s3420_s5 + $0x48] sm:$0xff]   ;;  %v2980_v35 = vld [vmem:[%s3437_s30 + $0x10] sm:$0xff]   ;;  %v977_v0 = vadd.s32 32, %v3486_v61  ;;  %v978_v6 = vadd.s32 40, %v3486_v61  ;;  %v3507_v7 = vadd.s32 128, %v3494_v1 }
  0x4e   : > { %v2975_v31 = vld [vmem:[%s3420_s5 + $0x8] sm:$0xff]   ;;  %v2976_v32 = vld [vmem:[%s3420_s5 + $0x40] sm:$0xff]   ;;  %v2981_v36 = vld [vmem:[%s3437_s30 + $0x18] sm:$0xff]   ;;  %v979_v11 = vadd.s32 48, %v3486_v61  ;;  %v980_v15 = vadd.s32 56, %v3486_v61  ;;  %v985_v54 = vadd.s32 96, %v3486_v61 }
  0x4f   : > { %v2977_v33 = vld [vmem:[%s3420_s5] sm:$0xff]   ;;  %v2979_v34 = vld [vmem:[%s3437_s30 + $0x8] sm:$0xff]   ;;  %v2984_v39 = vld [vmem:[%s3437_s30 + $0x30] sm:$0xff]   ;;  %v3503_v5 = vadd.s32 %v3498_v3, %v977_v0  ;;  %v3516_v10 = vadd.s32 %v3498_v3, %v978_v6  ;;  %v986_v6 = vadd.s32 104, %v3486_v61 }
  0x50   : > { %v2982_v37 = vld [vmem:[%s3437_s30 + $0x20] sm:$0xff]   ;;  %v2983_v38 = vld [vmem:[%s3437_s30 + $0x28] sm:$0xff]   ;;  %v2985_v40 = vld [vmem:[%s3437_s30 + $0x38] sm:$0xff]   ;;  %v3537_v18 = vadd.s32 %v3498_v3, %v979_v11 }
  0x51   : > { %v2986_v41 = vld [vmem:[%s3437_s30 + $0x40] sm:$0xff]   ;;  %v2987_v42 = vld [vmem:[%s3437_s30 + $0x48] sm:$0xff]   ;;  %v2988_v43 = vld [vmem:[%s3437_s30 + $0x50] sm:$0xff]   ;;  %vm1017_vm0 = vcmp.le.s32.totalorder %v3494_v1, %v3503_v5  ;;  %vm1018_vm1 = vcmp.le.s32.totalorder %v3507_v7, %v3503_v5  ;;  %vm1019_vm2 = vcmp.le.s32.totalorder %v3494_v1, %v3516_v10  ;;  %vm1020_vm3 = vcmp.le.s32.totalorder %v3507_v7, %v3516_v10 }
  0x52   : > { %v2989_v44 = vld [vmem:[%s3437_s30 + $0x58] sm:$0xff]   ;;  %v2990_v45 = vld [vmem:[%s3437_s30 + $0x60] sm:$0xff]   ;;  %v2991_v46 = vld [vmem:[%s3437_s30 + $0x68] sm:$0xff]   ;;  %vm1021_vm4 = vcmp.le.s32.totalorder %v3494_v1, %v3537_v18  ;;  %vm1022_vm5 = vcmp.le.s32.totalorder %v3507_v7, %v3537_v18 }
  0x53   : > { %2732 = vmatpush3.bf16.xpose.msra.mxu0 %v2965_v20  ;;  %v2992_v47 = vld [vmem:[%s3437_s30 + $0x70] sm:$0xff]   ;;  %v2993_v48 = vld [vmem:[%s3437_s30 + $0x78] sm:$0xff]   ;;  %v2998_v56 = vld [vmem:[%s3425_s8 + $0x68] sm:$0xff]  }
  0x54   : > { %2733 = vmatprep.subr.bf16.mxu0 %v2966_v21  ;;  %v2994_v49 = vld [vmem:[%s3425_s8 + $0x78] sm:$0xff]   ;;  %v2996_v51 = vld [vmem:[%s3425_s8 + $0x70] sm:$0xff]   ;;  %v2999_v57 = vld [vmem:[%s3425_s8 + $0x28] sm:$0xff]  }
  0x55   : > { %v2995_v50 = vld [vmem:[%s3425_s8 + $0x38] sm:$0xff]   ;;  %2889 = vmatprep.subr.bf16.mxu1 %v2994_v49  ;;  %v2997_v52 = vld [vmem:[%s3425_s8 + $0x30] sm:$0xff]   ;;  %v3000_v58 = vld [vmem:[%s3425_s8 + $0x60] sm:$0xff]  }
  0x56   : > { %2897 = vmatpush3.bf16.msra.mxu1 %v2995_v50  ;;  %v3001_v60 = vld [vmem:[%s3425_s8 + $0x20] sm:$0xff]  }
  0x57   : > { %2890 = vmatprep.subr.bf16.mxu1 %v2996_v51 }
  0x5a   : > { %2898 = vmatpush3.bf16.msra.mxu1 %v2997_v52 }
  0x5b   : > { %2734 = vmatpush3.bf16.xpose.msra.mxu0 %v2967_v22  ;;  %2891 = vmatprep.subr.bf16.mxu1 %v2998_v56  ;;  %v3550_v22 = vadd.s32 %v3498_v3, %v980_v15  ;;  %v3004_v15 = vld [vmem:[%s3425_s8 + $0x50] sm:$0xff]  }
  0x5c   : > { %2735 = vmatprep.subr.bf16.mxu0 %v2968_v23 }
  0x5d   : > { %vm1023_vm6 = vcmp.le.s32.totalorder %v3494_v1, %v3550_v22  ;;  %vm1024_vm7 = vcmp.le.s32.totalorder %v3507_v7, %v3550_v22 }
  0x5e   : > { %2899 = vmatpush3.bf16.msra.mxu1 %v2999_v57 }
  0x5f   : > { %2892 = vmatprep.subr.bf16.mxu1 %v3000_v58 }
  0x62   : > { %2900 = vmatpush3.bf16.msra.mxu1 %v3001_v60 }
  0x63   : > { %2736 = vmatpush3.bf16.xpose.msra.mxu0 %v2969_v25  ;;  %v981_v25 = vadd.s32 64, %v3486_v61 }
  0x64   : > { %2737 = vmatprep.subr.bf16.mxu0 %v2970_v26 }
  0x6b   : > { %2738 = vmatpush3.bf16.xpose.msra.mxu0 %v2971_v27 }
  0x6c   : > { %2739 = vmatprep.subr.bf16.mxu0 %v2972_v28 }
  0x73   : > { %2740 = vmatpush3.bf16.xpose.msra.mxu0 %v2973_v29 }
  0x74   : > { %2741 = vmatprep.subr.bf16.mxu0 %v2974_v30 }
  0x7b   : > { %2742 = vmatpush3.bf16.xpose.msra.mxu0 %v2975_v31  ;;  %v3576_v31 = vadd.s32 %v3498_v3, %v981_v25 }
  0x7c   : > { %2743 = vmatprep.subr.bf16.mxu0 %v2976_v32  ;;  %v982_v32 = vadd.s32 72, %v3486_v61 }
  0x7d   : > { %vm1025_vm8 = vcmp.le.s32.totalorder %v3494_v1, %v3576_v31  ;;  %vm1026_vm9 = vcmp.le.s32.totalorder %v3507_v7, %v3576_v31 }
  0x83   : > { %2744 = vmatpush3.bf16.xpose.msra.mxu0 %v2977_v33 }
  0x84   : > { %2777 = vmatprep.subr.bf16.mxu0 %v2994_v49 }
  0x8a   : > { %2746 = vmatmul.mubr.bf16.vlgmr.msra.gmra.mxu0 %v2978_v24 }
  0x8b   : > { %2747 = vmatprep.mubr.bf16.mxu0 %v2979_v34  ;;  %2778 = vmatpush3.bf16.msra.mxu0 %v2995_v50 }
  0x8c   : > { %2779 = vmatprep.subr.bf16.mxu0 %v2996_v51 }
  0x8f   : > { %2780 = vmatpush3.bf16.msra.mxu0 %v2997_v52 }
  0x90   : > { %2781 = vmatprep.subr.bf16.mxu0 %v2998_v56  ;;  %v3002_v56 = vld [vmem:[%s3425_s8 + $0x58] sm:$0xff]  }
  0x91   : > { %2893 = vmatprep.subr.bf16.mxu1 %v3002_v56 }
  0x92   : > { %2748 = vmatmul.mubr.bf16.gmra.mxu0 %v2979_v34 }
  0x93   : > { %2749 = vmatprep.mubr.bf16.mxu0 %v2980_v35  ;;  %2782 = vmatpush3.bf16.msra.mxu0 %v2999_v57  ;;  %v3003_v57 = vld [vmem:[%s3425_s8 + $0x18] sm:$0xff]  }
  0x94   : > { %2783 = vmatprep.subr.bf16.mxu0 %v3000_v58  ;;  %2901 = vmatpush3.bf16.msra.mxu1 %v3003_v57 }
  0x95   : > { %2894 = vmatprep.subr.bf16.mxu1 %v3004_v15 }
  0x97   : > { %2784 = vmatpush3.bf16.msra.mxu0 %v3001_v60 }
  0x98   : > { %2785 = vmatprep.subr.bf16.mxu0 %v3002_v56 }
  0x9a   : > { %2750 = vmatmul.mubr.bf16.gmra.mxu0 %v2980_v35 }
  0x9b   : > { %2751 = vmatprep.mubr.bf16.mxu0 %v2981_v36  ;;  %2786 = vmatpush3.bf16.msra.mxu0 %v3003_v57 }
  0x9c   : > { %2787 = vmatprep.subr.bf16.mxu0 %v3004_v15 }
  0xa2   : > { %2752 = vmatmul.mubr.bf16.gmra.mxu0 %v2981_v36  ;;  %v983_v36 = vadd.s32 80, %v3486_v61 }
  0xa3   : > { %2753 = vmatprep.mubr.bf16.mxu0 %v2982_v37 }
  0xaa   : > { %2754 = vmatmul.mubr.bf16.gmra.mxu0 %v2982_v37 }
  0xab   : > { %2755 = vmatprep.mubr.bf16.mxu0 %v2983_v38 }
  0xb2   : > { %2756 = vmatmul.mubr.bf16.gmra.mxu0 %v2983_v38 }
  0xb3   : > { %2757 = vmatprep.mubr.bf16.mxu0 %v2984_v39 }
  0xba   : > { %2758 = vmatmul.mubr.bf16.gmra.mxu0 %v2984_v39  ;;  %v3597_v39 = vadd.s32 %v3498_v3, %v982_v32  ;;  %v3007_v32 = vld [vmem:[%s3425_s8 + $0x8] sm:$0xff]  }
  0xbb   : > { %2759 = vmatprep.mubr.bf16.mxu0 %v2985_v40 }
  0xbc   : > { %vm1027_vm10 = vcmp.le.s32.totalorder %v3494_v1, %v3597_v39  ;;  %vm1028_vm11 = vcmp.le.s32.totalorder %v3507_v7, %v3597_v39 }
  0xc2   : > { %2760 = vmatmul.mubr.bf16.gmra.mxu0 %v2985_v40 }
  0xc3   : > { %2761 = vmatprep.mubr.bf16.mxu0 %v2986_v41 }
  0xca   : > { %2762 = vmatmul.mubr.bf16.gmra.mxu0 %v2986_v41 }
  0xcb   : > { %2763 = vmatprep.mubr.bf16.mxu0 %v2987_v42 }
  0xd2   : > { %2764 = vmatmul.mubr.bf16.gmra.mxu0 %v2987_v42 }
  0xd3   : > { %2765 = vmatprep.mubr.bf16.mxu0 %v2988_v43 }
  0xda   : > { %2766 = vmatmul.mubr.bf16.gmra.mxu0 %v2988_v43  ;;  %v3610_v43 = vadd.s32 %v3498_v3, %v983_v36 }
  0xdb   : > { %2767 = vmatprep.mubr.bf16.mxu0 %v2989_v44 }
  0xdc   : > { %vm4293_vm12 = vcmp.le.s32.totalorder %v3494_v1, %v3610_v43  ;;  %vm4290_vm13 = vcmp.le.s32.totalorder %v3507_v7, %v3610_v43 }
  0xe2   : > { %2768 = vmatmul.mubr.bf16.gmra.mxu0 %v2989_v44 }
  0xe3   : > { %2769 = vmatprep.mubr.bf16.mxu0 %v2990_v45 }
  0xea   : > { %2770 = vmatmul.mubr.bf16.gmra.mxu0 %v2990_v45 }
  0xeb   : > { %2771 = vmatprep.mubr.bf16.mxu0 %v2991_v46 }
  0xf2   : > { %2772 = vmatmul.mubr.bf16.gmra.mxu0 %v2991_v46  ;;  %v984_v46 = vadd.s32 88, %v3486_v61 }
  0xf3   : > { %2773 = vmatprep.mubr.bf16.mxu0 %v2992_v47 }
  0xf4   : > { %v3636_v52 = vadd.s32 %v3498_v3, %v984_v46  ;;  %v3008_v46 = vld [vmem:[%s3425_s8 + $0x40] sm:$0xff]  }
  0xf6   : > { %vm4291_vm14 = vcmp.le.s32.totalorder %v3494_v1, %v3636_v52  ;;  %vm4292_vm15 = vcmp.le.s32.totalorder %v3507_v7, %v3636_v52 }
  0xfa   : > { %2774 = vmatmul.mubr.bf16.gmra.mxu0 %v2992_v47 }
  0xfb   : > { %2775 = vmatprep.mubr.bf16.mxu0 %v2993_v48 }
 0x102   : > { %2776 = vmatmul.mubr.bf16.gmra.mxu0 %v2993_v48 }
 0x14a   : > { %v3476_v53 = vpop.f32.mrf.mxu0 }
 0x14c   : > { %v3478_v55 = vpop.f32.mrf.mxu0 }
 0x14e   : > { %v3483_v59 = vpop.f32.mrf.mxu0 }
 0x150   : > { %v3488_v62 = vpop.f32.mrf.mxu0 }
 0x152   : > { %v3491_v63 = vpop.f32.mrf.mxu0 }
 0x154   : > { %v3496_v2 = vpop.f32.mrf.mxu0 }
 0x156   : > { %v3500_v4 = vpop.f32.mrf.mxu0 }
 0x158   : > { %v3509_v8 = vpop.f32.mrf.mxu0 }
 0x15a   : > { %v832_v9 = vpop.f32.mrf.mxu0 }
 0x15b   : > { %v3522_v13 = vsel %vm1017_vm0, %v832_v9, -1e+30 }
 0x15c   : > { %v834_v12 = vpop.f32.mrf.mxu0 }
 0x15d   : > { %v3527_v14 = vsel %vm1018_vm1, %v834_v12, -1e+30  ;;  %v3659_v12 = vadd.s32 %v3498_v3, %v985_v54 }
 0x15e   : > { %v836_v16 = vpop.f32.mrf.mxu0  ;;  %v1181_v17 = vmax.f32 %v3522_v13, %v3527_v14 }
 0x15f   : > { %v3542_v20 = vsel %vm1019_vm2, %v836_v16, -1e+30  ;;  %v3005_v16 = vld [vmem:[%s3425_s8 + $0x10] sm:$0xff]  }
 0x160   : > { %1182 = vmax.xlane.f32.xlu0 %v1181_v17  ;;  %v838_v19 = vpop.f32.mrf.mxu0  ;;  %2902 = vmatpush3.bf16.msra.mxu1 %v3005_v16 }
 0x161   : > { %v3547_v21 = vsel %vm1020_vm3, %v838_v19, -1e+30  ;;  %2788 = vmatpush3.bf16.msra.mxu0 %v3005_v16 }
 0x162   : > { %v842_v23 = vpop.f32.mrf.mxu0  ;;  %v1184_v24 = vmax.f32 %v3542_v20, %v3547_v21 }
 0x163   : > { %v3562_v27 = vsel %vm1021_vm4, %v842_v23, -1e+30 }
 0x164   : > { %1185 = vmax.xlane.f32.xlu0 %v1184_v24  ;;  %v844_v26 = vpop.f32.mrf.mxu0  ;;  %v3674_v24 = vadd.s32 %v3498_v3, %v986_v6 }
 0x165   : > { %v3567_v28 = vsel %vm1022_vm5, %v844_v26, -1e+30 }
 0x166   : > { %v846_v29 = vpop.f32.mrf.mxu0  ;;  %v1187_v30 = vmax.f32 %v3562_v27, %v3567_v28 }
 0x167   : > { %v3582_v34 = vsel %vm1023_vm6, %v846_v29, -1e+30  ;;  %v987_v29 = vadd.s32 112, %v3486_v61 }
 0x168   : > { %1188 = vmax.xlane.f32.xlu1 %v1187_v30  ;;  %v848_v33 = vpop.f32.mrf.mxu0  ;;  %v3006_v30 = vld [vmem:[%s3425_s8 + $0x48] sm:$0xff]  }
 0x169   : > { %v3587_v35 = vsel %vm1024_vm7, %v848_v33, -1e+30  ;;  %2895 = vmatprep.subr.bf16.mxu1 %v3006_v30  ;;  %2789 = vmatprep.subr.bf16.mxu0 %v3006_v30 }
 0x16a   : > { %v852_v37 = vpop.f32.mrf.mxu0  ;;  %v1190_v38 = vmax.f32 %v3582_v34, %v3587_v35  ;;  %2903 = vmatpush3.bf16.msra.mxu1 %v3007_v32  ;;  %2790 = vmatpush3.bf16.msra.mxu0 %v3007_v32 }
 0x16b   : > { %v3602_v41 = vsel %vm1025_vm8, %v852_v37, -1e+30  ;;  %2896 = vmatprep.subr.bf16.mxu1 %v3008_v46  ;;  %2791 = vmatprep.subr.bf16.mxu0 %v3008_v46 }
 0x16c   : > { %1191 = vmax.xlane.f32.xlu1 %v1190_v38  ;;  %v854_v40 = vpop.f32.mrf.mxu0 }
 0x16d   : > { %v3607_v42 = vsel %vm1026_vm9, %v854_v40, -1e+30 }
 0x16e   : > { %v856_v44 = vpop.f32.mrf.mxu0  ;;  %v1193_v45 = vmax.f32 %v3602_v41, %v3607_v42 }
 0x16f   : > { %v3622_v48 = vsel %vm1027_vm10, %v856_v44, -1e+30  ;;  %v3702_v44 = vadd.s32 %v3498_v3, %v987_v29 }
 0x170   : > { %1194 = vmax.xlane.f32.xlu0 %v1193_v45  ;;  %v858_v47 = vpop.f32.mrf.mxu0  ;;  %v988_v45 = vadd.s32 120, %v3486_v61 }
 0x171   : > { %v3627_v49 = vsel %vm1028_vm11, %v858_v47, -1e+30  ;;  %v3009_v47 = vld [vmem:[%s3425_s8] sm:$0xff]  }
 0x172   : > { %v862_v50 = vpop.f32.mrf.mxu0  ;;  %v1196_v51 = vmax.f32 %v3622_v48, %v3627_v49  ;;  %2904 = vmatpush3.bf16.msra.mxu1 %v3009_v47  ;;  %2792 = vmatpush3.bf16.msra.mxu0 %v3009_v47 }
 0x173   : > { %v3644_v60 = vsel %vm4293_vm12, %v862_v50, -1e+30  ;;  %vm4296_vm12 = vcmp.le.s32.totalorder %v3507_v7, %v3674_v24 }
 0x174   : > { %1197 = vmax.xlane.f32.xlu1 %v1196_v51  ;;  %v864_v58 = vpop.f32.mrf.mxu0 }
 0x175   : > { %v3649_v0 = vsel %vm4290_vm13, %v864_v58, -1e+30  ;;  %vm4295_vm13 = vcmp.le.s32.totalorder %v3494_v1, %v3659_v12  ;;  %v3724_v58 = vadd.s32 %v3498_v3, %v988_v45 }
 0x176   : > { %v866_v9 = vpop.f32.mrf.mxu0  ;;  %v1199_v11 = vmax.f32 %v3644_v60, %v3649_v0 }
 0x177   : > { %v3666_v19 = vsel %vm4291_vm14, %v866_v9, -1e+30  ;;  %vm4294_vm14 = vcmp.le.s32.totalorder %v3507_v7, %v3659_v12 }
 0x178   : > { %1200 = vmax.xlane.f32.xlu0 %v1199_v11  ;;  %v868_v17 = vpop.f32.mrf.mxu0 }
 0x179   : > { %v3671_v23 = vsel %vm4292_vm15, %v868_v17, -1e+30  ;;  %vm4297_vm15 = vcmp.le.s32.totalorder %v3494_v1, %v3674_v24  ;;  %v990_v17 = vadd.s32 %v3498_v3, %v3486_v61 }
 0x17a   : > { %v872_v25 = vpop.f32.mrf.mxu0  ;;  %v1202_v26 = vmax.f32 %v3666_v19, %v3671_v23 }
 0x17b   : > { %v3688_v36 = vsel %vm4295_vm13, %v872_v25, -1e+30  ;;  %vm4298_vm13 = vcmp.le.s32.totalorder %v3507_v7, %v3702_v44  ;;  %v974_v25 = vadd.s32 8, %v3486_v61 }
 0x17c   : > { %1203 = vmax.xlane.f32.xlu1 %v1202_v26  ;;  %v874_v33 = vpop.f32.mrf.mxu0 }
 0x17d   : > { %v3693_v37 = vsel %vm4294_vm14, %v874_v33, -1e+30  ;;  %vm4299_vm14 = vcmp.le.s32.totalorder %v3494_v1, %v3702_v44 }
 0x17e   : > { %v876_v38 = vpop.f32.mrf.mxu0  ;;  %v1205_v40 = vmax.f32 %v3688_v36, %v3693_v37 }
 0x17f   : > { %v3710_v51 = vsel %vm4297_vm15, %v876_v38, -1e+30  ;;  %vm4300_vm15 = vcmp.le.s32.totalorder %v3507_v7, %v3724_v58  ;;  %v991_v38 = vadd.s32 %v3498_v3, %v974_v25 }
 0x180   : > { %1206 = vmax.xlane.f32.xlu0 %v1205_v40  ;;  %v878_v50 = vpop.f32.mrf.mxu0  ;;  %v975_v40 = vadd.s32 16, %v3486_v61 }
 0x181   : > { %v3715_v54 = vsel %vm4296_vm12, %v878_v50, -1e+30  ;;  %vm4301_vm12 = vcmp.le.s32.totalorder %v3494_v1, %v3724_v58 }
 0x182   : > { %v882_v56 = vpop.f32.mrf.mxu0  ;;  %v1208_v57 = vmax.f32 %v3710_v51, %v3715_v54 }
 0x183   : > { %v3729_v9 = vsel %vm4299_vm14, %v882_v56, -1e+30  ;;  %vm1010_vm14 = vcmp.le.s32.totalorder %v3507_v7, %v990_v17 }
 0x184   : > { %1209 = vmax.xlane.f32.xlu1 %v1208_v57  ;;  %v884_v6 = vpop.f32.mrf.mxu0  ;;  %v3770_v57 = vsel %vm1010_vm14, %v3478_v55, -1e+30 }
 0x185   : > { %v3734_v11 = vsel %vm4298_vm13, %v884_v6, -1e+30  ;;  %vm1009_vm13 = vcmp.le.s32.totalorder %v3494_v1, %v990_v17  ;;  %v992_v6 = vadd.s32 %v3498_v3, %v975_v40 }
 0x186   : > { %v886_v15 = vpop.f32.mrf.mxu0  ;;  %v1211_v16 = vmax.f32 %v3729_v9, %v3734_v11  ;;  %v3779_v25 = vsel %vm1009_vm13, %v3476_v53, -1e+30 }
 0x187   : > { %v3748_v29 = vsel %vm4301_vm12, %v886_v15, -1e+30  ;;  %vm1012_vm12 = vcmp.le.s32.totalorder %v3507_v7, %v991_v38  ;;  %v976_v15 = vadd.s32 24, %v3486_v61 }
 0x188   : > { %1212 = vmax.xlane.f32.xlu0 %v1211_v16  ;;  %v888_v26 = vpop.f32.mrf.mxu0  ;;  %v3792_v40 = vsel %vm1012_vm12, %v3488_v62, -1e+30 }
 0x189   : > { %v3753_v30 = vsel %vm4300_vm15, %v888_v26, -1e+30  ;;  %vm1011_vm15 = vcmp.le.s32.totalorder %v3494_v1, %v991_v38  ;;  %v993_v53 = vadd.s32 %v3498_v3, %v976_v15 }
 0x18a   : > { %v892_v32 = vpop.f32.mrf.mxu0  ;;  %v1214_v33 = vmax.f32 %v3748_v29, %v3753_v30 }
 0x18b   : > { %v3763_v46 = vsel %vm1009_vm13, %v892_v32, -1e+30  ;;  %vm1014_vm13 = vcmp.le.s32.totalorder %v3507_v7, %v992_v6 }
 0x18c   : > { %1215 = vmax.xlane.f32.xlu1 %v1214_v33  ;;  %v894_v45 = vpop.f32.mrf.mxu0  ;;  %v1169_v33 = vmax.f32 %v3779_v25, %v3770_v57  ;;  %v3813_v15 = vsel %vm1014_vm13, %v3496_v2, -1e+30 }
 0x18d   : > { %v3765_v47 = vsel %vm1010_vm14, %v894_v45, -1e+30  ;;  %vm1013_vm14 = vcmp.le.s32.totalorder %v3494_v1, %v992_v6  ;;  %v3800_v45 = vsel %vm1011_vm15, %v3483_v59, -1e+30 }
 0x18e   : > { %v896_v50 = vpop.f32.mrf.mxu0  ;;  %v1217_v56 = vmax.f32 %v3763_v46, %v3765_v47  ;;  %v3820_v38 = vsel %vm1013_vm14, %v3491_v63, -1e+30 }
 0x18f   : > { %v3783_v26 = vsel %vm1011_vm15, %v896_v50, -1e+30  ;;  %vm1016_vm15 = vcmp.le.s32.totalorder %v3507_v7, %v993_v53 }
 0x190   : > { %1218 = vmax.xlane.f32.xlu0 %v1217_v56  ;;  %v898_v16 = vpop.f32.mrf.mxu0 }
 0x191   : > { %v3785_v55 = vsel %vm1012_vm12, %v898_v16, -1e+30  ;;  %v1172_v16 = vmax.f32 %v3800_v45, %v3792_v40  ;;  %vm1015_vm12 = vcmp.le.s32.totalorder %v3494_v1, %v993_v53 }
 0x192   : > { %v902_v32 = vpop.f32.mrf.mxu0  ;;  %v1220_v61 = vmax.f32 %v3783_v26, %v3785_v55 }
 0x193   : > { %v3804_v50 = vsel %vm1013_vm14, %v902_v32, -1e+30 }
 0x194   : > { %1170 = vmax.xlane.f32.xlu0 %v1169_v33  ;;  %1221 = vmax.xlane.f32.xlu1 %v1220_v61  ;;  %v904_v17 = vpop.f32.mrf.mxu0  ;;  %v1175_v61 = vmax.f32 %v3820_v38, %v3813_v15 }
 0x195   : > { %v3806_v62 = vsel %vm1014_vm13, %v904_v17, -1e+30 }
 0x196   : > { %v906_v56 = vpop.f32.mrf.mxu0  ;;  %v1223_v3 = vmax.f32 %v3804_v50, %v3806_v62 }
 0x197   : > { %v3824_v32 = vsel %vm1015_vm12, %v906_v56, -1e+30  ;;  %v3843_v56 = vsel %vm1015_vm12, %v3500_v4, -1e+30 }
 0x198   : > { %1173 = vmax.xlane.f32.xlu1 %v1172_v16  ;;  %1224 = vmax.xlane.f32.xlu0 %v1223_v3  ;;  %v908_v59 = vpop.f32.mrf.mxu0  ;;  %v3833_v16 = vsel %vm1016_vm15, %v3509_v8, -1e+30 }
 0x199   : > { %v3826_v33 = vsel %vm1016_vm15, %v908_v59, -1e+30  ;;  %v1178_v59 = vmax.f32 %v3843_v56, %v3833_v16 }
 0x19a   : > { %v912_v2 = vpop.f32.mrf.mxu0  ;;  %v1226_v17 = vmax.f32 %v3824_v32, %v3826_v33 }
 0x19b   : > { %v3838_v63 = vsel %vm1017_vm0, %v912_v2, -1e+30  ;;  %vm4320_vm0 = vcmp.le.s32.totalorder %v3494_v1, %v3610_v43 }
 0x19c   : > { %1176 = vmax.xlane.f32.xlu0 %v1175_v61  ;;  %1227 = vmax.xlane.f32.xlu1 %v1226_v17  ;;  %v914_v6 = vpop.f32.mrf.mxu0 }
 0x19d   : > { %v3848_v3 = vsel %vm1018_vm1, %v914_v6, -1e+30  ;;  %vm4321_vm1 = vcmp.le.s32.totalorder %v3507_v7, %v3610_v43 }
 0x19e   : > { %v916_v8 = vpop.f32.mrf.mxu0  ;;  %v1229_v2 = vmax.f32 %v3838_v63, %v3848_v3 }
 0x19f   : > { %v3857_v4 = vsel %vm1019_vm2, %v916_v8, -1e+30  ;;  %vm4323_vm2 = vcmp.le.s32.totalorder %v3494_v1, %v3636_v52 }
 0x1a0   : > { %1179 = vmax.xlane.f32.xlu1 %v1178_v59  ;;  %1230 = vmax.xlane.f32.xlu0 %v1229_v2  ;;  %v918_v61 = vpop.f32.mrf.mxu0 }
 0x1a1   : > { %v3862_v5 = vsel %vm1020_vm3, %v918_v61, -1e+30  ;;  %vm4324_vm3 = vcmp.le.s32.totalorder %v3507_v7, %v3636_v52 }
 0x1a2   : > { %4315 = vst [vmem:[#allocation4_spill] sm:$0xff] %v3862_v5  ;;  %v922_v53 = vpop.f32.mrf.mxu0  ;;  %v1232_v17 = vmax.f32 %v3857_v4, %v3862_v5 }
 0x1a3   : > { %v3869_v6 = vsel %vm1021_vm4, %v922_v53, -1e+30  ;;  %vm4326_vm4 = vcmp.le.s32.totalorder %v3494_v1, %v3659_v12 }
 0x1a4   : > { %1233 = vmax.xlane.f32.xlu1 %v1232_v17  ;;  %v924_v59 = vpop.f32.mrf.mxu0 }
 0x1a5   : > { %v3874_v8 = vsel %vm1022_vm5, %v924_v59, -1e+30  ;;  %vm4327_vm5 = vcmp.le.s32.totalorder %v3507_v7, %v3659_v12 }
 0x1a6   : > { %4316 = vst [vmem:[#allocation5_spill] sm:$0xff] %v3874_v8  ;;  %v926_v2 = vpop.f32.mrf.mxu0  ;;  %v1235_v10 = vmax.f32 %v3869_v6, %v3874_v8 }
 0x1a7   : > { %v3881_v5 = vsel %vm1023_vm6, %v926_v2, -1e+30  ;;  %vm4329_vm6 = vcmp.le.s32.totalorder %v3494_v1, %v3674_v24 }
 0x1a8   : > { %1236 = vmax.xlane.f32.xlu0 %v1235_v10  ;;  %v928_v61 = vpop.f32.mrf.mxu0 }
 0x1a9   : > { %v3886_v53 = vsel %vm1024_vm7, %v928_v61, -1e+30  ;;  %vm4331_vm7 = vcmp.le.s32.totalorder %v3507_v7, %v3674_v24 }
 0x1aa   : > { %4317 = vst [vmem:[#allocation6_spill] sm:$0xff] %v3886_v53  ;;  %v932_v17 = vpop.f32.mrf.mxu0  ;;  %v1238_v18 = vmax.f32 %v3881_v5, %v3886_v53 }
 0x1ab   : > { %v3893_v59 = vsel %vm1025_vm8, %v932_v17, -1e+30  ;;  %vm4333_vm8 = vcmp.le.s32.totalorder %v3494_v1, %v3702_v44 }
 0x1ac   : > { %1239 = vmax.xlane.f32.xlu1 %v1238_v18  ;;  %v934_v10 = vpop.f32.mrf.mxu0 }
 0x1ad   : > { %v3898_v2 = vsel %vm1026_vm9, %v934_v10, -1e+30  ;;  %vm4335_vm9 = vcmp.le.s32.totalorder %v3507_v7, %v3702_v44 }
 0x1ae   : > { %4318 = vst [vmem:[#allocation7_spill] sm:$0xff] %v3898_v2  ;;  %v936_v8 = vpop.f32.mrf.mxu0  ;;  %v1241_v22 = vmax.f32 %v3893_v59, %v3898_v2 }
 0x1af   : > { %v3905_v53 = vsel %vm1027_vm10, %v936_v8, -1e+30  ;;  %vm4337_vm10 = vcmp.le.s32.totalorder %v3494_v1, %v3724_v58 }
 0x1b0   : > { %1242 = vmax.xlane.f32.xlu0 %v1241_v22  ;;  %v938_v61 = vpop.f32.mrf.mxu0 }
 0x1b1   : > { %v3910_v17 = vsel %vm1028_vm11, %v938_v61, -1e+30  ;;  %vm4338_vm11 = vcmp.le.s32.totalorder %v3507_v7, %v3724_v58 }
 0x1b2   : > { %4319 = vst [vmem:[#allocation8_spill] sm:$0xff] %v3910_v17  ;;  %v942_v18 = vpop.f32.mrf.mxu0  ;;  %v1244_v31 = vmax.f32 %v3905_v53, %v3910_v17 }
 0x1b3   : > { %v3917_v10 = vsel %vm4320_vm0, %v942_v18, -1e+30 }
 0x1b4   : > { %1245 = vmax.xlane.f32.xlu1 %v1244_v31  ;;  %v944_v22 = vpop.f32.mrf.mxu0 }
 0x1b5   : > { %v3922_v8 = vsel %vm4321_vm1, %v944_v22, -1e+30 }
 0x1b6   : > { %4322 = vst [vmem:[#allocation9_spill] sm:$0xff] %v3922_v8  ;;  %v946_v2 = vpop.f32.mrf.mxu0  ;;  %v1247_v39 = vmax.f32 %v3917_v10, %v3922_v8 }
 0x1b7   : > { %v3929_v17 = vsel %vm4323_vm2, %v946_v2, -1e+30 }
 0x1b8   : > { %1248 = vmax.xlane.f32.xlu0 %v1247_v39  ;;  %v948_v61 = vpop.f32.mrf.mxu0 }
 0x1b9   : > { %v3934_v18 = vsel %vm4324_vm3, %v948_v61, -1e+30 }
 0x1ba   : > { %4325 = vst [vmem:[#allocation10_spill] sm:$0xff] %v3934_v18  ;;  %v952_v31 = vpop.f32.mrf.mxu0  ;;  %v1250_v43 = vmax.f32 %v3929_v17, %v3934_v18 }
 0x1bb   : > { %v3941_v22 = vsel %vm4326_vm4, %v952_v31, -1e+30 }
 0x1bc   : > { %1251 = vmax.xlane.f32.xlu1 %v1250_v43  ;;  %v954_v39 = vpop.f32.mrf.mxu0 }
 0x1bd   : > { %v3946_v2 = vsel %vm4327_vm5, %v954_v39, -1e+30 }
 0x1be   : > { %4328 = vst [vmem:[#allocation11_spill] sm:$0xff] %v3946_v2  ;;  %v956_v8 = vpop.f32.mrf.mxu0  ;;  %v1253_v52 = vmax.f32 %v3941_v22, %v3946_v2 }
 0x1bf   : > { %v3953_v18 = vsel %vm4329_vm6, %v956_v8, -1e+30 }
 0x1c0   : > { %1254 = vmax.xlane.f32.xlu0 %v1253_v52  ;;  %v958_v61 = vpop.f32.mrf.mxu0  ;;  %4330 = vst [vmem:[#allocation12_spill] sm:$0xff] %v3953_v18 }
 0x1c1   : > { %v3958_v31 = vsel %vm4331_vm7, %v958_v61, -1e+30 }
 0x1c2   : > { %4332 = vst [vmem:[#allocation13_spill] sm:$0xff] %v3958_v31  ;;  %v962_v43 = vpop.f32.mrf.mxu0  ;;  %v1256_v12 = vmax.f32 %v3953_v18, %v3958_v31 }
 0x1c3   : > { %v3965_v39 = vsel %vm4333_vm8, %v962_v43, -1e+30 }
 0x1c4   : > { %4334 = vst [vmem:[#allocation14_spill] sm:$0xff] %v3965_v39  ;;  %1257 = vmax.xlane.f32.xlu1 %v1256_v12  ;;  %v964_v52 = vpop.f32.mrf.mxu0 }
 0x1c5   : > { %v3970_v8 = vsel %vm4335_vm9, %v964_v52, -1e+30 }
 0x1c6   : > { %4336 = vst [vmem:[#allocation15_spill] sm:$0xff] %v3970_v8  ;;  %v966_v2 = vpop.f32.mrf.mxu0  ;;  %v1259_v24 = vmax.f32 %v3965_v39, %v3970_v8 }
 0x1c7   : > { %v3977_v31 = vsel %vm4337_vm10, %v966_v2, -1e+30 }
 0x1c8   : > { %1260 = vmax.xlane.f32.xlu0 %v1259_v24  ;;  %v968_v61 = vpop.f32.mrf.mxu0 }
 0x1c9   : > { %v3982_v43 = vsel %vm4338_vm11, %v968_v61, -1e+30 }
 0x1ca   : > { %4339 = vst [vmem:[#allocation16_spill] sm:$0xff] %v3982_v43  ;;  %v1262_v44 = vmax.f32 %v3977_v31, %v3982_v43 }
 0x1cc   : > { %1263 = vmax.xlane.f32.xlu1 %v1262_v44 }
 0x1e9   : > { %v1183_v12 = vpop.xlane.xlu0 %1182 }
 0x1ea   : > { %v1273_v52 = vsub.f32 %v3522_v13, %v1183_v12  ;;  %v1274_v24 = vsub.f32 %v3527_v14, %v1183_v12  ;;  %v3012_v13 = vld [vmem:[%s3430_s11 + $0x74] ss:$8 sps:$4 sm:$0xff]  }
 0x1eb   : > { %2146 = vmatprep.subr.bf16.mxu1 %v3012_v13 }
 0x1ec   : > { %v1345_v8 = vmul.f32 1.442695, %v1273_v52  ;;  %v1347_v39 = vmul.f32 1.442695, %v1274_v24 }
 0x1ed   : > { %v1186_v1 = vpop.xlane.xlu0 %1185 }
 0x1ee   : > { %3058 = vpow2.f32 %v1345_v8  ;;  %v1275_v2 = vsub.f32 %v3542_v20, %v1186_v1  ;;  %v1276_v7 = vsub.f32 %v3547_v21, %v1186_v1 }
 0x1ef   : > { %3060 = vpow2.f32 %v1347_v39 }
 0x1f0   : > { %v1349_v58 = vmul.f32 1.442695, %v1275_v2  ;;  %v1351_v61 = vmul.f32 1.442695, %v1276_v7 }
 0x1f1   : > { %v1189_v18 = vpop.xlane.xlu1 %1188 }
 0x1f2   : > { %3062 = vpow2.f32 %v1349_v58  ;;  %v1277_v44 = vsub.f32 %v3562_v27, %v1189_v18  ;;  %v1278_v43 = vsub.f32 %v3567_v28, %v1189_v18 }
 0x1f3   : > { %3064 = vpow2.f32 %v1351_v61 }
 0x1f4   : > { %v1353_v14 = vmul.f32 1.442695, %v1277_v44  ;;  %v1355_v12 = vmul.f32 1.442695, %v1278_v43 }
 0x1f5   : > { %v1192_v52 = vpop.xlane.xlu1 %1191 }
 0x1f6   : > { %3066 = vpow2.f32 %v1353_v14  ;;  %v1279_v20 = vsub.f32 %v3582_v34, %v1192_v52  ;;  %v1280_v21 = vsub.f32 %v3587_v35, %v1192_v52 }
 0x1f7   : > { %3068 = vpow2.f32 %v1355_v12 }
 0x1f8   : > { %v1357_v39 = vmul.f32 1.442695, %v1279_v20  ;;  %v1359_v8 = vmul.f32 1.442695, %v1280_v21  ;;  %v3010_v20 = vld [vmem:[%s3430_s11 + $0x70] ss:$8 sps:$4 sm:$0xff]  }
 0x1f9   : > { %v1195_v24 = vpop.xlane.xlu0 %1194 }
 0x1fa   : > { %3070 = vpow2.f32 %v1357_v39  ;;  %v1281_v27 = vsub.f32 %v3602_v41, %v1195_v24  ;;  %v1282_v28 = vsub.f32 %v3607_v42, %v1195_v24 }
 0x1fb   : > { %v3059_v18 = vpop.eup %3058  ;;  %3072 = vpow2.f32 %v1359_v8 }
 0x1fc   : > { %v3061_v1 = vpop.eup %3060  ;;  %v1361_v43 = vmul.f32 1.442695, %v1281_v27  ;;  %v1363_v2 = vmul.f32 1.442695, %v1282_v28 }
 0x1fd   : > { %v1198_v7 = vpop.xlane.xlu1 %1197  ;;  %v3997_v58 = vadd.f32 %v3061_v1, %v3059_v18 }
 0x1fe   : > { %3074 = vpow2.f32 %v1361_v43  ;;  %v1283_v34 = vsub.f32 %v3622_v48, %v1198_v7  ;;  %v1284_v35 = vsub.f32 %v3627_v49, %v1198_v7  ;;  %v3015_v48 = vld [vmem:[%s3430_s11 + $0x64] ss:$8 sps:$4 sm:$0xff]   ;;  %v3018_v43 = vld [vmem:[%s3430_s11 + $0x54] ss:$8 sps:$4 sm:$0xff]  }
 0x1ff   : > { %v3063_v61 = vpop.eup %3062  ;;  %3076 = vpow2.f32 %v1363_v2 }
 0x200   : > { %v3065_v41 = vpop.eup %3064  ;;  %v1365_v44 = vmul.f32 1.442695, %v1283_v34  ;;  %v1367_v42 = vmul.f32 1.442695, %v1284_v35  ;;  %v1557_v13 = vpack.c.bf16 %v3063_v61, %v3059_v18 }
 0x201   : > { %v1201_v14 = vpop.xlane.xlu0 %1200  ;;  %v1558_v12 = vpack.c.bf16 %v3065_v41, %v3061_v1  ;;  %v4001_v52 = vadd.f32 %v3065_v41, %v3063_v61  ;;  %v3013_v1 = vld [vmem:[%s3430_s11 + $0x60] ss:$8 sps:$4 sm:$0xff]  }
 0x202   : > { %3078 = vpow2.f32 %v1365_v44  ;;  %v1285_v21 = vsub.f32 %v3644_v60, %v1201_v14  ;;  %v1286_v39 = vsub.f32 %v3649_v0, %v1201_v14  ;;  %v3021_v14 = vld [vmem:[%s3430_s11 + $0x44] ss:$8 sps:$4 sm:$0xff]  }
 0x203   : > { %v3067_v49 = vpop.eup %3066  ;;  %3080 = vpow2.f32 %v1367_v42  ;;  %1729 = vmatprep.mubr.bf16.mxu1 %v1558_v12 }
 0x204   : > { %v3069_v8 = vpop.eup %3068  ;;  %v1369_v24 = vmul.f32 1.442695, %v1285_v21  ;;  %v1371_v27 = vmul.f32 1.442695, %v1286_v39  ;;  %1730 = vmatmul.mubr.bf16.vlgmr.msra.gmra.mxu1 %v1557_v13  ;;  %v3016_v13 = vld [vmem:[%s3430_s11 + $0x50] ss:$8 sps:$4 sm:$0xff]  }
 0x205   : > { %v1204_v28 = vpop.xlane.xlu1 %1203  ;;  %v4007_v18 = vadd.f32 %v3069_v8, %v3067_v49  ;;  %2147 = vmatpush1.bf16.msra.mxu1 %v3010_v20 }
 0x206   : > { %3082 = vpow2.f32 %v1369_v24  ;;  %v1287_v60 = vsub.f32 %v3666_v19, %v1204_v28  ;;  %v1288_v0 = vsub.f32 %v3671_v23, %v1204_v28  ;;  %2148 = vmatprep.subr.bf16.mxu1 %v3015_v48  ;;  %v3024_v24 = vld [vmem:[%s3430_s11 + $0x34] ss:$8 sps:$4 sm:$0xff]  }
 0x207   : > { %v3071_v2 = vpop.eup %3070  ;;  %3084 = vpow2.f32 %v1371_v27 }
 0x208   : > { %v3073_v7 = vpop.eup %3072  ;;  %v1373_v34 = vmul.f32 1.442695, %v1287_v60  ;;  %v1375_v35 = vmul.f32 1.442695, %v1288_v0  ;;  %v1559_v61 = vpack.c.bf16 %v3071_v2, %v3067_v49 }
 0x209   : > { %v1207_v41 = vpop.xlane.xlu0 %1206  ;;  %v1560_v44 = vpack.c.bf16 %v3073_v7, %v3069_v8  ;;  %v4013_v42 = vadd.f32 %v3073_v7, %v3071_v2  ;;  %2149 = vmatpush1.bf16.msra.mxu1 %v3013_v1  ;;  %v3019_v8 = vld [vmem:[%s3430_s11 + $0x40] ss:$8 sps:$4 sm:$0xff]  }
 0x20a   : > { %3086 = vpow2.f32 %v1373_v34  ;;  %v1289_v19 = vsub.f32 %v3688_v36, %v1207_v41  ;;  %v1290_v23 = vsub.f32 %v3693_v37, %v1207_v41  ;;  %2150 = vmatprep.subr.bf16.mxu1 %v3018_v43  ;;  %v3022_v34 = vld [vmem:[%s3430_s11 + $0x30] ss:$8 sps:$4 sm:$0xff]  }
 0x20b   : > { %v3075_v12 = vpop.eup %3074  ;;  %3088 = vpow2.f32 %v1375_v35  ;;  %1737 = vmatprep.mubr.bf16.mxu1 %v1560_v44  ;;  %v3027_v35 = vld [vmem:[%s3430_s11 + $0x24] ss:$8 sps:$4 sm:$0xff]  }
 0x20c   : > { %v3077_v20 = vpop.eup %3076  ;;  %v1377_v21 = vmul.f32 1.442695, %v1289_v19  ;;  %v1379_v39 = vmul.f32 1.442695, %v1290_v23  ;;  %1738 = vmatmul.mubr.bf16.gmra.mxu1 %v1559_v61 }
 0x20d   : > { %v1210_v48 = vpop.xlane.xlu1 %1209  ;;  %v4019_v49 = vadd.f32 %v3077_v20, %v3075_v12  ;;  %2151 = vmatpush1.bf16.msra.mxu1 %v3016_v13 }
 0x20e   : > { %3090 = vpow2.f32 %v1377_v21  ;;  %v1291_v36 = vsub.f32 %v3710_v51, %v1210_v48  ;;  %v1292_v37 = vsub.f32 %v3715_v54, %v1210_v48  ;;  %2152 = vmatprep.subr.bf16.mxu1 %v3021_v14  ;;  %v3025_v14 = vld [vmem:[%s3430_s11 + $0x20] ss:$8 sps:$4 sm:$0xff]  }
 0x20f   : > { %v3079_v27 = vpop.eup %3078  ;;  %3092 = vpow2.f32 %v1379_v39 }
 0x210   : > { %v3081_v28 = vpop.eup %3080  ;;  %v1381_v1 = vmul.f32 1.442695, %v1291_v36  ;;  %v1383_v60 = vmul.f32 1.442695, %v1292_v37  ;;  %v1561_v0 = vpack.c.bf16 %v3079_v27, %v3075_v12 }
 0x211   : > { %v1213_v43 = vpop.xlane.xlu0 %1212  ;;  %v1562_v2 = vpack.c.bf16 %v3081_v28, %v3077_v20  ;;  %v4025_v7 = vadd.f32 %v3081_v28, %v3079_v27  ;;  %2153 = vmatpush1.bf16.msra.mxu1 %v3019_v8 }
 0x212   : > { %3094 = vpow2.f32 %v1381_v1  ;;  %v1293_v51 = vsub.f32 %v3729_v9, %v1213_v43  ;;  %v1294_v54 = vsub.f32 %v3734_v11, %v1213_v43  ;;  %2154 = vmatprep.subr.bf16.mxu1 %v3024_v24 }
 0x213   : > { %v3083_v61 = vpop.eup %3082  ;;  %3096 = vpow2.f32 %v1383_v60  ;;  %1745 = vmatprep.mubr.bf16.mxu1 %v1562_v2 }
 0x214   : > { %v3085_v41 = vpop.eup %3084  ;;  %v1385_v44 = vmul.f32 1.442695, %v1293_v51  ;;  %v1387_v13 = vmul.f32 1.442695, %v1294_v54  ;;  %1746 = vmatmul.mubr.bf16.gmra.mxu1 %v1561_v0 }
 0x215   : > { %v1216_v19 = vpop.xlane.xlu1 %1215  ;;  %v4031_v23 = vadd.f32 %v3085_v41, %v3083_v61  ;;  %2155 = vmatpush1.bf16.msra.mxu1 %v3022_v34 }
 0x216   : > { %3098 = vpow2.f32 %v1385_v44  ;;  %v1295_v12 = vsub.f32 %v3748_v29, %v1216_v19  ;;  %v1296_v9 = vsub.f32 %v3753_v30, %v1216_v19  ;;  %2156 = vmatprep.subr.bf16.mxu1 %v3027_v35 }
 0x217   : > { %v3087_v11 = vpop.eup %3086  ;;  %3100 = vpow2.f32 %v1387_v13 }
 0x218   : > { %v3089_v20 = vpop.eup %3088  ;;  %v1389_v21 = vmul.f32 1.442695, %v1295_v12  ;;  %v1391_v39 = vmul.f32 1.442695, %v1296_v9  ;;  %v1563_v48 = vpack.c.bf16 %v3087_v11, %v3083_v61 }
 0x219   : > { %v1219_v8 = vpop.xlane.xlu0 %1218  ;;  %v1564_v36 = vpack.c.bf16 %v3089_v20, %v3085_v41  ;;  %v4036_v37 = vadd.f32 %v3089_v20, %v3087_v11  ;;  %2157 = vmatpush1.bf16.msra.mxu1 %v3025_v14 }
 0x21a   : > { %3102 = vpow2.f32 %v1389_v21  ;;  %v1297_v24 = vsub.f32 %v3763_v46, %v1219_v8  ;;  %v1298_v27 = vsub.f32 %v3765_v47, %v1219_v8 }
 0x21b   : > { %v3091_v29 = vpop.eup %3090  ;;  %3104 = vpow2.f32 %v1391_v39  ;;  %1753 = vmatprep.mubr.bf16.mxu1 %v1564_v36 }
 0x21c   : > { %v3093_v30 = vpop.eup %3092  ;;  %v1393_v28 = vmul.f32 1.442695, %v1297_v24  ;;  %v1395_v1 = vmul.f32 1.442695, %v1298_v27  ;;  %1754 = vmatmul.mubr.bf16.gmra.mxu1 %v1563_v48 }
 0x21d   : > { %v1171_v60 = vpop.xlane.xlu0 %1170  ;;  %v1222_v0 = vpop.xlane.xlu1 %1221  ;;  %v4040_v43 = vadd.f32 %v3093_v30, %v3091_v29 }
 0x21e   : > { %3106 = vpow2.f32 %v1393_v28  ;;  %v1265_v2 = vsub.f32 %v3779_v25, %v1171_v60  ;;  %v1266_v34 = vsub.f32 %v3770_v57, %v1171_v60  ;;  %v1299_v46 = vsub.f32 %v3783_v26, %v1222_v0 }
 0x21f   : > { %v3095_v51 = vpop.eup %3094  ;;  %3108 = vpow2.f32 %v1395_v1  ;;  %v1300_v47 = vsub.f32 %v3785_v55, %v1222_v0 }
 0x220   : > { %v3097_v54 = vpop.eup %3096  ;;  %v1329_v35 = vmul.f32 1.442695, %v1265_v2  ;;  %v1331_v61 = vmul.f32 1.442695, %v1266_v34  ;;  %v1397_v41 = vmul.f32 1.442695, %v1299_v46  ;;  %v1565_v44 = vpack.c.bf16 %v3095_v51, %v3091_v29 }
 0x221   : > { %v1399_v13 = vmul.f32 1.442695, %v1300_v47  ;;  %v1174_v19 = vpop.xlane.xlu1 %1173  ;;  %v1225_v14 = vpop.xlane.xlu0 %1224  ;;  %v1566_v12 = vpack.c.bf16 %v3097_v54, %v3093_v30  ;;  %v4046_v9 = vadd.f32 %v3097_v54, %v3095_v51 }
 0x222   : > { %3110 = vpow2.f32 %v1329_v35  ;;  %v1267_v57 = vsub.f32 %v3800_v45, %v1174_v19  ;;  %v1268_v25 = vsub.f32 %v3792_v40, %v1174_v19  ;;  %v1301_v26 = vsub.f32 %v3804_v50, %v1225_v14 }
 0x223   : > { %v3099_v11 = vpop.eup %3098  ;;  %3112 = vpow2.f32 %v1331_v61  ;;  %v1302_v55 = vsub.f32 %v3806_v62, %v1225_v14  ;;  %1761 = vmatprep.mubr.bf16.mxu1 %v1566_v12 }
 0x224   : > { %v3101_v20 = vpop.eup %3100  ;;  %3114 = vpow2.f32 %v1397_v41  ;;  %v1333_v21 = vmul.f32 1.442695, %v1267_v57  ;;  %v1335_v39 = vmul.f32 1.442695, %v1268_v25  ;;  %v1401_v48 = vmul.f32 1.442695, %v1301_v26  ;;  %1762 = vmatmul.mubr.bf16.gmra.mxu1 %v1565_v44 }
 0x225   : > { %3116 = vpow2.f32 %v1399_v13  ;;  %v1403_v8 = vmul.f32 1.442695, %v1302_v55  ;;  %v1177_v36 = vpop.xlane.xlu0 %1176  ;;  %v1228_v24 = vpop.xlane.xlu1 %1227  ;;  %v4052_v45 = vadd.f32 %v3101_v20, %v3099_v11 }
 0x226   : > { %3118 = vpow2.f32 %v1333_v21  ;;  %v1269_v40 = vsub.f32 %v3820_v38, %v1177_v36  ;;  %v1270_v50 = vsub.f32 %v3813_v15, %v1177_v36  ;;  %v1303_v62 = vsub.f32 %v3824_v32, %v1228_v24 }
 0x227   : > { %v3103_v27 = vpop.eup %3102  ;;  %3120 = vpow2.f32 %v1335_v39  ;;  %v1304_v29 = vsub.f32 %v3826_v33, %v1228_v24  ;;  %v4341_v39 = vld [vmem:[#allocation5_spill] sm:$0xff] }
 0x228   : > { %v3105_v30 = vpop.eup %3104  ;;  %3122 = vpow2.f32 %v1401_v48  ;;  %v1337_v28 = vmul.f32 1.442695, %v1269_v40  ;;  %v1339_v1 = vmul.f32 1.442695, %v1270_v50  ;;  %v1405_v60 = vmul.f32 1.442695, %v1303_v62 }
 0x229   : > { %3124 = vpow2.f32 %v1403_v8  ;;  %v1407_v0 = vmul.f32 1.442695, %v1304_v29  ;;  %v1180_v2 = vpop.xlane.xlu1 %1179  ;;  %v1231_v34 = vpop.xlane.xlu0 %1230  ;;  %v1568_v46 = vpack.c.bf16 %v3105_v30, %v3101_v20  ;;  %v1567_v51 = vpack.c.bf16 %v3103_v27, %v3099_v11 }
 0x22a   : > { %3126 = vpow2.f32 %v1337_v28  ;;  %v1271_v15 = vsub.f32 %v3843_v56, %v1180_v2  ;;  %v1272_v38 = vsub.f32 %v3833_v16, %v1180_v2  ;;  %v1305_v32 = vsub.f32 %v3838_v63, %v1231_v34  ;;  %v4340_v63 = vld [vmem:[#allocation4_spill] sm:$0xff] }
 0x22b   : > { %v3107_v47 = vpop.eup %3106  ;;  %3128 = vpow2.f32 %v1339_v1  ;;  %v1306_v33 = vsub.f32 %v3848_v3, %v1231_v34  ;;  %1769 = vmatprep.mubr.bf16.mxu1 %v1568_v46  ;;  %v4062_v54 = vadd.f32 %v3105_v30, %v3103_v27 }
 0x22c   : > { %v3109_v35 = vpop.eup %3108  ;;  %3130 = vpow2.f32 %v1405_v60  ;;  %v1341_v61 = vmul.f32 1.442695, %v1271_v15  ;;  %v1343_v41 = vmul.f32 1.442695, %v1272_v38  ;;  %v1409_v44 = vmul.f32 1.442695, %v1305_v32  ;;  %1770 = vmatmul.mubr.bf16.gmra.mxu1 %v1567_v51 }
 0x22d   : > { %3132 = vpow2.f32 %v1407_v0  ;;  %v1411_v13 = vmul.f32 1.442695, %v1306_v33  ;;  %v1234_v56 = vpop.xlane.xlu1 %1233  ;;  %v1505_v19 = vadd.f32 %v3109_v35, %v3107_v47  ;;  %v4342_v0 = vld [vmem:[#allocation6_spill] sm:$0xff] }
 0x22e   : > { %3134 = vpow2.f32 %v1341_v61  ;;  %v1307_v16 = vsub.f32 %v3857_v4, %v1234_v56  ;;  %v1308_v14 = vsub.f32 %v4340_v63, %v1234_v56 }
 0x22f   : > { %v3111_v12 = vpop.eup %3110  ;;  %3136 = vpow2.f32 %v1343_v41  ;;  %1506 = vadd.xlane.f32.xlu0 %v1505_v19 }
 0x230   : > { %v3113_v3 = vpop.eup %3112  ;;  %3138 = vpow2.f32 %v1409_v44  ;;  %v1413_v57 = vmul.f32 1.442695, %v1307_v16  ;;  %v1415_v25 = vmul.f32 1.442695, %v1308_v14 }
 0x231   : > { %v3115_v26 = vpop.eup %3114  ;;  %3140 = vpow2.f32 %v1411_v13  ;;  %v1237_v11 = vpop.xlane.xlu0 %1236  ;;  %v1457_v55 = vadd.f32 %v3113_v3, %v3111_v12 }
 0x232   : > { %v3117_v20 = vpop.eup %3116  ;;  %3142 = vpow2.f32 %v1413_v57  ;;  %v1309_v21 = vsub.f32 %v3869_v6, %v1237_v11  ;;  %v1310_v48 = vsub.f32 %v4341_v39, %v1237_v11  ;;  %v1569_v4 = vpack.c.bf16 %v3115_v26, %v3107_v47  ;;  %v4344_v11 = vld [vmem:[#allocation8_spill] sm:$0xff] }
 0x233   : > { %v3119_v8 = vpop.eup %3118  ;;  %3144 = vpow2.f32 %v1415_v25  ;;  %v1570_v36 = vpack.c.bf16 %v3117_v20, %v3109_v35  ;;  %1458 = vadd.xlane.f32.xlu0 %v1457_v55  ;;  %v1508_v24 = vadd.f32 %v3117_v20, %v3115_v26 }
 0x234   : > { %v3121_v40 = vpop.eup %3120  ;;  %v1417_v50 = vmul.f32 1.442695, %v1309_v21  ;;  %v1419_v62 = vmul.f32 1.442695, %v1310_v48  ;;  %v1553_v27 = vpack.c.bf16 %v3119_v8, %v3111_v12  ;;  %v3028_v48 = vld [vmem:[%s3430_s11 + $0x10] ss:$8 sps:$4 sm:$0xff]  }
 0x235   : > { %v3123_v29 = vpop.eup %3122  ;;  %1777 = vmatprep.mubr.bf16.mxu1 %v1570_v36  ;;  %1509 = vadd.xlane.f32.xlu1 %v1508_v24  ;;  %v1240_v30 = vpop.xlane.xlu1 %1239  ;;  %v1554_v28 = vpack.c.bf16 %v3121_v40, %v3113_v3  ;;  %v1460_v1 = vadd.f32 %v3121_v40, %v3119_v8 }
 0x236   : > { %v3125_v60 = vpop.eup %3124  ;;  %3146 = vpow2.f32 %v1417_v50  ;;  %1778 = vmatmul.mubr.bf16.gmra.mxu1 %v1569_v4  ;;  %v1311_v6 = vsub.f32 %v3881_v5, %v1240_v30  ;;  %v1312_v2 = vsub.f32 %v4342_v0, %v1240_v30  ;;  %v4343_v5 = vld [vmem:[#allocation7_spill] sm:$0xff] }
 0x237   : > { %v3127_v34 = vpop.eup %3126  ;;  %3148 = vpow2.f32 %v1419_v62  ;;  %1713 = vmatprep.mubr.bf16.mxu0 %v1554_v28  ;;  %v1511_v46 = vadd.f32 %v3125_v60, %v3123_v29  ;;  %v3030_v4 = vld [vmem:[%s3430_s11 + $0x14] ss:$8 sps:$4 sm:$0xff]  }
 0x238   : > { %v3129_v51 = vpop.eup %3128  ;;  %v1421_v15 = vmul.f32 1.442695, %v1311_v6  ;;  %v1423_v38 = vmul.f32 1.442695, %v1312_v2  ;;  %1714 = vmatmul.mubr.bf16.vlgmr.msra.gmra.mxu0 %v1553_v27  ;;  %2158 = vmatprep.subr.bf16.mxu1 %v3030_v4  ;;  %v4345_v27 = vld [vmem:[#allocation9_spill] sm:$0xff]  ;;  %v4351_v4 = vld [vmem:[#allocation15_spill] sm:$0xff] }
 0x239   : > { %v3131_v32 = vpop.eup %3130  ;;  %1512 = vadd.xlane.f32.xlu0 %v1511_v46  ;;  %1461 = vadd.xlane.f32.xlu1 %v1460_v1  ;;  %v1243_v47 = vpop.xlane.xlu0 %1242  ;;  %v1463_v33 = vadd.f32 %v3129_v51, %v3127_v34 }
 0x23a   : > { %v3133_v35 = vpop.eup %3132  ;;  %3150 = vpow2.f32 %v1421_v15  ;;  %v1313_v61 = vsub.f32 %v3893_v59, %v1243_v47  ;;  %v1314_v41 = vsub.f32 %v4343_v5, %v1243_v47  ;;  %v1571_v44 = vpack.c.bf16 %v3131_v32, %v3123_v29  ;;  %2159 = vmatpush1.bf16.msra.mxu1 %v3028_v48  ;;  %v3031_v47 = vld [vmem:[%s3430_s11] ss:$8 sps:$4 sm:$0xff]   ;;  %v4347_v5 = vld [vmem:[#allocation11_spill] sm:$0xff] }
 0x23b   : > { %v3135_v13 = vpop.eup %3134  ;;  %3152 = vpow2.f32 %v1423_v38  ;;  %v1572_v56 = vpack.c.bf16 %v3133_v35, %v3125_v60  ;;  %v1514_v19 = vadd.f32 %v3133_v35, %v3131_v32 }
 0x23c   : > { %v3137_v16 = vpop.eup %3136  ;;  %v1425_v63 = vmul.f32 1.442695, %v1313_v61  ;;  %v1427_v14 = vmul.f32 1.442695, %v1314_v41  ;;  %v1555_v12 = vpack.c.bf16 %v3135_v13, %v3127_v34  ;;  %v4346_v34 = vld [vmem:[#allocation10_spill] sm:$0xff] }
 0x23d   : > { %v3139_v3 = vpop.eup %3138  ;;  %1785 = vmatprep.mubr.bf16.mxu1 %v1572_v56  ;;  %1464 = vadd.xlane.f32.xlu0 %v1463_v33  ;;  %v1246_v57 = vpop.xlane.xlu1 %1245  ;;  %v1556_v25 = vpack.c.bf16 %v3137_v16, %v3129_v51  ;;  %v1466_v20 = vadd.f32 %v3137_v16, %v3135_v13  ;;  %v3033_v61 = vld [vmem:[%s3430_s11 + $0x4] ss:$8 sps:$4 sm:$0xff]  }
 0x23e   : > { %v3141_v26 = vpop.eup %3140  ;;  %3154 = vpow2.f32 %v1425_v63  ;;  %1515 = vadd.xlane.f32.xlu1 %v1514_v19  ;;  %1786 = vmatmul.mubr.bf16.gmra.mxu1 %v1571_v44  ;;  %v1315_v59 = vsub.f32 %v3905_v53, %v1246_v57  ;;  %v1316_v55 = vsub.f32 %v4344_v11, %v1246_v57  ;;  %v3034_v63 = vld [vmem:[%s3430_s11 + $0xf0] ss:$8 sps:$4 sm:$0xff]   ;;  %v4349_v57 = vld [vmem:[#allocation13_spill] sm:$0xff] }
 0x23f   : > { %v3143_v21 = vpop.eup %3142  ;;  %3156 = vpow2.f32 %v1427_v14  ;;  %1721 = vmatprep.mubr.bf16.mxu0 %v1556_v25  ;;  %v1517_v39 = vadd.f32 %v3141_v26, %v3139_v3  ;;  %2160 = vmatprep.subr.bf16.mxu1 %v3033_v61  ;;  %v3043_v61 = vld [vmem:[%s3430_s11 + $0xc0] ss:$8 sps:$4 sm:$0xff]  }
 0x240   : > { %v3145_v8 = vpop.eup %3144  ;;  %v1429_v36 = vmul.f32 1.442695, %v1315_v59  ;;  %v1431_v24 = vmul.f32 1.442695, %v1316_v55  ;;  %1722 = vmatmul.mubr.bf16.gmra.mxu0 %v1555_v12  ;;  %v1573_v62 = vpack.c.bf16 %v3143_v21, %v3139_v3  ;;  %2161 = vmatpush1.bf16.msra.mxu1 %v3031_v47 }
 0x241   : > { %1518 = vadd.xlane.f32.xlu0 %v1517_v39  ;;  %v1249_v40 = vpop.xlane.xlu0 %1248  ;;  %v1574_v50 = vpack.c.bf16 %v3145_v8, %v3141_v26  ;;  %v1520_v30 = vadd.f32 %v3145_v8, %v3143_v21  ;;  %v4350_v39 = vld [vmem:[#allocation14_spill] sm:$0xff] }
 0x242   : > { %3158 = vpow2.f32 %v1429_v36  ;;  %1467 = vadd.xlane.f32.xlu1 %v1466_v20  ;;  %v1317_v53 = vsub.f32 %v3917_v10, %v1249_v40  ;;  %v1318_v29 = vsub.f32 %v4345_v27, %v1249_v40 }
 0x243   : > { %v3147_v28 = vpop.eup %3146  ;;  %3160 = vpow2.f32 %v1431_v24  ;;  %1793 = vmatprep.mubr.bf16.mxu1 %v1574_v50 }
 0x244   : > { %v3149_v1 = vpop.eup %3148  ;;  %v1433_v60 = vmul.f32 1.442695, %v1317_v53  ;;  %v1435_v6 = vmul.f32 1.442695, %v1318_v29  ;;  %v3037_v53 = vld [vmem:[%s3430_s11 + $0xe0] ss:$8 sps:$4 sm:$0xff]  }
 0x245   : > { %1470 = vadd.xlane.f32.xlu0 %v3997_v58  ;;  %v1252_v0 = vpop.xlane.xlu1 %1251  ;;  %v1523_v2 = vadd.f32 %v3149_v1, %v3147_v28 }
 0x246   : > { %3162 = vpow2.f32 %v1433_v60  ;;  %1521 = vadd.xlane.f32.xlu1 %v1520_v30  ;;  %1794 = vmatmul.mubr.bf16.gmra.mxu1 %v1573_v62  ;;  %v1319_v10 = vsub.f32 %v3929_v17, %v1252_v0  ;;  %v1320_v46 = vsub.f32 %v4346_v34, %v1252_v0  ;;  %v3039_v30 = vld [vmem:[%s3430_s11 + $0xe4] ss:$8 sps:$4 sm:$0xff]  }
 0x247   : > { %v3151_v51 = vpop.eup %3150  ;;  %3164 = vpow2.f32 %v1435_v6 }
 0x248   : > { %v3153_v15 = vpop.eup %3152  ;;  %v1437_v38 = vmul.f32 1.442695, %v1319_v10  ;;  %v1439_v32 = vmul.f32 1.442695, %v1320_v46  ;;  %v1575_v58 = vpack.c.bf16 %v3151_v51, %v3147_v28  ;;  %v4352_v28 = vld [vmem:[#allocation16_spill] sm:$0xff] }
 0x249   : > { %1524 = vadd.xlane.f32.xlu0 %v1523_v2  ;;  %v1255_v33 = vpop.xlane.xlu0 %1254  ;;  %v1576_v35 = vpack.c.bf16 %v3153_v15, %v3149_v1  ;;  %v1526_v44 = vadd.f32 %v3153_v15, %v3151_v51  ;;  %v3040_v51 = vld [vmem:[%s3430_s11 + $0xd0] ss:$8 sps:$4 sm:$0xff]   ;;  %v3042_v15 = vld [vmem:[%s3430_s11 + $0xd4] ss:$8 sps:$4 sm:$0xff]  }
 0x24a   : > { %3166 = vpow2.f32 %v1437_v38  ;;  %1473 = vadd.xlane.f32.xlu1 %v4001_v52  ;;  %v1321_v17 = vsub.f32 %v3941_v22, %v1255_v33  ;;  %v1322_v41 = vsub.f32 %v4347_v5, %v1255_v33  ;;  %v3036_v52 = vld [vmem:[%s3430_s11 + $0xf4] ss:$8 sps:$4 sm:$0xff]   ;;  %v4348_v22 = vld [vmem:[#allocation12_spill] sm:$0xff] }
 0x24b   : > { %v3155_v13 = vpop.eup %3154  ;;  %3168 = vpow2.f32 %v1439_v32  ;;  %1801 = vmatprep.mubr.bf16.mxu1 %v1576_v35  ;;  %2162 = vmatprep.subr.bf16.mxu1 %v3036_v52  ;;  %v3057_v52 = vld [vmem:[%s3430_s11 + $0x84] ss:$8 sps:$4 sm:$0xff]  }
 0x24c   : > { %v3157_v56 = vpop.eup %3156  ;;  %v1441_v19 = vmul.f32 1.442695, %v1321_v17  ;;  %v1443_v16 = vmul.f32 1.442695, %v1322_v41  ;;  %2163 = vmatpush2.bf16.msra.mxu1 %v3034_v63  ;;  %v3045_v17 = vld [vmem:[%s3430_s11 + $0xc4] ss:$8 sps:$4 sm:$0xff]  }
 0x24d   : > { %1476 = vadd.xlane.f32.xlu0 %v4007_v18  ;;  %v1258_v14 = vpop.xlane.xlu1 %1257  ;;  %v1529_v12 = vadd.f32 %v3157_v56, %v3155_v13  ;;  %2164 = vmatprep.subr.bf16.mxu1 %v3039_v30  ;;  %v3051_v63 = vld [vmem:[%s3430_s11 + $0xa4] ss:$8 sps:$4 sm:$0xff]  }
 0x24e   : > { %3170 = vpow2.f32 %v1441_v19  ;;  %1527 = vadd.xlane.f32.xlu1 %v1526_v44  ;;  %1802 = vmatmul.mubr.bf16.gmra.mxu1 %v1575_v58  ;;  %v1323_v3 = vsub.f32 %v4348_v22, %v1258_v14  ;;  %v1324_v25 = vsub.f32 %v4349_v57, %v1258_v14  ;;  %v3052_v14 = vld [vmem:[%s3430_s11 + $0x90] ss:$8 sps:$4 sm:$0xff]  }
 0x24f   : > { %v3159_v26 = vpop.eup %3158  ;;  %3172 = vpow2.f32 %v1443_v16 }
 0x250   : > { %v3161_v59 = vpop.eup %3160  ;;  %v1445_v11 = vmul.f32 1.442695, %v1323_v3  ;;  %v1447_v55 = vmul.f32 1.442695, %v1324_v25  ;;  %v1577_v21 = vpack.c.bf16 %v3159_v26, %v3155_v13  ;;  %2165 = vmatpush2.bf16.msra.mxu1 %v3037_v53  ;;  %v3048_v13 = vld [vmem:[%s3430_s11 + $0xb4] ss:$8 sps:$4 sm:$0xff]  }
 0x251   : > { %1530 = vadd.xlane.f32.xlu0 %v1529_v12  ;;  %v1261_v18 = vpop.xlane.xlu0 %1260  ;;  %v1578_v20 = vpack.c.bf16 %v3161_v59, %v3157_v56  ;;  %v1532_v36 = vadd.f32 %v3161_v59, %v3159_v26  ;;  %2166 = vmatprep.subr.bf16.mxu1 %v3042_v15  ;;  %v3054_v12 = vld [vmem:[%s3430_s11 + $0x94] ss:$8 sps:$4 sm:$0xff]  }
 0x252   : > { %3174 = vpow2.f32 %v1445_v11  ;;  %1479 = vadd.xlane.f32.xlu1 %v4013_v42  ;;  %v1325_v48 = vsub.f32 %v4350_v39, %v1261_v18  ;;  %v1326_v8 = vsub.f32 %v4351_v4, %v1261_v18 }
 0x253   : > { %v3163_v24 = vpop.eup %3162  ;;  %3176 = vpow2.f32 %v1447_v55  ;;  %1809 = vmatprep.mubr.bf16.mxu1 %v1578_v20 }
 0x254   : > { %v3165_v40 = vpop.eup %3164  ;;  %v1449_v50 = vmul.f32 1.442695, %v1325_v48  ;;  %v1451_v62 = vmul.f32 1.442695, %v1326_v8  ;;  %2167 = vmatpush2.bf16.msra.mxu1 %v3040_v51 }
 0x255   : > { %1482 = vadd.xlane.f32.xlu0 %v4019_v49  ;;  %v1264_v27 = vpop.xlane.xlu1 %1263  ;;  %v1535_v29 = vadd.f32 %v3165_v40, %v3163_v24  ;;  %2168 = vmatprep.subr.bf16.mxu1 %v3045_v17 }
 0x256   : > { %3178 = vpow2.f32 %v1449_v50  ;;  %1533 = vadd.xlane.f32.xlu1 %v1532_v36  ;;  %1810 = vmatmul.mubr.bf16.gmra.mxu1 %v1577_v21  ;;  %v1327_v42 = vsub.f32 %v3977_v31, %v1264_v27  ;;  %v1328_v1 = vsub.f32 %v4352_v28, %v1264_v27 }
 0x257   : > { %v3167_v60 = vpop.eup %3166  ;;  %3180 = vpow2.f32 %v1451_v62 }
 0x258   : > { %v3169_v6 = vpop.eup %3168  ;;  %v1453_v0 = vmul.f32 1.442695, %v1327_v42  ;;  %v1455_v2 = vmul.f32 1.442695, %v1328_v1  ;;  %v1579_v34 = vpack.c.bf16 %v3167_v60, %v3163_v24  ;;  %2169 = vmatpush2.bf16.msra.mxu1 %v3043_v61 }
 0x259   : > { %1536 = vadd.xlane.f32.xlu0 %v1535_v29  ;;  %v1580_v49 = vpack.c.bf16 %v3169_v6, %v3165_v40  ;;  %v1538_v10 = vadd.f32 %v3169_v6, %v3167_v60  ;;  %2170 = vmatprep.subr.bf16.mxu1 %v3048_v13 }
 0x25a   : > { %3182 = vpow2.f32 %v1453_v0  ;;  %1485 = vadd.xlane.f32.xlu1 %v4025_v7 }
 0x25b   : > { %v3171_v46 = vpop.eup %3170  ;;  %3184 = vpow2.f32 %v1455_v2  ;;  %1817 = vmatprep.mubr.bf16.mxu1 %v1580_v49 }
 0x25c   : > { %v3173_v31 = vpop.eup %3172 }
 0x25d   : > { %1488 = vadd.xlane.f32.xlu0 %v4031_v23  ;;  %v1541_v38 = vadd.f32 %v3173_v31, %v3171_v46 }
 0x25e   : > { %1539 = vadd.xlane.f32.xlu1 %v1538_v10  ;;  %1818 = vmatmul.mubr.bf16.gmra.mxu1 %v1579_v34 }
 0x25f   : > { %v3175_v32 = vpop.eup %3174 }
 0x260   : > { %v3177_v47 = vpop.eup %3176  ;;  %v1581_v35 = vpack.c.bf16 %v3175_v32, %v3171_v46 }
 0x261   : > { %1542 = vadd.xlane.f32.xlu0 %v1541_v38  ;;  %v1582_v7 = vpack.c.bf16 %v3177_v47, %v3173_v31  ;;  %v1544_v33 = vadd.f32 %v3177_v47, %v3175_v32 }
 0x262   : > { %1491 = vadd.xlane.f32.xlu1 %v4036_v37  ;;  %v3046_v37 = vld [vmem:[%s3430_s11 + $0xb0] ss:$8 sps:$4 sm:$0xff]  }
 0x263   : > { %v3179_v58 = vpop.eup %3178  ;;  %1825 = vmatprep.mubr.bf16.mxu1 %v1582_v7  ;;  %2171 = vmatpush2.bf16.msra.mxu1 %v3046_v37 }
 0x264   : > { %v3181_v23 = vpop.eup %3180  ;;  %2172 = vmatprep.subr.bf16.mxu1 %v3051_v63 }
 0x265   : > { %1494 = vadd.xlane.f32.xlu0 %v4040_v43  ;;  %v1547_v5 = vadd.f32 %v3181_v23, %v3179_v58  ;;  %v3049_v43 = vld [vmem:[%s3430_s11 + $0xa0] ss:$8 sps:$4 sm:$0xff]  }
 0x266   : > { %1545 = vadd.xlane.f32.xlu1 %v1544_v33  ;;  %1826 = vmatmul.mubr.bf16.gmra.mxu1 %v1581_v35 }
 0x267   : > { %v3183_v41 = vpop.eup %3182  ;;  %2173 = vmatpush2.bf16.msra.mxu1 %v3049_v43 }
 0x268   : > { %v3185_v44 = vpop.eup %3184  ;;  %v1583_v16 = vpack.c.bf16 %v3183_v41, %v3179_v58  ;;  %2174 = vmatprep.subr.bf16.mxu1 %v3054_v12 }
 0x269   : > { %1548 = vadd.xlane.f32.xlu0 %v1547_v5  ;;  %v1584_v56 = vpack.c.bf16 %v3185_v44, %v3181_v23  ;;  %v1550_v19 = vadd.f32 %v3185_v44, %v3183_v41 }
 0x26a   : > { %1497 = vadd.xlane.f32.xlu1 %v4046_v9  ;;  %v3055_v9 = vld [vmem:[%s3430_s11 + $0x80] ss:$8 sps:$4 sm:$0xff]  }
 0x26b   : > { %1833 = vmatprep.mubr.bf16.mxu1 %v1584_v56  ;;  %2175 = vmatpush2.bf16.msra.mxu1 %v3052_v14 }
 0x26c   : > { %2176 = vmatprep.subr.bf16.mxu1 %v3057_v52 }
 0x26d   : > { %1500 = vadd.xlane.f32.xlu0 %v4052_v45 }
 0x26e   : > { %1551 = vadd.xlane.f32.xlu1 %v1550_v19  ;;  %1834 = vmatmul.mubr.bf16.gmra.mxu1 %v1583_v16 }
 0x26f   : > { %2177 = vmatpush2.bf16.msra.mxu1 %v3055_v9 }
 0x272   : > { %1503 = vadd.xlane.f32.xlu1 %v4062_v54 }
 0x2b8   : > { %v4118_v22 = vpop.xlane.xlu0 %1506 }
 0x2bc   : > { %v4120_v3 = vpop.xlane.xlu0 %1458 }
 0x2be   : > { %v4122_v45 = vpop.xlane.xlu1 %1509 }
 0x2c2   : > { %v4124_v57 = vpop.xlane.xlu0 %1512  ;;  %v4126_v25 = vpop.xlane.xlu1 %1461 }
 0x2c4   : > { %v2805_v54 = vpop.f32.mrf.mxu1 }
 0x2c6   : > { %v4128_v26 = vpop.xlane.xlu0 %1464  ;;  %v2806_v59 = vpop.f32.mrf.mxu1 }
 0x2c7   : > { %v4130_v11 = vpop.xlane.xlu1 %1515  ;;  %v2807_v55 = vadd.f32 %v2806_v59, %v2805_v54 }
 0x2c8   : > { %v2808_v18 = vpop.f32.mrf.mxu1 }
 0x2ca   : > { %v4132_v20 = vpop.xlane.xlu0 %1518  ;;  %v2809_v21 = vpop.f32.mrf.mxu1 }
 0x2cb   : > { %v4134_v39 = vpop.xlane.xlu1 %1467  ;;  %v2810_v48 = vadd.f32 %v2809_v21, %v2808_v18 }
 0x2cc   : > { %v2811_v4 = vpop.f32.mrf.mxu1 }
 0x2ce   : > { %v1471_v8 = vpop.xlane.xlu0 %1470  ;;  %v2812_v36 = vpop.f32.mrf.mxu1 }
 0x2cf   : > { %v4136_v24 = vpop.xlane.xlu1 %1521  ;;  %v2813_v40 = vadd.f32 %v2812_v36, %v2811_v4  ;;  %3186 = vrcp.f32 %v1471_v8 }
 0x2d0   : > { %v2814_v50 = vpop.f32.mrf.mxu1 }
 0x2d2   : > { %v4138_v62 = vpop.xlane.xlu0 %1524  ;;  %v2815_v53 = vpop.f32.mrf.mxu1 }
 0x2d3   : > { %v1474_v27 = vpop.xlane.xlu1 %1473  ;;  %v2816_v29 = vadd.f32 %v2815_v53, %v2814_v50 }
 0x2d4   : > { %3188 = vrcp.f32 %v1474_v27  ;;  %v2817_v30 = vpop.f32.mrf.mxu1 }
 0x2d6   : > { %v1477_v42 = vpop.xlane.xlu0 %1476  ;;  %v2818_v28 = vpop.f32.mrf.mxu1 }
 0x2d7   : > { %v4140_v1 = vpop.xlane.xlu1 %1527  ;;  %v2819_v60 = vadd.f32 %v2818_v28, %v2817_v30  ;;  %3190 = vrcp.f32 %v1477_v42 }
 0x2d8   : > { %v2820_v6 = vpop.f32.mrf.mxu1 }
 0x2da   : > { %v4142_v0 = vpop.xlane.xlu0 %1530  ;;  %v2821_v2 = vpop.f32.mrf.mxu1 }
 0x2db   : > { %v1480_v49 = vpop.xlane.xlu1 %1479  ;;  %v2822_v10 = vadd.f32 %v2821_v2, %v2820_v6 }
 0x2dc   : > { %3192 = vrcp.f32 %v1480_v49  ;;  %v2823_v34 = vpop.f32.mrf.mxu1  ;;  %v3187_v51 = vpop.eup %3186 }
 0x2dd   : > { %v4150_v35 = vmul.f32 %v3187_v51, %v2807_v55 }
 0x2de   : > { %v1483_v46 = vpop.xlane.xlu0 %1482  ;;  %v2824_v31 = vpop.f32.mrf.mxu1 }
 0x2df   : > { %v4144_v15 = vpop.xlane.xlu1 %1533  ;;  %v4146_v38 = vadd.f32 %v2824_v31, %v2823_v34  ;;  %3194 = vrcp.f32 %v1483_v46 }
 0x2e0   : > { %v2826_v32 = vpop.f32.mrf.mxu1 }
 0x2e1   : > { %v3189_v47 = vpop.eup %3188 }
 0x2e2   : > { %v4148_v7 = vpop.xlane.xlu0 %1536  ;;  %v2827_v33 = vpop.f32.mrf.mxu1  ;;  %v4152_v58 = vmul.f32 %v3189_v47, %v2810_v48 }
 0x2e3   : > { %v1486_v23 = vpop.xlane.xlu1 %1485  ;;  %v2828_v61 = vadd.f32 %v2827_v33, %v2826_v32 }
 0x2e4   : > { %3196 = vrcp.f32 %v1486_v23  ;;  %v2829_v17 = vpop.f32.mrf.mxu1  ;;  %v1942_v5 = vpack.c.bf16 %v4152_v58, %v4150_v35  ;;  %v3191_v37 = vpop.eup %3190 }
 0x2e5   : > { %v4162_v14 = vmul.f32 %v3191_v37, %v2813_v40 }
 0x2e6   : > { %v1489_v41 = vpop.xlane.xlu0 %1488  ;;  %v2830_v44 = vpop.f32.mrf.mxu1 }
 0x2e7   : > { %v4156_v13 = vpop.xlane.xlu1 %1539  ;;  %v4158_v56 = vadd.f32 %v2830_v44, %v2829_v17  ;;  %3198 = vrcp.f32 %v1489_v41 }
 0x2e8   : > { %v2832_v19 = vpop.f32.mrf.mxu1 }
 0x2e9   : > { %v3193_v16 = vpop.eup %3192 }
 0x2ea   : > { %v4160_v43 = vpop.xlane.xlu0 %1542  ;;  %v2833_v63 = vpop.f32.mrf.mxu1  ;;  %v4164_v12 = vmul.f32 %v3193_v16, %v2816_v29 }
 0x2eb   : > { %v1492_v9 = vpop.xlane.xlu1 %1491  ;;  %v4166_v52 = vadd.f32 %v2833_v63, %v2832_v19 }
 0x2ec   : > { %3200 = vrcp.f32 %v1492_v9  ;;  %v2835_v54 = vpop.f32.mrf.mxu1  ;;  %v1944_v59 = vpack.c.bf16 %v4164_v12, %v4162_v14  ;;  %v3195_v21 = vpop.eup %3194 }
 0x2ed   : > { %3202 = vrcp.f32 %v4118_v22  ;;  %v4179_v53 = vmul.f32 %v3195_v21, %v2819_v60 }
 0x2ee   : > { %v1495_v55 = vpop.xlane.xlu0 %1494  ;;  %v2836_v18 = vpop.f32.mrf.mxu1  ;;  %3204 = vrcp.f32 %v4120_v3 }
 0x2ef   : > { %v4171_v48 = vpop.xlane.xlu1 %1545  ;;  %v4173_v4 = vadd.f32 %v2836_v18, %v2835_v54  ;;  %3206 = vrcp.f32 %v4122_v45 }
 0x2f0   : > { %v2838_v8 = vpop.f32.mrf.mxu1  ;;  %3208 = vrcp.f32 %v1495_v55 }
 0x2f1   : > { %v3197_v36 = vpop.eup %3196  ;;  %3210 = vrcp.f32 %v4126_v25 }
 0x2f2   : > { %v4177_v40 = vpop.xlane.xlu0 %1548  ;;  %v2839_v50 = vpop.f32.mrf.mxu1  ;;  %v4181_v27 = vmul.f32 %v3197_v36, %v2822_v10 }
 0x2f3   : > { %v1498_v22 = vpop.xlane.xlu1 %1497  ;;  %v4184_v29 = vadd.f32 %v2839_v50, %v2838_v8 }
 0x2f4   : > { %3212 = vrcp.f32 %v1498_v22  ;;  %v1946_v3 = vpack.c.bf16 %v4181_v27, %v4179_v53  ;;  %v3199_v42 = vpop.eup %3198 }
 0x2f5   : > { %3214 = vrcp.f32 %v4124_v57  ;;  %v4194_v10 = vmul.f32 %v3199_v42, %v4146_v38 }
 0x2f6   : > { %v2841_v30 = vpop.f32.mrf.mxu1  ;;  %v1501_v45 = vpop.xlane.xlu0 %1500  ;;  %3216 = vrcp.f32 %v4128_v26 }
 0x2f7   : > { %v4189_v28 = vpop.xlane.xlu1 %1551  ;;  %3218 = vrcp.f32 %v4130_v11 }
 0x2f8   : > { %v2842_v60 = vpop.f32.mrf.mxu1  ;;  %v2793_v6 = vpop.f32.mrf.mxu0  ;;  %3220 = vrcp.f32 %v1501_v45 }
 0x2f9   : > { %v3201_v2 = vpop.eup %3200  ;;  %3222 = vrcp.f32 %v4134_v39  ;;  %v2843_v57 = vadd.f32 %v2842_v60, %v2841_v30 }
 0x2fa   : > { %v2844_v25 = vpop.f32.mrf.mxu1  ;;  %v2794_v49 = vpop.f32.mrf.mxu0  ;;  %v4196_v34 = vmul.f32 %v3201_v2, %v2828_v61 }
 0x2fb   : > { %v1504_v46 = vpop.xlane.xlu1 %1503  ;;  %v3203_v31 = vpop.eup %3202  ;;  %v2795_v47 = vadd.f32 %v2794_v49, %v2793_v6 }
 0x2fc   : > { %3224 = vrcp.f32 %v1504_v46  ;;  %v2845_v26 = vpop.f32.mrf.mxu1  ;;  %v2796_v51 = vpop.f32.mrf.mxu0  ;;  %v1948_v32 = vpack.c.bf16 %v4196_v34, %v4194_v10  ;;  %v1875_v61 = vmul.f32 %v3203_v31, %v2843_v57 }
 0x2fd   : > { %v3205_v11 = vpop.eup %3204  ;;  %v2846_v33 = vadd.f32 %v2845_v26, %v2844_v25  ;;  %3226 = vrcp.f32 %v4132_v20 }
 0x2fe   : > { %v3207_v23 = vpop.eup %3206  ;;  %v2847_v17 = vpop.f32.mrf.mxu1  ;;  %3228 = vrcp.f32 %v4136_v24  ;;  %v1843_v9 = vmul.f32 %v3205_v11, %v2795_v47 }
 0x2ff   : > { %v2797_v38 = vpop.f32.mrf.mxu0  ;;  %v3209_v41 = vpop.eup %3208  ;;  %v1877_v44 = vmul.f32 %v3207_v23, %v2846_v33  ;;  %3230 = vrcp.f32 %v4138_v62 }
 0x300   : > { %v2798_v37 = vadd.f32 %v2797_v38, %v2796_v51  ;;  %v3211_v39 = vpop.eup %3210  ;;  %v2848_v19 = vpop.f32.mrf.mxu1  ;;  %v4204_v8 = vmul.f32 %v3209_v41, %v4158_v56  ;;  %3232 = vrcp.f32 %v4140_v1 }
 0x301   : > { %v2799_v16 = vpop.f32.mrf.mxu0  ;;  %v3213_v63 = vpop.eup %3212  ;;  %v1939_v55 = vpack.c.bf16 %v1877_v44, %v1875_v61  ;;  %v2849_v22 = vadd.f32 %v2848_v19, %v2847_v17  ;;  %3234 = vrcp.f32 %v4142_v0 }
 0x302   : > { %v1845_v54 = vmul.f32 %v3211_v39, %v2798_v37  ;;  %v2850_v18 = vpop.f32.mrf.mxu1  ;;  %v4207_v36 = vmul.f32 %v3213_v63, %v4166_v52  ;;  %v3215_v20 = vpop.eup %3214  ;;  %3236 = vrcp.f32 %v4144_v15 }
 0x303   : > { %v2800_v21 = vpop.f32.mrf.mxu0  ;;  %2178 = vmatprep.mubr.bf16.mxu1 %v1939_v55  ;;  %v3217_v45 = vpop.eup %3216  ;;  %v1879_v57 = vmul.f32 %v3215_v20, %v2849_v22  ;;  %3238 = vrcp.f32 %v4148_v7 }
 0x304   : > { %v1938_v50 = vpack.c.bf16 %v1845_v54, %v1843_v9  ;;  %v2851_v30 = vpop.f32.mrf.mxu1  ;;  %v1950_v24 = vpack.c.bf16 %v4207_v36, %v4204_v8  ;;  %v2801_v60 = vadd.f32 %v2800_v21, %v2799_v16  ;;  %v3219_v2 = vpop.eup %3218  ;;  %3240 = vrcp.f32 %v4156_v13  ;;  %v1909_v8 = vld [vmem:[#allocation2 + $0x18] sm:$0xff] }
 0x305   : > { %v2802_v42 = vpop.f32.mrf.mxu0  ;;  %v2852_v6 = vadd.f32 %v2851_v30, %v2850_v18  ;;  %v3221_v49 = vpop.eup %3220  ;;  %3242 = vrcp.f32 %v4160_v43 }
 0x306   : > { %2179 = vmatmul.mubr.bf16.vlgmr.msra.gmra.mxu1 %v1938_v50  ;;  %v2853_v25 = vpop.f32.mrf.mxu1  ;;  %v3223_v31 = vpop.eup %3222  ;;  %v1847_v11 = vmul.f32 %v3217_v45, %v2801_v60  ;;  %v4214_v17 = vmul.f32 %v3221_v49, %v4173_v4  ;;  %3244 = vrcp.f32 %v4171_v48 }
 0x307   : > { %v2803_v56 = vpop.f32.mrf.mxu0  ;;  %v1881_v52 = vmul.f32 %v3219_v2, %v2852_v6  ;;  %3246 = vrcp.f32 %v4177_v40 }
 0x308   : > { %v2804_v46 = vadd.f32 %v2803_v56, %v2802_v42  ;;  %v2854_v26 = vpop.f32.mrf.mxu1  ;;  %3248 = vrcp.f32 %v4189_v28 }
 0x309   : > { %v3225_v51 = vpop.eup %3224  ;;  %v1941_v33 = vpack.c.bf16 %v1881_v52, %v1879_v57  ;;  %v2855_v41 = vadd.f32 %v2854_v26, %v2853_v25 }
 0x30a   : > { %v1849_v47 = vmul.f32 %v3223_v31, %v2804_v46  ;;  %v2856_v23 = vpop.f32.mrf.mxu1  ;;  %v4217_v38 = vmul.f32 %v3225_v51, %v4184_v29  ;;  %v3227_v37 = vpop.eup %3226 }
 0x30b   : > { %2188 = vmatprep.mubr.bf16.mxu1 %v1941_v33  ;;  %v3229_v1 = vpop.eup %3228  ;;  %v1883_v16 = vmul.f32 %v3227_v37, %v2855_v41 }
 0x30c   : > { %v1940_v61 = vpack.c.bf16 %v1849_v47, %v1847_v11  ;;  %v2857_v44 = vpop.f32.mrf.mxu1  ;;  %v1952_v62 = vpack.c.bf16 %v4217_v38, %v4214_v17  ;;  %v3231_v18 = vpop.eup %3230 }
 0x30d   : > { %v2858_v39 = vadd.f32 %v2857_v44, %v2856_v23  ;;  %v3233_v50 = vpop.eup %3232 }
 0x30e   : > { %2189 = vmatmul.mubr.bf16.gmra.mxu1 %v1940_v61  ;;  %v2859_v19 = vpop.f32.mrf.mxu1  ;;  %v3235_v6 = vpop.eup %3234 }
 0x30f   : > { %v1885_v63 = vmul.f32 %v3229_v1, %v2858_v39  ;;  %v3237_v35 = vpop.eup %3236 }
 0x310   : > { %v2860_v4 = vpop.f32.mrf.mxu1  ;;  %v3239_v52 = vpop.eup %3238 }
 0x311   : > { %v1943_v29 = vpack.c.bf16 %v1885_v63, %v1883_v16  ;;  %v2861_v54 = vadd.f32 %v2860_v4, %v2859_v19  ;;  %v3241_v14 = vpop.eup %3240  ;;  %v1907_v63 = vld [vmem:[#allocation2] sm:$0xff] }
 0x312   : > { %v2862_v9 = vpop.f32.mrf.mxu1  ;;  %v3243_v47 = vpop.eup %3242 }
 0x313   : > { %2198 = vmatprep.mubr.bf16.mxu1 %v1943_v29  ;;  %v1887_v20 = vmul.f32 %v3231_v18, %v2861_v54  ;;  %v3245_v53 = vpop.eup %3244  ;;  %v1910_v18 = vld [vmem:[#allocation2 + $0x50] sm:$0xff] }
 0x314   : > { %v2863_v55 = vpop.f32.mrf.mxu1  ;;  %v3247_v37 = vpop.eup %3246 }
 0x315   : > { %v2864_v21 = vadd.f32 %v2863_v55, %v2862_v9  ;;  %v3249_v1 = vpop.eup %3248  ;;  %v1908_v9 = vld [vmem:[#allocation2 + $0xd8] sm:$0xff] }
 0x316   : > { %2199 = vmatmul.mubr.bf16.gmra.mxu1 %v1942_v5  ;;  %v2865_v22 = vpop.f32.mrf.mxu1 }
 0x317   : > { %v1889_v30 = vmul.f32 %v3233_v50, %v2864_v21 }
 0x318   : > { %v2866_v0 = vpop.f32.mrf.mxu1 }
 0x319   : > { %v1945_v15 = vpack.c.bf16 %v1889_v30, %v1887_v20  ;;  %v2867_v45 = vadd.f32 %v2866_v0, %v2865_v22  ;;  %v1911_v22 = vld [vmem:[#allocation2 + $0x68] sm:$0xff] }
 0x31a   : > { %v2868_v42 = vpop.f32.mrf.mxu1  ;;  %v1913_v0 = vld [vmem:[#allocation2 + $0x48] sm:$0xff] }
 0x31b   : > { %2208 = vmatprep.mubr.bf16.mxu1 %v1945_v15  ;;  %v1891_v5 = vmul.f32 %v3235_v6, %v2867_v45  ;;  %v1914_v45 = vld [vmem:[#allocation2 + $0x80] sm:$0xff] }
 0x31c   : > { %v2869_v60 = vpop.f32.mrf.mxu1 }
 0x31d   : > { %v2870_v2 = vadd.f32 %v2869_v60, %v2868_v42 }
 0x31e   : > { %2209 = vmatmul.mubr.bf16.gmra.mxu1 %v1944_v59  ;;  %v2871_v58 = vpop.f32.mrf.mxu1 }
 0x31f   : > { %v1893_v25 = vmul.f32 %v3237_v35, %v2870_v2  ;;  %v1915_v2 = vld [vmem:[#allocation2 + $0x88] sm:$0xff] }
 0x320   : > { %v2872_v7 = vpop.f32.mrf.mxu1 }
 0x321   : > { %v1947_v13 = vpack.c.bf16 %v1893_v25, %v1891_v5  ;;  %v2873_v49 = vadd.f32 %v2872_v7, %v2871_v58  ;;  %v1916_v5 = vld [vmem:[#allocation2 + $0xe8] sm:$0xff] }
 0x322   : > { %v2874_v56 = vpop.f32.mrf.mxu1 }
 0x323   : > { %2218 = vmatprep.mubr.bf16.mxu1 %v1947_v13  ;;  %v1895_v59 = vmul.f32 %v3239_v52, %v2873_v49  ;;  %v1917_v13 = vld [vmem:[#allocation2 + $0xb8] sm:$0xff] }
 0x324   : > { %v2875_v57 = vpop.f32.mrf.mxu1 }
 0x325   : > { %v2876_v46 = vadd.f32 %v2875_v57, %v2874_v56  ;;  %v1918_v57 = vld [vmem:[#allocation2 + $0x60] sm:$0xff] }
 0x326   : > { %2219 = vmatmul.mubr.bf16.gmra.mxu1 %v1946_v3  ;;  %v2877_v12 = vpop.f32.mrf.mxu1 }
 0x327   : > { %v1897_v31 = vmul.f32 %v3241_v14, %v2876_v46  ;;  %v1919_v14 = vld [vmem:[#allocation2 + $0xf0] sm:$0xff] }
 0x328   : > { %v2878_v43 = vpop.f32.mrf.mxu1 }
 0x329   : > { %v1949_v48 = vpack.c.bf16 %v1897_v31, %v1895_v59  ;;  %v2879_v51 = vadd.f32 %v2878_v43, %v2877_v12  ;;  %v1920_v31 = vld [vmem:[#allocation2 + $0x8] sm:$0xff] }
 0x32a   : > { %v2880_v26 = vpop.f32.mrf.mxu1 }
 0x32b   : > { %2228 = vmatprep.mubr.bf16.mxu1 %v1949_v48  ;;  %v1899_v3 = vmul.f32 %v3243_v47, %v2879_v51  ;;  %v1922_v47 = vld [vmem:[#allocation2 + $0x38] sm:$0xff] }
 0x32c   : > { %v2881_v11 = vpop.f32.mrf.mxu1 }
 0x32d   : > { %v2882_v33 = vadd.f32 %v2881_v11, %v2880_v26  ;;  %v1921_v26 = vld [vmem:[#allocation2 + $0x78] sm:$0xff] }
 0x32e   : > { %2229 = vmatmul.mubr.bf16.gmra.mxu1 %v1948_v32  ;;  %v2883_v27 = vpop.f32.mrf.mxu1  ;;  %v1906_v32 = vld [vmem:[#allocation2 + $0xb0] sm:$0xff] }
 0x32f   : > { %v1901_v23 = vmul.f32 %v3245_v53, %v2882_v33 }
 0x330   : > { %v2884_v41 = vpop.f32.mrf.mxu1 }
 0x331   : > { %v1951_v40 = vpack.c.bf16 %v1901_v23, %v1899_v3  ;;  %v2885_v44 = vadd.f32 %v2884_v41, %v2883_v27  ;;  %v1923_v27 = vld [vmem:[#allocation2 + $0x58] sm:$0xff]  ;;  %v1924_v41 = vld [vmem:[#allocation2 + $0x40] sm:$0xff] }
 0x332   : > { %v2886_v61 = vpop.f32.mrf.mxu1 }
 0x333   : > { %2238 = vmatprep.mubr.bf16.mxu1 %v1951_v40  ;;  %v1903_v19 = vmul.f32 %v3247_v37, %v2885_v44  ;;  %v1925_v44 = vld [vmem:[#allocation2 + $0xc8] sm:$0xff] }
 0x334   : > { %v2887_v28 = vpop.f32.mrf.mxu1 }
 0x335   : > { %v2888_v39 = vadd.f32 %v2887_v28, %v2886_v61 }
 0x336   : > { %2239 = vmatmul.mubr.bf16.gmra.mxu1 %v1950_v24 }
 0x337   : > { %v1905_v10 = vmul.f32 %v3249_v1, %v2888_v39  ;;  %v1926_v39 = vld [vmem:[#allocation2 + $0xe0] sm:$0xff] }
 0x339   : > { %v1953_v34 = vpack.c.bf16 %v1905_v10, %v1903_v19  ;;  %v1927_v10 = vld [vmem:[#allocation2 + $0x90] sm:$0xff] }
 0x33b   : > { %2248 = vmatprep.mubr.bf16.mxu1 %v1953_v34 }
 0x33e   : > { %2249 = vmatmul.mubr.bf16.gmra.mxu1 %v1952_v62  ;;  %v1912_v62 = vld [vmem:[#allocation2 + $0x30] sm:$0xff] }
 0x3c6   : > { %v2180_v16 = vpop.f32.mrf.mxu1 }
 0x3c7   : > { %v2259_v4 = vadd.f32 %v2180_v16, %v1906_v32  ;;  %v1928_v16 = vld [vmem:[#allocation2 + $0x70] sm:$0xff] }
 0x3c8   : > { %v2182_v29 = vpop.f32.mrf.mxu1 }
 0x3c9   : > { %2291 = vst [vmem:[#allocation2 + $0xb0] sm:$0xff] %v2259_v4  ;;  %v2260_v54 = vadd.f32 %v2182_v29, %v1907_v63  ;;  %v1929_v29 = vld [vmem:[#allocation2 + $0xc0] sm:$0xff] }
 0x3ca   : > { %v2184_v55 = vpop.f32.mrf.mxu1 }
 0x3cb   : > { %2292 = vst [vmem:[#allocation2] sm:$0xff] %v2260_v54  ;;  %v2261_v36 = vadd.f32 %v2184_v55, %v1908_v9  ;;  %v1930_v55 = vld [vmem:[#allocation2 + $0xa8] sm:$0xff] }
 0x3cc   : > { %v2186_v24 = vpop.f32.mrf.mxu1 }
 0x3cd   : > { %2293 = vst [vmem:[#allocation2 + $0xd8] sm:$0xff] %v2261_v36  ;;  %v2262_v21 = vadd.f32 %v2186_v24, %v1909_v8  ;;  %v1931_v24 = vld [vmem:[#allocation2 + $0xd0] sm:$0xff] }
 0x3ce   : > { %v2190_v50 = vpop.f32.mrf.mxu1 }
 0x3cf   : > { %2294 = vst [vmem:[#allocation2 + $0x18] sm:$0xff] %v2262_v21  ;;  %v2263_v17 = vadd.f32 %v2190_v50, %v1910_v18  ;;  %v1932_v50 = vld [vmem:[#allocation2 + $0x10] sm:$0xff] }
 0x3d0   : > { %v2192_v38 = vpop.f32.mrf.mxu1 }
 0x3d1   : > { %2295 = vst [vmem:[#allocation2 + $0x50] sm:$0xff] %v2263_v17  ;;  %v2264_v20 = vadd.f32 %v2192_v38, %v1911_v22  ;;  %v1933_v38 = vld [vmem:[#allocation2 + $0x28] sm:$0xff] }
 0x3d2   : > { %v2194_v30 = vpop.f32.mrf.mxu1 }
 0x3d3   : > { %2296 = vst [vmem:[#allocation2 + $0x68] sm:$0xff] %v2264_v20  ;;  %v2265_v15 = vadd.f32 %v2194_v30, %v1912_v62  ;;  %v1934_v30 = vld [vmem:[#allocation2 + $0xa0] sm:$0xff] }
 0x3d4   : > { %v2196_v42 = vpop.f32.mrf.mxu1 }
 0x3d5   : > { %2297 = vst [vmem:[#allocation2 + $0x30] sm:$0xff] %v2265_v15  ;;  %v2266_v60 = vadd.f32 %v2196_v42, %v1913_v0  ;;  %v1935_v42 = vld [vmem:[#allocation2 + $0xf8] sm:$0xff] }
 0x3d6   : > { %v2200_v6 = vpop.f32.mrf.mxu1 }
 0x3d7   : > { %2298 = vst [vmem:[#allocation2 + $0x48] sm:$0xff] %v2266_v60  ;;  %v2267_v35 = vadd.f32 %v2200_v6, %v1914_v45  ;;  %v1936_v6 = vld [vmem:[#allocation2 + $0x20] sm:$0xff] }
 0x3d8   : > { %v2202_v58 = vpop.f32.mrf.mxu1 }
 0x3d9   : > { %2299 = vst [vmem:[#allocation2 + $0x80] sm:$0xff] %v2267_v35  ;;  %v2268_v25 = vadd.f32 %v2202_v58, %v1915_v2  ;;  %v1937_v58 = vld [vmem:[#allocation2 + $0x98] sm:$0xff] }
 0x3da   : > { %v2204_v7 = vpop.f32.mrf.mxu1 }
 0x3db   : > { %2300 = vst [vmem:[#allocation2 + $0x88] sm:$0xff] %v2268_v25  ;;  %v2269_v56 = vadd.f32 %v2204_v7, %v1916_v5 }
 0x3dc   : > { %v2206_v49 = vpop.f32.mrf.mxu1 }
 0x3dd   : > { %2301 = vst [vmem:[#allocation2 + $0xe8] sm:$0xff] %v2269_v56  ;;  %v2270_v52 = vadd.f32 %v2206_v49, %v1917_v13 }
 0x3de   : > { %v2210_v46 = vpop.f32.mrf.mxu1 }
 0x3df   : > { %2302 = vst [vmem:[#allocation2 + $0xb8] sm:$0xff] %v2270_v52  ;;  %v2271_v12 = vadd.f32 %v2210_v46, %v1918_v57 }
 0x3e0   : > { %v2212_v59 = vpop.f32.mrf.mxu1 }
 0x3e1   : > { %2303 = vst [vmem:[#allocation2 + $0x60] sm:$0xff] %v2271_v12  ;;  %v2272_v43 = vadd.f32 %v2212_v59, %v1919_v14 }
 0x3e2   : > { %v2214_v48 = vpop.f32.mrf.mxu1 }
 0x3e3   : > { %2304 = vst [vmem:[#allocation2 + $0xf0] sm:$0xff] %v2272_v43  ;;  %v2273_v51 = vadd.f32 %v2214_v48, %v1920_v31 }
 0x3e4   : > { %v2216_v11 = vpop.f32.mrf.mxu1 }
 0x3e5   : > { %2305 = vst [vmem:[#allocation2 + $0x8] sm:$0xff] %v2273_v51  ;;  %v2274_v33 = vadd.f32 %v2216_v11, %v1921_v26 }
 0x3e6   : > { %v2220_v53 = vpop.f32.mrf.mxu1 }
 0x3e7   : > { %2306 = vst [vmem:[#allocation2 + $0x78] sm:$0xff] %v2274_v33  ;;  %v2275_v3 = vadd.f32 %v2220_v53, %v1922_v47 }
 0x3e8   : > { %v2222_v23 = vpop.f32.mrf.mxu1 }
 0x3e9   : > { %2307 = vst [vmem:[#allocation2 + $0x38] sm:$0xff] %v2275_v3  ;;  %v2276_v40 = vadd.f32 %v2222_v23, %v1923_v27 }
 0x3ea   : > { %v2224_v61 = vpop.f32.mrf.mxu1 }
 0x3eb   : > { %2308 = vst [vmem:[#allocation2 + $0x58] sm:$0xff] %v2276_v40  ;;  %v2277_v28 = vadd.f32 %v2224_v61, %v1924_v41 }
 0x3ec   : > { %v2226_v37 = vpop.f32.mrf.mxu1 }
 0x3ed   : > { %2309 = vst [vmem:[#allocation2 + $0x40] sm:$0xff] %v2277_v28  ;;  %v2278_v1 = vadd.f32 %v2226_v37, %v1925_v44 }
 0x3ee   : > { %v2230_v19 = vpop.f32.mrf.mxu1 }
 0x3ef   : > { %2310 = vst [vmem:[#allocation2 + $0xc8] sm:$0xff] %v2278_v1  ;;  %v2279_v34 = vadd.f32 %v2230_v19, %v1926_v39 }
 0x3f0   : > { %v2232_v32 = vpop.f32.mrf.mxu1 }
 0x3f1   : > { %2311 = vst [vmem:[#allocation2 + $0xe0] sm:$0xff] %v2279_v34  ;;  %v2280_v63 = vadd.f32 %v2232_v32, %v1927_v10 }
 0x3f2   : > { %v2234_v4 = vpop.f32.mrf.mxu1 }
 0x3f3   : > { %2312 = vst [vmem:[#allocation2 + $0x90] sm:$0xff] %v2280_v63  ;;  %v2281_v9 = vadd.f32 %v2234_v4, %v1928_v16 }
 0x3f4   : > { %v2236_v54 = vpop.f32.mrf.mxu1 }
 0x3f5   : > { %2313 = vst [vmem:[#allocation2 + $0x70] sm:$0xff] %v2281_v9  ;;  %v2282_v8 = vadd.f32 %v2236_v54, %v1929_v29 }
 0x3f6   : > { %v2240_v36 = vpop.f32.mrf.mxu1 }
 0x3f7   : > { %2314 = vst [vmem:[#allocation2 + $0xc0] sm:$0xff] %v2282_v8  ;;  %v2283_v18 = vadd.f32 %v2240_v36, %v1930_v55 }
 0x3f8   : > { %v2242_v21 = vpop.f32.mrf.mxu1 }
 0x3f9   : > { %2315 = vst [vmem:[#allocation2 + $0xa8] sm:$0xff] %v2283_v18  ;;  %v2284_v22 = vadd.f32 %v2242_v21, %v1931_v24 }
 0x3fa   : > { %v2244_v17 = vpop.f32.mrf.mxu1 }
 0x3fb   : > { %2316 = vst [vmem:[#allocation2 + $0xd0] sm:$0xff] %v2284_v22  ;;  %v2285_v62 = vadd.f32 %v2244_v17, %v1932_v50 }
 0x3fc   : > { %v2246_v20 = vpop.f32.mrf.mxu1 }
 0x3fd   : > { %2317 = vst [vmem:[#allocation2 + $0x10] sm:$0xff] %v2285_v62  ;;  %v2286_v0 = vadd.f32 %v2246_v20, %v1933_v38 }
 0x3fe   : > { %v2250_v15 = vpop.f32.mrf.mxu1 }
 0x3ff   : > { %2318 = vst [vmem:[#allocation2 + $0x28] sm:$0xff] %v2286_v0  ;;  %v2287_v45 = vadd.f32 %v2250_v15, %v1934_v30 }
 0x400   : > { %v2252_v60 = vpop.f32.mrf.mxu1 }
 0x401   : > { %2319 = vst [vmem:[#allocation2 + $0xa0] sm:$0xff] %v2287_v45  ;;  %v2288_v2 = vadd.f32 %v2252_v60, %v1935_v42 }
 0x402   : > { %v2254_v35 = vpop.f32.mrf.mxu1 }
 0x403   : > { %2320 = vst [vmem:[#allocation2 + $0xf8] sm:$0xff] %v2288_v2  ;;  %v2289_v5 = vadd.f32 %v2254_v35, %v1936_v6  ;;  %2326 = sbr.rel (%p2689_p0) target bundleno = 1047 (0x417), region = 85 }
 0x404   : > { %v2256_v25 = vpop.f32.mrf.mxu1 }
 0x405   : > { %2321 = vst [vmem:[#allocation2 + $0x20] sm:$0xff] %v2289_v5  ;;  %v2290_v7 = vadd.f32 %v2256_v25, %v1937_v58 }
 0x407   : > { %2322 = vst [vmem:[#allocation2 + $0x98] sm:$0xff] %v2290_v7 }
 0x408   : > { %v2327_v13 = vld [vmem:[#allocation2 + $0xb0] sm:$0xff]  ;;  %v2328_v56 = vld [vmem:[#allocation2] sm:$0xff]  ;;  %v2329_v49 = vld [vmem:[#allocation2 + $0xd8] sm:$0xff] }
 0x409   : > { %v2713_v57 = vpack.c.bf16 %v2328_v56, %v2327_v13  ;;  %v2330_v52 = vld [vmem:[#allocation2 + $0x18] sm:$0xff]  ;;  %v2331_v46 = vld [vmem:[#allocation2 + $0x50] sm:$0xff]  ;;  %v2332_v14 = vld [vmem:[#allocation2 + $0x68] sm:$0xff] }
 0x40a   : > { %v2714_v12 = vpack.c.bf16 %v2330_v52, %v2329_v49  ;;  %v2715_v59 = vpack.c.bf16 %v2332_v14, %v2331_v46  ;;  %v2333_v31 = vld [vmem:[#allocation2 + $0x30] sm:$0xff]  ;;  %v2334_v43 = vld [vmem:[#allocation2 + $0x48] sm:$0xff]  ;;  %v2335_v48 = vld [vmem:[#allocation2 + $0x80] sm:$0xff] }
 0x40b   : > { %2455 = vst [vmem:[%s3435_s29] sm:$0xff] %v2713_v57  ;;  %v2716_v26 = vpack.c.bf16 %v2334_v43, %v2333_v31  ;;  %v2336_v51 = vld [vmem:[#allocation2 + $0x88] sm:$0xff]  ;;  %v2338_v47 = vld [vmem:[#allocation2 + $0xb8] sm:$0xff]  ;;  %v2339_v27 = vld [vmem:[#allocation2 + $0x60] sm:$0xff] }
 0x40c   : > { %v2337_v11 = vld [vmem:[#allocation2 + $0xe8] sm:$0xff]  ;;  %2456 = vst [vmem:[%s3435_s29 + $0x8] sm:$0xff] %v2714_v12  ;;  %2457 = vst [vmem:[%s3435_s29 + $0x10] sm:$0xff] %v2715_v59  ;;  %v2717_v33 = vpack.c.bf16 %v2336_v51, %v2335_v48  ;;  %v2340_v3 = vld [vmem:[#allocation2 + $0xf0] sm:$0xff] }
 0x40d   : > { %v2718_v53 = vpack.c.bf16 %v2338_v47, %v2337_v11  ;;  %v2341_v23 = vld [vmem:[#allocation2 + $0x8] sm:$0xff]  ;;  %2458 = vst [vmem:[%s3435_s29 + $0x18] sm:$0xff] %v2716_v26  ;;  %v2719_v41 = vpack.c.bf16 %v2340_v3, %v2339_v27  ;;  %v2342_v40 = vld [vmem:[#allocation2 + $0x78] sm:$0xff]  ;;  %v2345_v39 = vld [vmem:[#allocation2 + $0x40] sm:$0xff] }
 0x40e   : > { %v2343_v61 = vld [vmem:[#allocation2 + $0x38] sm:$0xff]  ;;  %2459 = vst [vmem:[%s3435_s29 + $0x20] sm:$0xff] %v2717_v33  ;;  %v2720_v28 = vpack.c.bf16 %v2342_v40, %v2341_v23  ;;  %v2346_v1 = vld [vmem:[#allocation2 + $0xc8] sm:$0xff]  ;;  %v2347_v19 = vld [vmem:[#allocation2 + $0xe0] sm:$0xff] }
 0x40f   : > { %v2344_v44 = vld [vmem:[#allocation2 + $0x58] sm:$0xff]  ;;  %2460 = vst [vmem:[%s3435_s29 + $0x28] sm:$0xff] %v2718_v53  ;;  %2461 = vst [vmem:[%s3435_s29 + $0x30] sm:$0xff] %v2719_v41  ;;  %v2722_v10 = vpack.c.bf16 %v2346_v1, %v2345_v39  ;;  %v2348_v34 = vld [vmem:[#allocation2 + $0x90] sm:$0xff] }
 0x410   : > { %v2721_v37 = vpack.c.bf16 %v2344_v44, %v2343_v61  ;;  %v2349_v32 = vld [vmem:[#allocation2 + $0x70] sm:$0xff]  ;;  %v2350_v16 = vld [vmem:[#allocation2 + $0xc0] sm:$0xff]  ;;  %2462 = vst [vmem:[%s3435_s29 + $0x38] sm:$0xff] %v2720_v28  ;;  %v2723_v63 = vpack.c.bf16 %v2348_v34, %v2347_v19  ;;  %v2351_v29 = vld [vmem:[#allocation2 + $0xa8] sm:$0xff] }
 0x411   : > { %v2724_v4 = vpack.c.bf16 %v2350_v16, %v2349_v32  ;;  %v2352_v9 = vld [vmem:[#allocation2 + $0xd0] sm:$0xff]  ;;  %2464 = vst [vmem:[%s3435_s29 + $0x48] sm:$0xff] %v2722_v10  ;;  %v2354_v8 = vld [vmem:[#allocation2 + $0x28] sm:$0xff]  ;;  %v2355_v36 = vld [vmem:[#allocation2 + $0xa0] sm:$0xff] }
 0x412   : > { %2463 = vst [vmem:[%s3435_s29 + $0x40] sm:$0xff] %v2721_v37  ;;  %v2353_v54 = vld [vmem:[#allocation2 + $0x10] sm:$0xff]  ;;  %v2725_v55 = vpack.c.bf16 %v2352_v9, %v2351_v29  ;;  %v2356_v24 = vld [vmem:[#allocation2 + $0xf8] sm:$0xff]  ;;  %2465 = vst [vmem:[%s3435_s29 + $0x50] sm:$0xff] %v2723_v63 }
 0x413   : > { %2466 = vst [vmem:[%s3435_s29 + $0x58] sm:$0xff] %v2724_v4  ;;  %v2726_v18 = vpack.c.bf16 %v2354_v8, %v2353_v54  ;;  %v2727_v21 = vpack.c.bf16 %v2356_v24, %v2355_v36  ;;  %v2357_v50 = vld [vmem:[#allocation2 + $0x20] sm:$0xff]  ;;  %v2358_v22 = vld [vmem:[#allocation2 + $0x98] sm:$0xff] }
 0x414   : > { %2467 = vst [vmem:[%s3435_s29 + $0x60] sm:$0xff] %v2725_v55  ;;  %v2728_v17 = vpack.c.bf16 %v2358_v22, %v2357_v50 }
 0x415   : > { %2468 = vst [vmem:[%s3435_s29 + $0x68] sm:$0xff] %v2726_v18  ;;  %2469 = vst [vmem:[%s3435_s29 + $0x70] sm:$0xff] %v2727_v21 }
 0x416   : > { %2470 = vst [vmem:[%s3435_s29 + $0x78] sm:$0xff] %v2728_v17 }
 0x417 PF: > { %s14_s21 = sadd.s32 1, %s3304_s21   ;;  %s4353_s15 = smov %s3284_s16 }
 0x418   : > { %p11_p1 = scmp.ge.s32.totalorder %s14_s21, 6   ;;  %s4354_s16 = smov %s3383_s28 }
 0x419   : > { %s4355_s17 = smov %s3296_s19  ;;  %s4356_s18 = smov %s3300_s20 }
 0x41a   : > { %s4357_s19 = smov %s4360_s22  ;;  %s4358_s20 = smov %s4364_s23 }
 0x41b   :  { %13 = sbr.rel (!%p11_p1) target bundleno = 4 (0x4), region = 129 }

// kernel: qwen3_decoder_layer.5
= control target key start
LH: loop header
LB: loop body
LE: loop exit
PB: predicated region body
PF: predicated region fallthrough
CT: control target
= control target key end

     0   :  { %s4420_s0 = inlined_call_operand.vmem [shape: bf16[256,256], index: 0, kind: input, shape index: {}]   ;;  %s4421_s1 = inlined_call_operand.hbm [shape: bf16[256,256], index: 1, kind: input, shape index: {}, may-alias: {1,6}]   ;;  %s4422_s2 = inlined_call_operand.vmem [shape: f32[1,256], index: 2, kind: input, shape index: {}]   ;;  %s4423_s3 = inlined_call_operand.vmem [shape: bf16[2,256,512], index: 3, kind: input, shape index: {}]   ;;  %s4424_s4 = inlined_call_operand.vmem [shape: bf16[512,256], index: 4, kind: input, shape index: {}]   ;;  %s4425_s5 = inlined_call_operand.hbm [shape: bf16[256,256], index: 5, kind: output, shape index: {0}]   ;;  %s4426_s6 = inlined_call_operand.hbm [shape: bf16[256,256], index: 6, kind: output, shape index: {1}, may-alias: {1,6}]  }
   0x1   :  { %4431 = sst [smem:[#allocation19_spill]] %s4421_s1 }
   0x2   :  { %12 = vsyncpa [#allocation5], 0 }
   0x3   :  { %14 = vsyncpa [#allocation5 + $0x1], 0 }
   0x4   :  { %15 = vsyncpa [#allocation6], 0 }
   0x5   :  { %17 = vsyncpa [#allocation6 + $0x1], 0 }
   0x6   :  { %18 = vsyncpa [#allocation9], 0 }
   0x7   :  { %20 = vsyncpa [#allocation9 + $0x1], 0  ;;  %s3595_s21 = smov 0   ;;  %s3597_s22 = smov 0  }
   0x8   :  { %s3599_s23 = smov 0   ;;  %s3601_s24 = smov 0  }
   0x9   :  { %s3603_s25 = smov 0   ;;  %s3605_s26 = smov 0  }
   0xa   :  { %s3607_s27 = smov 0   ;;  %s3609_s28 = smov 0  }
   0xb LB: > { %4432 = sst [smem:[#allocation13_spill]] %s3530_s23  ;;  %s2676_s29 = sadd.s32 4294967295, %s3550_s28   ;;  %s3550_s28 = sphi %s3609_s28, %s26_s28   ;;  %s3546_s27 = sphi %s3607_s27, %s4449_s27   ;;  %s3542_s26 = sphi %s3605_s26, %s4448_s26   ;;  %s3538_s25 = sphi %s3603_s25, %s4447_s25   ;;  %s3534_s24 = sphi %s3601_s24, %s4446_s24   ;;  %s3530_s23 = sphi %s3599_s23, %s4445_s23   ;;  %s3526_s22 = sphi %s3597_s22, %s4451_s22   ;;  %s3522_s21 = sphi %s3595_s21, %s4450_s21  }
   0xc   : > { %4433 = sst [smem:[#allocation14_spill]] %s3542_s26  ;;  %s2677_s30 = sadd.s32 4294967294, %s3550_s28  }
   0xd   : > { %4434 = sst [smem:[#allocation15_spill]] %s3546_s27  ;;  %s35_s7 = sadd.s32 1, %s3542_s26 }
   0xe   : > { %s38_s8 = sadd.s32 1, %s3546_s27  ;;  %p36_p0 = scmp.ge.s32.totalorder %s35_s7, 2 }
   0xf   : > { %s71_s9 = sadd.s32 1, %s3530_s23  ;;  %p78_p1 = scmp.ne.s32.totalorder %s3530_s23, %s3526_s22 }
  0x10   : > { %p79_p2 = scmp.eq.s32.totalorder %s3550_s28, 0  ;;  %s4453_s7 = smov (%p36_p0, %s35_s7), 0 }
  0x11   : > { %4435 = sst [smem:[#allocation16_spill]] %s4453_s7  ;;  %s4455_s8 = smov (!%p36_p0, %s38_s8), %s3546_s27 }
  0x12   : > { %p3646_p3 = por %p79_p2, %p78_p1  ;;  %p84_p4 = scmp.ne.s32.totalorder %s3526_s22, %s3522_s21 }
  0x13   : > { %p40_p5 = scmp.ge.s32.totalorder %s4455_s8, 2  ;;  %p85_p6 = scmp.eq.s32.totalorder %s2676_s29, 0 }
  0x14   : > { %p181_p7 = scmp.eq.s32.totalorder %s2676_s29, 3  ;;  %p187_p8 = scmp.eq.s32.totalorder %s2677_s30, 3 }
  0x15   : > { %s4457_s8 = smov (%p40_p5, %s4455_s8), 0  ;;  %p3654_p9 = por %p85_p6, %p84_p4 }
  0x16   : > { %4437 = sst [smem:[#allocation17_spill]] %s4457_s8  ;;  %p3658_p10 = por %p181_p7, %p78_p1 }
  0x17   : > { %s68_s13 = ssub.s32 %s3546_s27, %s4457_s8  ;;  %p3664_p11 = por %p187_p8, %p84_p4 }
  0x18   : > { %p69_p12 = scmp.eq.s32.totalorder %s68_s13, 0  ;;  %p3006_p13 = scmp.lt.s32.totalorder %s3550_s28, 4 }
  0x19   : > { %s246_s15 = sand.u32 1, %s3530_s23   ;;  %s2901_s18 = sshll.u32 %s3546_s27, 11 }
  0x1a   : > { %s3671_s16 = scalar_select %p69_p12, %s3530_s23, %s71_s9  }
  0x1b   : > { %s2680_s17 = sshll.u32 %s246_s15, 7  ;;  %s4442_s1 = sld [smem:[#allocation19_spill]] }
  0x1c   : > { %4441 = sst [smem:[#allocation18_spill]] %s3671_s16  ;;  %s250_s30 = scalar_lea.vmem [#allocation4], %s2680_s17 }
  0x1d   : > { %s258_s7 = sshll.u32 %s250_s30, 4  ;;  %p3679_p0 = pnand %p3006_p13, %p3646_p3  ;;  %s259_s7 = int_to_ptr.vmem [resolvable:$true] %s258_s7 }
  0x1e   : > { %p2684_p1 = scmp.ge.s32.totalorder %s3550_s28, 1  ;;  %s247_s13 = scalar_lea.sflag [#allocation5], %s246_s15 }
  0x1f   : > { %p3398_p2 = pneg %p3679_p0  ;;  %s3409_s9 = scalar_lea.vmem %s259_s7, 2048 }
  0x20   : > { %p3410_p4 = scmp.ne.s32.totalorder %s259_s7, %s3409_s9  ;;  %s3552_s27 = smov [#allocation4]  }
  0x21   : > { %s257_s29 = scalar_lea.hbm %s4442_s1, %s2901_s18  ;;  %s3414_s19 = sshll.u32 %s3552_s27, 4  ;;  %s3415_s19 = int_to_ptr.vmem [resolvable:$false] %s3414_s19 }
  0x22   : > { %p3412_p5 = pnand %p3410_p4, %p3398_p2  ;;  %s3416_s17 = scalar_lea.vmem %s3415_s19, 4096 }
  0x23   : > { %p3417_p7 = scmp.lt.s32.totalorder %s259_s7, %s3415_s19  ;;  %p3418_p8 = scmp.lt.s32.totalorder %s3416_s17, %s3409_s9 }
  0x24   : > { %p3413_p6 = pneg %p3412_p5 }
  0x25   : > { %p3419_p12 = por %p3418_p8, %p3417_p7 }
  0x27   : > { %p3420_p3 = pnand %p3419_p12, %p3413_p6 }
  0x29   : > { %3423 = shalt.err (!%p3420_p3)
}
  0x2a   : > { %s3553_s10 = smov 128   ;;  %s3554_s15 = smov 8  }
  0x2b   : > { %2998 = dma.hbm_to_vmem [thread:$0]  (!%p3679_p0), %s257_s29, 2048, %s259_s7, %s247_s13, %s3553_s10, %s3553_s10, %s3554_s15  }
  0x2c   : > { %p284_p13 = scmp.lt.s32.totalorder %s3550_s28, 5 }
  0x2e   : > { %p285_p2 = pnand %p2684_p1, %p284_p13 }
  0x2f   : > { %s3692_s27 = sand.u32 (!%p285_p2), 1, %s3526_s22  }
  0x30   : > { %288 = sbr.rel (%p285_p2) target bundleno = 905 (0x389), region = 40  ;;  %s2685_s18 = sshll.u32 (!%p285_p2), %s3692_s27, 7 }
  0x31   : > { %s291_s20 = scalar_lea.sflag (!%p285_p2), [#allocation5], %s3692_s27  ;;  %s3696_s30 = scalar_lea.vmem (!%p285_p2), [#allocation4], %s2685_s18 }
  0x35   : > { %3509 = dma.done.wait (%p3654_p9), %s291_s20, 2048  }
  0x36   : > { %3511 = vsyncadd (%p3654_p9), %s291_s20, 4294965248  ;;  %s2688_s7 = sshll.u32 %s3538_s25, 4  ;;  %p353_p0 = scmp.lt.s32.totalorder %s3534_s24, 1 }
  0x37   : > { %p346_p1 = scmp.lt.s32.totalorder %s2688_s7, 31  ;;  %s2693_s8 = sshll.u32 %s3534_s24, 5 }
  0x38   : > { %s354_s29 = scalar_select %p353_p0, %s3534_s24, 1 }
  0x39   : > { %s4459_s7 = smov (!%p346_p1, %s2688_s7), 31  ;;  %p359_p4 = scmp.lt.s32.totalorder %s2693_s8, 63 }
  0x3a   : > { %s2903_s13 = sshll.u32 %s354_s29, 9  ;;  %s2902_s9 = sshll.u32 %s4459_s7, 3 }
  0x3b   : > { %s3709_s10 = scalar_lea.vmem %s4423_s3, %s2903_s13  ;;  %s3714_s20 = scalar_lea.vmem %s4420_s0, %s2902_s9 }
  0x3c   : > { %s4461_s8 = smov (!%p359_p4, %s2693_s8), 63  ;;  %s3721_s29 = scalar_lea.vmem [#allocation7], %s2685_s18 }
  0x3d   : > { %s2904_s1 = sshll.u32 %s4461_s8, 3  ;;  %s3723_s7 = scalar_lea.vmem [#allocation8], %s2685_s18 }
  0x3e   : > { %s3719_s23 = scalar_lea.vmem %s4424_s4, %s2904_s1  ;;  %p2696_p9 = scmp.ne.s32.totalorder %s3534_s24, 0 }
  0x40   : > { %370 = sbr.rel (%p2696_p9) target bundleno = 278 (0x116), region = 48 }
  0x45   : > { %v373_v0 = vld [vmem:[%s3714_s20 + $0x10] sm:$0xff]  ;;  %v371_v2 = vld [vmem:[%s3714_s20] sm:$0xff]  ;;  %v374_v8 = vld [vmem:[%s3714_s20 + $0x18] sm:$0xff] }
  0x46   : > { %v421_v1 = vld [vmem:[%s3696_s30 + $0x10] sm:$0xff]  ;;  %v391_v3 = vunpack.c.l.bf16 %v373_v0  ;;  %v392_v4 = vunpack.c.h.bf16 %v373_v0  ;;  %v419_v7 = vld [vmem:[%s3696_s30] sm:$0xff]  ;;  %v422_v9 = vld [vmem:[%s3696_s30 + $0x18] sm:$0xff]  ;;  %v387_v10 = vunpack.c.l.bf16 %v371_v2  ;;  %v388_v11 = vunpack.c.h.bf16 %v371_v2 }
  0x47   : > { %v439_v5 = vunpack.c.l.bf16 %v421_v1  ;;  %v440_v6 = vunpack.c.h.bf16 %v421_v1  ;;  %v435_v12 = vunpack.c.l.bf16 %v419_v7  ;;  %v436_v13 = vunpack.c.h.bf16 %v419_v7  ;;  %v372_v14 = vld [vmem:[%s3714_s20 + $0x8] sm:$0xff]  ;;  %v375_v38 = vld [vmem:[%s3714_s20 + $0x20] sm:$0xff]  ;;  %v378_v52 = vld [vmem:[%s3714_s20 + $0x38] sm:$0xff] }
  0x48   : > { %v393_v17 = vunpack.c.l.bf16 %v374_v8  ;;  %v394_v18 = vunpack.c.h.bf16 %v374_v8  ;;  %v441_v21 = vunpack.c.l.bf16 %v422_v9  ;;  %v442_v22 = vunpack.c.h.bf16 %v422_v9  ;;  %v420_v23 = vld [vmem:[%s3696_s30 + $0x8] sm:$0xff]  ;;  %v423_v43 = vld [vmem:[%s3696_s30 + $0x20] sm:$0xff]  ;;  %v426_v61 = vld [vmem:[%s3696_s30 + $0x38] sm:$0xff] }
  0x49   : > { %v3733_v15 = vadd.f32 %v439_v5, %v391_v3  ;;  %v3735_v16 = vadd.f32 %v440_v6, %v392_v4  ;;  %v3737_v19 = vadd.f32 %v435_v12, %v387_v10  ;;  %v3739_v20 = vadd.f32 %v436_v13, %v388_v11  ;;  %v376_v28 = vld [vmem:[%s3714_s20 + $0x28] sm:$0xff]  ;;  %v377_v2 = vld [vmem:[%s3714_s20 + $0x30] sm:$0xff] }
  0x4a   : > { %v389_v27 = vunpack.c.l.bf16 %v372_v14  ;;  %v3755_v32 = vadd.f32 %v441_v21, %v393_v17  ;;  %v3758_v34 = vadd.f32 %v442_v22, %v394_v18  ;;  %v390_v35 = vunpack.c.h.bf16 %v372_v14  ;;  %v424_v37 = vld [vmem:[%s3696_s30 + $0x28] sm:$0xff]  ;;  %v425_v3 = vld [vmem:[%s3696_s30 + $0x30] sm:$0xff] }
  0x4b   : > { %v615_v24 = vmul.f32 %v3733_v15, %v3733_v15  ;;  %v616_v25 = vmul.f32 %v3735_v16, %v3735_v16  ;;  %v2907_v26 = vpack.c.bf16 %v3735_v16, %v3733_v15  ;;  %v611_v29 = vmul.f32 %v3737_v19, %v3737_v19  ;;  %v380_v12 = vld [vmem:[%s3714_s20 + $0x48] sm:$0xff] }
  0x4c   : > { %v612_v30 = vmul.f32 %v3739_v20, %v3739_v20  ;;  %v2905_v31 = vpack.c.bf16 %v3739_v20, %v3737_v19  ;;  %v437_v36 = vunpack.c.l.bf16 %v420_v23  ;;  %v617_v40 = vmul.f32 %v3755_v32, %v3755_v32 }
  0x4d   : > { %v649_v33 = vadd.f32 %v616_v25, %v615_v24  ;;  %597 = vst [vmem:[%s3723_s7 + $0x10] sm:$0xff] %v2907_v26  ;;  %v438_v41 = vunpack.c.h.bf16 %v420_v23  ;;  %v397_v42 = vunpack.c.l.bf16 %v376_v28  ;;  %v2908_v44 = vpack.c.bf16 %v3758_v34, %v3755_v32  ;;  %v428_v25 = vld [vmem:[%s3696_s30 + $0x48] sm:$0xff] }
  0x4e   : > { %v643_v39 = vadd.f32 %v612_v30, %v611_v29  ;;  %595 = vst [vmem:[%s3723_s7] sm:$0xff] %v2905_v31  ;;  %v618_v45 = vmul.f32 %v3758_v34, %v3758_v34  ;;  %v3770_v46 = vadd.f32 %v437_v36, %v389_v27  ;;  %v398_v47 = vunpack.c.h.bf16 %v376_v28  ;;  %v379_v30 = vld [vmem:[%s3714_s20 + $0x40] sm:$0xff] }
  0x4f   : > { %650 = vadd.xlane.f32.xlu1 %v649_v33  ;;  %v3772_v48 = vadd.f32 %v438_v41, %v390_v35  ;;  %v445_v49 = vunpack.c.l.bf16 %v424_v37  ;;  %v446_v50 = vunpack.c.h.bf16 %v424_v37  ;;  %v395_v51 = vunpack.c.l.bf16 %v375_v38  ;;  %598 = vst [vmem:[%s3723_s7 + $0x18] sm:$0xff] %v2908_v44  ;;  %v427_v31 = vld [vmem:[%s3696_s30 + $0x40] sm:$0xff] }
  0x50   : > { %644 = vadd.xlane.f32.xlu0 %v643_v39  ;;  %v652_v53 = vadd.f32 %v618_v45, %v617_v40  ;;  %v613_v54 = vmul.f32 %v3770_v46, %v3770_v46  ;;  %v396_v55 = vunpack.c.h.bf16 %v375_v38  ;;  %v443_v56 = vunpack.c.l.bf16 %v423_v43 }
  0x51   : > { %v2906_v57 = vpack.c.bf16 %v3772_v48, %v3770_v46  ;;  %v614_v58 = vmul.f32 %v3772_v48, %v3772_v48  ;;  %v3782_v59 = vadd.f32 %v445_v49, %v397_v42  ;;  %v3784_v60 = vadd.f32 %v446_v50, %v398_v47  ;;  %v382_v42 = vld [vmem:[%s3714_s20 + $0x58] sm:$0xff] }
  0x52   : > { %v444_v62 = vunpack.c.h.bf16 %v423_v43  ;;  %v3787_v63 = vadd.f32 %v443_v56, %v395_v51  ;;  %v401_v0 = vunpack.c.l.bf16 %v378_v52  ;;  %v402_v1 = vunpack.c.h.bf16 %v378_v52 }
  0x53   : > { %653 = vadd.xlane.f32.xlu1 %v652_v53  ;;  %596 = vst [vmem:[%s3723_s7 + $0x8] sm:$0xff] %v2906_v57  ;;  %v646_v4 = vadd.f32 %v614_v58, %v613_v54  ;;  %v2910_v5 = vpack.c.bf16 %v3784_v60, %v3782_v59  ;;  %v621_v6 = vmul.f32 %v3782_v59, %v3782_v59  ;;  %v449_v10 = vunpack.c.l.bf16 %v426_v61  ;;  %v430_v53 = vld [vmem:[%s3696_s30 + $0x58] sm:$0xff]  ;;  %v381_v58 = vld [vmem:[%s3714_s20 + $0x50] sm:$0xff] }
  0x54   : > { %v622_v7 = vmul.f32 %v3784_v60, %v3784_v60  ;;  %v3798_v8 = vadd.f32 %v444_v62, %v396_v55  ;;  %v619_v9 = vmul.f32 %v3787_v63, %v3787_v63  ;;  %v450_v11 = vunpack.c.h.bf16 %v426_v61  ;;  %v429_v61 = vld [vmem:[%s3696_s30 + $0x50] sm:$0xff] }
  0x55   : > { %647 = vadd.xlane.f32.xlu0 %v646_v4  ;;  %600 = vst [vmem:[%s3723_s7 + $0x28] sm:$0xff] %v2910_v5  ;;  %v399_v14 = vunpack.c.l.bf16 %v377_v2  ;;  %v400_v17 = vunpack.c.h.bf16 %v377_v2  ;;  %v447_v18 = vunpack.c.l.bf16 %v425_v3  ;;  %v3808_v23 = vadd.f32 %v449_v10, %v401_v0 }
  0x56   : > { %v658_v13 = vadd.f32 %v622_v7, %v621_v6  ;;  %v2909_v21 = vpack.c.bf16 %v3798_v8, %v3787_v63  ;;  %v620_v22 = vmul.f32 %v3798_v8, %v3798_v8  ;;  %v3810_v24 = vadd.f32 %v450_v11, %v402_v1  ;;  %v384_v7 = vld [vmem:[%s3714_s20 + $0x68] sm:$0xff] }
  0x57   : > { %v448_v26 = vunpack.c.h.bf16 %v425_v3  ;;  %v3813_v27 = vadd.f32 %v447_v18, %v399_v14  ;;  %v405_v28 = vunpack.c.l.bf16 %v380_v12  ;;  %v406_v29 = vunpack.c.h.bf16 %v380_v12 }
  0x58   : > { %659 = vadd.xlane.f32.xlu1 %v658_v13  ;;  %599 = vst [vmem:[%s3723_s7 + $0x20] sm:$0xff] %v2909_v21  ;;  %v655_v33 = vadd.f32 %v620_v22, %v619_v9  ;;  %v2912_v35 = vpack.c.bf16 %v3810_v24, %v3808_v23  ;;  %v625_v36 = vmul.f32 %v3808_v23, %v3808_v23  ;;  %v453_v40 = vunpack.c.l.bf16 %v428_v25  ;;  %v432_v21 = vld [vmem:[%s3696_s30 + $0x68] sm:$0xff] }
  0x59   : > { %v626_v37 = vmul.f32 %v3810_v24, %v3810_v24  ;;  %v3824_v38 = vadd.f32 %v448_v26, %v400_v17  ;;  %v623_v39 = vmul.f32 %v3813_v27, %v3813_v27  ;;  %v454_v41 = vunpack.c.h.bf16 %v428_v25 }
  0x5a   : > { %656 = vadd.xlane.f32.xlu0 %v655_v33  ;;  %602 = vst [vmem:[%s3723_s7 + $0x38] sm:$0xff] %v2912_v35  ;;  %v403_v44 = vunpack.c.l.bf16 %v379_v30  ;;  %v404_v45 = vunpack.c.h.bf16 %v379_v30  ;;  %v451_v47 = vunpack.c.l.bf16 %v427_v31  ;;  %v3834_v51 = vadd.f32 %v453_v40, %v405_v28  ;;  %v431_v30 = vld [vmem:[%s3696_s30 + $0x60] sm:$0xff] }
  0x5b   : > { %v664_v43 = vadd.f32 %v626_v37, %v625_v36  ;;  %v2911_v49 = vpack.c.bf16 %v3824_v38, %v3813_v27  ;;  %v624_v50 = vmul.f32 %v3824_v38, %v3824_v38  ;;  %v3836_v52 = vadd.f32 %v454_v41, %v406_v29  ;;  %v383_v29 = vld [vmem:[%s3714_s20 + $0x60] sm:$0xff] }
  0x5c   : > { %v452_v54 = vunpack.c.h.bf16 %v427_v31  ;;  %v3839_v55 = vadd.f32 %v451_v47, %v403_v44  ;;  %v409_v56 = vunpack.c.l.bf16 %v382_v42  ;;  %v410_v57 = vunpack.c.h.bf16 %v382_v42  ;;  %v386_v42 = vld [vmem:[%s3714_s20 + $0x78] sm:$0xff] }
  0x5d   : > { %665 = vadd.xlane.f32.xlu1 %v664_v43  ;;  %601 = vst [vmem:[%s3723_s7 + $0x30] sm:$0xff] %v2911_v49  ;;  %v661_v62 = vadd.f32 %v624_v50, %v623_v39  ;;  %v2914_v0 = vpack.c.bf16 %v3836_v52, %v3834_v51  ;;  %v629_v1 = vmul.f32 %v3834_v51, %v3834_v51  ;;  %v457_v5 = vunpack.c.l.bf16 %v430_v53 }
  0x5e   : > { %v630_v2 = vmul.f32 %v3836_v52, %v3836_v52  ;;  %v3850_v3 = vadd.f32 %v452_v54, %v404_v45  ;;  %v627_v4 = vmul.f32 %v3839_v55, %v3839_v55  ;;  %v458_v6 = vunpack.c.h.bf16 %v430_v53 }
  0x5f   : > { %662 = vadd.xlane.f32.xlu0 %v661_v62  ;;  %604 = vst [vmem:[%s3723_s7 + $0x48] sm:$0xff] %v2914_v0  ;;  %v407_v10 = vunpack.c.l.bf16 %v381_v58  ;;  %v408_v11 = vunpack.c.h.bf16 %v381_v58  ;;  %v455_v12 = vunpack.c.l.bf16 %v429_v61  ;;  %v3860_v17 = vadd.f32 %v457_v5, %v409_v56  ;;  %v434_v56 = vld [vmem:[%s3696_s30 + $0x78] sm:$0xff]  ;;  %v385_v0 = vld [vmem:[%s3714_s20 + $0x70] sm:$0xff] }
  0x60   : > { %v670_v9 = vadd.f32 %v630_v2, %v629_v1  ;;  %v2913_v13 = vpack.c.bf16 %v3850_v3, %v3839_v55  ;;  %v628_v14 = vmul.f32 %v3850_v3, %v3850_v3  ;;  %v3862_v18 = vadd.f32 %v458_v6, %v410_v57  ;;  %v433_v1 = vld [vmem:[%s3696_s30 + $0x70] sm:$0xff] }
  0x61   : > { %v456_v22 = vunpack.c.h.bf16 %v429_v61  ;;  %v3865_v25 = vadd.f32 %v455_v12, %v407_v10  ;;  %v413_v26 = vunpack.c.l.bf16 %v384_v7  ;;  %v414_v28 = vunpack.c.h.bf16 %v384_v7 }
  0x62   : > { %671 = vadd.xlane.f32.xlu1 %v670_v9  ;;  %603 = vst [vmem:[%s3723_s7 + $0x40] sm:$0xff] %v2913_v13  ;;  %v667_v31 = vadd.f32 %v628_v14, %v627_v4  ;;  %v2916_v33 = vpack.c.bf16 %v3862_v18, %v3860_v17  ;;  %v633_v35 = vmul.f32 %v3860_v17, %v3860_v17  ;;  %v461_v40 = vunpack.c.l.bf16 %v432_v21 }
  0x63   : > { %v634_v36 = vmul.f32 %v3862_v18, %v3862_v18  ;;  %v3876_v37 = vadd.f32 %v456_v22, %v408_v11  ;;  %v631_v39 = vmul.f32 %v3865_v25, %v3865_v25  ;;  %v462_v41 = vunpack.c.h.bf16 %v432_v21 }
  0x64   : > { %668 = vadd.xlane.f32.xlu0 %v667_v31  ;;  %606 = vst [vmem:[%s3723_s7 + $0x58] sm:$0xff] %v2916_v33  ;;  %v411_v44 = vunpack.c.l.bf16 %v383_v29  ;;  %v412_v45 = vunpack.c.h.bf16 %v383_v29  ;;  %v459_v47 = vunpack.c.l.bf16 %v431_v30  ;;  %v3886_v53 = vadd.f32 %v461_v40, %v413_v26 }
  0x65   : > { %v676_v43 = vadd.f32 %v634_v36, %v633_v35  ;;  %v2915_v49 = vpack.c.bf16 %v3876_v37, %v3865_v25  ;;  %v632_v50 = vmul.f32 %v3876_v37, %v3876_v37  ;;  %v3888_v54 = vadd.f32 %v462_v41, %v414_v28 }
  0x66   : > { %v460_v57 = vunpack.c.h.bf16 %v431_v30  ;;  %v3891_v58 = vadd.f32 %v459_v47, %v411_v44  ;;  %v417_v61 = vunpack.c.l.bf16 %v386_v42  ;;  %v418_v62 = vunpack.c.h.bf16 %v386_v42 }
  0x67   : > { %677 = vadd.xlane.f32.xlu1 %v676_v43  ;;  %605 = vst [vmem:[%s3723_s7 + $0x50] sm:$0xff] %v2915_v49  ;;  %v673_v2 = vadd.f32 %v632_v50, %v631_v39  ;;  %v2918_v4 = vpack.c.bf16 %v3888_v54, %v3886_v53  ;;  %v637_v5 = vmul.f32 %v3886_v53, %v3886_v53  ;;  %v465_v10 = vunpack.c.l.bf16 %v434_v56 }
  0x68   : > { %v638_v6 = vmul.f32 %v3888_v54, %v3888_v54  ;;  %v3902_v7 = vadd.f32 %v460_v57, %v412_v45  ;;  %v635_v9 = vmul.f32 %v3891_v58, %v3891_v58  ;;  %v466_v11 = vunpack.c.h.bf16 %v434_v56 }
  0x69   : > { %674 = vadd.xlane.f32.xlu0 %v673_v2  ;;  %608 = vst [vmem:[%s3723_s7 + $0x68] sm:$0xff] %v2918_v4  ;;  %v415_v13 = vunpack.c.l.bf16 %v385_v0  ;;  %v416_v14 = vunpack.c.h.bf16 %v385_v0  ;;  %v463_v21 = vunpack.c.l.bf16 %v433_v1  ;;  %v3911_v28 = vadd.f32 %v465_v10, %v417_v61 }
  0x6a   : > { %v682_v12 = vadd.f32 %v638_v6, %v637_v5  ;;  %v2917_v22 = vpack.c.bf16 %v3902_v7, %v3891_v58  ;;  %v636_v26 = vmul.f32 %v3902_v7, %v3902_v7  ;;  %v3913_v29 = vadd.f32 %v466_v11, %v418_v62 }
  0x6b   : > { %v464_v30 = vunpack.c.h.bf16 %v433_v1  ;;  %v3915_v31 = vadd.f32 %v463_v21, %v415_v13  ;;  %v641_v36 = vmul.f32 %v3911_v28, %v3911_v28  ;;  %v3555_v47 = vmov 0.0  }
  0x6c   : > { %683 = vadd.xlane.f32.xlu1 %v682_v12  ;;  %607 = vst [vmem:[%s3723_s7 + $0x60] sm:$0xff] %v2917_v22  ;;  %v679_v33 = vadd.f32 %v636_v26, %v635_v9  ;;  %v2920_v35 = vpack.c.bf16 %v3913_v29, %v3911_v28  ;;  %v642_v39 = vmul.f32 %v3913_v29, %v3913_v29  ;;  %928 = vst [vmem:[#allocation3 + $0xa8] sm:$0xff] %v3555_v47  ;;  %v774_v1 = vlaneseq }
  0x6d   : > { %v3924_v40 = vadd.f32 %v464_v30, %v416_v14  ;;  %v639_v41 = vmul.f32 %v3915_v31, %v3915_v31  ;;  %929 = vst [vmem:[#allocation3 + $0x68] sm:$0xff] %v3555_v47  ;;  %930 = vst [vmem:[#allocation3 + $0x10] sm:$0xff] %v3555_v47  ;;  %v772_v30 = vld [vmem:[%s4422_s2] sm:$0x3] }
  0x6e   : > { %680 = vadd.xlane.f32.xlu0 %v679_v33  ;;  %610 = vst [vmem:[%s3723_s7 + $0x78] sm:$0xff] %v2920_v35  ;;  %v688_v42 = vadd.f32 %v642_v39, %v641_v36  ;;  %931 = vst [vmem:[#allocation3 + $0xc0] sm:$0xff] %v3555_v47  ;;  %v775_v9 = vshrl.u32 %v774_v1, 7 }
  0x6f   : > { %v2919_v43 = vpack.c.bf16 %v3924_v40, %v3915_v31  ;;  %v640_v44 = vmul.f32 %v3924_v40, %v3924_v40  ;;  %932 = vst [vmem:[#allocation3 + $0xc8] sm:$0xff] %v3555_v47  ;;  %933 = vst [vmem:[#allocation3 + $0xb0] sm:$0xff] %v3555_v47 }
  0x70   : > { %689 = vadd.xlane.f32.xlu1 %v688_v42  ;;  %934 = vst [vmem:[#allocation3 + $0x70] sm:$0xff] %v3555_v47  ;;  %935 = vst [vmem:[#allocation3 + $0x38] sm:$0xff] %v3555_v47  ;;  %v776_v21 = vsub.s32 0, %v775_v9  ;;  %v780_v22 = vsub.s32 1, %v775_v9 }
  0x71   : > { %609 = vst [vmem:[%s3723_s7 + $0x70] sm:$0xff] %v2919_v43  ;;  %v685_v45 = vadd.f32 %v640_v44, %v639_v41  ;;  %936 = vst [vmem:[#allocation3 + $0x48] sm:$0xff] %v3555_v47 }
  0x72   : > { %937 = vst [vmem:[#allocation3 + $0xf8] sm:$0xff] %v3555_v47  ;;  %938 = vst [vmem:[#allocation3 + $0x78] sm:$0xff] %v3555_v47  ;;  %v3937_v39 = vrot.slane %v772_v30, %v776_v21  ;;  %v3939_v41 = vrot.slane %v772_v30, %v780_v22 }
  0x73   : > { %686 = vadd.xlane.f32.xlu0 %v685_v45  ;;  %939 = vst [vmem:[#allocation3 + $0x88] sm:$0xff] %v3555_v47  ;;  %940 = vst [vmem:[#allocation3 + $0xf0] sm:$0xff] %v3555_v47 }
  0x74   : > { %941 = vst [vmem:[#allocation3 + $0x18] sm:$0xff] %v3555_v47  ;;  %942 = vst [vmem:[#allocation3 + $0x30] sm:$0xff] %v3555_v47 }
  0x75   : > { %943 = vst [vmem:[#allocation3 + $0x50] sm:$0xff] %v3555_v47  ;;  %944 = vst [vmem:[#allocation3 + $0xb8] sm:$0xff] %v3555_v47 }
  0x76   : > { %945 = vst [vmem:[#allocation3 + $0xd0] sm:$0xff] %v3555_v47  ;;  %946 = vst [vmem:[#allocation3 + $0xd8] sm:$0xff] %v3555_v47 }
  0x77   : > { %947 = vst [vmem:[#allocation3 + $0x58] sm:$0xff] %v3555_v47  ;;  %948 = vst [vmem:[#allocation3 + $0x80] sm:$0xff] %v3555_v47 }
  0x78   : > { %949 = vst [vmem:[#allocation3 + $0x40] sm:$0xff] %v3555_v47  ;;  %950 = vst [vmem:[#allocation3 + $0x28] sm:$0xff] %v3555_v47 }
  0x79   : > { %951 = vst [vmem:[#allocation3] sm:$0xff] %v3555_v47  ;;  %952 = vst [vmem:[#allocation3 + $0x90] sm:$0xff] %v3555_v47 }
  0x7a   : > { %953 = vst [vmem:[#allocation3 + $0xe8] sm:$0xff] %v3555_v47  ;;  %954 = vst [vmem:[#allocation3 + $0xa0] sm:$0xff] %v3555_v47 }
  0x7b   : > { %955 = vst [vmem:[#allocation3 + $0x20] sm:$0xff] %v3555_v47  ;;  %956 = vst [vmem:[#allocation3 + $0x8] sm:$0xff] %v3555_v47 }
  0x7c   : > { %957 = vst [vmem:[#allocation3 + $0xe0] sm:$0xff] %v3555_v47  ;;  %958 = vst [vmem:[#allocation3 + $0x60] sm:$0xff] %v3555_v47 }
  0x7d   : > { %959 = vst [vmem:[#allocation3 + $0x98] sm:$0xff] %v3555_v47 }
  0xd8   : > { %v651_v49 = vpop.xlane.xlu1 %650 }
  0xd9   : > { %v694_v50 = vmul.f32 0.00390625, %v651_v49  ;;  %v645_v56 = vpop.xlane.xlu0 %644 }
  0xda   : > { %v692_v57 = vmul.f32 0.00390625, %v645_v56 }
  0xdb   : > { %v710_v61 = vadd.f32 1e-06, %v694_v50 }
  0xdc   : > { %v708_v62 = vadd.f32 1e-06, %v692_v57  ;;  %v654_v0 = vpop.xlane.xlu1 %653 }
  0xdd   : > { %3077 = vrsqrt.f32 %v710_v61  ;;  %v695_v2 = vmul.f32 0.00390625, %v654_v0 }
  0xde   : > { %3079 = vrsqrt.f32 %v708_v62  ;;  %v648_v5 = vpop.xlane.xlu0 %647 }
  0xdf   : > { %v711_v4 = vadd.f32 1e-06, %v695_v2  ;;  %v693_v6 = vmul.f32 0.00390625, %v648_v5 }
  0xe1   : > { %3081 = vrsqrt.f32 %v711_v4  ;;  %v660_v10 = vpop.xlane.xlu1 %659  ;;  %v709_v11 = vadd.f32 1e-06, %v693_v6 }
  0xe2   : > { %v697_v12 = vmul.f32 0.00390625, %v660_v10 }
  0xe3   : > { %3083 = vrsqrt.f32 %v709_v11  ;;  %v657_v14 = vpop.xlane.xlu0 %656 }
  0xe4   : > { %v713_v13 = vadd.f32 1e-06, %v697_v12  ;;  %v696_v26 = vmul.f32 0.00390625, %v657_v14 }
  0xe6   : > { %3085 = vrsqrt.f32 %v713_v13  ;;  %v666_v33 = vpop.xlane.xlu1 %665  ;;  %v712_v35 = vadd.f32 1e-06, %v696_v26 }
  0xe7   : > { %v699_v36 = vmul.f32 0.00390625, %v666_v33 }
  0xe8   : > { %3087 = vrsqrt.f32 %v712_v35  ;;  %v663_v43 = vpop.xlane.xlu0 %662 }
  0xe9   : > { %v715_v42 = vadd.f32 1e-06, %v699_v36  ;;  %v698_v45 = vmul.f32 0.00390625, %v663_v43 }
  0xea   : > { %v3078_v44 = vpop.eup %3077 }
  0xeb   : > { %v3080_v47 = vpop.eup %3079  ;;  %v744_v49 = vmul.f32 %v3078_v44, %v3733_v15  ;;  %v745_v50 = vmul.f32 %v3078_v44, %v3735_v16  ;;  %3089 = vrsqrt.f32 %v715_v42  ;;  %v672_v56 = vpop.xlane.xlu1 %671  ;;  %v714_v62 = vadd.f32 1e-06, %v698_v45 }
  0xec   : > { %v740_v57 = vmul.f32 %v3080_v47, %v3737_v19  ;;  %v741_v61 = vmul.f32 %v3080_v47, %v3739_v20  ;;  %v701_v0 = vmul.f32 0.00390625, %v672_v56 }
  0xed   : > { %v788_v1 = vmul.f32 %v3937_v39, %v744_v49  ;;  %v789_v2 = vmul.f32 %v3939_v41, %v745_v50  ;;  %3091 = vrsqrt.f32 %v714_v62  ;;  %v669_v16 = vpop.xlane.xlu0 %668 }
  0xee   : > { %v3082_v4 = vpop.eup %3081  ;;  %v784_v5 = vmul.f32 %v3937_v39, %v740_v57  ;;  %v785_v6 = vmul.f32 %v3939_v41, %v741_v61  ;;  %v717_v15 = vadd.f32 1e-06, %v701_v0  ;;  %v700_v20 = vmul.f32 0.00390625, %v669_v16 }
  0xef   : > { %v2923_v9 = vpack.c.bf16 %v789_v2, %v788_v1  ;;  %v746_v10 = vmul.f32 %v3082_v4, %v3755_v32  ;;  %v747_v19 = vmul.f32 %v3082_v4, %v3758_v34 }
  0xf0   : > { %v2921_v11 = vpack.c.bf16 %v785_v6, %v784_v5  ;;  %3093 = vrsqrt.f32 %v717_v15  ;;  %v678_v12 = vpop.xlane.xlu1 %677  ;;  %v3084_v13 = vpop.eup %3083  ;;  %v716_v22 = vadd.f32 1e-06, %v700_v20 }
  0xf1   : > { %914 = vst [vmem:[#allocation2 + $0x58] sm:$0xff] %v2923_v9  ;;  %v790_v14 = vmul.f32 %v3937_v39, %v746_v10  ;;  %v791_v21 = vmul.f32 %v3939_v41, %v747_v19  ;;  %v703_v26 = vmul.f32 0.00390625, %v678_v12  ;;  %v742_v30 = vmul.f32 %v3084_v13, %v3770_v46 }
  0xf2   : > { %912 = vst [vmem:[#allocation2 + $0x30] sm:$0xff] %v2921_v11  ;;  %v743_v33 = vmul.f32 %v3084_v13, %v3772_v48  ;;  %3095 = vrsqrt.f32 %v716_v22  ;;  %v675_v36 = vpop.xlane.xlu0 %674 }
  0xf3   : > { %v3086_v32 = vpop.eup %3085  ;;  %v2924_v35 = vpack.c.bf16 %v791_v21, %v790_v14  ;;  %v719_v34 = vadd.f32 1e-06, %v703_v26  ;;  %v786_v42 = vmul.f32 %v3937_v39, %v742_v30  ;;  %v702_v47 = vmul.f32 0.00390625, %v675_v36 }
  0xf4   : > { %v787_v43 = vmul.f32 %v3939_v41, %v743_v33  ;;  %v750_v44 = vmul.f32 %v3086_v32, %v3782_v59  ;;  %v751_v45 = vmul.f32 %v3086_v32, %v3784_v60 }
  0xf5   : > { %915 = vst [vmem:[#allocation2 + $0x18] sm:$0xff] %v2924_v35  ;;  %3097 = vrsqrt.f32 %v719_v34  ;;  %v684_v49 = vpop.xlane.xlu1 %683  ;;  %v3088_v46 = vpop.eup %3087  ;;  %v718_v0 = vadd.f32 1e-06, %v702_v47 }
  0xf6   : > { %v2922_v50 = vpack.c.bf16 %v787_v43, %v786_v42  ;;  %v794_v48 = vmul.f32 %v3937_v39, %v750_v44  ;;  %v795_v56 = vmul.f32 %v3939_v41, %v751_v45  ;;  %v705_v57 = vmul.f32 0.00390625, %v684_v49 }
  0xf7   : > { %v748_v61 = vmul.f32 %v3088_v46, %v3787_v63  ;;  %v749_v62 = vmul.f32 %v3088_v46, %v3798_v8  ;;  %v681_v2 = vpop.xlane.xlu0 %680  ;;  %3099 = vrsqrt.f32 %v718_v0 }
  0xf8   : > { %v3090_v1 = vpop.eup %3089  ;;  %913 = vst [vmem:[#allocation2] sm:$0xff] %v2922_v50  ;;  %v2926_v59 = vpack.c.bf16 %v795_v56, %v794_v48  ;;  %v721_v60 = vadd.f32 1e-06, %v705_v57  ;;  %v704_v16 = vmul.f32 0.00390625, %v681_v2 }
  0xf9   : > { %v792_v4 = vmul.f32 %v3937_v39, %v748_v61  ;;  %v793_v5 = vmul.f32 %v3939_v41, %v749_v62  ;;  %v754_v6 = vmul.f32 %v3090_v1, %v3808_v23  ;;  %v755_v15 = vmul.f32 %v3090_v1, %v3810_v24  ;;  %v690_v63 = vpop.xlane.xlu1 %689 }
  0xfa   : > { %917 = vst [vmem:[#allocation2 + $0x68] sm:$0xff] %v2926_v59  ;;  %v3092_v9 = vpop.eup %3091  ;;  %3101 = vrsqrt.f32 %v721_v60  ;;  %v720_v12 = vadd.f32 1e-06, %v704_v16  ;;  %v707_v13 = vmul.f32 0.00390625, %v690_v63 }
  0xfb   : > { %v2925_v8 = vpack.c.bf16 %v793_v5, %v792_v4  ;;  %v798_v10 = vmul.f32 %v3937_v39, %v754_v6  ;;  %v799_v19 = vmul.f32 %v3939_v41, %v755_v15  ;;  %v752_v20 = vmul.f32 %v3092_v9, %v3813_v27 }
  0xfc   : > { %v753_v11 = vmul.f32 %v3092_v9, %v3824_v38  ;;  %v687_v14 = vpop.xlane.xlu0 %686  ;;  %3103 = vrsqrt.f32 %v720_v12  ;;  %v723_v33 = vadd.f32 1e-06, %v707_v13 }
  0xfd   : > { %v3094_v23 = vpop.eup %3093  ;;  %916 = vst [vmem:[#allocation2 + $0x50] sm:$0xff] %v2925_v8  ;;  %v2928_v24 = vpack.c.bf16 %v799_v19, %v798_v10  ;;  %v796_v21 = vmul.f32 %v3937_v39, %v752_v20  ;;  %v706_v27 = vmul.f32 0.00390625, %v687_v14 }
  0xfe   : > { %v797_v22 = vmul.f32 %v3939_v41, %v753_v11  ;;  %v758_v26 = vmul.f32 %v3094_v23, %v3834_v51  ;;  %v759_v30 = vmul.f32 %v3094_v23, %v3836_v52  ;;  %3105 = vrsqrt.f32 %v723_v33 }
  0xff   : > { %919 = vst [vmem:[#allocation2 + $0x48] sm:$0xff] %v2928_v24  ;;  %v3096_v32 = vpop.eup %3095  ;;  %v722_v43 = vadd.f32 1e-06, %v706_v27 }
 0x100   : > { %v2927_v38 = vpack.c.bf16 %v797_v22, %v796_v21  ;;  %v802_v35 = vmul.f32 %v3937_v39, %v758_v26  ;;  %v803_v34 = vmul.f32 %v3939_v41, %v759_v30  ;;  %v756_v36 = vmul.f32 %v3096_v32, %v3839_v55 }
 0x101   : > { %v757_v42 = vmul.f32 %v3096_v32, %v3850_v3  ;;  %3107 = vrsqrt.f32 %v722_v43 }
 0x102   : > { %v3098_v44 = vpop.eup %3097  ;;  %918 = vst [vmem:[#allocation2 + $0x8] sm:$0xff] %v2927_v38  ;;  %v2930_v51 = vpack.c.bf16 %v803_v34, %v802_v35  ;;  %v800_v52 = vmul.f32 %v3937_v39, %v756_v36 }
 0x103   : > { %v801_v45 = vmul.f32 %v3939_v41, %v757_v42  ;;  %v762_v47 = vmul.f32 %v3098_v44, %v3860_v17  ;;  %v763_v49 = vmul.f32 %v3098_v44, %v3862_v18 }
 0x104   : > { %921 = vst [vmem:[#allocation2 + $0x20] sm:$0xff] %v2930_v51  ;;  %v3100_v50 = vpop.eup %3099 }
 0x105   : > { %v2929_v46 = vpack.c.bf16 %v801_v45, %v800_v52  ;;  %v806_v55 = vmul.f32 %v3937_v39, %v762_v47  ;;  %v807_v3 = vmul.f32 %v3939_v41, %v763_v49  ;;  %v760_v57 = vmul.f32 %v3100_v50, %v3865_v25 }
 0x106   : > { %v761_v61 = vmul.f32 %v3100_v50, %v3876_v37 }
 0x107   : > { %920 = vst [vmem:[#allocation2 + $0x40] sm:$0xff] %v2929_v46  ;;  %v2932_v48 = vpack.c.bf16 %v807_v3, %v806_v55  ;;  %v3102_v56 = vpop.eup %3101  ;;  %v804_v62 = vmul.f32 %v3937_v39, %v760_v57 }
 0x108   : > { %v766_v17 = vmul.f32 %v3102_v56, %v3886_v53  ;;  %v767_v18 = vmul.f32 %v3102_v56, %v3888_v54  ;;  %v805_v0 = vmul.f32 %v3939_v41, %v761_v61 }
 0x109   : > { %923 = vst [vmem:[#allocation2 + $0x38] sm:$0xff] %v2932_v48  ;;  %v3104_v60 = vpop.eup %3103 }
 0x10a   : > { %v810_v1 = vmul.f32 %v3937_v39, %v766_v17  ;;  %v811_v59 = vmul.f32 %v3939_v41, %v767_v18  ;;  %v2931_v2 = vpack.c.bf16 %v805_v0, %v804_v62  ;;  %v764_v25 = vmul.f32 %v3104_v60, %v3891_v58 }
 0x10b   : > { %v765_v37 = vmul.f32 %v3104_v60, %v3902_v7  ;;  %v3106_v5 = vpop.eup %3105 }
 0x10c   : > { %v2934_v4 = vpack.c.bf16 %v811_v59, %v810_v1  ;;  %922 = vst [vmem:[#allocation2 + $0x10] sm:$0xff] %v2931_v2  ;;  %v808_v53 = vmul.f32 %v3937_v39, %v764_v25  ;;  %v770_v6 = vmul.f32 %v3106_v5, %v3911_v28  ;;  %v771_v15 = vmul.f32 %v3106_v5, %v3913_v29 }
 0x10d   : > { %v809_v54 = vmul.f32 %v3939_v41, %v765_v37 }
 0x10e   : > { %925 = vst [vmem:[#allocation2 + $0x70] sm:$0xff] %v2934_v4  ;;  %v3108_v16 = vpop.eup %3107  ;;  %v814_v9 = vmul.f32 %v3937_v39, %v770_v6  ;;  %v815_v8 = vmul.f32 %v3939_v41, %v771_v15 }
 0x10f   : > { %v2933_v63 = vpack.c.bf16 %v809_v54, %v808_v53  ;;  %v768_v58 = vmul.f32 %v3108_v16, %v3915_v31  ;;  %v769_v7 = vmul.f32 %v3108_v16, %v3924_v40 }
 0x110   : > { %v2936_v10 = vpack.c.bf16 %v815_v8, %v814_v9 }
 0x111   : > { %924 = vst [vmem:[#allocation2 + $0x60] sm:$0xff] %v2933_v63  ;;  %v812_v19 = vmul.f32 %v3937_v39, %v768_v58  ;;  %v813_v20 = vmul.f32 %v3939_v41, %v769_v7 }
 0x112   : > { %927 = vst [vmem:[#allocation2 + $0x28] sm:$0xff] %v2936_v10 }
 0x113   : > { %v2935_v28 = vpack.c.bf16 %v813_v20, %v812_v19 }
 0x115   : > { %926 = vst [vmem:[#allocation2 + $0x78] sm:$0xff] %v2935_v28 }
 0x116 PF: > { %v3109_v29 = vld [vmem:[%s3709_s10 + $0xe4] ss:$16 sps:$4 sm:$0xff]   ;;  %v3111_v31 = vld [vmem:[%s3709_s10 + $0xe0] ss:$16 sps:$4 sm:$0xff]   ;;  %v3132_v23 = vld [vmem:[%s3709_s10 + $0xec] ss:$16 sps:$4 sm:$0xff]  }
 0x117   : > { %1440 = vmatprep.subr.bf16.mxu0 %v3109_v29  ;;  %v3112_v40 = vld [vmem:[%s3709_s10 + $0xc4] ss:$16 sps:$4 sm:$0xff]   ;;  %v3114_v39 = vld [vmem:[%s3709_s10 + $0xc0] ss:$16 sps:$4 sm:$0xff]   ;;  %v3135_v24 = vld [vmem:[%s3709_s10 + $0xe8] ss:$16 sps:$4 sm:$0xff]   ;;  %1553 = vmatprep.subr.bf16.mxu1 %v3132_v23 }
 0x118   : > { %1441 = vmatpush1.bf16.msra.mxu0 %v3111_v31  ;;  %v3115_v41 = vld [vmem:[%s3709_s10 + $0xa4] ss:$16 sps:$4 sm:$0xff]   ;;  %v3117_v11 = vld [vmem:[%s3709_s10 + $0xa0] ss:$16 sps:$4 sm:$0xff]   ;;  %v3138_v21 = vld [vmem:[%s3709_s10 + $0xcc] ss:$16 sps:$4 sm:$0xff]   ;;  %1554 = vmatpush1.bf16.msra.mxu1 %v3135_v24 }
 0x119   : > { %1442 = vmatprep.subr.bf16.mxu0 %v3112_v40  ;;  %v3118_v12 = vld [vmem:[%s3709_s10 + $0x84] ss:$16 sps:$4 sm:$0xff]   ;;  %v3120_v13 = vld [vmem:[%s3709_s10 + $0x80] ss:$16 sps:$4 sm:$0xff]   ;;  %v3141_v22 = vld [vmem:[%s3709_s10 + $0xc8] ss:$16 sps:$4 sm:$0xff]   ;;  %1555 = vmatprep.subr.bf16.mxu1 %v3138_v21 }
 0x11a   : > { %v3121_v14 = vld [vmem:[%s3709_s10 + $0x64] ss:$16 sps:$4 sm:$0xff]   ;;  %v3123_v26 = vld [vmem:[%s3709_s10 + $0x60] ss:$16 sps:$4 sm:$0xff]   ;;  %v3144_v33 = vld [vmem:[%s3709_s10 + $0xac] ss:$16 sps:$4 sm:$0xff]  }
 0x11b   : > { %v3124_v30 = vld [vmem:[%s3709_s10 + $0x44] ss:$16 sps:$4 sm:$0xff]   ;;  %v3147_v27 = vld [vmem:[%s3709_s10 + $0xa8] ss:$16 sps:$4 sm:$0xff]   ;;  %v3126_v32 = vld [vmem:[%s3709_s10 + $0x40] ss:$16 sps:$4 sm:$0xff]  }
 0x11c   : > { %1443 = vmatpush1.bf16.msra.mxu0 %v3114_v39  ;;  %1556 = vmatpush1.bf16.msra.mxu1 %v3141_v22  ;;  %v3150_v38 = vld [vmem:[%s3709_s10 + $0x8c] ss:$16 sps:$4 sm:$0xff]   ;;  %v3127_v35 = vld [vmem:[%s3709_s10 + $0x24] ss:$16 sps:$4 sm:$0xff]   ;;  %v3129_v34 = vld [vmem:[%s3709_s10 + $0x20] ss:$16 sps:$4 sm:$0xff]  }
 0x11d   : > { %1444 = vmatprep.subr.bf16.mxu0 %v3115_v41  ;;  %1557 = vmatprep.subr.bf16.mxu1 %v3144_v33  ;;  %v3153_v36 = vld [vmem:[%s3709_s10 + $0x88] ss:$16 sps:$4 sm:$0xff]   ;;  %v3156_v42 = vld [vmem:[%s3709_s10 + $0x6c] ss:$16 sps:$4 sm:$0xff]   ;;  %v3130_v43 = vld [vmem:[%s3709_s10 + $0x4] ss:$16 sps:$4 sm:$0xff]  }
 0x11e   : > { %v3159_v44 = vld [vmem:[%s3709_s10 + $0x68] ss:$16 sps:$4 sm:$0xff]   ;;  %v3134_v51 = vld [vmem:[%s3709_s10] ss:$16 sps:$4 sm:$0xff]   ;;  %v3162_v52 = vld [vmem:[%s3709_s10 + $0x4c] ss:$16 sps:$4 sm:$0xff]  }
 0x11f   : > { %v3136_v45 = vld [vmem:[%s3709_s10 + $0x1e4] ss:$16 sps:$4 sm:$0xff]   ;;  %v3140_v47 = vld [vmem:[%s3709_s10 + $0x1e0] ss:$16 sps:$4 sm:$0xff]   ;;  %v3165_v49 = vld [vmem:[%s3709_s10 + $0x48] ss:$16 sps:$4 sm:$0xff]  }
 0x120   : > { %1445 = vmatpush1.bf16.msra.mxu0 %v3117_v11  ;;  %1558 = vmatpush1.bf16.msra.mxu1 %v3147_v27  ;;  %v3168_v46 = vld [vmem:[%s3709_s10 + $0x2c] ss:$16 sps:$4 sm:$0xff]   ;;  %v3142_v55 = vld [vmem:[%s3709_s10 + $0x1c4] ss:$16 sps:$4 sm:$0xff]   ;;  %v3171_v3 = vld [vmem:[%s3709_s10 + $0x28] ss:$16 sps:$4 sm:$0xff]  }
 0x121   : > { %1446 = vmatprep.subr.bf16.mxu0 %v3118_v12  ;;  %1559 = vmatprep.subr.bf16.mxu1 %v3150_v38  ;;  %v3186_v50 = vld [vmem:[#allocation2 + $0x34] ss:$-48 sps:$4 sm:$0xff]   ;;  %v3146_v48 = vld [vmem:[%s3709_s10 + $0x1c0] ss:$16 sps:$4 sm:$0xff]   ;;  %v3174_v56 = vld [vmem:[%s3709_s10 + $0xc] ss:$16 sps:$4 sm:$0xff]  }
 0x122   : > { %v3148_v57 = vld [vmem:[%s3709_s10 + $0x1a4] ss:$16 sps:$4 sm:$0xff]   ;;  %1472 = vmatprep.mubr.bf16.mxu0 %v3186_v50  ;;  %v3152_v61 = vld [vmem:[%s3709_s10 + $0x1a0] ss:$16 sps:$4 sm:$0xff]   ;;  %1585 = vmatprep.mubr.bf16.mxu1 %v3186_v50  ;;  %v3177_v17 = vld [vmem:[%s3709_s10 + $0x8] ss:$16 sps:$4 sm:$0xff]  }
 0x123   : > { %v3180_v18 = vld [vmem:[%s3709_s10 + $0x1ec] ss:$16 sps:$4 sm:$0xff]   ;;  %v3154_v62 = vld [vmem:[%s3709_s10 + $0x184] ss:$16 sps:$4 sm:$0xff]   ;;  %v3158_v0 = vld [vmem:[%s3709_s10 + $0x180] ss:$16 sps:$4 sm:$0xff]  }
 0x124   : > { %1447 = vmatpush1.bf16.msra.mxu0 %v3120_v13  ;;  %1560 = vmatpush1.bf16.msra.mxu1 %v3153_v36  ;;  %v3183_v1 = vld [vmem:[%s3709_s10 + $0x1e8] ss:$16 sps:$4 sm:$0xff]   ;;  %v3187_v59 = vld [vmem:[%s3709_s10 + $0x1cc] ss:$16 sps:$4 sm:$0xff]   ;;  %v3160_v60 = vld [vmem:[%s3709_s10 + $0x164] ss:$16 sps:$4 sm:$0xff]  }
 0x125   : > { %1448 = vmatprep.subr.bf16.mxu0 %v3121_v14  ;;  %1561 = vmatprep.subr.bf16.mxu1 %v3156_v42  ;;  %v3164_v2 = vld [vmem:[%s3709_s10 + $0x160] ss:$16 sps:$4 sm:$0xff]   ;;  %v3189_v4 = vld [vmem:[%s3709_s10 + $0x1c8] ss:$16 sps:$4 sm:$0xff]   ;;  %v3190_v25 = vld [vmem:[%s3709_s10 + $0x1ac] ss:$16 sps:$4 sm:$0xff]  }
 0x126   : > { %v3166_v37 = vld [vmem:[%s3709_s10 + $0x144] ss:$16 sps:$4 sm:$0xff]   ;;  %v3170_v5 = vld [vmem:[%s3709_s10 + $0x140] ss:$16 sps:$4 sm:$0xff]   ;;  %v3192_v53 = vld [vmem:[%s3709_s10 + $0x1a8] ss:$16 sps:$4 sm:$0xff]  }
 0x127   : > { %v3193_v54 = vld [vmem:[%s3709_s10 + $0x18c] ss:$16 sps:$4 sm:$0xff]   ;;  %v3172_v6 = vld [vmem:[%s3709_s10 + $0x124] ss:$16 sps:$4 sm:$0xff]   ;;  %v3176_v15 = vld [vmem:[%s3709_s10 + $0x120] ss:$16 sps:$4 sm:$0xff]  }
 0x128   : > { %1449 = vmatpush1.bf16.msra.mxu0 %v3123_v26  ;;  %1562 = vmatpush1.bf16.msra.mxu1 %v3159_v44  ;;  %v3195_v16 = vld [vmem:[%s3709_s10 + $0x188] ss:$16 sps:$4 sm:$0xff]   ;;  %v3196_v63 = vld [vmem:[%s3709_s10 + $0x16c] ss:$16 sps:$4 sm:$0xff]   ;;  %v3178_v9 = vld [vmem:[%s3709_s10 + $0x104] ss:$16 sps:$4 sm:$0xff]  }
 0x129   : > { %1450 = vmatprep.subr.bf16.mxu0 %v3124_v30  ;;  %1563 = vmatprep.subr.bf16.mxu1 %v3162_v52  ;;  %v3182_v8 = vld [vmem:[%s3709_s10 + $0x100] ss:$16 sps:$4 sm:$0xff]   ;;  %v3198_v58 = vld [vmem:[%s3709_s10 + $0x168] ss:$16 sps:$4 sm:$0xff]   ;;  %v3202_v7 = vld [vmem:[%s3709_s10 + $0x14c] ss:$16 sps:$4 sm:$0xff]  }
 0x12a   : > { %v962_v10 = vld [vmem:[#allocation2 + $0x58] sm:$0xff]  ;;  %v3184_v28 = vld [vmem:[#allocation2 + $0x30] ss:$-48 sps:$4 sm:$0xff]   ;;  %v3225_v41 = vld [vmem:[%s3719_s23 + $0x64] ss:$8 sps:$4 sm:$0xff]   ;;  %p2873_p5 = scmp.ne.s32.totalorder %s3534_s24, 1 }
 0x12b   : > { %v963_v19 = vld [vmem:[#allocation2 + $0x18] sm:$0xff]  ;;  %v3223_v13 = vld [vmem:[%s3719_s23 + $0x60] ss:$8 sps:$4 sm:$0xff]   ;;  %v3199_v21 = vld [vmem:[#allocation2 + $0x54] ss:$24 sps:$4 sm:$0xff]  }
 0x12c   : > { %1451 = vmatpush1.bf16.msra.mxu0 %v3126_v32  ;;  %1564 = vmatpush1.bf16.msra.mxu1 %v3165_v49  ;;  %v3222_v20 = vld [vmem:[%s3719_s23 + $0x74] ss:$8 sps:$4 sm:$0xff]   ;;  %v3204_v29 = vld [vmem:[%s3709_s10 + $0x148] ss:$16 sps:$4 sm:$0xff]   ;;  %v2732_v39 = vcombine.high %v962_v10, %v963_v19  ;;  %v2731_v24 = vcombine.low %v962_v10, %v963_v19  ;;  %v3231_v26 = vld [vmem:[%s3719_s23 + $0x44] ss:$8 sps:$4 sm:$0xff]  }
 0x12d   : > { %1452 = vmatprep.subr.bf16.mxu0 %v3127_v35  ;;  %1565 = vmatprep.subr.bf16.mxu1 %v3168_v46  ;;  %v3205_v31 = vld [vmem:[%s3709_s10 + $0x12c] ss:$16 sps:$4 sm:$0xff]   ;;  %v3220_v40 = vld [vmem:[%s3719_s23 + $0x70] ss:$8 sps:$4 sm:$0xff]   ;;  %v3229_v27 = vld [vmem:[%s3719_s23 + $0x40] ss:$8 sps:$4 sm:$0xff]  }
 0x12e   : > { %v3207_v11 = vld [vmem:[%s3709_s10 + $0x128] ss:$16 sps:$4 sm:$0xff]   ;;  %v3208_v12 = vld [vmem:[%s3709_s10 + $0x10c] ss:$16 sps:$4 sm:$0xff]   ;;  %v968_v36 = vld [vmem:[#allocation2 + $0x40] sm:$0xff] }
 0x12f   : > { %v3228_v23 = vld [vmem:[%s3719_s23 + $0x54] ss:$8 sps:$4 sm:$0xff]   ;;  %v3210_v14 = vld [vmem:[%s3709_s10 + $0x108] ss:$16 sps:$4 sm:$0xff]   ;;  %v969_v42 = vld [vmem:[#allocation2 + $0x20] sm:$0xff] }
 0x130   : > { %1453 = vmatpush1.bf16.msra.mxu0 %v3129_v34  ;;  %1566 = vmatpush1.bf16.msra.mxu1 %v3171_v3  ;;  %v3226_v22 = vld [vmem:[%s3719_s23 + $0x50] ss:$8 sps:$4 sm:$0xff]   ;;  %v966_v30 = vld [vmem:[#allocation2 + $0x8] sm:$0xff]  ;;  %v3234_v32 = vld [vmem:[%s3719_s23 + $0x34] ss:$8 sps:$4 sm:$0xff]   ;;  %v2738_v44 = vcombine.high %v968_v36, %v969_v42 }
 0x131   : > { %1454 = vmatprep.subr.bf16.mxu0 %v3130_v43  ;;  %1567 = vmatprep.subr.bf16.mxu1 %v3174_v56  ;;  %v967_v33 = vld [vmem:[#allocation2 + $0x48] sm:$0xff]  ;;  %v3232_v34 = vld [vmem:[%s3719_s23 + $0x30] ss:$8 sps:$4 sm:$0xff]   ;;  %v3211_v52 = vld [vmem:[#allocation2 + $0x14] ss:$40 sps:$4 sm:$0xff]  }
 0x132   : > { %v3201_v38 = vld [vmem:[#allocation2 + $0x50] ss:$24 sps:$4 sm:$0xff]   ;;  %v2736_v35 = vcombine.high %v966_v30, %v967_v33  ;;  %v2735_v43 = vcombine.low %v966_v30, %v967_v33  ;;  %v3217_v46 = vld [vmem:[#allocation2 + $0x7c] ss:$-80 sps:$4 sm:$0xff]  }
 0x133   : > { %v3216_v49 = vld [vmem:[#allocation2 + $0x60] ss:$16 sps:$4 sm:$0xff]   ;;  %v3237_v3 = vld [vmem:[%s3719_s23 + $0x24] ss:$8 sps:$4 sm:$0xff]  }
 0x134   : > { %1455 = vmatpush1.bf16.msra.mxu0 %v3134_v51  ;;  %1568 = vmatpush1.bf16.msra.mxu1 %v3177_v17  ;;  %v2737_v51 = vcombine.low %v968_v36, %v969_v42  ;;  %v3235_v50 = vld [vmem:[%s3719_s23 + $0x20] ss:$8 sps:$4 sm:$0xff]   ;;  %v3238_v56 = vld [vmem:[%s3719_s23 + $0x10] ss:$8 sps:$4 sm:$0xff]   ;;  %v3246_v17 = vld [vmem:[%s3719_s23 + $0xf4] ss:$8 sps:$4 sm:$0xff]  }
 0x135   : > { %1456 = vmatprep.subr.bf16.mxu0 %v3136_v45  ;;  %1569 = vmatprep.subr.bf16.mxu1 %v3180_v18  ;;  %v3213_v45 = vld [vmem:[#allocation2 + $0x10] ss:$40 sps:$4 sm:$0xff]  }
 0x136   : > { %v3244_v18 = vld [vmem:[%s3719_s23 + $0xf0] ss:$8 sps:$4 sm:$0xff]  }
 0x138   : > { %1457 = vmatpush2.bf16.msra.mxu0 %v3140_v47  ;;  %1570 = vmatpush2.bf16.msra.mxu1 %v3183_v1  ;;  %v3214_v47 = vld [vmem:[#allocation2 + $0x64] ss:$16 sps:$4 sm:$0xff]  }
 0x139   : > { %1458 = vmatprep.subr.bf16.mxu0 %v3142_v55  ;;  %1571 = vmatprep.subr.bf16.mxu1 %v3187_v59  ;;  %v3219_v55 = vld [vmem:[#allocation2 + $0x78] ss:$-80 sps:$4 sm:$0xff]   ;;  %v3252_v1 = vld [vmem:[%s3719_s23 + $0xd4] ss:$8 sps:$4 sm:$0xff]  }
 0x13a   : > { %v3250_v59 = vld [vmem:[%s3719_s23 + $0xd0] ss:$8 sps:$4 sm:$0xff]  }
 0x13c   : > { %1459 = vmatpush2.bf16.msra.mxu0 %v3146_v48  ;;  %1572 = vmatpush2.bf16.msra.mxu1 %v3189_v4  ;;  %v3240_v48 = vld [vmem:[%s3719_s23 + $0x14] ss:$8 sps:$4 sm:$0xff]  }
 0x13d   : > { %1460 = vmatprep.subr.bf16.mxu0 %v3148_v57  ;;  %1573 = vmatprep.subr.bf16.mxu1 %v3190_v25  ;;  %v3243_v57 = vld [vmem:[%s3719_s23 + $0x4] ss:$8 sps:$4 sm:$0xff]   ;;  %v3258_v4 = vld [vmem:[%s3719_s23 + $0xb4] ss:$8 sps:$4 sm:$0xff]   ;;  %v3256_v25 = vld [vmem:[%s3719_s23 + $0xb0] ss:$8 sps:$4 sm:$0xff]  }
 0x140   : > { %1461 = vmatpush2.bf16.msra.mxu0 %v3152_v61  ;;  %1574 = vmatpush2.bf16.msra.mxu1 %v3192_v53  ;;  %v3241_v61 = vld [vmem:[%s3719_s23] ss:$8 sps:$4 sm:$0xff]   ;;  %v3264_v53 = vld [vmem:[%s3719_s23 + $0x94] ss:$8 sps:$4 sm:$0xff]  }
 0x141   : > { %1462 = vmatprep.subr.bf16.mxu0 %v3154_v62  ;;  %1575 = vmatprep.subr.bf16.mxu1 %v3193_v54  ;;  %v3249_v62 = vld [vmem:[%s3719_s23 + $0xe4] ss:$8 sps:$4 sm:$0xff]   ;;  %v3262_v54 = vld [vmem:[%s3719_s23 + $0x90] ss:$8 sps:$4 sm:$0xff]  }
 0x144   : > { %1463 = vmatpush2.bf16.msra.mxu0 %v3158_v0  ;;  %1576 = vmatpush2.bf16.msra.mxu1 %v3195_v16  ;;  %v3247_v0 = vld [vmem:[%s3719_s23 + $0xe0] ss:$8 sps:$4 sm:$0xff]  }
 0x145   : > { %1464 = vmatprep.subr.bf16.mxu0 %v3160_v60  ;;  %1577 = vmatprep.subr.bf16.mxu1 %v3196_v63  ;;  %v3255_v60 = vld [vmem:[%s3719_s23 + $0xc4] ss:$8 sps:$4 sm:$0xff]  }
 0x148   : > { %1465 = vmatpush2.bf16.msra.mxu0 %v3164_v2  ;;  %1578 = vmatpush2.bf16.msra.mxu1 %v3198_v58  ;;  %v3253_v2 = vld [vmem:[%s3719_s23 + $0xc0] ss:$8 sps:$4 sm:$0xff]  }
 0x149   : > { %1466 = vmatprep.subr.bf16.mxu0 %v3166_v37  ;;  %1579 = vmatprep.subr.bf16.mxu1 %v3202_v7  ;;  %v3261_v37 = vld [vmem:[%s3719_s23 + $0xa4] ss:$8 sps:$4 sm:$0xff]  }
 0x14c   : > { %1467 = vmatpush2.bf16.msra.mxu0 %v3170_v5  ;;  %1580 = vmatpush2.bf16.msra.mxu1 %v3204_v29  ;;  %v3259_v5 = vld [vmem:[%s3719_s23 + $0xa0] ss:$8 sps:$4 sm:$0xff]  }
 0x14d   : > { %1468 = vmatprep.subr.bf16.mxu0 %v3172_v6  ;;  %1581 = vmatprep.subr.bf16.mxu1 %v3205_v31  ;;  %v3267_v6 = vld [vmem:[%s3719_s23 + $0x84] ss:$8 sps:$4 sm:$0xff]  }
 0x150   : > { %1469 = vmatpush2.bf16.msra.mxu0 %v3176_v15  ;;  %1582 = vmatpush2.bf16.msra.mxu1 %v3207_v11  ;;  %v3265_v15 = vld [vmem:[%s3719_s23 + $0x80] ss:$8 sps:$4 sm:$0xff]  }
 0x151   : > { %1470 = vmatprep.subr.bf16.mxu0 %v3178_v9  ;;  %1583 = vmatprep.subr.bf16.mxu1 %v3208_v12 }
 0x154   : > { %1471 = vmatpush2.bf16.msra.mxu0 %v3182_v8  ;;  %1584 = vmatpush2.bf16.msra.mxu1 %v3210_v14 }
 0x155   : > { %2162 = vmatprep.subr.bf16.mxu0 %v3222_v20  ;;  %2957 = vmatprep.subr.bf16.mxu1 %v3222_v20 }
 0x157   : > { %1473 = vmatmul.mubr.bf16.vlgmr.msra.gmra.mxu0 %v3184_v28  ;;  %1586 = vmatmul.mubr.bf16.vlgmr.msra.gmra.mxu1 %v3184_v28 }
 0x158   : > { %1482 = vmatprep.mubr.bf16.mxu0 %v2732_v39  ;;  %2163 = vmatpush1.bf16.msra.mxu0 %v3220_v40 }
 0x159   : > { %2164 = vmatprep.subr.bf16.mxu0 %v3225_v41  ;;  %1595 = vmatprep.mubr.bf16.mxu1 %v2732_v39 }
 0x15a   : > { %2973 = vmatpush1.bf16.msra.mxu1 %v3220_v40 }
 0x15b   : > { %2958 = vmatprep.subr.bf16.mxu1 %v3225_v41 }
 0x15c   : > { %2165 = vmatpush1.bf16.msra.mxu0 %v3223_v13 }
 0x15d   : > { %2166 = vmatprep.subr.bf16.mxu0 %v3228_v23 }
 0x15e   : > { %2974 = vmatpush1.bf16.msra.mxu1 %v3223_v13 }
 0x15f   : > { %1483 = vmatmul.mubr.bf16.gmra.mxu0 %v2731_v24  ;;  %2959 = vmatprep.subr.bf16.mxu1 %v3228_v23 }
 0x160   : > { %1492 = vmatprep.mubr.bf16.mxu0 %v3199_v21  ;;  %2167 = vmatpush1.bf16.msra.mxu0 %v3226_v22 }
 0x161   : > { %2168 = vmatprep.subr.bf16.mxu0 %v3231_v26  ;;  %1596 = vmatmul.mubr.bf16.gmra.mxu1 %v2731_v24 }
 0x162   : > { %1605 = vmatprep.mubr.bf16.mxu1 %v3199_v21  ;;  %2975 = vmatpush1.bf16.msra.mxu1 %v3226_v22 }
 0x163   : > { %2960 = vmatprep.subr.bf16.mxu1 %v3231_v26 }
 0x164   : > { %2169 = vmatpush1.bf16.msra.mxu0 %v3229_v27 }
 0x165   : > { %2170 = vmatprep.subr.bf16.mxu0 %v3234_v32 }
 0x166   : > { %2976 = vmatpush1.bf16.msra.mxu1 %v3229_v27 }
 0x167   : > { %1493 = vmatmul.mubr.bf16.gmra.mxu0 %v3201_v38  ;;  %2961 = vmatprep.subr.bf16.mxu1 %v3234_v32 }
 0x168   : > { %1502 = vmatprep.mubr.bf16.mxu0 %v2736_v35  ;;  %2171 = vmatpush1.bf16.msra.mxu0 %v3232_v34 }
 0x169   : > { %1606 = vmatmul.mubr.bf16.gmra.mxu1 %v3201_v38  ;;  %2172 = vmatprep.subr.bf16.mxu0 %v3237_v3 }
 0x16a   : > { %1615 = vmatprep.mubr.bf16.mxu1 %v2736_v35  ;;  %2977 = vmatpush1.bf16.msra.mxu1 %v3232_v34 }
 0x16b   : > { %2962 = vmatprep.subr.bf16.mxu1 %v3237_v3 }
 0x16c   : > { %2173 = vmatpush1.bf16.msra.mxu0 %v3235_v50 }
 0x16d   : > { %2174 = vmatprep.subr.bf16.mxu0 %v3240_v48 }
 0x16e   : > { %2978 = vmatpush1.bf16.msra.mxu1 %v3235_v50 }
 0x16f   : > { %1503 = vmatmul.mubr.bf16.gmra.mxu0 %v2735_v43  ;;  %2963 = vmatprep.subr.bf16.mxu1 %v3240_v48 }
 0x170   : > { %1512 = vmatprep.mubr.bf16.mxu0 %v2738_v44  ;;  %2175 = vmatpush1.bf16.msra.mxu0 %v3238_v56 }
 0x171   : > { %1616 = vmatmul.mubr.bf16.gmra.mxu1 %v2735_v43  ;;  %2176 = vmatprep.subr.bf16.mxu0 %v3243_v57 }
 0x172   : > { %1625 = vmatprep.mubr.bf16.mxu1 %v2738_v44  ;;  %2979 = vmatpush1.bf16.msra.mxu1 %v3238_v56 }
 0x173   : > { %2964 = vmatprep.subr.bf16.mxu1 %v3243_v57 }
 0x174   : > { %2177 = vmatpush1.bf16.msra.mxu0 %v3241_v61 }
 0x175   : > { %2178 = vmatprep.subr.bf16.mxu0 %v3246_v17 }
 0x176   : > { %2980 = vmatpush1.bf16.msra.mxu1 %v3241_v61 }
 0x177   : > { %1513 = vmatmul.mubr.bf16.gmra.mxu0 %v2737_v51  ;;  %2965 = vmatprep.subr.bf16.mxu1 %v3246_v17 }
 0x178   : > { %1522 = vmatprep.mubr.bf16.mxu0 %v3211_v52  ;;  %2179 = vmatpush2.bf16.msra.mxu0 %v3244_v18 }
 0x179   : > { %1626 = vmatmul.mubr.bf16.gmra.mxu1 %v2737_v51  ;;  %2180 = vmatprep.subr.bf16.mxu0 %v3249_v62 }
 0x17a   : > { %1635 = vmatprep.mubr.bf16.mxu1 %v3211_v52  ;;  %2981 = vmatpush2.bf16.msra.mxu1 %v3244_v18 }
 0x17b   : > { %2966 = vmatprep.subr.bf16.mxu1 %v3249_v62 }
 0x17c   : > { %2181 = vmatpush2.bf16.msra.mxu0 %v3247_v0 }
 0x17d   : > { %2182 = vmatprep.subr.bf16.mxu0 %v3252_v1 }
 0x17e   : > { %2982 = vmatpush2.bf16.msra.mxu1 %v3247_v0 }
 0x17f   : > { %1523 = vmatmul.mubr.bf16.gmra.mxu0 %v3213_v45  ;;  %2967 = vmatprep.subr.bf16.mxu1 %v3252_v1 }
 0x180   : > { %1532 = vmatprep.mubr.bf16.mxu0 %v3214_v47  ;;  %2183 = vmatpush2.bf16.msra.mxu0 %v3250_v59 }
 0x181   : > { %1636 = vmatmul.mubr.bf16.gmra.mxu1 %v3213_v45  ;;  %2184 = vmatprep.subr.bf16.mxu0 %v3255_v60 }
 0x182   : > { %1645 = vmatprep.mubr.bf16.mxu1 %v3214_v47  ;;  %2983 = vmatpush2.bf16.msra.mxu1 %v3250_v59 }
 0x183   : > { %2968 = vmatprep.subr.bf16.mxu1 %v3255_v60 }
 0x184   : > { %2185 = vmatpush2.bf16.msra.mxu0 %v3253_v2 }
 0x185   : > { %2186 = vmatprep.subr.bf16.mxu0 %v3258_v4 }
 0x186   : > { %2984 = vmatpush2.bf16.msra.mxu1 %v3253_v2 }
 0x187   : > { %1533 = vmatmul.mubr.bf16.gmra.mxu0 %v3216_v49  ;;  %2969 = vmatprep.subr.bf16.mxu1 %v3258_v4 }
 0x188   : > { %1542 = vmatprep.mubr.bf16.mxu0 %v3217_v46  ;;  %2187 = vmatpush2.bf16.msra.mxu0 %v3256_v25 }
 0x189   : > { %1646 = vmatmul.mubr.bf16.gmra.mxu1 %v3216_v49  ;;  %2188 = vmatprep.subr.bf16.mxu0 %v3261_v37 }
 0x18a   : > { %1655 = vmatprep.mubr.bf16.mxu1 %v3217_v46  ;;  %2985 = vmatpush2.bf16.msra.mxu1 %v3256_v25 }
 0x18b   : > { %2970 = vmatprep.subr.bf16.mxu1 %v3261_v37 }
 0x18c   : > { %2189 = vmatpush2.bf16.msra.mxu0 %v3259_v5 }
 0x18d   : > { %2190 = vmatprep.subr.bf16.mxu0 %v3264_v53 }
 0x18e   : > { %2986 = vmatpush2.bf16.msra.mxu1 %v3259_v5 }
 0x18f   : > { %1543 = vmatmul.mubr.bf16.gmra.mxu0 %v3219_v55  ;;  %2971 = vmatprep.subr.bf16.mxu1 %v3264_v53 }
 0x190   : > { %2191 = vmatpush2.bf16.msra.mxu0 %v3262_v54 }
 0x191   : > { %1656 = vmatmul.mubr.bf16.gmra.mxu1 %v3219_v55  ;;  %2192 = vmatprep.subr.bf16.mxu0 %v3267_v6 }
 0x192   : > { %2987 = vmatpush2.bf16.msra.mxu1 %v3262_v54 }
 0x193   : > { %2972 = vmatprep.subr.bf16.mxu1 %v3267_v6 }
 0x194   : > { %2193 = vmatpush2.bf16.msra.mxu0 %v3265_v15 }
 0x196   : > { %2988 = vmatpush2.bf16.msra.mxu1 %v3265_v15 }
 0x217   : > { %v4101_v16 = vpop.f32.mrf.mxu0  ;;  %v4119_v40 = vpop.f32.mrf.mxu1 }
 0x218   : > { %v2809_v63 = vmul.f32 -1.442695, %v4101_v16 }
 0x219   : > { %v4104_v9 = vpop.f32.mrf.mxu0  ;;  %v4124_v11 = vpop.f32.mrf.mxu1 }
 0x21a   : > { %3268 = vpow2.f32 %v2809_v63  ;;  %v2810_v8 = vmul.f32 -1.442695, %v4104_v9 }
 0x21b   : > { %v4107_v58 = vpop.f32.mrf.mxu0  ;;  %v4129_v23 = vpop.f32.mrf.mxu1 }
 0x21c   : > { %3270 = vpow2.f32 %v2810_v8  ;;  %v2811_v7 = vmul.f32 -1.442695, %v4107_v58 }
 0x21d   : > { %v4110_v10 = vpop.f32.mrf.mxu0  ;;  %v4134_v26 = vpop.f32.mrf.mxu1 }
 0x21e   : > { %3272 = vpow2.f32 %v2811_v7  ;;  %v2812_v19 = vmul.f32 -1.442695, %v4110_v10 }
 0x21f   : > { %v4113_v20 = vpop.f32.mrf.mxu0 }
 0x220   : > { %3274 = vpow2.f32 %v2812_v19  ;;  %v2813_v28 = vmul.f32 -1.442695, %v4113_v20 }
 0x221   : > { %v4116_v29 = vpop.f32.mrf.mxu0  ;;  %v4139_v38 = vpop.f32.mrf.mxu1 }
 0x222   : > { %3276 = vpow2.f32 %v2813_v28  ;;  %v2814_v31 = vmul.f32 -1.442695, %v4116_v29 }
 0x223   : > { %v4121_v39 = vpop.f32.mrf.mxu0  ;;  %v4144_v43 = vpop.f32.mrf.mxu1 }
 0x224   : > { %3278 = vpow2.f32 %v2814_v31  ;;  %v2815_v41 = vmul.f32 -1.442695, %v4121_v39 }
 0x225   : > { %v4126_v12 = vpop.f32.mrf.mxu0  ;;  %v4149_v47 = vpop.f32.mrf.mxu1 }
 0x226   : > { %3280 = vpow2.f32 %v2815_v41  ;;  %v2816_v13 = vmul.f32 -1.442695, %v4126_v12 }
 0x227   : > { %v3269_v24 = vpop.eup %3268  ;;  %v4131_v14 = vpop.f32.mrf.mxu0 }
 0x228   : > { %v1762_v21 = vadd.f32 1.0, %v3269_v24  ;;  %3282 = vpow2.f32 %v2816_v13  ;;  %v2817_v22 = vmul.f32 -1.442695, %v4131_v14  ;;  %v4154_v50 = vpop.f32.mrf.mxu1 }
 0x229   : > { %v3271_v30 = vpop.eup %3270  ;;  %v4136_v33 = vpop.f32.mrf.mxu0 }
 0x22a   : > { %3284 = vrcp.f32 %v1762_v21  ;;  %v1763_v27 = vadd.f32 1.0, %v3271_v30  ;;  %v2818_v32 = vmul.f32 -1.442695, %v4136_v33  ;;  %v4159_v17 = vpop.f32.mrf.mxu1 }
 0x22b   : > { %v3273_v35 = vpop.eup %3272  ;;  %3286 = vpow2.f32 %v2817_v22  ;;  %v4141_v34 = vpop.f32.mrf.mxu0 }
 0x22c   : > { %3288 = vrcp.f32 %v1763_v27  ;;  %v1764_v36 = vadd.f32 1.0, %v3273_v35  ;;  %v2819_v42 = vmul.f32 -1.442695, %v4141_v34  ;;  %v4164_v59 = vpop.f32.mrf.mxu1 }
 0x22d   : > { %v3275_v44 = vpop.eup %3274  ;;  %3290 = vpow2.f32 %v2818_v32  ;;  %v4146_v51 = vpop.f32.mrf.mxu0 }
 0x22e   : > { %3292 = vrcp.f32 %v1764_v36  ;;  %v1765_v52 = vadd.f32 1.0, %v3275_v44  ;;  %v2820_v45 = vmul.f32 -1.442695, %v4146_v51  ;;  %v4169_v37 = vpop.f32.mrf.mxu1 }
 0x22f   : > { %v3277_v49 = vpop.eup %3276  ;;  %3294 = vpow2.f32 %v2819_v42  ;;  %v4151_v46 = vpop.f32.mrf.mxu0 }
 0x230   : > { %3296 = vrcp.f32 %v1765_v52  ;;  %v1766_v55 = vadd.f32 1.0, %v3277_v49  ;;  %v2821_v3 = vmul.f32 -1.442695, %v4151_v46  ;;  %v4174_v15 = vpop.f32.mrf.mxu1 }
 0x231   : > { %v3279_v48 = vpop.eup %3278  ;;  %3298 = vpow2.f32 %v2820_v45  ;;  %v4156_v56 = vpop.f32.mrf.mxu0 }
 0x232   : > { %3300 = vrcp.f32 %v1766_v55  ;;  %v1767_v57 = vadd.f32 1.0, %v3279_v48  ;;  %v2822_v61 = vmul.f32 -1.442695, %v4156_v56  ;;  %v4179_v31 = vpop.f32.mrf.mxu1 }
 0x233   : > { %v3281_v18 = vpop.eup %3280  ;;  %3302 = vpow2.f32 %v2821_v3  ;;  %v4161_v62 = vpop.f32.mrf.mxu0 }
 0x234   : > { %3304 = vrcp.f32 %v1767_v57  ;;  %v1768_v0 = vadd.f32 1.0, %v3281_v18  ;;  %v2823_v1 = vmul.f32 -1.442695, %v4161_v62  ;;  %v4186_v32 = vpop.f32.mrf.mxu1 }
 0x235   : > { %v3283_v60 = vpop.eup %3282  ;;  %3306 = vpow2.f32 %v2822_v61  ;;  %v4166_v2 = vpop.f32.mrf.mxu0 }
 0x236   : > { %3308 = vrcp.f32 %v1768_v0  ;;  %v1769_v4 = vadd.f32 1.0, %v3283_v60  ;;  %v2824_v25 = vmul.f32 -1.442695, %v4166_v2  ;;  %v4193_v49 = vpop.f32.mrf.mxu1 }
 0x237   : > { %v3285_v5 = vpop.eup %3284  ;;  %3310 = vpow2.f32 %v2823_v1  ;;  %v4171_v53 = vpop.f32.mrf.mxu0 }
 0x238   : > { %v3287_v54 = vpop.eup %3286  ;;  %3312 = vrcp.f32 %v1769_v4  ;;  %v2825_v6 = vmul.f32 -1.442695, %v4171_v53  ;;  %v1858_v36 = vmul.f32 %v3285_v5, %v4101_v16  ;;  %v4200_v18 = vpop.f32.mrf.mxu1 }
 0x239   : > { %v3289_v63 = vpop.eup %3288  ;;  %v1770_v8 = vadd.f32 1.0, %v3287_v54  ;;  %3314 = vpow2.f32 %v2824_v25  ;;  %v4176_v7 = vpop.f32.mrf.mxu0 }
 0x23a   : > { %v3291_v19 = vpop.eup %3290  ;;  %3316 = vpow2.f32 %v2825_v6  ;;  %v2826_v28 = vmul.f32 -1.442695, %v4176_v7  ;;  %v1859_v22 = vmul.f32 %v3289_v63, %v4104_v9  ;;  %v1890_v1 = vmul.f32 %v1858_v36, %v4119_v40  ;;  %v4207_v54 = vpop.f32.mrf.mxu1 }
 0x23b   : > { %v3293_v41 = vpop.eup %3292  ;;  %3318 = vrcp.f32 %v1770_v8  ;;  %v1771_v13 = vadd.f32 1.0, %v3291_v19  ;;  %v4181_v24 = vpop.f32.mrf.mxu0 }
 0x23c   : > { %v3295_v21 = vpop.eup %3294  ;;  %v1860_v30 = vmul.f32 %v3293_v41, %v4107_v58  ;;  %3320 = vpow2.f32 %v2826_v28  ;;  %v2827_v27 = vmul.f32 -1.442695, %v4181_v24  ;;  %v1891_v57 = vmul.f32 %v1859_v22, %v4124_v11  ;;  %v4214_v41 = vpop.f32.mrf.mxu1 }
 0x23d   : > { %v3297_v35 = vpop.eup %3296  ;;  %3322 = vrcp.f32 %v1771_v13  ;;  %v1772_v42 = vadd.f32 1.0, %v3295_v21  ;;  %v4189_v44 = vpop.f32.mrf.mxu0 }
 0x23e   : > { %v3299_v52 = vpop.eup %3298  ;;  %v1861_v45 = vmul.f32 %v3297_v35, %v4110_v10  ;;  %3324 = vpow2.f32 %v2827_v27  ;;  %v2828_v9 = vmul.f32 -1.442695, %v4189_v44  ;;  %v1892_v3 = vmul.f32 %v1860_v30, %v4129_v23 }
 0x23f   : > { %v3301_v58 = vpop.eup %3300  ;;  %3326 = vrcp.f32 %v1772_v42  ;;  %v1773_v55 = vadd.f32 1.0, %v3299_v52  ;;  %v4196_v48 = vpop.f32.mrf.mxu0 }
 0x240   : > { %v3303_v16 = vpop.eup %3302  ;;  %v1893_v61 = vmul.f32 %v1861_v45, %v4134_v26  ;;  %3328 = vpow2.f32 %v2828_v9  ;;  %v2829_v60 = vmul.f32 -1.442695, %v4196_v48  ;;  %v1922_v6 = vpack.c.bf16 %v1892_v3, %v1890_v1 }
 0x241   : > { %v3305_v10 = vpop.eup %3304  ;;  %3330 = vrcp.f32 %v1773_v55  ;;  %v1774_v0 = vadd.f32 1.0, %v3303_v16  ;;  %v4204_v4 = vpop.f32.mrf.mxu0  ;;  %v1862_v21 = vmul.f32 %v3301_v58, %v4113_v20 }
 0x242   : > { %v3307_v23 = vpop.eup %3306  ;;  %v1923_v25 = vpack.c.bf16 %v1893_v61, %v1891_v57  ;;  %v2830_v5 = vmul.f32 -1.442695, %v4204_v4  ;;  %v1863_v19 = vmul.f32 %v3305_v10, %v4116_v29  ;;  %v4220_v29 = vpop.f32.mrf.mxu1 }
 0x243   : > { %v3309_v11 = vpop.eup %3308  ;;  %3332 = vrcp.f32 %v1774_v0  ;;  %v1775_v26 = vadd.f32 1.0, %v3307_v23  ;;  %v4209_v63 = vpop.f32.mrf.mxu0  ;;  %v1894_v16 = vmul.f32 %v1862_v21, %v4139_v38 }
 0x244   : > { %v3311_v8 = vpop.eup %3310  ;;  %v1864_v40 = vmul.f32 %v3309_v11, %v4121_v39  ;;  %3334 = vpow2.f32 %v2829_v60  ;;  %v2831_v28 = vmul.f32 -1.442695, %v4209_v63  ;;  %2194 = vmatprep.mubr.bf16.mxu0 %v1923_v25  ;;  %v1895_v58 = vmul.f32 %v1863_v19, %v4144_v43 }
 0x245   : > { %v3313_v13 = vpop.eup %3312  ;;  %3336 = vrcp.f32 %v1775_v26  ;;  %v1776_v22 = vadd.f32 1.0, %v3311_v8  ;;  %v4217_v30 = vpop.f32.mrf.mxu0  ;;  %2195 = vmatmul.mubr.bf16.vlgmr.msra.gmra.mxu0 %v1922_v6 }
 0x246   : > { %v3315_v27 = vpop.eup %3314  ;;  %v1865_v35 = vmul.f32 %v3313_v13, %v4126_v12  ;;  %3338 = vpow2.f32 %v2830_v5  ;;  %v1896_v42 = vmul.f32 %v1864_v40, %v4149_v47  ;;  %v2832_v52 = vmul.f32 -1.442695, %v4217_v30  ;;  %v4228_v12 = vpop.f32.mrf.mxu1 }
 0x247   : > { %v3317_v39 = vpop.eup %3316  ;;  %3340 = vrcp.f32 %v1776_v22  ;;  %v1777_v36 = vadd.f32 1.0, %v3315_v27  ;;  %v4224_v45 = vpop.f32.mrf.mxu0 }
 0x248   : > { %v3319_v20 = vpop.eup %3318  ;;  %v1778_v9 = vadd.f32 1.0, %v3317_v39  ;;  %v1897_v55 = vmul.f32 %v1865_v35, %v4154_v50  ;;  %3342 = vpow2.f32 %v2831_v28  ;;  %v2833_v57 = vmul.f32 -1.442695, %v4224_v45  ;;  %v4237_v38 = vpop.f32.mrf.mxu1 }
 0x249   : > { %v3321_v3 = vpop.eup %3320  ;;  %3344 = vrcp.f32 %v1777_v36  ;;  %v4232_v47 = vpop.f32.mrf.mxu0  ;;  %v1924_v60 = vpack.c.bf16 %v1896_v42, %v1894_v16  ;;  %v1866_v40 = vmul.f32 %v3319_v20, %v4131_v14 }
 0x24a   : > { %v3323_v61 = vpop.eup %3322  ;;  %3346 = vrcp.f32 %v1778_v9  ;;  %v1779_v10 = vadd.f32 1.0, %v3321_v3  ;;  %v1925_v0 = vpack.c.bf16 %v1897_v55, %v1895_v58  ;;  %v2834_v43 = vmul.f32 -1.442695, %v4232_v47  ;;  %v4251_v35 = vpop.f32.mrf.mxu1 }
 0x24b   : > { %v3325_v1 = vpop.eup %3324  ;;  %3348 = vpow2.f32 %v2832_v52  ;;  %v4235_v50 = vpop.f32.mrf.mxu0  ;;  %v1867_v11 = vmul.f32 %v3323_v61, %v4136_v33  ;;  %v1898_v20 = vmul.f32 %v1866_v40, %v4159_v17 }
 0x24c   : > { %v3327_v23 = vpop.eup %3326  ;;  %3350 = vrcp.f32 %v1779_v10  ;;  %v1780_v25 = vadd.f32 1.0, %v3325_v1  ;;  %2204 = vmatprep.mubr.bf16.mxu0 %v1925_v0  ;;  %v2835_v6 = vmul.f32 -1.442695, %v4235_v50 }
 0x24d   : > { %v3329_v5 = vpop.eup %3328  ;;  %v1868_v26 = vmul.f32 %v3327_v23, %v4141_v34  ;;  %3352 = vpow2.f32 %v2833_v57  ;;  %v4242_v8 = vpop.f32.mrf.mxu0  ;;  %2205 = vmatmul.mubr.bf16.gmra.mxu0 %v1924_v60  ;;  %v1899_v14 = vmul.f32 %v1867_v11, %v4164_v59 }
 0x24e   : > { %v3331_v19 = vpop.eup %3330  ;;  %3354 = vrcp.f32 %v1780_v25  ;;  %v1781_v28 = vadd.f32 1.0, %v3329_v5  ;;  %v2836_v13 = vmul.f32 -1.442695, %v4242_v8  ;;  %v4262_v57 = vpop.f32.mrf.mxu1 }
 0x24f   : > { %v1869_v21 = vmul.f32 %v3331_v19, %v4146_v51  ;;  %3356 = vpow2.f32 %v2834_v43  ;;  %v4247_v22 = vpop.f32.mrf.mxu0  ;;  %v1900_v34 = vmul.f32 %v1868_v26, %v4169_v37 }
 0x250   : > { %v3333_v33 = vpop.eup %3332  ;;  %3358 = vrcp.f32 %v1781_v28  ;;  %v2837_v27 = vmul.f32 -1.442695, %v4247_v22 }
 0x251   : > { %v3335_v39 = vpop.eup %3334  ;;  %v1901_v36 = vmul.f32 %v1869_v21, %v4174_v15  ;;  %3360 = vpow2.f32 %v2835_v6  ;;  %v4255_v42 = vpop.f32.mrf.mxu0  ;;  %v1926_v16 = vpack.c.bf16 %v1900_v34, %v1898_v20  ;;  %v1870_v60 = vmul.f32 %v3333_v33, %v4151_v46 }
 0x252   : > { %v3337_v51 = vpop.eup %3336  ;;  %v1782_v52 = vadd.f32 1.0, %v3335_v39  ;;  %3362 = vpow2.f32 %v2836_v13  ;;  %v2838_v9 = vmul.f32 -1.442695, %v4255_v42 }
 0x253   : > { %v3339_v37 = vpop.eup %3338  ;;  %v1927_v58 = vpack.c.bf16 %v1901_v36, %v1899_v14  ;;  %3364 = vpow2.f32 %v2837_v27  ;;  %v4259_v55 = vpop.f32.mrf.mxu0  ;;  %v1871_v10 = vmul.f32 %v3337_v51, %v4156_v56  ;;  %v1902_v28 = vmul.f32 %v1870_v60, %v4179_v31 }
 0x254   : > { %v3341_v3 = vpop.eup %3340  ;;  %3366 = vrcp.f32 %v1782_v52  ;;  %v1783_v59 = vadd.f32 1.0, %v3339_v37  ;;  %v2839_v15 = vmul.f32 -1.442695, %v4259_v55 }
 0x255   : > { %v3343_v61 = vpop.eup %3342  ;;  %v1872_v17 = vmul.f32 %v3341_v3, %v4161_v62  ;;  %3368 = vpow2.f32 %v2838_v9  ;;  %2214 = vmatprep.mubr.bf16.mxu0 %v1927_v58  ;;  %v4266_v0 = vpop.f32.mrf.mxu0  ;;  %v1903_v19 = vmul.f32 %v1871_v10, %v4186_v32 }
 0x256   : > { %v3345_v1 = vpop.eup %3344  ;;  %3370 = vrcp.f32 %v1783_v59  ;;  %v1784_v43 = vadd.f32 1.0, %v3343_v61  ;;  %v2840_v23 = vmul.f32 -1.442695, %v4266_v0  ;;  %2215 = vmatmul.mubr.bf16.gmra.mxu0 %v1926_v16  ;;  %v4272_v62 = vpop.f32.mrf.mxu1 }
 0x257   : > { %v3347_v25 = vpop.eup %3346  ;;  %v1873_v5 = vmul.f32 %v3345_v1, %v4166_v2  ;;  %3372 = vpow2.f32 %v2839_v15  ;;  %v1904_v56 = vmul.f32 %v1872_v17, %v4193_v49 }
 0x258   : > { %v3349_v11 = vpop.eup %3348  ;;  %3374 = vrcp.f32 %v1784_v43  ;;  %v4279_v39 = vpop.f32.mrf.mxu1  ;;  %v1874_v32 = vmul.f32 %v3347_v25, %v4171_v53 }
 0x259   : > { %v3351_v26 = vpop.eup %3350  ;;  %v1785_v6 = vadd.f32 1.0, %v3349_v11  ;;  %v1905_v46 = vmul.f32 %v1873_v5, %v4200_v18  ;;  %3376 = vpow2.f32 %v2840_v23  ;;  %v1928_v27 = vpack.c.bf16 %v1904_v56, %v1902_v28 }
 0x25a   : > { %v3353_v40 = vpop.eup %3352  ;;  %v1875_v33 = vmul.f32 %v3351_v26, %v4176_v7  ;;  %v1649_v58 = vpop.f32.mrf.mxu1  ;;  %v1906_v3 = vmul.f32 %v1874_v32, %v4207_v54 }
 0x25b   : > { %v3355_v13 = vpop.eup %3354  ;;  %3378 = vrcp.f32 %v1785_v6  ;;  %v1929_v2 = vpack.c.bf16 %v1905_v46, %v1903_v19  ;;  %v1786_v34 = vadd.f32 1.0, %v3353_v40 }
 0x25c   : > { %v3357_v21 = vpop.eup %3356  ;;  %v1876_v49 = vmul.f32 %v3355_v13, %v4181_v24  ;;  %v1907_v9 = vmul.f32 %v1875_v33, %v4214_v41  ;;  %v1651_v17 = vpop.f32.mrf.mxu1 }
 0x25d   : > { %v3359_v14 = vpop.eup %3358  ;;  %v1787_v18 = vadd.f32 1.0, %v3357_v21  ;;  %2224 = vmatprep.mubr.bf16.mxu0 %v1929_v2 }
 0x25e   : > { %v3361_v36 = vpop.eup %3360  ;;  %v1877_v31 = vmul.f32 %v3359_v14, %v4189_v44  ;;  %2225 = vmatmul.mubr.bf16.gmra.mxu0 %v1928_v27  ;;  %v1908_v7 = vmul.f32 %v1876_v49, %v4220_v29  ;;  %v1653_v5 = vpop.f32.mrf.mxu1 }
 0x25f   : > { %v3363_v51 = vpop.eup %3362  ;;  %3380 = vrcp.f32 %v1787_v18  ;;  %v1788_v52 = vadd.f32 1.0, %v3361_v36 }
 0x260   : > { %v3365_v20 = vpop.eup %3364  ;;  %3382 = vrcp.f32 %v1786_v34  ;;  %v1789_v24 = vadd.f32 1.0, %v3363_v51  ;;  %v1909_v37 = vmul.f32 %v1877_v31, %v4228_v12  ;;  %v1930_v61 = vpack.c.bf16 %v1908_v7, %v1906_v3  ;;  %v1940_v3 = vld [vmem:[#allocation3 + $0x10] sm:$0xff] }
 0x261   : > { %v3367_v53 = vpop.eup %3366  ;;  %3384 = vrcp.f32 %v1788_v52  ;;  %v1790_v29 = vadd.f32 1.0, %v3365_v20 }
 0x262   : > { %v3369_v59 = vpop.eup %3368  ;;  %3386 = vrcp.f32 %v1789_v24  ;;  %v1931_v44 = vpack.c.bf16 %v1909_v37, %v1907_v9  ;;  %v1878_v25 = vmul.f32 %v3367_v53, %v4196_v48 }
 0x263   : > { %v3371_v16 = vpop.eup %3370  ;;  %v1791_v15 = vadd.f32 1.0, %v3369_v59 }
 0x264   : > { %v3373_v10 = vpop.eup %3372  ;;  %2234 = vmatprep.mubr.bf16.mxu1 %v1931_v44  ;;  %v1879_v43 = vmul.f32 %v3371_v16, %v4204_v4  ;;  %v1657_v4 = vpop.f32.mrf.mxu1 }
 0x265   : > { %v3375_v1 = vpop.eup %3374  ;;  %3388 = vrcp.f32 %v1791_v15  ;;  %v1792_v41 = vadd.f32 1.0, %v3373_v10  ;;  %2235 = vmatmul.mubr.bf16.vlgmr.msra.gmra.mxu1 %v1930_v61  ;;  %v1942_v15 = vld [vmem:[#allocation3 + $0xc8] sm:$0xff] }
 0x266   : > { %v3377_v12 = vpop.eup %3376  ;;  %v1880_v60 = vmul.f32 %v3375_v1, %v4209_v63  ;;  %v1911_v26 = vmul.f32 %v1879_v43, %v4251_v35  ;;  %v1910_v63 = vmul.f32 %v1878_v25, %v4237_v38  ;;  %v1659_v21 = vpop.f32.mrf.mxu1  ;;  %v1945_v43 = vld [vmem:[#allocation3 + $0x38] sm:$0xff] }
 0x267   : > { %3390 = vrcp.f32 %v1792_v41  ;;  %v1793_v54 = vadd.f32 1.0, %v3377_v12  ;;  %v1944_v41 = vld [vmem:[#allocation3 + $0x70] sm:$0xff] }
 0x268   : > { %v3379_v23 = vpop.eup %3378  ;;  %3392 = vrcp.f32 %v1790_v29  ;;  %v1912_v56 = vmul.f32 %v1880_v60, %v4262_v57  ;;  %v1943_v29 = vld [vmem:[#allocation3 + $0xb0] sm:$0xff] }
 0x269   : > { %v1881_v11 = vmul.f32 %v3379_v23, %v4217_v30  ;;  %3394 = vrcp.f32 %v1793_v54 }
 0x26a   : > { %v1932_v13 = vpack.c.bf16 %v1912_v56, %v1910_v63  ;;  %v1947_v56 = vld [vmem:[#allocation3 + $0xf8] sm:$0xff] }
 0x26b   : > { %v1913_v6 = vmul.f32 %v1881_v11, %v4272_v62 }
 0x26c   : > { %v3381_v19 = vpop.eup %3380 }
 0x26d   : > { %v3383_v46 = vpop.eup %3382  ;;  %v1933_v40 = vpack.c.bf16 %v1913_v6, %v1911_v26  ;;  %v1883_v48 = vmul.f32 %v3381_v19, %v4232_v47  ;;  %v1661_v47 = vpop.f32.mrf.mxu1  ;;  %v1948_v19 = vld [vmem:[#allocation3 + $0x78] sm:$0xff] }
 0x26e   : > { %v3385_v28 = vpop.eup %3384  ;;  %v1882_v57 = vmul.f32 %v3383_v46, %v4224_v45  ;;  %v1949_v46 = vld [vmem:[#allocation3 + $0x88] sm:$0xff] }
 0x26f   : > { %v3387_v2 = vpop.eup %3386  ;;  %v1884_v30 = vmul.f32 %v3385_v28, %v4235_v50  ;;  %2244 = vmatprep.mubr.bf16.mxu1 %v1933_v40  ;;  %v1915_v33 = vmul.f32 %v1883_v48, %v1649_v58  ;;  %v1663_v51 = vpop.f32.mrf.mxu1  ;;  %v1939_v58 = vld [vmem:[#allocation3 + $0x68] sm:$0xff]  ;;  %v1950_v48 = vld [vmem:[#allocation3 + $0xf0] sm:$0xff] }
 0x270   : > { %v1885_v35 = vmul.f32 %v3387_v2, %v4242_v8  ;;  %2245 = vmatmul.mubr.bf16.gmra.mxu1 %v1932_v13  ;;  %v1914_v27 = vmul.f32 %v1882_v57, %v4279_v39 }
 0x271   : > { %v1916_v38 = vmul.f32 %v1884_v30, %v1651_v17  ;;  %v1951_v30 = vld [vmem:[#allocation3 + $0x18] sm:$0xff] }
 0x272   : > { %v3389_v62 = vpop.eup %3388  ;;  %v1917_v49 = vmul.f32 %v1885_v35, %v1653_v5  ;;  %v1946_v5 = vld [vmem:[#allocation3 + $0x48] sm:$0xff] }
 0x273   : > { %v1887_v18 = vmul.f32 %v3389_v62, %v4255_v42  ;;  %v1934_v45 = vpack.c.bf16 %v1916_v38, %v1914_v27  ;;  %v1938_v42 = vld [vmem:[#allocation3 + $0xa8] sm:$0xff]  ;;  %v1953_v38 = vld [vmem:[#allocation3 + $0x50] sm:$0xff] }
 0x274   : > { %v3391_v34 = vpop.eup %3390  ;;  %v1935_v14 = vpack.c.bf16 %v1917_v49, %v1915_v33 }
 0x275   : > { %v3393_v32 = vpop.eup %3392  ;;  %v1888_v36 = vmul.f32 %v3391_v34, %v4259_v55  ;;  %v1919_v52 = vmul.f32 %v1887_v18, %v1659_v21  ;;  %v1952_v21 = vld [vmem:[#allocation3 + $0x30] sm:$0xff]  ;;  %v1954_v34 = vld [vmem:[#allocation3 + $0xb8] sm:$0xff] }
 0x276   : > { %v3395_v50 = vpop.eup %3394  ;;  %2254 = vmatprep.mubr.bf16.mxu1 %v1935_v14  ;;  %v1886_v31 = vmul.f32 %v3393_v32, %v4247_v22  ;;  %v1941_v22 = vld [vmem:[#allocation3 + $0xc0] sm:$0xff]  ;;  %v1955_v32 = vld [vmem:[#allocation3 + $0xd0] sm:$0xff] }
 0x277   : > { %v1889_v8 = vmul.f32 %v3395_v50, %v4266_v0  ;;  %v1920_v20 = vmul.f32 %v1888_v36, %v1661_v47  ;;  %v1956_v36 = vld [vmem:[#allocation3 + $0xd8] sm:$0xff] }
 0x278   : > { %2255 = vmatmul.mubr.bf16.gmra.mxu1 %v1934_v45  ;;  %v1918_v24 = vmul.f32 %v1886_v31, %v1657_v4  ;;  %v1957_v31 = vld [vmem:[#allocation3 + $0x58] sm:$0xff] }
 0x279   : > { %v1921_v7 = vmul.f32 %v1889_v8, %v1663_v51 }
 0x27a   : > { %v1936_v9 = vpack.c.bf16 %v1920_v20, %v1918_v24  ;;  %v1958_v20 = vld [vmem:[#allocation3 + $0x80] sm:$0xff] }
 0x27b   : > { %v1937_v39 = vpack.c.bf16 %v1921_v7, %v1919_v52  ;;  %v1959_v24 = vld [vmem:[#allocation3 + $0x40] sm:$0xff] }
 0x27d   : > { %2264 = vmatprep.mubr.bf16.mxu1 %v1937_v39 }
 0x280   : > { %2265 = vmatmul.mubr.bf16.gmra.mxu1 %v1936_v9 }
 0x305   : > { %v2196_v37 = vpop.f32.mrf.mxu0 }
 0x306   : > { %v2275_v55 = vadd.f32 %v2196_v37, %v1938_v42  ;;  %v1960_v37 = vld [vmem:[#allocation3 + $0x28] sm:$0xff] }
 0x307   : > { %v2198_v53 = vpop.f32.mrf.mxu0 }
 0x308   : > { %2307 = vst [vmem:[#allocation3 + $0xa8] sm:$0xff] %v2275_v55  ;;  %v2276_v0 = vadd.f32 %v2198_v53, %v1939_v58  ;;  %v1961_v53 = vld [vmem:[#allocation3] sm:$0xff] }
 0x309   : > { %v2200_v59 = vpop.f32.mrf.mxu0 }
 0x30a   : > { %2308 = vst [vmem:[#allocation3 + $0x68] sm:$0xff] %v2276_v0  ;;  %v2277_v44 = vadd.f32 %v2200_v59, %v1940_v3  ;;  %v1962_v59 = vld [vmem:[#allocation3 + $0x90] sm:$0xff] }
 0x30b   : > { %v2202_v16 = vpop.f32.mrf.mxu0 }
 0x30c   : > { %2309 = vst [vmem:[#allocation3 + $0x10] sm:$0xff] %v2277_v44  ;;  %v2278_v61 = vadd.f32 %v2202_v16, %v1941_v22  ;;  %v1963_v16 = vld [vmem:[#allocation3 + $0xe8] sm:$0xff] }
 0x30d   : > { %v2206_v10 = vpop.f32.mrf.mxu0 }
 0x30e   : > { %2310 = vst [vmem:[#allocation3 + $0xc0] sm:$0xff] %v2278_v61  ;;  %v2279_v17 = vadd.f32 %v2206_v10, %v1942_v15  ;;  %v1964_v10 = vld [vmem:[#allocation3 + $0xa0] sm:$0xff] }
 0x30f   : > { %v2208_v1 = vpop.f32.mrf.mxu0 }
 0x310   : > { %2311 = vst [vmem:[#allocation3 + $0xc8] sm:$0xff] %v2279_v17  ;;  %v2280_v12 = vadd.f32 %v2208_v1, %v1943_v29  ;;  %v1965_v1 = vld [vmem:[#allocation3 + $0x20] sm:$0xff] }
 0x311   : > { %v2210_v60 = vpop.f32.mrf.mxu0 }
 0x312   : > { %2312 = vst [vmem:[#allocation3 + $0xb0] sm:$0xff] %v2280_v12  ;;  %v2281_v54 = vadd.f32 %v2210_v60, %v1944_v41  ;;  %v1966_v60 = vld [vmem:[#allocation3 + $0x8] sm:$0xff] }
 0x313   : > { %v2212_v23 = vpop.f32.mrf.mxu0 }
 0x314   : > { %2313 = vst [vmem:[#allocation3 + $0x70] sm:$0xff] %v2281_v54  ;;  %v2282_v25 = vadd.f32 %v2212_v23, %v1945_v43  ;;  %v1967_v23 = vld [vmem:[#allocation3 + $0xe0] sm:$0xff] }
 0x316   : > { %2314 = vst [vmem:[#allocation3 + $0x38] sm:$0xff] %v2282_v25  ;;  %v2216_v11 = vpop.f32.mrf.mxu0 }
 0x317   : > { %v2283_v26 = vadd.f32 %v2216_v11, %v1946_v5  ;;  %v1968_v11 = vld [vmem:[#allocation3 + $0x60] sm:$0xff] }
 0x318   : > { %v2218_v6 = vpop.f32.mrf.mxu0 }
 0x319   : > { %2315 = vst [vmem:[#allocation3 + $0x48] sm:$0xff] %v2283_v26  ;;  %v2284_v63 = vadd.f32 %v2218_v6, %v1947_v56  ;;  %v1969_v6 = vld [vmem:[#allocation3 + $0x98] sm:$0xff] }
 0x31a   : > { %v2220_v4 = vpop.f32.mrf.mxu0 }
 0x31b   : > { %2316 = vst [vmem:[#allocation3 + $0xf8] sm:$0xff] %v2284_v63  ;;  %v2285_v40 = vadd.f32 %v2220_v4, %v1948_v19 }
 0x31c   : > { %v2222_v28 = vpop.f32.mrf.mxu0 }
 0x31d   : > { %2317 = vst [vmem:[#allocation3 + $0x78] sm:$0xff] %v2285_v40  ;;  %v2286_v13 = vadd.f32 %v2222_v28, %v1949_v46 }
 0x31e   : > { %v2226_v2 = vpop.f32.mrf.mxu0 }
 0x31f   : > { %2318 = vst [vmem:[#allocation3 + $0x88] sm:$0xff] %v2286_v13  ;;  %v2287_v57 = vadd.f32 %v2226_v2, %v1950_v48 }
 0x320   : > { %v2228_v35 = vpop.f32.mrf.mxu0 }
 0x321   : > { %2319 = vst [vmem:[#allocation3 + $0xf0] sm:$0xff] %v2287_v57  ;;  %v2288_v62 = vadd.f32 %v2228_v35, %v1951_v30 }
 0x322   : > { %v2230_v33 = vpop.f32.mrf.mxu0 }
 0x323   : > { %2320 = vst [vmem:[#allocation3 + $0x18] sm:$0xff] %v2288_v62  ;;  %v2289_v49 = vadd.f32 %v2230_v33, %v1952_v21 }
 0x324   : > { %v2232_v27 = vpop.f32.mrf.mxu0 }
 0x325   : > { %2321 = vst [vmem:[#allocation3 + $0x30] sm:$0xff] %v2289_v49  ;;  %v2290_v14 = vadd.f32 %v2232_v27, %v1953_v38  ;;  %v2236_v47 = vpop.f32.mrf.mxu1 }
 0x326   : > { %v2291_v18 = vadd.f32 %v2236_v47, %v1954_v34 }
 0x327   : > { %2322 = vst [vmem:[#allocation3 + $0x50] sm:$0xff] %v2290_v14  ;;  %v2238_v50 = vpop.f32.mrf.mxu1 }
 0x328   : > { %2323 = vst [vmem:[#allocation3 + $0xb8] sm:$0xff] %v2291_v18  ;;  %v2292_v45 = vadd.f32 %v2238_v50, %v1955_v32 }
 0x329   : > { %v2240_v8 = vpop.f32.mrf.mxu1 }
 0x32a   : > { %2324 = vst [vmem:[#allocation3 + $0xd0] sm:$0xff] %v2292_v45  ;;  %v2293_v51 = vadd.f32 %v2240_v8, %v1956_v36 }
 0x32b   : > { %v2242_v52 = vpop.f32.mrf.mxu1 }
 0x32c   : > { %2325 = vst [vmem:[#allocation3 + $0xd8] sm:$0xff] %v2293_v51  ;;  %v2294_v7 = vadd.f32 %v2242_v52, %v1957_v31 }
 0x32e   : > { %2326 = vst [vmem:[#allocation3 + $0x58] sm:$0xff] %v2294_v7 }
 0x330   : > { %v2246_v39 = vpop.f32.mrf.mxu1 }
 0x331   : > { %v2295_v9 = vadd.f32 %v2246_v39, %v1958_v20 }
 0x332   : > { %v2248_v42 = vpop.f32.mrf.mxu1 }
 0x333   : > { %2327 = vst [vmem:[#allocation3 + $0x80] sm:$0xff] %v2295_v9  ;;  %v2296_v58 = vadd.f32 %v2248_v42, %v1959_v24 }
 0x334   : > { %v2250_v55 = vpop.f32.mrf.mxu1 }
 0x335   : > { %2328 = vst [vmem:[#allocation3 + $0x40] sm:$0xff] %v2296_v58  ;;  %v2297_v3 = vadd.f32 %v2250_v55, %v1960_v37 }
 0x336   : > { %v2252_v0 = vpop.f32.mrf.mxu1 }
 0x337   : > { %2329 = vst [vmem:[#allocation3 + $0x28] sm:$0xff] %v2297_v3  ;;  %v2298_v22 = vadd.f32 %v2252_v0, %v1961_v53 }
 0x338   : > { %v2256_v44 = vpop.f32.mrf.mxu1 }
 0x339   : > { %2330 = vst [vmem:[#allocation3] sm:$0xff] %v2298_v22  ;;  %v2299_v15 = vadd.f32 %v2256_v44, %v1962_v59 }
 0x33a   : > { %v2258_v61 = vpop.f32.mrf.mxu1 }
 0x33b   : > { %2331 = vst [vmem:[#allocation3 + $0x90] sm:$0xff] %v2299_v15  ;;  %v2300_v29 = vadd.f32 %v2258_v61, %v1963_v16 }
 0x33c   : > { %v2260_v17 = vpop.f32.mrf.mxu1 }
 0x33d   : > { %2332 = vst [vmem:[#allocation3 + $0xe8] sm:$0xff] %v2300_v29  ;;  %v2301_v41 = vadd.f32 %v2260_v17, %v1964_v10 }
 0x33e   : > { %v2262_v12 = vpop.f32.mrf.mxu1 }
 0x33f   : > { %2333 = vst [vmem:[#allocation3 + $0xa0] sm:$0xff] %v2301_v41  ;;  %v2302_v43 = vadd.f32 %v2262_v12, %v1965_v1 }
 0x340   : > { %v2266_v54 = vpop.f32.mrf.mxu1 }
 0x341   : > { %2334 = vst [vmem:[#allocation3 + $0x20] sm:$0xff] %v2302_v43  ;;  %v2303_v25 = vadd.f32 %v2266_v54, %v1966_v60 }
 0x342   : > { %v2268_v5 = vpop.f32.mrf.mxu1 }
 0x343   : > { %2335 = vst [vmem:[#allocation3 + $0x8] sm:$0xff] %v2303_v25  ;;  %v2304_v56 = vadd.f32 %v2268_v5, %v1967_v23 }
 0x344   : > { %v2270_v26 = vpop.f32.mrf.mxu1 }
 0x345   : > { %2336 = vst [vmem:[#allocation3 + $0xe0] sm:$0xff] %v2304_v56  ;;  %v2305_v19 = vadd.f32 %v2270_v26, %v1968_v11  ;;  %2342 = sbr.rel (%p2873_p5) target bundleno = 858 (0x35a), region = 52 }
 0x346   : > { %v2272_v63 = vpop.f32.mrf.mxu1 }
 0x347   : > { %2337 = vst [vmem:[#allocation3 + $0x60] sm:$0xff] %v2305_v19  ;;  %v2306_v4 = vadd.f32 %v2272_v63, %v1969_v6 }
 0x349   : > { %2338 = vst [vmem:[#allocation3 + $0x98] sm:$0xff] %v2306_v4 }
 0x34a   : > { %v2343_v46 = vld [vmem:[#allocation3 + $0xa8] sm:$0xff]  ;;  %v2345_v28 = vld [vmem:[#allocation3 + $0x10] sm:$0xff]  ;;  %v2346_v13 = vld [vmem:[#allocation3 + $0xc0] sm:$0xff] }
 0x34b   : > { %v2344_v40 = vld [vmem:[#allocation3 + $0x68] sm:$0xff]  ;;  %v2348_v30 = vld [vmem:[#allocation3 + $0xb0] sm:$0xff]  ;;  %v2938_v57 = vpack.c.bf16 %v2346_v13, %v2345_v28  ;;  %v2350_v62 = vld [vmem:[#allocation3 + $0x38] sm:$0xff] }
 0x34c   : > { %v2937_v48 = vpack.c.bf16 %v2344_v40, %v2343_v46  ;;  %v2347_v2 = vld [vmem:[#allocation3 + $0xc8] sm:$0xff]  ;;  %v2349_v21 = vld [vmem:[#allocation3 + $0x70] sm:$0xff]  ;;  %v2352_v49 = vld [vmem:[#allocation3 + $0xf8] sm:$0xff] }
 0x34d   : > { %v2939_v35 = vpack.c.bf16 %v2348_v30, %v2347_v2  ;;  %v2351_v33 = vld [vmem:[#allocation3 + $0x48] sm:$0xff]  ;;  %v2940_v38 = vpack.c.bf16 %v2350_v62, %v2349_v21  ;;  %v2353_v34 = vld [vmem:[#allocation3 + $0x78] sm:$0xff]  ;;  %2472 = vst [vmem:[%s3721_s29 + $0x8] sm:$0xff] %v2938_v57  ;;  %v2355_v32 = vld [vmem:[#allocation3 + $0xf0] sm:$0xff] }
 0x34e   : > { %2471 = vst [vmem:[%s3721_s29] sm:$0xff] %v2937_v48  ;;  %v2354_v27 = vld [vmem:[#allocation3 + $0x88] sm:$0xff]  ;;  %v2941_v14 = vpack.c.bf16 %v2352_v49, %v2351_v33  ;;  %v2356_v18 = vld [vmem:[#allocation3 + $0x18] sm:$0xff]  ;;  %v2357_v50 = vld [vmem:[#allocation3 + $0x30] sm:$0xff] }
 0x34f   : > { %2473 = vst [vmem:[%s3721_s29 + $0x10] sm:$0xff] %v2939_v35  ;;  %v2942_v47 = vpack.c.bf16 %v2354_v27, %v2353_v34  ;;  %2474 = vst [vmem:[%s3721_s29 + $0x18] sm:$0xff] %v2940_v38  ;;  %v2943_v36 = vpack.c.bf16 %v2356_v18, %v2355_v32  ;;  %v2358_v45 = vld [vmem:[#allocation3 + $0x50] sm:$0xff]  ;;  %v2359_v8 = vld [vmem:[#allocation3 + $0xb8] sm:$0xff] }
 0x350   : > { %v2360_v31 = vld [vmem:[#allocation3 + $0xd0] sm:$0xff]  ;;  %2475 = vst [vmem:[%s3721_s29 + $0x20] sm:$0xff] %v2941_v14  ;;  %v2944_v51 = vpack.c.bf16 %v2358_v45, %v2357_v50  ;;  %v2361_v7 = vld [vmem:[#allocation3 + $0xd8] sm:$0xff]  ;;  %v2363_v39 = vld [vmem:[#allocation3 + $0x80] sm:$0xff] }
 0x351   : > { %2476 = vst [vmem:[%s3721_s29 + $0x28] sm:$0xff] %v2942_v47  ;;  %v2945_v52 = vpack.c.bf16 %v2360_v31, %v2359_v8  ;;  %v2362_v20 = vld [vmem:[#allocation3 + $0x58] sm:$0xff]  ;;  %2477 = vst [vmem:[%s3721_s29 + $0x30] sm:$0xff] %v2943_v36  ;;  %v2364_v9 = vld [vmem:[#allocation3 + $0x40] sm:$0xff] }
 0x352   : > { %v2946_v24 = vpack.c.bf16 %v2362_v20, %v2361_v7  ;;  %v2365_v42 = vld [vmem:[#allocation3 + $0x28] sm:$0xff]  ;;  %v2366_v37 = vld [vmem:[#allocation3] sm:$0xff]  ;;  %2478 = vst [vmem:[%s3721_s29 + $0x38] sm:$0xff] %v2944_v51  ;;  %v2947_v58 = vpack.c.bf16 %v2364_v9, %v2363_v39  ;;  %v2367_v53 = vld [vmem:[#allocation3 + $0x90] sm:$0xff] }
 0x353   : > { %2479 = vst [vmem:[%s3721_s29 + $0x40] sm:$0xff] %v2945_v52  ;;  %v2948_v55 = vpack.c.bf16 %v2366_v37, %v2365_v42  ;;  %v2368_v3 = vld [vmem:[#allocation3 + $0xe8] sm:$0xff]  ;;  %v2369_v0 = vld [vmem:[#allocation3 + $0xa0] sm:$0xff]  ;;  %v2374_v29 = vld [vmem:[#allocation3 + $0x98] sm:$0xff] }
 0x354   : > { %2480 = vst [vmem:[%s3721_s29 + $0x48] sm:$0xff] %v2946_v24  ;;  %v2949_v59 = vpack.c.bf16 %v2368_v3, %v2367_v53  ;;  %v2370_v22 = vld [vmem:[#allocation3 + $0x20] sm:$0xff]  ;;  %v2371_v44 = vld [vmem:[#allocation3 + $0x8] sm:$0xff]  ;;  %2481 = vst [vmem:[%s3721_s29 + $0x50] sm:$0xff] %v2947_v58 }
 0x355   : > { %v2372_v16 = vld [vmem:[#allocation3 + $0xe0] sm:$0xff]  ;;  %2482 = vst [vmem:[%s3721_s29 + $0x58] sm:$0xff] %v2948_v55  ;;  %v2950_v15 = vpack.c.bf16 %v2370_v22, %v2369_v0 }
 0x356   : > { %v2951_v61 = vpack.c.bf16 %v2372_v16, %v2371_v44  ;;  %v2373_v10 = vld [vmem:[#allocation3 + $0x60] sm:$0xff]  ;;  %2483 = vst [vmem:[%s3721_s29 + $0x60] sm:$0xff] %v2949_v59 }
 0x357   : > { %v2952_v17 = vpack.c.bf16 %v2374_v29, %v2373_v10  ;;  %2484 = vst [vmem:[%s3721_s29 + $0x68] sm:$0xff] %v2950_v15 }
 0x358   : > { %2485 = vst [vmem:[%s3721_s29 + $0x70] sm:$0xff] %v2951_v61 }
 0x359   : > { %2486 = vst [vmem:[%s3721_s29 + $0x78] sm:$0xff] %v2952_v17 }
 0x35a PF: > { %s2954_s23 = sshll.u32 %s3538_s25, 11  ;;  %s2507_s30 = sshll.u32 %s3721_s29, 4  ;;  %s4330_s30 = int_to_ptr.vmem [resolvable:$true] %s2507_s30 }
 0x35b   : > { %s4327_s18 = scalar_lea.hbm %s4425_s5, %s2954_s23  ;;  %s2488_s8 = scalar_lea.sflag [#allocation6], %s3692_s27 }
 0x35c   : > { %s3424_s13 = scalar_lea.vmem %s4330_s30, 2048  ;;  %s3556_s9 = smov [#allocation7]  }
 0x35d   : > { %p3425_p6 = scmp.ne.s32.totalorder %s4330_s30, %s3424_s13  ;;  %s3428_s19 = sshll.u32 %s3556_s9, 4  ;;  %s3429_s19 = int_to_ptr.vmem [resolvable:$false] %s3428_s19 }
 0x35e   : > { %s3430_s17 = scalar_lea.vmem %s3429_s19, 4096  ;;  %p3431_p12 = scmp.lt.s32.totalorder %s4330_s30, %s3429_s19 }
 0x35f   : > { %p3426_p7 = pnand %p3425_p6, %p3658_p10  ;;  %p3432_p3 = scmp.lt.s32.totalorder %s3430_s17, %s3424_s13 }
 0x361   : > { %p3427_p8 = pneg %p3426_p7  ;;  %p3433_p13 = por %p3432_p3, %p3431_p12 }
 0x363   : > { %p3434_p2 = pnand %p3433_p13, %p3427_p8 }
 0x365   : > { %3437 = shalt.err (!%p3434_p2)
}
 0x366   : > { %s3438_s10 = scalar_lea.hbm %s4327_s18, 2048  ;;  %s3442_s20 = scalar_lea.hbm %s4425_s5, 4096 }
 0x367   : > { %p3439_p0 = scmp.ne.s32.totalorder %s4327_s18, %s3438_s10  ;;  %p3443_p9 = scmp.lt.s32.totalorder %s4327_s18, %s4425_s5 }
 0x368   : > { %p3444_p5 = scmp.lt.s32.totalorder %s3442_s20, %s3438_s10 }
 0x369   : > { %p3440_p1 = pnand %p3439_p0, %p3658_p10 }
 0x36a   : > { %p3445_p6 = por %p3444_p5, %p3443_p9 }
 0x36b   : > { %p3441_p4 = pneg %p3440_p1 }
 0x36d   : > { %p3446_p7 = pnand %p3445_p6, %p3441_p4 }
 0x36f   : > { %3449 = shalt.err (!%p3446_p7)
}
 0x370   : > { %s3557_s26 = smov 128   ;;  %s3558_s24 = smov 8  }
 0x371   : > { %2991 = dma.vmem_to_hbm [thread:$0]  (%p3658_p10), %s4330_s30, 2048, %s4327_s18, %s2488_s8, %s3557_s26, %s3557_s26, %s3558_s24  }
 0x372   : > { %s4363_s9 = scalar_lea.hbm %s4426_s6, %s2954_s23  ;;  %s2524_s19 = sshll.u32 %s3723_s7, 4  ;;  %s4366_s19 = int_to_ptr.vmem [resolvable:$true] %s2524_s19 }
 0x373   : > { %s2493_s17 = scalar_lea.sflag [#allocation9], %s3692_s27  ;;  %s3450_s10 = scalar_lea.vmem %s4366_s19, 2048 }
 0x374   : > { %p3451_p8 = scmp.ne.s32.totalorder %s4366_s19, %s3450_s10  ;;  %s3559_s11 = smov [#allocation8]  }
 0x375   : > { %s3454_s18 = sshll.u32 %s3559_s11, 4  ;;  %s3455_s18 = int_to_ptr.vmem [resolvable:$false] %s3454_s18 }
 0x376   : > { %p3452_p12 = pnand %p3451_p8, %p3658_p10  ;;  %s3456_s25 = scalar_lea.vmem %s3455_s18, 4096 }
 0x377   : > { %p3457_p13 = scmp.lt.s32.totalorder %s4366_s19, %s3455_s18  ;;  %p3458_p2 = scmp.lt.s32.totalorder %s3456_s25, %s3450_s10 }
 0x378   : > { %p3453_p3 = pneg %p3452_p12 }
 0x379   : > { %p3459_p0 = por %p3458_p2, %p3457_p13 }
 0x37b   : > { %p3460_p1 = pnand %p3459_p0, %p3453_p3 }
 0x37d   : > { %3463 = shalt.err (!%p3460_p1)
}
 0x37e   : > { %s3464_s7 = scalar_lea.hbm %s4363_s9, 2048  ;;  %s3468_s30 = scalar_lea.hbm %s4426_s6, 4096 }
 0x37f   : > { %p3465_p4 = scmp.ne.s32.totalorder %s4363_s9, %s3464_s7  ;;  %p3469_p6 = scmp.lt.s32.totalorder %s4363_s9, %s4426_s6 }
 0x380   : > { %p3470_p7 = scmp.lt.s32.totalorder %s3468_s30, %s3464_s7 }
 0x381   : > { %p3466_p9 = pnand %p3465_p4, %p3658_p10 }
 0x382   : > { %p3471_p8 = por %p3470_p7, %p3469_p6 }
 0x383   : > { %p3467_p5 = pneg %p3466_p9 }
 0x385   : > { %p3472_p12 = pnand %p3471_p8, %p3467_p5 }
 0x387   : > { %3475 = shalt.err (!%p3472_p12)
}
 0x388   : > { %2992 = dma.vmem_to_hbm [thread:$0]  (%p3658_p10), %s4366_s19, 2048, %s4363_s9, %s2493_s17, %s3557_s26, %s3557_s26, %s3558_s24  }
 0x389 PF: > { %p3007_p3 = scmp.ge.s32.totalorder %s3550_s28, 2  ;;  %s2539_s20 = sand.u32 1, %s3522_s21  }
 0x38a   : > { %s2540_s29 = scalar_lea.sflag [#allocation6], %s2539_s20 }
 0x38b   : > { %p3000_p13 = pnand %p3007_p3, %p3664_p11 }
 0x38d   : > { %p3001_p2 = pneg %p3000_p13 }
 0x38f   : > { %3513 = dma.done.wait (%p3001_p2), %s2540_s29, 2048  }
 0x390   : > { %3515 = vsyncadd (%p3001_p2), %s2540_s29, 4294965248  ;;  %s2549_s1 = scalar_lea.sflag [#allocation9], %s2539_s20 }
 0x391   : > { %3517 = dma.done.wait (%p3001_p2), %s2549_s1, 2048  }
 0x392   : > { %3519 = vsyncadd (%p3001_p2), %s2549_s1, 4294965248  ;;  %s26_s28 = sadd.s32 1, %s3550_s28   ;;  %s4444_s12 = sld [smem:[#allocation13_spill]] }
 0x393   : > { %p23_p0 = scmp.ge.s32.totalorder %s26_s28, 6   ;;  %s4445_s23 = sld [smem:[#allocation18_spill]] }
 0x394   : > { %s4446_s24 = sld [smem:[#allocation14_spill]]  ;;  %s4450_s21 = smov %s3526_s22 }
 0x395   : > { %s4447_s25 = sld [smem:[#allocation15_spill]]  ;;  %25 = sbr.rel (!%p23_p0) target bundleno = 11 (0xb), region = 119 }
 0x396   : > { %s4448_s26 = sld [smem:[#allocation16_spill]] }
 0x397   : > { %s4449_s27 = sld [smem:[#allocation17_spill]] }
 0x398   : > { %s4451_s22 = smov %s4444_s12 }
 0x39a   :  { %2554 = vsyncpa [#allocation5], 1 }
 0x39b   :  { %2556 = vsyncpa [#allocation5 + $0x1], 1 }
 0x39c   :  { %2557 = vsyncpa [#allocation6], 1 }
 0x39d   :  { %2559 = vsyncpa [#allocation6 + $0x1], 1 }
 0x39e   :  { %2560 = vsyncpa [#allocation9], 1 }
 0x39f   :  { %2562 = vsyncpa [#allocation9 + $0x1], 1 }

// kernel: qwen3_decoder_layer.3
= control target key start
LH: loop header
LB: loop body
LE: loop exit
PB: predicated region body
PF: predicated region fallthrough
CT: control target
= control target key end

     0   :  { %s9277_s0 = inlined_call_operand.vmem [shape: bf16[256,256], index: 0, kind: input, shape index: {}]   ;;  %s9278_s1 = inlined_call_operand.vmem [shape: f32[1,256], index: 1, kind: input, shape index: {}]   ;;  %s9279_s2 = inlined_call_operand.vmem [shape: bf16[256,1024], index: 2, kind: input, shape index: {}]   ;;  %s9280_s3 = inlined_call_operand.vmem [shape: f32[1,128], index: 3, kind: input, shape index: {}]   ;;  %s9281_s4 = inlined_call_operand.vmem [shape: f32[1,128], index: 4, kind: input, shape index: {}]   ;;  %s9282_s5 = inlined_call_operand.vmem [shape: f32[256,128], index: 5, kind: input, shape index: {}]   ;;  %s9283_s6 = inlined_call_operand.vmem [shape: f32[256,128], index: 6, kind: input, shape index: {}]   ;;  %s9284_s7 = inlined_call_operand.vmem [shape: bf16[4,256,128], index: 7, kind: output, shape index: {0}]   ;;  %s9285_s8 = inlined_call_operand.vmem [shape: bf16[2,256,128], index: 8, kind: output, shape index: {1}]   ;;  %s9286_s9 = inlined_call_operand.vmem [shape: bf16[2,256,128], index: 9, kind: output, shape index: {2}]   ;;  %s9287_s10 = inlined_call_operand.hbm [shape: bf16[256,256], index: 10, kind: output, shape index: {3}]  }
   0x1   :  { %9428 = sst [smem:[#allocation91_spill]] %s9277_s0 }
   0x2   :  { %16 = vsyncpa [#allocation7], 0 }
   0x3   :  { %18 = vsyncpa [#allocation7 + $0x1], 0  ;;  %s6436_s13 = smov 0   ;;  %s6438_s14 = smov 0  }
   0x4   :  { %s6440_s15 = smov 0   ;;  %s6442_s16 = smov 0  }
   0x5 LB: > { %9429 = sst [smem:[#allocation9_spill]] %s6371_s15  ;;  %s6457_s17 = sadd.s32 4294967295, %s6375_s16   ;;  %s6375_s16 = sphi %s6442_s16, %s9708_s16   ;;  %s6371_s15 = sphi %s6440_s15, %s9705_s15   ;;  %s6367_s14 = sphi %s6438_s14, %s9707_s14   ;;  %s6363_s13 = sphi %s6436_s13, %s9706_s13  }
   0x6   : > { %s5161_s18 = sadd.s32 4294967294, %s6375_s16   ;;  %s6461_s19 = sadd.s32 1, %s6375_s16  }
   0x7   : > { %s193_s20 = sadd.s32 1, %s6371_s15  ;;  %s190_s21 = ssub.s32 %s6375_s16, %s6461_s19 }
   0x8   : > { %p203_p0 = scmp.ne.s32.totalorder %s6371_s15, %s6367_s14  ;;  %p191_p1 = scmp.eq.s32.totalorder %s190_s21, 0 }
   0x9   : > { %p204_p2 = scmp.eq.s32.totalorder %s6457_s17, 1  ;;  %p287_p3 = scmp.ne.s32.totalorder %s6367_s14, %s6363_s13 }
   0xa   : > { %p288_p4 = scmp.eq.s32.totalorder %s5161_s18, 1  ;;  %p5164_p7 = scmp.ge.s32.totalorder %s6375_s16, 1 }
   0xb   : > { %s6472_s22 = scalar_select %p191_p1, %s6371_s15, %s193_s20  }
   0xc   : > { %p6474_p5 = por %p204_p2, %p203_p0  ;;  %p6478_p6 = por %p288_p4, %p287_p3 }
   0xd   : > { %9430 = sst [smem:[#allocation10_spill]] %s6472_s22  ;;  %p346_p8 = scmp.lt.s32.totalorder %s6375_s16, 3 }
   0xf   : > { %p347_p9 = pnand %p5164_p7, %p346_p8 }
  0x11   : > { %350 = sbr.rel (%p347_p9) target bundleno = 978 (0x3d2), region = 48 }
  0x16   : > { %s5169_s25 = sshll.u32 %s6457_s17, 4  ;;  %v771_v0 = vld [vmem:[%s9279_s2 + $0x1c0] sm:$0xff]  ;;  %v772_v2 = vld [vmem:[%s9279_s2 + $0x1c8] sm:$0xff]  ;;  %s6495_s12 = sand.u32 1, %s6367_s14  }
  0x17   : > { %v775_v1 = vld [vmem:[%s9279_s2 + $0x1e0] sm:$0xff]  ;;  %p408_p10 = scmp.lt.s32.totalorder %s5169_s25, 31  ;;  %v776_v4 = vld [vmem:[%s9279_s2 + $0x1e8] sm:$0xff]  ;;  %s6533_s22 = sshll.u32 %s6495_s12, 7 }
  0x18   : > { %v5233_v3 = vcombine.high %v771_v0, %v775_v1  ;;  %v5232_v5 = vcombine.low %v771_v0, %v775_v1  ;;  %v763_v6 = vld [vmem:[%s9279_s2 + $0x180] sm:$0xff]  ;;  %v5235_v8 = vcombine.high %v772_v2, %v776_v4  ;;  %v5234_v9 = vcombine.low %v772_v2, %v776_v4  ;;  %v764_v11 = vld [vmem:[%s9279_s2 + $0x188] sm:$0xff]  ;;  %s9433_s0 = sld [smem:[#allocation91_spill]]  ;;  %s7563_s26 = scalar_lea.vmem [#allocation5], %s6533_s22 }
  0x19   : > { %v767_v7 = vld [vmem:[%s9279_s2 + $0x1a0] sm:$0xff]  ;;  %v768_v12 = vld [vmem:[%s9279_s2 + $0x1a8] sm:$0xff]  ;;  %s9710_s25 = smov (!%p408_p10, %s5169_s25), 31  ;;  %s6377_s30 = smov 64  }
  0x1a   : > { %v5225_v10 = vcombine.high %v763_v6, %v767_v7  ;;  %v6515_v13 = vld [vmem:[%s9279_s2 + $0x140] sm:$0xff]  ;;  %1483 = vmatprep.subr.bf16.mxu0 %v5233_v3  ;;  %v5227_v14 = vcombine.high %v764_v11, %v768_v12  ;;  %v6525_v16 = vld [vmem:[%s9279_s2 + $0x148] sm:$0xff]  ;;  %1596 = vmatprep.subr.bf16.mxu1 %v5235_v8  ;;  %v5224_v18 = vcombine.low %v763_v6, %v767_v7  ;;  %s6550_s28 = sshll.u32 %s9710_s25, 3  ;;  %s6611_s25 = scalar_lea.vmem [#allocation6], %s6533_s22 }
  0x1b   : > { %v6520_v15 = vld [vmem:[%s9279_s2 + $0x160] sm:$0xff]  ;;  %v6530_v17 = vld [vmem:[%s9279_s2 + $0x168] sm:$0xff]  ;;  %1484 = vmatpush1.bf16.msra.mxu0 %v5232_v5  ;;  %1597 = vmatpush1.bf16.msra.mxu1 %v5234_v9  ;;  %v5226_v22 = vcombine.low %v764_v11, %v768_v12  ;;  %s8367_s20 = scalar_lea.vmem %s9282_s5, %s6550_s28  ;;  %s8474_s15 = scalar_lea.vmem %s9283_s6, %s6550_s28 }
  0x1c   : > { %v6538_v19 = vld [vmem:[%s9279_s2 + $0x100] sm:$0xff]  ;;  %v6548_v21 = vld [vmem:[%s9279_s2 + $0x108] sm:$0xff]  ;;  %1485 = vmatprep.subr.bf16.mxu0 %v5225_v10  ;;  %v5217_v23 = vcombine.high %v6515_v13, %v6520_v15  ;;  %v5219_v24 = vcombine.high %v6525_v16, %v6530_v17  ;;  %1598 = vmatprep.subr.bf16.mxu1 %v5227_v14  ;;  %v5216_v28 = vcombine.low %v6515_v13, %v6520_v15  ;;  %s5658_s18 = sshll.u32 (%p6474_p5), %s6457_s17, 6 }
  0x1d   : > { %v6543_v20 = vld [vmem:[%s9279_s2 + $0x120] sm:$0xff]  ;;  %v6559_v25 = vld [vmem:[%s9279_s2 + $0x128] sm:$0xff]  ;;  %v5218_v29 = vcombine.low %v6525_v16, %v6530_v17 }
  0x1e   : > { %v6564_v26 = vld [vmem:[%s9279_s2 + $0xc0] sm:$0xff]  ;;  %s6575_s27 = scalar_lea.vmem %s9433_s0, %s6550_s28  ;;  %v5209_v30 = vcombine.high %v6538_v19, %v6543_v20  ;;  %v5208_v31 = vcombine.low %v6538_v19, %v6543_v20  ;;  %v6588_v32 = vld [vmem:[%s9279_s2 + $0xc8] sm:$0xff]  ;;  %v5211_v37 = vcombine.high %v6548_v21, %v6559_v25  ;;  %v5210_v38 = vcombine.low %v6548_v21, %v6559_v25  ;;  %s5165_s28 = sshll.u32 %s6495_s12, 8 }
  0x1f   : > { %v6569_v27 = vld [vmem:[%s9279_s2 + $0xe0] sm:$0xff]  ;;  %v6593_v33 = vld [vmem:[%s9279_s2 + $0xe8] sm:$0xff]  ;;  %v432_v36 = vld [vmem:[%s6575_s27 + $0x10] sm:$0xff]  ;;  %1486 = vmatpush1.bf16.msra.mxu0 %v5224_v18  ;;  %1599 = vmatpush1.bf16.msra.mxu1 %v5226_v22  ;;  %s8587_s11 = scalar_lea.vmem [#allocation3], %s5165_s28 }
  0x20   : > { %v430_v34 = vld [vmem:[%s6575_s27] sm:$0xff]  ;;  %v431_v35 = vld [vmem:[%s6575_s27 + $0x8] sm:$0xff]  ;;  %v5201_v39 = vcombine.high %v6564_v26, %v6569_v27  ;;  %v5203_v40 = vcombine.high %v6588_v32, %v6593_v33  ;;  %480 = vst [vmem:[%s6611_s25 + $0x10] sm:$0xff] %v432_v36  ;;  %v433_v45 = vld [vmem:[%s6575_s27 + $0x18] sm:$0xff]  ;;  %v6623_v48 = vunpack.c.l.bf16 %v432_v36  ;;  %v6625_v49 = vunpack.c.h.bf16 %v432_v36  ;;  %1487 = vmatprep.subr.bf16.mxu0 %v5217_v23  ;;  %1600 = vmatprep.subr.bf16.mxu1 %v5219_v24 }
  0x21   : > { %v6606_v41 = vunpack.c.l.bf16 %v430_v34  ;;  %v6608_v42 = vunpack.c.h.bf16 %v430_v34  ;;  %478 = vst [vmem:[%s6611_s25] sm:$0xff] %v430_v34  ;;  %v6614_v43 = vunpack.c.l.bf16 %v431_v35  ;;  %v6616_v44 = vunpack.c.h.bf16 %v431_v35  ;;  %479 = vst [vmem:[%s6611_s25 + $0x8] sm:$0xff] %v431_v35  ;;  %v435_v46 = vld [vmem:[%s6575_s27 + $0x28] sm:$0xff]  ;;  %v434_v47 = vld [vmem:[%s6575_s27 + $0x20] sm:$0xff] }
  0x22   : > { %v6627_v50 = vunpack.c.l.bf16 %v433_v45  ;;  %v6629_v51 = vunpack.c.h.bf16 %v433_v45  ;;  %481 = vst [vmem:[%s6611_s25 + $0x18] sm:$0xff] %v433_v45  ;;  %483 = vst [vmem:[%s6611_s25 + $0x28] sm:$0xff] %v435_v46  ;;  %v437_v52 = vld [vmem:[%s6575_s27 + $0x38] sm:$0xff]  ;;  %v436_v53 = vld [vmem:[%s6575_s27 + $0x30] sm:$0xff]  ;;  %v498_v62 = vmul.f32 %v6623_v48, %v6623_v48  ;;  %v499_v63 = vmul.f32 %v6625_v49, %v6625_v49 }
  0x23   : > { %482 = vst [vmem:[%s6611_s25 + $0x20] sm:$0xff] %v434_v47  ;;  %v6637_v54 = vld [vmem:[%s6575_s27 + $0x48] sm:$0xff]  ;;  %v494_v55 = vmul.f32 %v6606_v41, %v6606_v41  ;;  %v495_v56 = vmul.f32 %v6608_v42, %v6608_v42  ;;  %v496_v57 = vmul.f32 %v6614_v43, %v6614_v43  ;;  %v497_v58 = vmul.f32 %v6616_v44, %v6616_v44  ;;  %v438_v59 = vld [vmem:[%s6575_s27 + $0x40] sm:$0xff]  ;;  %v6653_v60 = vld [vmem:[%s6575_s27 + $0x58] sm:$0xff] }
  0x24   : > { %485 = vst [vmem:[%s6611_s25 + $0x38] sm:$0xff] %v437_v52  ;;  %484 = vst [vmem:[%s6611_s25 + $0x30] sm:$0xff] %v436_v53  ;;  %v6656_v61 = vld [vmem:[%s6575_s27 + $0x50] sm:$0xff]  ;;  %v500_v0 = vmul.f32 %v6627_v50, %v6627_v50  ;;  %v501_v1 = vmul.f32 %v6629_v51, %v6629_v51  ;;  %v6672_v2 = vld [vmem:[%s6575_s27 + $0x68] sm:$0xff]  ;;  %v6680_v7 = vunpack.c.l.bf16 %v435_v46  ;;  %v6682_v8 = vunpack.c.h.bf16 %v435_v46  ;;  %1488 = vmatpush1.bf16.msra.mxu0 %v5216_v28 }
  0x25   : > { %487 = vst [vmem:[%s6611_s25 + $0x48] sm:$0xff] %v6637_v54  ;;  %486 = vst [vmem:[%s6611_s25 + $0x40] sm:$0xff] %v438_v59  ;;  %v6675_v3 = vld [vmem:[%s6575_s27 + $0x60] sm:$0xff]  ;;  %v6678_v4 = vld [vmem:[%s6575_s27 + $0x78] sm:$0xff]  ;;  %v526_v5 = vadd.f32 %v495_v56, %v494_v55  ;;  %v529_v6 = vadd.f32 %v497_v58, %v496_v57  ;;  %v532_v10 = vadd.f32 %v499_v63, %v498_v62  ;;  %v6696_v12 = vunpack.c.l.bf16 %v434_v47 }
  0x26   : > { %489 = vst [vmem:[%s6611_s25 + $0x58] sm:$0xff] %v6653_v60  ;;  %488 = vst [vmem:[%s6611_s25 + $0x50] sm:$0xff] %v6656_v61  ;;  %v6691_v9 = vld [vmem:[%s6575_s27 + $0x70] sm:$0xff]  ;;  %v535_v11 = vadd.f32 %v501_v1, %v500_v0  ;;  %v6698_v14 = vunpack.c.h.bf16 %v434_v47  ;;  %1601 = vmatpush1.bf16.msra.mxu1 %v5218_v29  ;;  %1489 = vmatprep.subr.bf16.mxu0 %v5209_v30  ;;  %v504_v13 = vmul.f32 %v6680_v7, %v6680_v7  ;;  %v732_v55 = vld [vmem:[%s9279_s2 + $0x88] sm:$0xff]  ;;  %s9122_s27 = scalar_lea.vmem (%p6474_p5), %s9284_s7, %s5658_s18 }
  0x27   : > { %491 = vst [vmem:[%s6611_s25 + $0x68] sm:$0xff] %v6672_v2  ;;  %490 = vst [vmem:[%s6611_s25 + $0x60] sm:$0xff] %v6675_v3  ;;  %527 = vadd.xlane.f32.xlu0 %v526_v5  ;;  %v505_v15 = vmul.f32 %v6682_v8, %v6682_v8  ;;  %v6712_v18 = vunpack.c.l.bf16 %v437_v52  ;;  %v6714_v22 = vunpack.c.h.bf16 %v437_v52  ;;  %1602 = vmatprep.subr.bf16.mxu1 %v5211_v37  ;;  %v6723_v23 = vunpack.c.l.bf16 %v436_v53  ;;  %v731_v52 = vld [vmem:[%s9279_s2 + $0x80] sm:$0xff]  ;;  %v736_v56 = vld [vmem:[%s9279_s2 + $0xa8] sm:$0xff] }
  0x28   : > { %493 = vst [vmem:[%s6611_s25 + $0x78] sm:$0xff] %v6678_v4  ;;  %492 = vst [vmem:[%s6611_s25 + $0x70] sm:$0xff] %v6691_v9  ;;  %533 = vadd.xlane.f32.xlu1 %v532_v10  ;;  %v502_v16 = vmul.f32 %v6696_v12, %v6696_v12  ;;  %v503_v17 = vmul.f32 %v6698_v14, %v6698_v14  ;;  %v6725_v24 = vunpack.c.h.bf16 %v436_v53  ;;  %1490 = vmatpush1.bf16.msra.mxu0 %v5208_v31  ;;  %v735_v53 = vld [vmem:[%s9279_s2 + $0xa0] sm:$0xff] }
  0x29   : > { %v508_v28 = vmul.f32 %v6712_v18, %v6712_v18  ;;  %v5200_v29 = vcombine.low %v6564_v26, %v6569_v27  ;;  %v5202_v30 = vcombine.low %v6588_v32, %v6593_v33  ;;  %v509_v34 = vmul.f32 %v6714_v22, %v6714_v22  ;;  %1491 = vmatprep.subr.bf16.mxu0 %v5201_v39 }
  0x2a   : > { %v506_v35 = vmul.f32 %v6723_v23, %v6723_v23  ;;  %v507_v36 = vmul.f32 %v6725_v24, %v6725_v24  ;;  %1603 = vmatpush1.bf16.msra.mxu1 %v5210_v38  ;;  %v538_v19 = vadd.f32 %v503_v17, %v502_v16  ;;  %v6748_v20 = vunpack.c.l.bf16 %v438_v59 }
  0x2b   : > { %530 = vadd.xlane.f32.xlu0 %v529_v6  ;;  %v6750_v31 = vunpack.c.h.bf16 %v438_v59  ;;  %1604 = vmatprep.subr.bf16.mxu1 %v5203_v40  ;;  %v541_v37 = vadd.f32 %v505_v15, %v504_v13  ;;  %v6756_v45 = vunpack.c.l.bf16 %v6637_v54  ;;  %v6759_v21 = vunpack.c.h.bf16 %v6637_v54 }
  0x2c   : > { %536 = vadd.xlane.f32.xlu1 %v535_v11  ;;  %1492 = vmatpush1.bf16.msra.mxu0 %v5200_v29  ;;  %v547_v25 = vadd.f32 %v509_v34, %v508_v28  ;;  %v544_v26 = vadd.f32 %v507_v36, %v506_v35  ;;  %v510_v27 = vmul.f32 %v6748_v20, %v6748_v20  ;;  %v6766_v33 = vunpack.c.l.bf16 %v6656_v61  ;;  %v715_v28 = vld [vmem:[%s9279_s2] sm:$0xff] }
  0x2d   : > { %v511_v32 = vmul.f32 %v6750_v31, %v6750_v31  ;;  %v6769_v38 = vunpack.c.h.bf16 %v6656_v61  ;;  %v512_v39 = vmul.f32 %v6756_v45, %v6756_v45  ;;  %v513_v40 = vmul.f32 %v6759_v21, %v6759_v21  ;;  %v727_v61 = vld [vmem:[%s9279_s2 + $0x60] sm:$0xff] }
  0x2e   : > { %1605 = vmatpush1.bf16.msra.mxu1 %v5202_v30  ;;  %v6776_v46 = vunpack.c.l.bf16 %v6653_v60  ;;  %v6779_v47 = vunpack.c.h.bf16 %v6653_v60  ;;  %v6788_v54 = vunpack.c.l.bf16 %v6672_v2  ;;  %v6797_v57 = vunpack.c.h.bf16 %v6672_v2  ;;  %v723_v60 = vld [vmem:[%s9279_s2 + $0x40] sm:$0xff]  ;;  %v724_v2 = vld [vmem:[%s9279_s2 + $0x48] sm:$0xff] }
  0x2f   : > { %539 = vadd.xlane.f32.xlu0 %v538_v19  ;;  %v6800_v58 = vunpack.c.l.bf16 %v6675_v3  ;;  %v6803_v59 = vunpack.c.h.bf16 %v6675_v3  ;;  %v550_v62 = vadd.f32 %v511_v32, %v510_v27  ;;  %v514_v63 = vmul.f32 %v6766_v33, %v6766_v33  ;;  %v728_v3 = vld [vmem:[%s9279_s2 + $0x68] sm:$0xff]  ;;  %v719_v36 = vld [vmem:[%s9279_s2 + $0x20] sm:$0xff] }
  0x30   : > { %542 = vadd.xlane.f32.xlu1 %v541_v37  ;;  %v515_v0 = vmul.f32 %v6769_v38, %v6769_v38  ;;  %v5193_v1 = vcombine.high %v731_v52, %v735_v53  ;;  %v553_v5 = vadd.f32 %v513_v40, %v512_v39  ;;  %v516_v6 = vmul.f32 %v6776_v46, %v6776_v46  ;;  %v716_v19 = vld [vmem:[%s9279_s2 + $0x8] sm:$0xff] }
  0x31   : > { %v517_v10 = vmul.f32 %v6779_v47, %v6779_v47  ;;  %v5195_v11 = vcombine.high %v732_v55, %v736_v56  ;;  %v520_v13 = vmul.f32 %v6788_v54, %v6788_v54  ;;  %v5192_v15 = vcombine.low %v731_v52, %v735_v53  ;;  %v720_v37 = vld [vmem:[%s9279_s2 + $0x28] sm:$0xff] }
  0x32   : > { %1493 = vmatprep.subr.bf16.mxu0 %v5193_v1  ;;  %v5194_v16 = vcombine.low %v732_v55, %v736_v56  ;;  %v5185_v17 = vcombine.high %v723_v60, %v727_v61  ;;  %v521_v29 = vmul.f32 %v6797_v57, %v6797_v57  ;;  %v518_v30 = vmul.f32 %v6800_v58, %v6800_v58 }
  0x33   : > { %545 = vadd.xlane.f32.xlu0 %v544_v26  ;;  %v519_v34 = vmul.f32 %v6803_v59, %v6803_v59  ;;  %1606 = vmatprep.subr.bf16.mxu1 %v5195_v11  ;;  %v5187_v35 = vcombine.high %v724_v2, %v728_v3  ;;  %v6846_v26 = vunpack.c.l.bf16 %v6691_v9  ;;  %v6849_v27 = vunpack.c.h.bf16 %v6691_v9  ;;  %v835_v9 = vld [vmem:[%s9279_s2 + $0x3c0] sm:$0xff] }
  0x34   : > { %548 = vadd.xlane.f32.xlu1 %v547_v25  ;;  %v556_v25 = vadd.f32 %v515_v0, %v514_v63  ;;  %1494 = vmatpush1.bf16.msra.mxu0 %v5192_v15  ;;  %v5184_v32 = vcombine.low %v723_v60, %v727_v61  ;;  %v559_v39 = vadd.f32 %v517_v10, %v516_v6  ;;  %v6852_v40 = vunpack.c.l.bf16 %v6678_v4  ;;  %v839_v61 = vld [vmem:[%s9279_s2 + $0x3e0] sm:$0xff]  ;;  %v840_v63 = vld [vmem:[%s9279_s2 + $0x3e8] sm:$0xff] }
  0x35   : > { %v6855_v52 = vunpack.c.h.bf16 %v6678_v4  ;;  %1607 = vmatpush1.bf16.msra.mxu1 %v5194_v16  ;;  %v5186_v53 = vcombine.low %v724_v2, %v728_v3  ;;  %1495 = vmatprep.subr.bf16.mxu0 %v5185_v17  ;;  %v5177_v55 = vcombine.high %v715_v28, %v719_v36  ;;  %v5179_v56 = vcombine.high %v716_v19, %v720_v37  ;;  %v836_v4 = vld [vmem:[%s9279_s2 + $0x3c8] sm:$0xff]  ;;  %v831_v15 = vld [vmem:[%s9279_s2 + $0x3a0] sm:$0xff] }
  0x36   : > { %1608 = vmatprep.subr.bf16.mxu1 %v5187_v35  ;;  %v562_v60 = vadd.f32 %v519_v34, %v518_v30  ;;  %v522_v0 = vmul.f32 %v6846_v26, %v6846_v26  ;;  %v523_v1 = vmul.f32 %v6849_v27, %v6849_v27  ;;  %v5176_v2 = vcombine.low %v715_v28, %v719_v36  ;;  %v828_v16 = vld [vmem:[%s9279_s2 + $0x388] sm:$0xff] }
  0x37   : > { %551 = vadd.xlane.f32.xlu0 %v550_v62  ;;  %v565_v62 = vadd.f32 %v521_v29, %v520_v13  ;;  %v524_v3 = vmul.f32 %v6852_v40, %v6852_v40  ;;  %v5178_v6 = vcombine.low %v716_v19, %v720_v37  ;;  %v5297_v10 = vcombine.high %v835_v9, %v839_v61  ;;  %v827_v13 = vld [vmem:[%s9279_s2 + $0x380] sm:$0xff]  ;;  %v832_v17 = vld [vmem:[%s9279_s2 + $0x3a8] sm:$0xff] }
  0x38   : > { %554 = vadd.xlane.f32.xlu1 %v553_v5  ;;  %1496 = vmatpush1.bf16.msra.mxu0 %v5184_v32  ;;  %v525_v5 = vmul.f32 %v6855_v52, %v6855_v52  ;;  %v5299_v11 = vcombine.high %v836_v4, %v840_v63  ;;  %v568_v28 = vadd.f32 %v523_v1, %v522_v0  ;;  %v819_v19 = vld [vmem:[%s9279_s2 + $0x340] sm:$0xff]  ;;  %v824_v32 = vld [vmem:[%s9279_s2 + $0x368] sm:$0xff] }
  0x39   : > { %1609 = vmatpush1.bf16.msra.mxu1 %v5186_v53  ;;  %1497 = vmatprep.subr.bf16.mxu0 %v5177_v55  ;;  %v5296_v29 = vcombine.low %v835_v9, %v839_v61  ;;  %v5298_v34 = vcombine.low %v836_v4, %v840_v63  ;;  %v5289_v35 = vcombine.high %v827_v13, %v831_v15  ;;  %v823_v37 = vld [vmem:[%s9279_s2 + $0x360] sm:$0xff]  ;;  %v816_v61 = vld [vmem:[%s9279_s2 + $0x328] sm:$0xff] }
  0x3a   : > { %1610 = vmatprep.subr.bf16.mxu1 %v5179_v56  ;;  %v571_v30 = vadd.f32 %v525_v5, %v524_v3  ;;  %v5291_v36 = vcombine.high %v828_v16, %v832_v17  ;;  %v5290_v53 = vcombine.low %v828_v16, %v832_v17  ;;  %v5281_v55 = vcombine.high %v819_v19, %v823_v37  ;;  %v811_v9 = vld [vmem:[%s9279_s2 + $0x300] sm:$0xff]  ;;  %v804_v5 = vld [vmem:[%s9279_s2 + $0x2c8] sm:$0xff] }
  0x3b   : > { %557 = vadd.xlane.f32.xlu0 %v556_v25  ;;  %v820_v25 = vld [vmem:[%s9279_s2 + $0x348] sm:$0xff]  ;;  %v5280_v4 = vcombine.low %v819_v19, %v823_v37  ;;  %v807_v3 = vld [vmem:[%s9279_s2 + $0x2e0] sm:$0xff] }
  0x3c   : > { %560 = vadd.xlane.f32.xlu1 %v559_v39  ;;  %1498 = vmatpush1.bf16.msra.mxu0 %v5176_v2  ;;  %v5288_v39 = vcombine.low %v827_v13, %v831_v15  ;;  %v5283_v56 = vcombine.high %v820_v25, %v824_v32  ;;  %v5282_v63 = vcombine.low %v820_v25, %v824_v32  ;;  %v803_v2 = vld [vmem:[%s9279_s2 + $0x2c0] sm:$0xff]  ;;  %v6933_v13 = vld [vmem:[%s9279_s2 + $0x1f0] sm:$0xff]  ;;  %v6938_v15 = vld [vmem:[%s9279_s2 + $0x1d8] sm:$0xff] }
  0x3d   : > { %1611 = vmatpush1.bf16.msra.mxu1 %v5178_v6  ;;  %1499 = vmatprep.subr.bf16.mxu0 %v5297_v10  ;;  %v808_v6 = vld [vmem:[%s9279_s2 + $0x2e8] sm:$0xff]  ;;  %v5265_v17 = vcombine.high %v803_v2, %v807_v3  ;;  %v5264_v25 = vcombine.low %v803_v2, %v807_v3 }
  0x3e   : > { %1612 = vmatprep.subr.bf16.mxu1 %v5299_v11  ;;  %v6928_v11 = vld [vmem:[%s9279_s2 + $0x1d0] sm:$0xff]  ;;  %v796_v19 = vld [vmem:[%s9279_s2 + $0x288] sm:$0xff]  ;;  %v5266_v32 = vcombine.low %v804_v5, %v808_v6 }
  0x3f   : > { %563 = vadd.xlane.f32.xlu0 %v562_v60  ;;  %v812_v60 = vld [vmem:[%s9279_s2 + $0x308] sm:$0xff] }
  0x40   : > { %566 = vadd.xlane.f32.xlu1 %v565_v62  ;;  %1500 = vmatpush2.bf16.msra.mxu0 %v5296_v29  ;;  %v815_v62 = vld [vmem:[%s9279_s2 + $0x320] sm:$0xff]  ;;  %v5275_v1 = vcombine.high %v812_v60, %v816_v61  ;;  %v5274_v16 = vcombine.low %v812_v60, %v816_v61  ;;  %v5267_v29 = vcombine.high %v804_v5, %v808_v6  ;;  %v800_v37 = vld [vmem:[%s9279_s2 + $0x2a8] sm:$0xff] }
  0x41   : > { %1613 = vmatpush2.bf16.msra.mxu1 %v5298_v34  ;;  %1501 = vmatprep.subr.bf16.mxu0 %v5289_v35  ;;  %v5273_v0 = vcombine.high %v811_v9, %v815_v62  ;;  %v5272_v10 = vcombine.low %v811_v9, %v815_v62  ;;  %v799_v34 = vld [vmem:[%s9279_s2 + $0x2a0] sm:$0xff]  ;;  %v5236_v35 = vcombine.low %v6928_v11, %v6933_v13  ;;  %v788_v9 = vld [vmem:[%s9279_s2 + $0x248] sm:$0xff] }
  0x42   : > { %1614 = vmatprep.subr.bf16.mxu1 %v5291_v36  ;;  %v792_v62 = vld [vmem:[%s9279_s2 + $0x268] sm:$0xff]  ;;  %v5258_v61 = vcombine.low %v796_v19, %v800_v37 }
  0x43   : > { %569 = vadd.xlane.f32.xlu0 %v568_v28  ;;  %v6943_v28 = vld [vmem:[%s9279_s2 + $0x1f8] sm:$0xff]  ;;  %v780_v2 = vld [vmem:[%s9279_s2 + $0x208] sm:$0xff]  ;;  %v5250_v6 = vcombine.low %v788_v9, %v792_v62 }
  0x44   : > { %572 = vadd.xlane.f32.xlu1 %v571_v30  ;;  %1502 = vmatpush2.bf16.msra.mxu0 %v5288_v39  ;;  %v795_v30 = vld [vmem:[%s9279_s2 + $0x280] sm:$0xff]  ;;  %v5238_v36 = vcombine.low %v6938_v15, %v6943_v28  ;;  %v784_v3 = vld [vmem:[%s9279_s2 + $0x228] sm:$0xff] }
  0x45   : > { %1615 = vmatpush2.bf16.msra.mxu1 %v5290_v53  ;;  %1503 = vmatprep.subr.bf16.mxu0 %v5281_v55  ;;  %v5257_v39 = vcombine.high %v795_v30, %v799_v34  ;;  %v5259_v53 = vcombine.high %v796_v19, %v800_v37  ;;  %v787_v55 = vld [vmem:[%s9279_s2 + $0x240] sm:$0xff]  ;;  %v5256_v60 = vcombine.low %v795_v30, %v799_v34 }
  0x46   : > { %1616 = vmatprep.subr.bf16.mxu1 %v5283_v56  ;;  %v791_v56 = vld [vmem:[%s9279_s2 + $0x260] sm:$0xff]  ;;  %v5237_v30 = vcombine.high %v6928_v11, %v6933_v13  ;;  %v5239_v34 = vcombine.high %v6938_v15, %v6943_v28  ;;  %v7069_v11 = vld [vmem:[%s9279_s2 + $0x130] sm:$0xff]  ;;  %v750_v28 = vld [vmem:[%s9279_s2 + $0x118] sm:$0xff] }
  0x47   : > { %v5248_v5 = vcombine.low %v787_v55, %v791_v56 }
  0x48   : > { %1504 = vmatpush2.bf16.msra.mxu0 %v5280_v4  ;;  %v5249_v4 = vcombine.high %v787_v55, %v791_v56 }
  0x49   : > { %1617 = vmatpush2.bf16.msra.mxu1 %v5282_v63  ;;  %1505 = vmatprep.subr.bf16.mxu0 %v5273_v0  ;;  %v5251_v63 = vcombine.high %v788_v9, %v792_v62  ;;  %v779_v0 = vld [vmem:[%s9279_s2 + $0x200] sm:$0xff] }
  0x4a   : > { %1618 = vmatprep.subr.bf16.mxu1 %v5275_v1  ;;  %v783_v1 = vld [vmem:[%s9279_s2 + $0x220] sm:$0xff] }
  0x4c   : > { %1506 = vmatpush2.bf16.msra.mxu0 %v5272_v10  ;;  %v5241_v10 = vcombine.high %v779_v0, %v783_v1 }
  0x4d   : > { %1619 = vmatpush2.bf16.msra.mxu1 %v5274_v16  ;;  %1507 = vmatprep.subr.bf16.mxu0 %v5265_v17  ;;  %v5243_v16 = vcombine.high %v780_v2, %v784_v3  ;;  %v5240_v17 = vcombine.low %v779_v0, %v783_v1 }
  0x4e   : > { %1620 = vmatprep.subr.bf16.mxu1 %v5267_v29  ;;  %v5242_v29 = vcombine.low %v780_v2, %v784_v3 }
  0x50   : > { %1508 = vmatpush2.bf16.msra.mxu0 %v5264_v25 }
  0x51   : > { %1621 = vmatpush2.bf16.msra.mxu1 %v5266_v32  ;;  %1509 = vmatprep.subr.bf16.mxu0 %v5257_v39 }
  0x52   : > { %1622 = vmatprep.subr.bf16.mxu1 %v5259_v53 }
  0x54   : > { %1510 = vmatpush2.bf16.msra.mxu0 %v5256_v60 }
  0x55   : > { %1623 = vmatpush2.bf16.msra.mxu1 %v5258_v61  ;;  %1511 = vmatprep.subr.bf16.mxu0 %v5249_v4 }
  0x56   : > { %1624 = vmatprep.subr.bf16.mxu1 %v5251_v63  ;;  %v657_v63 = vlaneseq }
  0x58   : > { %1512 = vmatpush2.bf16.msra.mxu0 %v5248_v5 }
  0x59   : > { %1625 = vmatpush2.bf16.msra.mxu1 %v5250_v6  ;;  %1513 = vmatprep.subr.bf16.mxu0 %v5241_v10  ;;  %v658_v10 = vshrl.u32 %v657_v63, 7 }
  0x5a   : > { %1626 = vmatprep.subr.bf16.mxu1 %v5243_v16 }
  0x5c   : > { %1514 = vmatpush2.bf16.msra.mxu0 %v5240_v17 }
  0x5d   : > { %1627 = vmatpush2.bf16.msra.mxu1 %v5242_v29  ;;  %1709 = vmatprep.subr.bf16.mxu0 %v5237_v30 }
  0x5e   : > { %1822 = vmatprep.subr.bf16.mxu1 %v5239_v34  ;;  %v663_v34 = vsub.s32 1, %v658_v10 }
  0xb0   : > { %v528_v19 = vpop.xlane.xlu0 %527 }
  0xb1   : > { %v575_v37 = vmul.f32 0.00390625, %v528_v19  ;;  %v534_v25 = vpop.xlane.xlu1 %533 }
  0xb2   : > { %v577_v32 = vmul.f32 0.00390625, %v534_v25  ;;  %v655_v25 = vld [vmem:[%s9278_s1] sm:$0x3] }
  0xb3   : > { %v591_v39 = vadd.f32 1e-06, %v575_v37 }
  0xb4   : > { %v531_v53 = vpop.xlane.xlu0 %530  ;;  %v593_v55 = vadd.f32 1e-06, %v577_v32  ;;  %v659_v32 = vsub.s32 0, %v658_v10 }
  0xb5   : > { %6086 = vrsqrt.f32 %v591_v39  ;;  %v576_v56 = vmul.f32 0.00390625, %v531_v53  ;;  %v537_v9 = vpop.xlane.xlu1 %536 }
  0xb6   : > { %6088 = vrsqrt.f32 %v593_v55  ;;  %v578_v62 = vmul.f32 0.00390625, %v537_v9 }
  0xb7   : > { %v592_v60 = vadd.f32 1e-06, %v576_v56 }
  0xb8   : > { %v594_v61 = vadd.f32 1e-06, %v578_v62  ;;  %v540_v4 = vpop.xlane.xlu0 %539  ;;  %v6993_v62 = vrot.slane %v655_v25, %v663_v34 }
  0xb9   : > { %6090 = vrsqrt.f32 %v592_v60  ;;  %v543_v0 = vpop.xlane.xlu1 %542  ;;  %v579_v1 = vmul.f32 0.00390625, %v540_v4  ;;  %v6996_v4 = vrot.slane %v655_v25, %v659_v32 }
  0xba   : > { %6092 = vrsqrt.f32 %v594_v61  ;;  %v580_v2 = vmul.f32 0.00390625, %v543_v0 }
  0xbb   : > { %v595_v3 = vadd.f32 1e-06, %v579_v1 }
  0xbc   : > { %v596_v5 = vadd.f32 1e-06, %v580_v2  ;;  %v546_v6 = vpop.xlane.xlu0 %545 }
  0xbd   : > { %6094 = vrsqrt.f32 %v595_v3  ;;  %v549_v16 = vpop.xlane.xlu1 %548  ;;  %v581_v17 = vmul.f32 0.00390625, %v546_v6 }
  0xbe   : > { %6096 = vrsqrt.f32 %v596_v5  ;;  %v582_v29 = vmul.f32 0.00390625, %v549_v16 }
  0xbf   : > { %v597_v30 = vadd.f32 1e-06, %v581_v17 }
  0xc0   : > { %v552_v19 = vpop.xlane.xlu0 %551  ;;  %v598_v37 = vadd.f32 1e-06, %v582_v29  ;;  %v770_v29 = vld [vmem:[%s9279_s2 + $0x1b8] sm:$0xff] }
  0xc1   : > { %v555_v39 = vpop.xlane.xlu1 %554  ;;  %v583_v56 = vmul.f32 0.00390625, %v552_v19  ;;  %6098 = vrsqrt.f32 %v597_v30 }
  0xc2   : > { %v6087_v53 = vpop.eup %6086  ;;  %v584_v60 = vmul.f32 0.00390625, %v555_v39  ;;  %6100 = vrsqrt.f32 %v598_v37 }
  0xc3   : > { %v6089_v55 = vpop.eup %6088  ;;  %v624_v9 = vmul.f32 %v6087_v53, %v6608_v42  ;;  %v623_v61 = vmul.f32 %v6087_v53, %v6606_v41  ;;  %v599_v5 = vadd.f32 1e-06, %v583_v56  ;;  %v7005_v42 = vld [vmem:[%s9279_s2 + $0x190] sm:$0xff] }
  0xc4   : > { %v628_v63 = vmul.f32 %v6089_v55, %v6625_v49  ;;  %v600_v10 = vadd.f32 1e-06, %v584_v60  ;;  %v558_v30 = vpop.xlane.xlu0 %557  ;;  %v627_v37 = vmul.f32 %v6089_v55, %v6623_v48  ;;  %v758_v55 = vld [vmem:[%s9279_s2 + $0x158] sm:$0xff] }
  0xc5   : > { %v668_v6 = vmul.f32 %v6993_v62, %v624_v9  ;;  %v667_v49 = vmul.f32 %v6996_v4, %v623_v61  ;;  %v561_v32 = vpop.xlane.xlu1 %560  ;;  %6102 = vrsqrt.f32 %v599_v5  ;;  %v7032_v61 = vld [vmem:[%s9279_s2 + $0x150] sm:$0xff] }
  0xc6   : > { %v6091_v0 = vpop.eup %6090  ;;  %6104 = vrsqrt.f32 %v600_v10  ;;  %v671_v5 = vmul.f32 %v6996_v4, %v627_v37 }
  0xc7   : > { %v6093_v1 = vpop.eup %6092  ;;  %v626_v2 = vmul.f32 %v6091_v0, %v6616_v44  ;;  %v625_v3 = vmul.f32 %v6091_v0, %v6614_v43  ;;  %v769_v43 = vld [vmem:[%s9279_s2 + $0x1b0] sm:$0xff]  ;;  %v766_v44 = vld [vmem:[%s9279_s2 + $0x198] sm:$0xff] }
  0xc8   : > { %v630_v41 = vmul.f32 %v6093_v1, %v6629_v51  ;;  %v672_v51 = vmul.f32 %v6993_v62, %v628_v63  ;;  %v629_v25 = vmul.f32 %v6093_v1, %v6627_v50  ;;  %v5229_v9 = vcombine.high %v7005_v42, %v769_v43  ;;  %v761_v50 = vld [vmem:[%s9279_s2 + $0x170] sm:$0xff]  ;;  %v762_v0 = vld [vmem:[%s9279_s2 + $0x178] sm:$0xff] }
  0xc9   : > { %v670_v16 = vmul.f32 %v6993_v62, %v626_v2  ;;  %v669_v17 = vmul.f32 %v6996_v4, %v625_v3  ;;  %v5231_v60 = vcombine.high %v766_v44, %v770_v29  ;;  %v585_v63 = vmul.f32 0.00390625, %v558_v30 }
  0xca   : > { %v6095_v34 = vpop.eup %6094  ;;  %v674_v19 = vmul.f32 %v6993_v62, %v630_v41  ;;  %v586_v1 = vmul.f32 0.00390625, %v561_v32  ;;  %v5230_v10 = vcombine.low %v766_v44, %v770_v29  ;;  %v5223_v41 = vcombine.high %v758_v55, %v762_v0 }
  0xcb   : > { %v6097_v39 = vpop.eup %6096  ;;  %v7024_v53 = vpack.c.bf16 %v670_v16, %v668_v6  ;;  %v7026_v56 = vpack.c.bf16 %v669_v17, %v667_v49  ;;  %v632_v2 = vmul.f32 %v6095_v34, %v6698_v14  ;;  %v673_v6 = vmul.f32 %v6996_v4, %v629_v25  ;;  %v7064_v16 = vld [vmem:[%s9279_s2 + $0x110] sm:$0xff]  ;;  %v567_v17 = vpop.xlane.xlu1 %566 }
  0xcc   : > { %v7036_v48 = vpack.c.bf16 %v674_v19, %v672_v51  ;;  %v634_v3 = vmul.f32 %v6097_v39, %v6682_v8  ;;  %v5228_v14 = vcombine.low %v7005_v42, %v769_v43  ;;  %v5221_v8 = vcombine.high %v7032_v61, %v761_v50  ;;  %v564_v43 = vpop.xlane.xlu0 %563 }
  0xcd   : > { %1515 = vmatprep.mubr.bf16.mxu0 %v7024_v53  ;;  %1628 = vmatprep.mubr.bf16.mxu1 %v7024_v53  ;;  %v601_v13 = vadd.f32 1e-06, %v585_v63  ;;  %v676_v42 = vmul.f32 %v6993_v62, %v632_v2  ;;  %v7081_v29 = vpack.c.bf16 %v673_v6, %v671_v5  ;;  %v631_v51 = vmul.f32 %v6095_v34, %v6696_v12  ;;  %v745_v34 = vld [vmem:[%s9279_s2 + $0xf0] sm:$0xff] }
  0xce   : > { %1516 = vmatmul.mubr.bf16.vlgmr.msra.gmra.mxu0 %v7026_v56  ;;  %1629 = vmatmul.mubr.bf16.vlgmr.msra.gmra.mxu1 %v7026_v56  ;;  %v6099_v15 = vpop.eup %6098  ;;  %v678_v49 = vmul.f32 %v6993_v62, %v634_v3  ;;  %v633_v30 = vmul.f32 %v6097_v39, %v6680_v7  ;;  %v5220_v19 = vcombine.low %v7032_v61, %v761_v50  ;;  %v587_v12 = vmul.f32 0.00390625, %v564_v43  ;;  %v742_v39 = vld [vmem:[%s9279_s2 + $0xd8] sm:$0xff]  ;;  %v733_v5 = vld [vmem:[%s9279_s2 + $0x90] sm:$0xff] }
  0xcf   : > { %1710 = vmatpush1.bf16.msra.mxu0 %v5236_v35  ;;  %1823 = vmatpush1.bf16.msra.mxu1 %v5238_v36  ;;  %v754_v35 = vld [vmem:[%s9279_s2 + $0x138] sm:$0xff]  ;;  %v602_v36 = vadd.f32 1e-06, %v586_v1  ;;  %v6101_v44 = vpop.eup %6100  ;;  %v5222_v37 = vcombine.low %v758_v55, %v762_v0  ;;  %v5213_v25 = vcombine.high %v7064_v16, %v7069_v11  ;;  %6106 = vrsqrt.f32 %v601_v13  ;;  %v737_v6 = vld [vmem:[%s9279_s2 + $0xb0] sm:$0xff] }
  0xd0   : > { %1711 = vmatprep.subr.bf16.mxu0 %v5229_v9  ;;  %1824 = vmatprep.subr.bf16.mxu1 %v5231_v60  ;;  %v5215_v32 = vcombine.high %v750_v28, %v754_v35  ;;  %v741_v9 = vld [vmem:[%s9279_s2 + $0xd0] sm:$0xff]  ;;  %v588_v60 = vmul.f32 0.00390625, %v567_v17  ;;  %v7091_v7 = vpack.c.bf16 %v678_v49, %v676_v42  ;;  %v746_v61 = vld [vmem:[%s9279_s2 + $0xf8] sm:$0xff]  ;;  %v636_v63 = vmul.f32 %v6099_v15, %v6725_v24 }
  0xd1   : > { %1525 = vmatprep.mubr.bf16.mxu0 %v7036_v48  ;;  %1638 = vmatprep.mubr.bf16.mxu1 %v7036_v48  ;;  %6108 = vrsqrt.f32 %v602_v36  ;;  %v638_v50 = vmul.f32 %v6101_v44, %v6714_v22  ;;  %v675_v55 = vmul.f32 %v6996_v4, %v631_v51  ;;  %v677_v0 = vmul.f32 %v6996_v4, %v633_v30 }
  0xd2   : > { %v5212_v1 = vcombine.low %v7064_v16, %v7069_v11  ;;  %v5214_v2 = vcombine.low %v750_v28, %v754_v35  ;;  %v7110_v3 = vpop.eup %6102  ;;  %v5205_v24 = vcombine.high %v741_v9, %v745_v34  ;;  %v5207_v22 = vcombine.high %v742_v39, %v746_v61  ;;  %v573_v28 = vpop.xlane.xlu1 %572 }
  0xd3   : > { %1712 = vmatpush1.bf16.msra.mxu0 %v5228_v14  ;;  %1825 = vmatpush1.bf16.msra.mxu1 %v5230_v10  ;;  %v604_v14 = vadd.f32 1e-06, %v588_v60  ;;  %v6105_v10 = vpop.eup %6104  ;;  %v603_v16 = vadd.f32 1e-06, %v587_v12  ;;  %v680_v11 = vmul.f32 %v6993_v62, %v636_v63  ;;  %v682_v13 = vmul.f32 %v6993_v62, %v638_v50  ;;  %v570_v35 = vpop.xlane.xlu0 %569 }
  0xd4   : > { %1713 = vmatprep.subr.bf16.mxu0 %v5221_v8  ;;  %1826 = vmatprep.subr.bf16.mxu1 %v5223_v41  ;;  %v734_v8 = vld [vmem:[%s9279_s2 + $0x98] sm:$0xff]  ;;  %v7128_v36 = vpack.c.bf16 %v677_v0, %v675_v55  ;;  %v635_v42 = vmul.f32 %v6099_v15, %v6723_v23  ;;  %v637_v49 = vmul.f32 %v6101_v44, %v6712_v18  ;;  %v729_v18 = vld [vmem:[%s9279_s2 + $0x70] sm:$0xff] }
  0xd5   : > { %v738_v41 = vld [vmem:[%s9279_s2 + $0xb8] sm:$0xff]  ;;  %v5204_v17 = vcombine.low %v741_v9, %v745_v34  ;;  %v5206_v43 = vcombine.low %v742_v39, %v746_v61  ;;  %v5197_v51 = vcombine.high %v733_v5, %v737_v6  ;;  %6110 = vrsqrt.f32 %v604_v14  ;;  %v721_v55 = vld [vmem:[%s9279_s2 + $0x30] sm:$0xff] }
  0xd6   : > { %1526 = vmatmul.mubr.bf16.gmra.mxu0 %v7081_v29  ;;  %1639 = vmatmul.mubr.bf16.gmra.mxu1 %v7081_v29  ;;  %v5199_v30 = vcombine.high %v734_v8, %v738_v41  ;;  %6112 = vrsqrt.f32 %v603_v16  ;;  %v726_v23 = vld [vmem:[%s9279_s2 + $0x58] sm:$0xff]  ;;  %v640_v44 = vmul.f32 %v7110_v3, %v6750_v31  ;;  %v642_v9 = vmul.f32 %v6105_v10, %v6759_v21  ;;  %v717_v31 = vld [vmem:[%s9279_s2 + $0x10] sm:$0xff] }
  0xd7   : > { %1714 = vmatpush1.bf16.msra.mxu0 %v5220_v19  ;;  %1827 = vmatpush1.bf16.msra.mxu1 %v5222_v37  ;;  %v725_v19 = vld [vmem:[%s9279_s2 + $0x50] sm:$0xff]  ;;  %v590_v37 = vmul.f32 0.00390625, %v573_v28  ;;  %v730_v15 = vld [vmem:[%s9279_s2 + $0x78] sm:$0xff]  ;;  %v679_v60 = vmul.f32 %v6996_v4, %v635_v42  ;;  %v681_v12 = vmul.f32 %v6996_v4, %v637_v49  ;;  %v5196_v34 = vcombine.low %v733_v5, %v737_v6 }
  0xd8   : > { %1715 = vmatprep.subr.bf16.mxu0 %v5213_v25  ;;  %1828 = vmatprep.subr.bf16.mxu1 %v5215_v32  ;;  %v589_v25 = vmul.f32 0.00390625, %v570_v35  ;;  %v7135_v32 = vpack.c.bf16 %v682_v13, %v680_v11  ;;  %v5198_v39 = vcombine.low %v734_v8, %v738_v41  ;;  %v5189_v61 = vcombine.high %v725_v19, %v729_v18  ;;  %v718_v0 = vld [vmem:[%s9279_s2 + $0x18] sm:$0xff]  ;;  %v837_v28 = vld [vmem:[%s9279_s2 + $0x3d0] sm:$0xff] }
  0xd9   : > { %1535 = vmatprep.mubr.bf16.mxu0 %v7091_v7  ;;  %1648 = vmatprep.mubr.bf16.mxu1 %v7091_v7  ;;  %v5191_v63 = vcombine.high %v726_v23, %v730_v15  ;;  %v606_v21 = vadd.f32 1e-06, %v590_v37  ;;  %v7169_v6 = vpack.c.bf16 %v681_v12, %v679_v60  ;;  %v639_v14 = vmul.f32 %v7110_v3, %v6748_v20  ;;  %v841_v20 = vld [vmem:[%s9279_s2 + $0x3f0] sm:$0xff]  ;;  %v842_v3 = vld [vmem:[%s9279_s2 + $0x3f8] sm:$0xff] }
  0xda   : > { %v641_v8 = vmul.f32 %v6105_v10, %v6756_v45  ;;  %v5188_v41 = vcombine.low %v725_v19, %v729_v18  ;;  %v5190_v16 = vcombine.low %v726_v23, %v730_v15  ;;  %v5181_v11 = vcombine.high %v717_v31, %v721_v55  ;;  %v838_v45 = vld [vmem:[%s9279_s2 + $0x3d8] sm:$0xff]  ;;  %v833_v37 = vld [vmem:[%s9279_s2 + $0x3b0] sm:$0xff] }
  0xdb   : > { %1716 = vmatpush1.bf16.msra.mxu0 %v5212_v1  ;;  %1829 = vmatpush1.bf16.msra.mxu1 %v5214_v2  ;;  %v722_v1 = vld [vmem:[%s9279_s2 + $0x38] sm:$0xff]  ;;  %v605_v2 = vadd.f32 1e-06, %v589_v25  ;;  %6114 = vrsqrt.f32 %v606_v21  ;;  %v683_v49 = vmul.f32 %v6996_v4, %v639_v14  ;;  %v5303_v19 = vcombine.high %v838_v45, %v842_v3 }
  0xdc   : > { %1717 = vmatprep.subr.bf16.mxu0 %v5205_v24  ;;  %1830 = vmatprep.subr.bf16.mxu1 %v5207_v22  ;;  %v6107_v50 = vpop.eup %6106  ;;  %v684_v24 = vmul.f32 %v6993_v62, %v640_v44  ;;  %v686_v22 = vmul.f32 %v6993_v62, %v642_v9  ;;  %v5183_v13 = vcombine.high %v718_v0, %v722_v1  ;;  %v830_v25 = vld [vmem:[%s9279_s2 + $0x398] sm:$0xff] }
  0xdd   : > { %6116 = vrsqrt.f32 %v605_v2  ;;  %v644_v10 = vmul.f32 %v6107_v50, %v6769_v38  ;;  %v829_v38 = vld [vmem:[%s9279_s2 + $0x390] sm:$0xff]  ;;  %v834_v18 = vld [vmem:[%s9279_s2 + $0x3b8] sm:$0xff]  ;;  %v643_v60 = vmul.f32 %v6107_v50, %v6766_v33 }
  0xde   : > { %1536 = vmatmul.mubr.bf16.gmra.mxu0 %v7128_v36  ;;  %1649 = vmatmul.mubr.bf16.gmra.mxu1 %v7128_v36  ;;  %v6109_v5 = vpop.eup %6108  ;;  %v7177_v35 = vpack.c.bf16 %v686_v22, %v684_v24  ;;  %v825_v33 = vld [vmem:[%s9279_s2 + $0x370] sm:$0xff]  ;;  %v826_v50 = vld [vmem:[%s9279_s2 + $0x378] sm:$0xff]  ;;  %v5292_v24 = vcombine.low %v829_v38, %v833_v37  ;;  %v5294_v22 = vcombine.low %v830_v25, %v834_v18 }
  0xdf   : > { %1718 = vmatpush1.bf16.msra.mxu0 %v5204_v17  ;;  %1831 = vmatpush1.bf16.msra.mxu1 %v5206_v43  ;;  %v646_v42 = vmul.f32 %v6109_v5, %v6779_v47  ;;  %v685_v17 = vmul.f32 %v6996_v4, %v641_v8  ;;  %v5180_v43 = vcombine.low %v717_v31, %v721_v55  ;;  %v821_v31 = vld [vmem:[%s9279_s2 + $0x350] sm:$0xff] }
  0xe0   : > { %1719 = vmatprep.subr.bf16.mxu0 %v5197_v51  ;;  %1832 = vmatprep.subr.bf16.mxu1 %v5199_v30  ;;  %v5182_v51 = vcombine.low %v718_v0, %v722_v1  ;;  %v5301_v30 = vcombine.high %v837_v28, %v841_v20  ;;  %v688_v23 = vmul.f32 %v6993_v62, %v644_v10  ;;  %v817_v8 = vld [vmem:[%s9279_s2 + $0x330] sm:$0xff] }
  0xe1   : > { %1545 = vmatprep.mubr.bf16.mxu0 %v7135_v32  ;;  %1658 = vmatprep.mubr.bf16.mxu1 %v7135_v32  ;;  %v690_v15 = vmul.f32 %v6993_v62, %v646_v42  ;;  %v7210_v9 = vpack.c.bf16 %v685_v17, %v683_v49  ;;  %v645_v12 = vmul.f32 %v6109_v5, %v6776_v46  ;;  %v822_v46 = vld [vmem:[%s9279_s2 + $0x358] sm:$0xff] }
  0xe2   : > { %v6111_v47 = vpop.eup %6110  ;;  %v687_v1 = vmul.f32 %v6996_v4, %v643_v60  ;;  %v5285_v5 = vcombine.high %v821_v31, %v825_v33  ;;  %v5287_v14 = vcombine.high %v822_v46, %v826_v50  ;;  %v5284_v10 = vcombine.low %v821_v31, %v825_v33  ;;  %v802_v60 = vld [vmem:[%s9279_s2 + $0x2b8] sm:$0xff] }
  0xe3   : > { %1720 = vmatpush1.bf16.msra.mxu0 %v5196_v34  ;;  %1833 = vmatpush1.bf16.msra.mxu1 %v5198_v39  ;;  %v6113_v44 = vpop.eup %6112  ;;  %v5300_v34 = vcombine.low %v837_v28, %v841_v20  ;;  %v5302_v39 = vcombine.low %v838_v45, %v842_v3  ;;  %v7217_v21 = vpack.c.bf16 %v690_v15, %v688_v23 }
  0xe4   : > { %1721 = vmatprep.subr.bf16.mxu0 %v5189_v61  ;;  %1834 = vmatprep.subr.bf16.mxu1 %v5191_v63  ;;  %v5293_v61 = vcombine.high %v829_v38, %v833_v37  ;;  %v5295_v63 = vcombine.high %v830_v25, %v834_v18  ;;  %v648_v55 = vmul.f32 %v6113_v44, %v6803_v59 }
  0xe5   : > { %v650_v0 = vmul.f32 %v6111_v47, %v6797_v57  ;;  %v689_v2 = vmul.f32 %v6996_v4, %v645_v12  ;;  %v813_v57 = vld [vmem:[%s9279_s2 + $0x310] sm:$0xff]  ;;  %v647_v45 = vmul.f32 %v6113_v44, %v6800_v58  ;;  %v649_v3 = vmul.f32 %v6111_v47, %v6788_v54  ;;  %v806_v54 = vld [vmem:[%s9279_s2 + $0x2d8] sm:$0xff] }
  0xe6   : > { %1546 = vmatmul.mubr.bf16.gmra.mxu0 %v7169_v6  ;;  %1659 = vmatmul.mubr.bf16.gmra.mxu1 %v7169_v6  ;;  %v5286_v42 = vcombine.low %v822_v46, %v826_v50  ;;  %v5277_v49 = vcombine.high %v813_v57, %v817_v8  ;;  %v809_v58 = vld [vmem:[%s9279_s2 + $0x2f0] sm:$0xff]  ;;  %v5276_v25 = vcombine.low %v813_v57, %v817_v8  ;;  %v798_v44 = vld [vmem:[%s9279_s2 + $0x298] sm:$0xff] }
  0xe7   : > { %1722 = vmatpush1.bf16.msra.mxu0 %v5188_v41  ;;  %1835 = vmatpush1.bf16.msra.mxu1 %v5190_v16  ;;  %v814_v41 = vld [vmem:[%s9279_s2 + $0x318] sm:$0xff]  ;;  %v7250_v20 = vpack.c.bf16 %v689_v2, %v687_v1  ;;  %v691_v47 = vmul.f32 %v6996_v4, %v647_v45  ;;  %v693_v37 = vmul.f32 %v6996_v4, %v649_v3  ;;  %v781_v57 = vld [vmem:[%s9279_s2 + $0x210] sm:$0xff] }
  0xe8   : > { %1723 = vmatprep.subr.bf16.mxu0 %v5181_v11  ;;  %1836 = vmatprep.subr.bf16.mxu1 %v5183_v13  ;;  %v6115_v59 = vpop.eup %6114  ;;  %v818_v16 = vld [vmem:[%s9279_s2 + $0x338] sm:$0xff]  ;;  %v692_v11 = vmul.f32 %v6993_v62, %v648_v55  ;;  %v694_v13 = vmul.f32 %v6993_v62, %v650_v0  ;;  %v5263_v50 = vcombine.high %v798_v44, %v802_v60  ;;  %v789_v55 = vld [vmem:[%s9279_s2 + $0x250] sm:$0xff] }
  0xe9   : > { %1555 = vmatprep.mubr.bf16.mxu0 %v7177_v35  ;;  %1668 = vmatprep.mubr.bf16.mxu1 %v7177_v35  ;;  %v5279_v17 = vcombine.high %v814_v41, %v818_v16  ;;  %v654_v38 = vmul.f32 %v6115_v59, %v6855_v52  ;;  %v5278_v18 = vcombine.low %v814_v41, %v818_v16  ;;  %v801_v52 = vld [vmem:[%s9279_s2 + $0x2b0] sm:$0xff]  ;;  %v782_v8 = vld [vmem:[%s9279_s2 + $0x218] sm:$0xff] }
  0xea   : > { %v6117_v28 = vpop.eup %6116  ;;  %v786_v41 = vld [vmem:[%s9279_s2 + $0x238] sm:$0xff] }
  0xeb   : > { %1724 = vmatpush1.bf16.msra.mxu0 %v5180_v43  ;;  %1837 = vmatpush1.bf16.msra.mxu1 %v5182_v51  ;;  %v805_v43 = vld [vmem:[%s9279_s2 + $0x2d0] sm:$0xff]  ;;  %v7257_v51 = vpack.c.bf16 %v694_v13, %v692_v11  ;;  %v5246_v3 = vcombine.low %v782_v8, %v786_v41 }
  0xec   : > { %1725 = vmatprep.subr.bf16.mxu0 %v5301_v30  ;;  %1838 = vmatprep.subr.bf16.mxu1 %v5303_v19  ;;  %v810_v30 = vld [vmem:[%s9279_s2 + $0x2f8] sm:$0xff]  ;;  %v652_v19 = vmul.f32 %v6117_v28, %v6849_v27  ;;  %v5269_v23 = vcombine.high %v805_v43, %v809_v58  ;;  %v797_v27 = vld [vmem:[%s9279_s2 + $0x290] sm:$0xff]  ;;  %v5268_v31 = vcombine.low %v805_v43, %v809_v58 }
  0xed   : > { %v5271_v15 = vcombine.high %v806_v54, %v810_v30  ;;  %v5270_v33 = vcombine.low %v806_v54, %v810_v30  ;;  %v5261_v46 = vcombine.high %v797_v27, %v801_v52 }
  0xee   : > { %1556 = vmatmul.mubr.bf16.gmra.mxu0 %v7210_v9  ;;  %1669 = vmatmul.mubr.bf16.gmra.mxu1 %v7210_v9  ;;  %v696_v12 = vmul.f32 %v6993_v62, %v652_v19 }
  0xef   : > { %1726 = vmatpush2.bf16.msra.mxu0 %v5300_v34  ;;  %1839 = vmatpush2.bf16.msra.mxu1 %v5302_v39  ;;  %v698_v34 = vmul.f32 %v6993_v62, %v654_v38  ;;  %v7290_v39 = vpack.c.bf16 %v693_v37, %v691_v47  ;;  %v794_v62 = vld [vmem:[%s9279_s2 + $0x278] sm:$0xff] }
  0xf0   : > { %1727 = vmatprep.subr.bf16.mxu0 %v5293_v61  ;;  %1840 = vmatprep.subr.bf16.mxu1 %v5295_v63  ;;  %v651_v61 = vmul.f32 %v6117_v28, %v6846_v26  ;;  %v653_v63 = vmul.f32 %v6115_v59, %v6852_v40  ;;  %v793_v26 = vld [vmem:[%s9279_s2 + $0x270] sm:$0xff]  ;;  %v790_v40 = vld [vmem:[%s9279_s2 + $0x258] sm:$0xff]  ;;  %v5247_v28 = vcombine.high %v782_v8, %v786_v41 }
  0xf1   : > { %1565 = vmatprep.mubr.bf16.mxu0 %v7217_v21  ;;  %1678 = vmatprep.mubr.bf16.mxu1 %v7217_v21  ;;  %v7297_v0 = vpack.c.bf16 %v698_v34, %v696_v12  ;;  %v5252_v16 = vcombine.low %v789_v55, %v793_v26  ;;  %v5254_v11 = vcombine.low %v790_v40, %v794_v62 }
  0xf2   : > { %v695_v1 = vmul.f32 %v6996_v4, %v651_v61  ;;  %v697_v2 = vmul.f32 %v6996_v4, %v653_v63  ;;  %v785_v4 = vld [vmem:[%s9279_s2 + $0x230] sm:$0xff] }
  0xf3   : > { %1728 = vmatpush2.bf16.msra.mxu0 %v5292_v24  ;;  %1841 = vmatpush2.bf16.msra.mxu1 %v5294_v22  ;;  %v5260_v24 = vcombine.low %v797_v27, %v801_v52  ;;  %v5262_v22 = vcombine.low %v798_v44, %v802_v60  ;;  %v5245_v13 = vcombine.high %v781_v57, %v785_v4 }
  0xf4   : > { %1729 = vmatprep.subr.bf16.mxu0 %v5285_v5  ;;  %1842 = vmatprep.subr.bf16.mxu1 %v5287_v14  ;;  %v5253_v5 = vcombine.high %v789_v55, %v793_v26  ;;  %v5255_v14 = vcombine.high %v790_v40, %v794_v62  ;;  %v713_v59 = vpack.c.bf16 %v697_v2, %v695_v1 }
  0xf5   : > { %v5244_v45 = vcombine.low %v781_v57, %v785_v4 }
  0xf6   : > { %1566 = vmatmul.mubr.bf16.gmra.mxu0 %v7250_v20  ;;  %1679 = vmatmul.mubr.bf16.gmra.mxu1 %v7250_v20 }
  0xf7   : > { %1730 = vmatpush2.bf16.msra.mxu0 %v5284_v10  ;;  %1843 = vmatpush2.bf16.msra.mxu1 %v5286_v42 }
  0xf8   : > { %1731 = vmatprep.subr.bf16.mxu0 %v5277_v49  ;;  %1844 = vmatprep.subr.bf16.mxu1 %v5279_v17 }
  0xf9   : > { %1575 = vmatprep.mubr.bf16.mxu0 %v7257_v51  ;;  %1688 = vmatprep.mubr.bf16.mxu1 %v7257_v51 }
  0xfb   : > { %1732 = vmatpush2.bf16.msra.mxu0 %v5276_v25  ;;  %1845 = vmatpush2.bf16.msra.mxu1 %v5278_v18 }
  0xfc   : > { %1733 = vmatprep.subr.bf16.mxu0 %v5269_v23  ;;  %1846 = vmatprep.subr.bf16.mxu1 %v5271_v15 }
  0xfe   : > { %1576 = vmatmul.mubr.bf16.gmra.mxu0 %v7290_v39  ;;  %1689 = vmatmul.mubr.bf16.gmra.mxu1 %v7290_v39 }
  0xff   : > { %1734 = vmatpush2.bf16.msra.mxu0 %v5268_v31  ;;  %1847 = vmatpush2.bf16.msra.mxu1 %v5270_v33 }
 0x100   : > { %1735 = vmatprep.subr.bf16.mxu0 %v5261_v46  ;;  %1848 = vmatprep.subr.bf16.mxu1 %v5263_v50 }
 0x101   : > { %1585 = vmatprep.mubr.bf16.mxu0 %v7297_v0  ;;  %1698 = vmatprep.mubr.bf16.mxu1 %v7297_v0 }
 0x103   : > { %1736 = vmatpush2.bf16.msra.mxu0 %v5260_v24  ;;  %1849 = vmatpush2.bf16.msra.mxu1 %v5262_v22 }
 0x104   : > { %1737 = vmatprep.subr.bf16.mxu0 %v5253_v5  ;;  %1850 = vmatprep.subr.bf16.mxu1 %v5255_v14 }
 0x106   : > { %1586 = vmatmul.mubr.bf16.gmra.mxu0 %v713_v59  ;;  %1699 = vmatmul.mubr.bf16.gmra.mxu1 %v713_v59 }
 0x107   : > { %1738 = vmatpush2.bf16.msra.mxu0 %v5252_v16  ;;  %1741 = vmatprep.mubr.bf16.mxu0 %v7024_v53 }
 0x108   : > { %1851 = vmatpush2.bf16.msra.mxu1 %v5254_v11  ;;  %1854 = vmatprep.mubr.bf16.mxu1 %v7024_v53 }
 0x109   : > { %1739 = vmatprep.subr.bf16.mxu0 %v5245_v13  ;;  %1852 = vmatprep.subr.bf16.mxu1 %v5247_v28 }
 0x10b   : > { %1740 = vmatpush2.bf16.msra.mxu0 %v5244_v45 }
 0x10c   : > { %1853 = vmatpush2.bf16.msra.mxu1 %v5246_v3 }
 0x10e   : > { %1742 = vmatmul.mubr.bf16.vlgmr.msra.gmra.mxu0 %v7026_v56 }
 0x10f   : > { %1855 = vmatmul.mubr.bf16.vlgmr.msra.gmra.mxu1 %v7026_v56  ;;  %1751 = vmatprep.mubr.bf16.mxu0 %v7036_v48 }
 0x110   : > { %1864 = vmatprep.mubr.bf16.mxu1 %v7036_v48 }
 0x116   : > { %1752 = vmatmul.mubr.bf16.gmra.mxu0 %v7081_v29 }
 0x117   : > { %1865 = vmatmul.mubr.bf16.gmra.mxu1 %v7081_v29  ;;  %1761 = vmatprep.mubr.bf16.mxu0 %v7091_v7 }
 0x118   : > { %1874 = vmatprep.mubr.bf16.mxu1 %v7091_v7 }
 0x11e   : > { %1762 = vmatmul.mubr.bf16.gmra.mxu0 %v7128_v36 }
 0x11f   : > { %1875 = vmatmul.mubr.bf16.gmra.mxu1 %v7128_v36  ;;  %1771 = vmatprep.mubr.bf16.mxu0 %v7135_v32 }
 0x120   : > { %1884 = vmatprep.mubr.bf16.mxu1 %v7135_v32 }
 0x126   : > { %1772 = vmatmul.mubr.bf16.gmra.mxu0 %v7169_v6 }
 0x127   : > { %1885 = vmatmul.mubr.bf16.gmra.mxu1 %v7169_v6  ;;  %1781 = vmatprep.mubr.bf16.mxu0 %v7177_v35 }
 0x128   : > { %1894 = vmatprep.mubr.bf16.mxu1 %v7177_v35 }
 0x12e   : > { %1782 = vmatmul.mubr.bf16.gmra.mxu0 %v7210_v9 }
 0x12f   : > { %1895 = vmatmul.mubr.bf16.gmra.mxu1 %v7210_v9  ;;  %1791 = vmatprep.mubr.bf16.mxu0 %v7217_v21 }
 0x130   : > { %1904 = vmatprep.mubr.bf16.mxu1 %v7217_v21 }
 0x136   : > { %1792 = vmatmul.mubr.bf16.gmra.mxu0 %v7250_v20 }
 0x137   : > { %1905 = vmatmul.mubr.bf16.gmra.mxu1 %v7250_v20  ;;  %1801 = vmatprep.mubr.bf16.mxu0 %v7257_v51 }
 0x138   : > { %1914 = vmatprep.mubr.bf16.mxu1 %v7257_v51 }
 0x13e   : > { %1802 = vmatmul.mubr.bf16.gmra.mxu0 %v7290_v39 }
 0x13f   : > { %1915 = vmatmul.mubr.bf16.gmra.mxu1 %v7290_v39  ;;  %1811 = vmatprep.mubr.bf16.mxu0 %v7297_v0 }
 0x140   : > { %1924 = vmatprep.mubr.bf16.mxu1 %v7297_v0 }
 0x146   : > { %1812 = vmatmul.mubr.bf16.gmra.mxu0 %v713_v59 }
 0x147   : > { %1925 = vmatmul.mubr.bf16.gmra.mxu1 %v713_v59 }
 0x18e   : > { %v7356_v53 = vpop.f32.mrf.mxu0  ;;  %v7358_v56 = vpop.f32.mrf.mxu1 }
 0x18f   : > { %v2113_v48 = vmul.f32 %v7356_v53, %v7356_v53  ;;  %v2793_v6 = vmul.f32 %v7358_v56, %v7358_v56 }
 0x190   : > { %v7362_v29 = vpop.f32.mrf.mxu0  ;;  %v7364_v7 = vpop.f32.mrf.mxu1 }
 0x191   : > { %2129 = vadd.xlane.f32.xlu0 %v2113_v48  ;;  %v2456_v42 = vmul.f32 %v7362_v29, %v7362_v29  ;;  %v3130_v54 = vmul.f32 %v7364_v7, %v7364_v7 }
 0x192   : > { %v7366_v36 = vpop.f32.mrf.mxu0  ;;  %v7368_v32 = vpop.f32.mrf.mxu1 }
 0x193   : > { %v2114_v35 = vmul.f32 %v7366_v36, %v7366_v36  ;;  %v2794_v49 = vmul.f32 %v7368_v32, %v7368_v32 }
 0x194   : > { %v7374_v9 = vpop.f32.mrf.mxu0  ;;  %v7376_v21 = vpop.f32.mrf.mxu1 }
 0x195   : > { %2809 = vadd.xlane.f32.xlu0 %v2793_v6  ;;  %2131 = vadd.xlane.f32.xlu1 %v2114_v35  ;;  %v2457_v30 = vmul.f32 %v7374_v9, %v7374_v9  ;;  %v3131_v25 = vmul.f32 %v7376_v21, %v7376_v21 }
 0x196   : > { %v7378_v20 = vpop.f32.mrf.mxu0  ;;  %v7380_v10 = vpop.f32.mrf.mxu1 }
 0x197   : > { %v2115_v18 = vmul.f32 %v7378_v20, %v7378_v20  ;;  %v2795_v44 = vmul.f32 %v7380_v10, %v7380_v10 }
 0x198   : > { %v7386_v17 = vpop.f32.mrf.mxu0  ;;  %v7388_v43 = vpop.f32.mrf.mxu1 }
 0x199   : > { %2472 = vadd.xlane.f32.xlu0 %v2456_v42  ;;  %2811 = vadd.xlane.f32.xlu1 %v2794_v49  ;;  %v2458_v63 = vmul.f32 %v7386_v17, %v7386_v17  ;;  %v3132_v0 = vmul.f32 %v7388_v43, %v7388_v43 }
 0x19a   : > { %v7390_v51 = vpop.f32.mrf.mxu0  ;;  %v7392_v58 = vpop.f32.mrf.mxu1 }
 0x19b   : > { %v2116_v60 = vmul.f32 %v7390_v51, %v7390_v51  ;;  %v2796_v24 = vmul.f32 %v7392_v58, %v7392_v58 }
 0x19c   : > { %v7398_v19 = vpop.f32.mrf.mxu0  ;;  %v7400_v38 = vpop.f32.mrf.mxu1 }
 0x19d   : > { %3146 = vadd.xlane.f32.xlu0 %v3130_v54  ;;  %2474 = vadd.xlane.f32.xlu1 %v2457_v30  ;;  %v2459_v4 = vmul.f32 %v7398_v19, %v7398_v19  ;;  %v3133_v28 = vmul.f32 %v7400_v38, %v7400_v38 }
 0x19e   : > { %v7402_v47 = vpop.f32.mrf.mxu0  ;;  %v7404_v37 = vpop.f32.mrf.mxu1 }
 0x19f   : > { %9434 = vst [vmem:[#allocation11_spill] sm:$0xff] %v7404_v37  ;;  %v2117_v42 = vmul.f32 %v7402_v47, %v7402_v47 }
 0x1a0   : > { %v7410_v23 = vpop.f32.mrf.mxu0  ;;  %v7412_v15 = vpop.f32.mrf.mxu1 }
 0x1a1   : > { %9435 = vst [vmem:[#allocation12_spill] sm:$0xff] %v7410_v23  ;;  %9436 = vst [vmem:[#allocation13_spill] sm:$0xff] %v7412_v15  ;;  %3148 = vadd.xlane.f32.xlu1 %v3131_v25  ;;  %2133 = vadd.xlane.f32.xlu0 %v2115_v18 }
 0x1a2   : > { %v7414_v27 = vpop.f32.mrf.mxu0  ;;  %v7416_v52 = vpop.f32.mrf.mxu1 }
 0x1a3   : > { %9437 = vst [vmem:[#allocation14_spill] sm:$0xff] %v7416_v52  ;;  %v2118_v31 = vmul.f32 %v7414_v27, %v7414_v27  ;;  %v2798_v26 = vmul.f32 %v7416_v52, %v7416_v52 }
 0x1a4   : > { %v7422_v12 = vpop.f32.mrf.mxu0  ;;  %v7424_v34 = vpop.f32.mrf.mxu1 }
 0x1a5   : > { %9438 = vst [vmem:[#allocation15_spill] sm:$0xff] %v7422_v12  ;;  %9439 = vst [vmem:[#allocation16_spill] sm:$0xff] %v7424_v34  ;;  %2813 = vadd.xlane.f32.xlu0 %v2795_v44  ;;  %2135 = vadd.xlane.f32.xlu1 %v2116_v60  ;;  %v2461_v22 = vmul.f32 %v7422_v12, %v7422_v12  ;;  %v3135_v8 = vmul.f32 %v7424_v34, %v7424_v34 }
 0x1a6   : > { %v7426_v39 = vpop.f32.mrf.mxu0  ;;  %v7428_v61 = vpop.f32.mrf.mxu1  ;;  %v2797_v44 = vmul.f32 %v7404_v37, %v7404_v37 }
 0x1a7   : > { %9440 = vst [vmem:[#allocation17_spill] sm:$0xff] %v7426_v39  ;;  %9441 = vst [vmem:[#allocation18_spill] sm:$0xff] %v7428_v61 }
 0x1a8   : > { %v7434_v33 = vpop.f32.mrf.mxu0  ;;  %v7436_v46 = vpop.f32.mrf.mxu1 }
 0x1a9   : > { %9442 = vst [vmem:[#allocation19_spill] sm:$0xff] %v7434_v33  ;;  %9443 = vst [vmem:[#allocation20_spill] sm:$0xff] %v7436_v46  ;;  %2476 = vadd.xlane.f32.xlu0 %v2458_v63  ;;  %2139 = vadd.xlane.f32.xlu1 %v2118_v31 }
 0x1aa   : > { %v7438_v50 = vpop.f32.mrf.mxu0  ;;  %v7440_v55 = vpop.f32.mrf.mxu1 }
 0x1ab   : > { %9444 = vst [vmem:[#allocation21_spill] sm:$0xff] %v7438_v50  ;;  %9445 = vst [vmem:[#allocation22_spill] sm:$0xff] %v7440_v55  ;;  %v2120_v45 = vmul.f32 %v7438_v50, %v7438_v50  ;;  %v2800_v49 = vmul.f32 %v7440_v55, %v7440_v55 }
 0x1ac   : > { %v7446_v40 = vpop.f32.mrf.mxu0  ;;  %v7448_v62 = vpop.f32.mrf.mxu1 }
 0x1ad   : > { %9446 = vst [vmem:[#allocation23_spill] sm:$0xff] %v7446_v40  ;;  %9447 = vst [vmem:[#allocation24_spill] sm:$0xff] %v7448_v62  ;;  %3150 = vadd.xlane.f32.xlu0 %v3132_v0  ;;  %2819 = vadd.xlane.f32.xlu1 %v2798_v26  ;;  %v2463_v60 = vmul.f32 %v7446_v40, %v7446_v40 }
 0x1ae   : > { %v7450_v1 = vpop.f32.mrf.mxu0  ;;  %v7452_v2 = vpop.f32.mrf.mxu1 }
 0x1af   : > { %9448 = vst [vmem:[#allocation25_spill] sm:$0xff] %v7450_v1 }
 0x1b0   : > { %v7458_v5 = vpop.f32.mrf.mxu0  ;;  %v7460_v14 = vpop.f32.mrf.mxu1 }
 0x1b1   : > { %2815 = vadd.xlane.f32.xlu0 %v2796_v24  ;;  %2482 = vadd.xlane.f32.xlu1 %v2461_v22  ;;  %v2460_v24 = vmul.f32 %v7410_v23, %v7410_v23  ;;  %v3137_v22 = vmul.f32 %v7448_v62, %v7448_v62 }
 0x1b2   : > { %v7462_v57 = vpop.f32.mrf.mxu0  ;;  %v7464_v59 = vpop.f32.mrf.mxu1 }
 0x1b3   : > { %9449 = vst [vmem:[#allocation26_spill] sm:$0xff] %v7462_v57  ;;  %9450 = vst [vmem:[#allocation27_spill] sm:$0xff] %v7464_v59  ;;  %v2802_v40 = vmul.f32 %v7464_v59, %v7464_v59 }
 0x1b4   : > { %v7470_v41 = vpop.f32.mrf.mxu0  ;;  %v7472_v16 = vpop.f32.mrf.mxu1 }
 0x1b5   : > { %9451 = vst [vmem:[#allocation28_spill] sm:$0xff] %v7470_v41  ;;  %9452 = vst [vmem:[#allocation29_spill] sm:$0xff] %v7472_v16  ;;  %2478 = vadd.xlane.f32.xlu0 %v2459_v4  ;;  %3156 = vadd.xlane.f32.xlu1 %v3135_v8 }
 0x1b6   : > { %v7474_v11 = vpop.f32.mrf.mxu0  ;;  %v7476_v13 = vpop.f32.mrf.mxu1 }
 0x1b8   : > { %v7482_v3 = vpop.f32.mrf.mxu0  ;;  %v7484_v48 = vpop.f32.mrf.mxu1 }
 0x1b9   : > { %3152 = vadd.xlane.f32.xlu0 %v3133_v28  ;;  %2143 = vadd.xlane.f32.xlu1 %v2120_v45 }
 0x1ba   : > { %v7486_v6 = vpop.f32.mrf.mxu0  ;;  %v7488_v35 = vpop.f32.mrf.mxu1 }
 0x1bb   : > { %9453 = vst [vmem:[#allocation30_spill] sm:$0xff] %v7486_v6  ;;  %9454 = vst [vmem:[#allocation31_spill] sm:$0xff] %v7488_v35 }
 0x1bc   : > { %v7494_v54 = vpop.f32.mrf.mxu0  ;;  %v7496_v30 = vpop.f32.mrf.mxu1 }
 0x1bd   : > { %9455 = vst [vmem:[#allocation32_spill] sm:$0xff] %v7494_v54  ;;  %9456 = vst [vmem:[#allocation33_spill] sm:$0xff] %v7496_v30  ;;  %2137 = vadd.xlane.f32.xlu0 %v2117_v42  ;;  %2823 = vadd.xlane.f32.xlu1 %v2800_v49  ;;  %v3134_v42 = vmul.f32 %v7412_v15, %v7412_v15  ;;  %v2122_v49 = vmul.f32 %v7462_v57, %v7462_v57 }
 0x1be   : > { %v7498_v25 = vpop.f32.mrf.mxu0  ;;  %v7500_v18 = vpop.f32.mrf.mxu1  ;;  %v2465_v15 = vmul.f32 %v7470_v41, %v7470_v41  ;;  %v2467_v52 = vmul.f32 %v7494_v54, %v7494_v54 }
 0x1c0   : > { %v7506_v63 = vpop.f32.mrf.mxu0  ;;  %v7508_v31 = vpop.f32.mrf.mxu1 }
 0x1c1   : > { %9457 = vst [vmem:[#allocation34_spill] sm:$0xff] %v7506_v63  ;;  %9458 = vst [vmem:[#allocation35_spill] sm:$0xff] %v7508_v31  ;;  %2817 = vadd.xlane.f32.xlu0 %v2797_v44  ;;  %2486 = vadd.xlane.f32.xlu1 %v2463_v60 }
 0x1c2   : > { %v7510_v0 = vpop.f32.mrf.mxu0  ;;  %v7512_v26 = vpop.f32.mrf.mxu1 }
 0x1c3   : > { %9459 = vst [vmem:[#allocation36_spill] sm:$0xff] %v7510_v0  ;;  %9460 = vst [vmem:[#allocation37_spill] sm:$0xff] %v7512_v26 }
 0x1c4   : > { %v7518_v4 = vpop.f32.mrf.mxu0  ;;  %v7520_v8 = vpop.f32.mrf.mxu1 }
 0x1c5   : > { %9461 = vst [vmem:[#allocation38_spill] sm:$0xff] %v7518_v4  ;;  %9462 = vst [vmem:[#allocation39_spill] sm:$0xff] %v7520_v8  ;;  %2480 = vadd.xlane.f32.xlu0 %v2460_v24  ;;  %3160 = vadd.xlane.f32.xlu1 %v3137_v22  ;;  %v2119_v22 = vmul.f32 %v7426_v39, %v7426_v39 }
 0x1c6   : > { %v7522_v28 = vpop.f32.mrf.mxu0  ;;  %v7524_v45 = vpop.f32.mrf.mxu1 }
 0x1c7   : > { %9463 = vst [vmem:[#allocation40_spill] sm:$0xff] %v7522_v28  ;;  %9464 = vst [vmem:[#allocation41_spill] sm:$0xff] %v7524_v45 }
 0x1c8   : > { %v7530_v44 = vpop.f32.mrf.mxu0  ;;  %v7532_v60 = vpop.f32.mrf.mxu1 }
 0x1c9   : > { %9465 = vst [vmem:[#allocation42_spill] sm:$0xff] %v7530_v44  ;;  %9466 = vst [vmem:[#allocation43_spill] sm:$0xff] %v7532_v60  ;;  %3154 = vadd.xlane.f32.xlu0 %v3134_v42  ;;  %2147 = vadd.xlane.f32.xlu1 %v2122_v49  ;;  %v2799_v49 = vmul.f32 %v7428_v61, %v7428_v61 }
 0x1ca   : > { %v7534_v62 = vpop.f32.mrf.mxu0  ;;  %v7536_v24 = vpop.f32.mrf.mxu1 }
 0x1cb   : > { %9467 = vst [vmem:[#allocation44_spill] sm:$0xff] %v7534_v62  ;;  %9468 = vst [vmem:[#allocation45_spill] sm:$0xff] %v7536_v24 }
 0x1cc   : > { %v7542_v55 = vpop.f32.mrf.mxu0  ;;  %v7544_v50 = vpop.f32.mrf.mxu1 }
 0x1cd   : > { %9469 = vst [vmem:[#allocation46_spill] sm:$0xff] %v7542_v55  ;;  %9470 = vst [vmem:[#allocation47_spill] sm:$0xff] %v7544_v50  ;;  %2141 = vadd.xlane.f32.xlu0 %v2119_v22  ;;  %2827 = vadd.xlane.f32.xlu1 %v2802_v40  ;;  %v2462_v40 = vmul.f32 %v7434_v33, %v7434_v33  ;;  %v3139_v22 = vmul.f32 %v7472_v16, %v7472_v16 }
 0x1ce   : > { %v7546_v57 = vpop.f32.mrf.mxu0  ;;  %v3136_v33 = vmul.f32 %v7436_v46, %v7436_v46 }
 0x1cf   : > { %9471 = vst [vmem:[#allocation48_spill] sm:$0xff] %v7546_v57  ;;  %v1856_v42 = vpop.f32.mrf.mxu1 }
 0x1d0   : > { %v7552_v39 = vpop.f32.mrf.mxu0 }
 0x1d1   : > { %9472 = vst [vmem:[#allocation49_spill] sm:$0xff] %v7552_v39  ;;  %v1858_v34 = vpop.f32.mrf.mxu1  ;;  %2821 = vadd.xlane.f32.xlu0 %v2799_v49  ;;  %2490 = vadd.xlane.f32.xlu1 %v2465_v15 }
 0x1d2   : > { %v7554_v59 = vpop.f32.mrf.mxu0 }
 0x1d3   : > { %9473 = vst [vmem:[#allocation50_spill] sm:$0xff] %v7554_v59  ;;  %v1860_v23 = vpop.f32.mrf.mxu1 }
 0x1d4   : > { %v5906_v12 = vpack.c.bf16 %v1860_v23, %v1856_v42  ;;  %v7560_v37 = vpop.f32.mrf.mxu0  ;;  %v2124_v23 = vmul.f32 %v7486_v6, %v7486_v6 }
 0x1d5   : > { %9474 = vst [vmem:[#allocation51_spill] sm:$0xff] %v7560_v37  ;;  %v1862_v61 = vpop.f32.mrf.mxu1  ;;  %2484 = vadd.xlane.f32.xlu0 %v2462_v40  ;;  %3164 = vadd.xlane.f32.xlu1 %v3139_v22 }
 0x1d6   : > { %5907 = vst [vmem:[%s7563_s26] sm:$0xff] %v5906_v12   ;;  %v5946_v15 = vpack.c.bf16 %v1862_v61, %v1858_v34  ;;  %v7566_v49 = vpop.f32.mrf.mxu0  ;;  %v2121_v34 = vmul.f32 %v7450_v1, %v7450_v1  ;;  %v2804_v61 = vmul.f32 %v7488_v35, %v7488_v35 }
 0x1d7   : > { %9475 = vst [vmem:[#allocation52_spill] sm:$0xff] %v7566_v49  ;;  %v1866_v41 = vpop.f32.mrf.mxu1 }
 0x1d8   : > { %6036 = vst [vmem:[%s7563_s26 + $0x40] sm:$0xff] %v5946_v15   ;;  %v7573_v42 = vpop.f32.mrf.mxu0 }
 0x1d9   : > { %9476 = vst [vmem:[#allocation53_spill] sm:$0xff] %v7573_v42  ;;  %v1868_v40 = vpop.f32.mrf.mxu1  ;;  %3158 = vadd.xlane.f32.xlu0 %v3136_v33  ;;  %2151 = vadd.xlane.f32.xlu1 %v2124_v23  ;;  %v2801_v23 = vmul.f32 %v7452_v2, %v7452_v2 }
 0x1da   : > { %v7575_v22 = vpop.f32.mrf.mxu0 }
 0x1db   : > { %9477 = vst [vmem:[#allocation54_spill] sm:$0xff] %v7575_v22  ;;  %v1870_v12 = vpop.f32.mrf.mxu1 }
 0x1dc   : > { %v5911_v16 = vpack.c.bf16 %v1870_v12, %v1866_v41  ;;  %v7581_v46 = vpop.f32.mrf.mxu0 }
 0x1dd   : > { %9478 = vst [vmem:[#allocation55_spill] sm:$0xff] %v7581_v46  ;;  %v1872_v6 = vpop.f32.mrf.mxu1  ;;  %2145 = vadd.xlane.f32.xlu0 %v2121_v34  ;;  %2831 = vadd.xlane.f32.xlu1 %v2804_v61 }
 0x1de   : > { %6029 = vst [vmem:[%s7563_s26 + $0x8] sm:$0xff] %v5911_v16   ;;  %v5951_v15 = vpack.c.bf16 %v1872_v6, %v1868_v40  ;;  %v7589_v1 = vpop.f32.mrf.mxu0  ;;  %v2464_v16 = vmul.f32 %v7458_v5, %v7458_v5  ;;  %v3141_v6 = vmul.f32 %v7496_v30, %v7496_v30 }
 0x1df   : > { %v1876_v33 = vpop.f32.mrf.mxu1  ;;  %9479 = vst [vmem:[#allocation56_spill] sm:$0xff] %v7589_v1 }
 0x1e0   : > { %6037 = vst [vmem:[%s7563_s26 + $0x48] sm:$0xff] %v5951_v15   ;;  %v7595_v40 = vpop.f32.mrf.mxu0 }
 0x1e1   : > { %v1878_v35 = vpop.f32.mrf.mxu1  ;;  %2825 = vadd.xlane.f32.xlu0 %v2801_v23  ;;  %2494 = vadd.xlane.f32.xlu1 %v2467_v52  ;;  %9480 = vst [vmem:[#allocation57_spill] sm:$0xff] %v7595_v40  ;;  %v3138_v52 = vmul.f32 %v7460_v14, %v7460_v14  ;;  %v2126_v23 = vmul.f32 %v7510_v0, %v7510_v0 }
 0x1e2   : > { %v7602_v54 = vpop.f32.mrf.mxu0 }
 0x1e3   : > { %v1880_v41 = vpop.f32.mrf.mxu1  ;;  %9481 = vst [vmem:[#allocation58_spill] sm:$0xff] %v7602_v54 }
 0x1e4   : > { %v5916_v12 = vpack.c.bf16 %v1880_v41, %v1876_v33  ;;  %v2123_v41 = vmul.f32 %v7474_v11, %v7474_v11 }
 0x1e5   : > { %v1882_v34 = vpop.f32.mrf.mxu1  ;;  %2488 = vadd.xlane.f32.xlu0 %v2464_v16  ;;  %3168 = vadd.xlane.f32.xlu1 %v3141_v6  ;;  %v7609_v16 = vpop.f32.mrf.mxu0 }
 0x1e6   : > { %6030 = vst [vmem:[%s7563_s26 + $0x10] sm:$0xff] %v5916_v12   ;;  %v5956_v61 = vpack.c.bf16 %v1882_v34, %v1878_v35  ;;  %v2806_v35 = vmul.f32 %v7512_v26, %v7512_v26  ;;  %9482 = vst [vmem:[#allocation59_spill] sm:$0xff] %v7609_v16 }
 0x1e7   : > { %v1886_v15 = vpop.f32.mrf.mxu1  ;;  %v7616_v0 = vpop.f32.mrf.mxu0 }
 0x1e8   : > { %6038 = vst [vmem:[%s7563_s26 + $0x50] sm:$0xff] %v5956_v61   ;;  %9483 = vst [vmem:[#allocation60_spill] sm:$0xff] %v7616_v0 }
 0x1e9   : > { %v1888_v30 = vpop.f32.mrf.mxu1  ;;  %3162 = vadd.xlane.f32.xlu0 %v3138_v52  ;;  %2155 = vadd.xlane.f32.xlu1 %v2126_v23  ;;  %v2803_v52 = vmul.f32 %v7476_v13, %v7476_v13  ;;  %v2469_v23 = vmul.f32 %v7518_v4, %v7518_v4 }
 0x1eb   : > { %v1890_v33 = vpop.f32.mrf.mxu1 }
 0x1ec   : > { %v5921_v6 = vpack.c.bf16 %v1890_v33, %v1886_v15  ;;  %v2466_v33 = vmul.f32 %v7482_v3, %v7482_v3 }
 0x1ed   : > { %v1892_v12 = vpop.f32.mrf.mxu1  ;;  %2149 = vadd.xlane.f32.xlu0 %v2123_v41  ;;  %2835 = vadd.xlane.f32.xlu1 %v2806_v35  ;;  %v7623_v41 = vpop.f32.mrf.mxu0 }
 0x1ee   : > { %6031 = vst [vmem:[%s7563_s26 + $0x18] sm:$0xff] %v5921_v6   ;;  %v5961_v34 = vpack.c.bf16 %v1892_v12, %v1888_v30  ;;  %v3143_v30 = vmul.f32 %v7520_v8, %v7520_v8  ;;  %9484 = vst [vmem:[#allocation61_spill] sm:$0xff] %v7623_v41 }
 0x1ef   : > { %v1896_v61 = vpop.f32.mrf.mxu1  ;;  %v7630_v4 = vpop.f32.mrf.mxu0 }
 0x1f0   : > { %6039 = vst [vmem:[%s7563_s26 + $0x58] sm:$0xff] %v5961_v34   ;;  %9485 = vst [vmem:[#allocation62_spill] sm:$0xff] %v7630_v4 }
 0x1f1   : > { %v1898_v26 = vpop.f32.mrf.mxu1  ;;  %2829 = vadd.xlane.f32.xlu0 %v2803_v52  ;;  %2498 = vadd.xlane.f32.xlu1 %v2469_v23  ;;  %v3140_v52 = vmul.f32 %v7484_v48, %v7484_v48  ;;  %v2128_v23 = vmul.f32 %v7534_v62, %v7534_v62 }
 0x1f3   : > { %v1900_v15 = vpop.f32.mrf.mxu1 }
 0x1f4   : > { %v5926_v35 = vpack.c.bf16 %v1900_v15, %v1896_v61  ;;  %v2125_v15 = vmul.f32 %v7498_v25, %v7498_v25 }
 0x1f5   : > { %v1902_v6 = vpop.f32.mrf.mxu1  ;;  %2492 = vadd.xlane.f32.xlu0 %v2466_v33  ;;  %3172 = vadd.xlane.f32.xlu1 %v3143_v30  ;;  %v7637_v33 = vpop.f32.mrf.mxu0 }
 0x1f6   : > { %6032 = vst [vmem:[%s7563_s26 + $0x20] sm:$0xff] %v5926_v35   ;;  %v5966_v12 = vpack.c.bf16 %v1902_v6, %v1898_v26  ;;  %v2808_v26 = vmul.f32 %v7536_v24, %v7536_v24  ;;  %9486 = vst [vmem:[#allocation63_spill] sm:$0xff] %v7637_v33 }
 0x1f7   : > { %v1906_v34 = vpop.f32.mrf.mxu1  ;;  %v7644_v62 = vpop.f32.mrf.mxu0 }
 0x1f8   : > { %6040 = vst [vmem:[%s7563_s26 + $0x60] sm:$0xff] %v5966_v12   ;;  %9487 = vst [vmem:[#allocation64_spill] sm:$0xff] %v7644_v62 }
 0x1f9   : > { %v1908_v8 = vpop.f32.mrf.mxu1  ;;  %3166 = vadd.xlane.f32.xlu0 %v3140_v52  ;;  %2159 = vadd.xlane.f32.xlu1 %v2128_v23  ;;  %v2805_v52 = vmul.f32 %v7500_v18, %v7500_v18  ;;  %v2471_v23 = vmul.f32 %v7542_v55, %v7542_v55 }
 0x1fb   : > { %v1910_v61 = vpop.f32.mrf.mxu1 }
 0x1fc   : > { %v5931_v30 = vpack.c.bf16 %v1910_v61, %v1906_v34  ;;  %v2468_v61 = vmul.f32 %v7506_v63, %v7506_v63 }
 0x1fd   : > { %v1912_v35 = vpop.f32.mrf.mxu1  ;;  %2153 = vadd.xlane.f32.xlu0 %v2125_v15  ;;  %2839 = vadd.xlane.f32.xlu1 %v2808_v26  ;;  %v7651_v15 = vpop.f32.mrf.mxu0 }
 0x1fe   : > { %6033 = vst [vmem:[%s7563_s26 + $0x28] sm:$0xff] %v5931_v30   ;;  %v5971_v6 = vpack.c.bf16 %v1912_v35, %v1908_v8  ;;  %v3145_v8 = vmul.f32 %v7544_v50, %v7544_v50  ;;  %9488 = vst [vmem:[#allocation65_spill] sm:$0xff] %v7651_v15 }
 0x1ff   : > { %v1916_v12 = vpop.f32.mrf.mxu1  ;;  %v7658_v55 = vpop.f32.mrf.mxu0 }
 0x200   : > { %6041 = vst [vmem:[%s7563_s26 + $0x68] sm:$0xff] %v5971_v6   ;;  %9489 = vst [vmem:[#allocation66_spill] sm:$0xff] %v7658_v55 }
 0x201   : > { %v1918_v24 = vpop.f32.mrf.mxu1  ;;  %2833 = vadd.xlane.f32.xlu0 %v2805_v52  ;;  %2502 = vadd.xlane.f32.xlu1 %v2471_v23  ;;  %v3142_v52 = vmul.f32 %v7508_v31, %v7508_v31  ;;  %v3468_v23 = vmul.f32 %v7554_v59, %v7554_v59 }
 0x203   : > { %v1920_v34 = vpop.f32.mrf.mxu1 }
 0x204   : > { %v5936_v26 = vpack.c.bf16 %v1920_v34, %v1916_v12  ;;  %v2127_v34 = vmul.f32 %v7522_v28, %v7522_v28 }
 0x205   : > { %v1922_v30 = vpop.f32.mrf.mxu1  ;;  %2496 = vadd.xlane.f32.xlu0 %v2468_v61  ;;  %3176 = vadd.xlane.f32.xlu1 %v3145_v8  ;;  %v7665_v61 = vpop.f32.mrf.mxu0 }
 0x206   : > { %6034 = vst [vmem:[%s7563_s26 + $0x30] sm:$0xff] %v5936_v26   ;;  %v5976_v35 = vpack.c.bf16 %v1922_v30, %v1918_v24  ;;  %v3810_v24 = vmul.f32 %v7560_v37, %v7560_v37  ;;  %9490 = vst [vmem:[#allocation67_spill] sm:$0xff] %v7665_v61  ;;  %v2470_v37 = vmul.f32 %v7530_v44, %v7530_v44 }
 0x207   : > { %v1926_v6 = vpop.f32.mrf.mxu1 }
 0x208   : > { %6042 = vst [vmem:[%s7563_s26 + $0x70] sm:$0xff] %v5976_v35   ;;  %v2807_v35 = vmul.f32 %v7524_v45, %v7524_v45 }
 0x209   : > { %v1928_v50 = vpop.f32.mrf.mxu1  ;;  %3170 = vadd.xlane.f32.xlu0 %v3142_v52  ;;  %3485 = vadd.xlane.f32.xlu1 %v3468_v23  ;;  %v3812_v52 = vmul.f32 %v7581_v46, %v7581_v46  ;;  %v7672_v23 = vpop.f32.mrf.mxu0 }
 0x20a   : > { %9491 = vst [vmem:[#allocation68_spill] sm:$0xff] %v7672_v23 }
 0x20b   : > { %v1930_v12 = vpop.f32.mrf.mxu1 }
 0x20c   : > { %v5941_v8 = vpack.c.bf16 %v1930_v12, %v1926_v6  ;;  %v3472_v6 = vmul.f32 %v7602_v54, %v7602_v54  ;;  %v7679_v12 = vpop.f32.mrf.mxu0 }
 0x20d   : > { %v1932_v26 = vpop.f32.mrf.mxu1  ;;  %2157 = vadd.xlane.f32.xlu0 %v2127_v34  ;;  %3827 = vadd.xlane.f32.xlu1 %v3810_v24  ;;  %9492 = vst [vmem:[#allocation69_spill] sm:$0xff] %v7679_v12  ;;  %v3814_v34 = vmul.f32 %v7609_v16, %v7609_v16 }
 0x20e   : > { %6035 = vst [vmem:[%s7563_s26 + $0x38] sm:$0xff] %v5941_v8   ;;  %v5981_v30 = vpack.c.bf16 %v1932_v26, %v1928_v50  ;;  %v3144_v50 = vmul.f32 %v7532_v60, %v7532_v60  ;;  %v7685_v24 = vpop.f32.mrf.mxu0  ;;  %v3467_v26 = vmul.f32 %v7546_v57, %v7546_v57 }
 0x20f   : > { %9493 = vst [vmem:[#allocation70_spill] sm:$0xff] %v7685_v24 }
 0x210   : > { %6043 = vst [vmem:[%s7563_s26 + $0x78] sm:$0xff] %v5981_v30   ;;  %v3474_v30 = vmul.f32 %v7630_v4, %v7630_v4 }
 0x211   : > { %2837 = vadd.xlane.f32.xlu0 %v2807_v35  ;;  %3831 = vadd.xlane.f32.xlu1 %v3812_v52 }
 0x215   : > { %2500 = vadd.xlane.f32.xlu0 %v2470_v37  ;;  %3493 = vadd.xlane.f32.xlu1 %v3472_v6  ;;  %v7693_v37 = vpop.f32.mrf.mxu0  ;;  %v3809_v6 = vmul.f32 %v7552_v39, %v7552_v39 }
 0x216   : > { %9494 = vst [vmem:[#allocation71_spill] sm:$0xff] %v7693_v37 }
 0x219   : > { %3174 = vadd.xlane.f32.xlu0 %v3144_v50  ;;  %3835 = vadd.xlane.f32.xlu1 %v3814_v34  ;;  %v3816_v50 = vmul.f32 %v7637_v33, %v7637_v33  ;;  %v7701_v34 = vpop.f32.mrf.mxu0 }
 0x21a   : > { %v7687_v8 = vpop.xlane.xlu0 %2129  ;;  %9495 = vst [vmem:[#allocation72_spill] sm:$0xff] %v7701_v34 }
 0x21b   : > { %v7709_v4 = vpop.f32.mrf.mxu0 }
 0x21c   : > { %9496 = vst [vmem:[#allocation73_spill] sm:$0xff] %v7709_v4 }
 0x21d   : > { %3483 = vadd.xlane.f32.xlu0 %v3467_v26  ;;  %3497 = vadd.xlane.f32.xlu1 %v3474_v30  ;;  %v3469_v26 = vmul.f32 %v7566_v49, %v7566_v49  ;;  %v3476_v30 = vmul.f32 %v7658_v55, %v7658_v55  ;;  %v7717_v33 = vpop.f32.mrf.mxu0  ;;  %v3470_v55 = vmul.f32 %v7575_v22, %v7575_v22 }
 0x21e   : > { %v2132_v35 = vpop.xlane.xlu1 %2131  ;;  %v7695_v52 = vpop.xlane.xlu0 %2809  ;;  %9497 = vst [vmem:[#allocation74_spill] sm:$0xff] %v7717_v33  ;;  %v3480_v60 = vmul.f32 %v7717_v33, %v7717_v33 }
 0x221   : > { %3825 = vadd.xlane.f32.xlu0 %v3809_v6  ;;  %3839 = vadd.xlane.f32.xlu1 %v3816_v50  ;;  %v3811_v6 = vmul.f32 %v7573_v42, %v7573_v42  ;;  %v3818_v50 = vmul.f32 %v7665_v61, %v7665_v61  ;;  %v3471_v61 = vmul.f32 %v7589_v1, %v7589_v1 }
 0x222   : > { %v2812_v16 = vpop.xlane.xlu1 %2811  ;;  %v7703_v54 = vpop.xlane.xlu0 %2472 }
 0x225   : > { %3487 = vadd.xlane.f32.xlu0 %v3469_v26  ;;  %3501 = vadd.xlane.f32.xlu1 %v3476_v30  ;;  %v3478_v26 = vmul.f32 %v7685_v24, %v7685_v24  ;;  %v7723_v30 = vpop.f32.mrf.mxu0 }
 0x226   : > { %v2475_v46 = vpop.xlane.xlu1 %2474  ;;  %v7711_v39 = vpop.xlane.xlu0 %3146  ;;  %9498 = vst [vmem:[#allocation75_spill] sm:$0xff] %v7723_v30 }
 0x229   : > { %3829 = vadd.xlane.f32.xlu0 %v3811_v6  ;;  %3843 = vadd.xlane.f32.xlu1 %v3818_v50  ;;  %v3820_v6 = vmul.f32 %v7693_v37, %v7693_v37  ;;  %v7731_v50 = vpop.f32.mrf.mxu0 }
 0x22a   : > { %v3149_v49 = vpop.xlane.xlu1 %3148  ;;  %v2134_v57 = vpop.xlane.xlu0 %2133  ;;  %9499 = vst [vmem:[#allocation76_spill] sm:$0xff] %v7731_v50 }
 0x22b   : > { %v7739_v44 = vpop.f32.mrf.mxu0 }
 0x22c   : > { %9500 = vst [vmem:[#allocation77_spill] sm:$0xff] %v7739_v44 }
 0x22d   : > { %3489 = vadd.xlane.f32.xlu0 %v3470_v55  ;;  %3505 = vadd.xlane.f32.xlu1 %v3478_v26  ;;  %v3813_v55 = vmul.f32 %v7595_v40, %v7595_v40  ;;  %v2163_v26 = vmul.f32 0.0078125, %v2132_v35  ;;  %v7747_v28 = vpop.f32.mrf.mxu0  ;;  %v2842_v35 = vmul.f32 0.0078125, %v2812_v16 }
 0x22e   : > { %v7725_v42 = vpop.xlane.xlu1 %2135  ;;  %v2814_v59 = vpop.xlane.xlu0 %2813  ;;  %9501 = vst [vmem:[#allocation78_spill] sm:$0xff] %v7747_v28 }
 0x22f   : > { %v2179_v45 = vadd.f32 1e-06, %v2163_v26  ;;  %v2505_v26 = vmul.f32 0.0078125, %v2475_v46 }
 0x231   : > { %3491 = vadd.xlane.f32.xlu0 %v3471_v61  ;;  %3847 = vadd.xlane.f32.xlu1 %v3820_v6  ;;  %v3473_v61 = vmul.f32 %v7616_v0, %v7616_v0  ;;  %v3822_v6 = vmul.f32 %v7723_v30, %v7723_v30  ;;  %6118 = vrsqrt.f32 %v2179_v45  ;;  %v7757_v0 = vpop.f32.mrf.mxu0  ;;  %v2858_v30 = vadd.f32 1e-06, %v2842_v35 }
 0x232   : > { %v7733_v22 = vpop.xlane.xlu1 %2139  ;;  %v2477_v24 = vpop.xlane.xlu0 %2476  ;;  %9502 = vst [vmem:[#allocation79_spill] sm:$0xff] %v7757_v0  ;;  %v2521_v31 = vadd.f32 1e-06, %v2505_v26  ;;  %v3817_v35 = vmul.f32 %v7651_v15, %v7651_v15  ;;  %v2843_v26 = vmul.f32 0.0078125, %v2814_v59  ;;  %v7793_v59 = vld [vmem:[%s9280_s3] ss:$0 sm:$0xff] }
 0x233   : > { %6120 = vrsqrt.f32 %v2858_v30 }
 0x234   : > { %6122 = vrsqrt.f32 %v2521_v31 }
 0x235   : > { %3833 = vadd.xlane.f32.xlu0 %v3813_v55  ;;  %3509 = vadd.xlane.f32.xlu1 %v3480_v60  ;;  %v3815_v60 = vmul.f32 %v7623_v41, %v7623_v41  ;;  %v3482_v55 = vmul.f32 %v7747_v28, %v7747_v28  ;;  %v3824_v41 = vmul.f32 %v7757_v0, %v7757_v0  ;;  %v3179_v28 = vmul.f32 0.0078125, %v3149_v49 }
 0x236   : > { %v7741_v1 = vpop.xlane.xlu1 %2819  ;;  %v3151_v37 = vpop.xlane.xlu0 %3150  ;;  %v3477_v49 = vmul.f32 %v7672_v23, %v7672_v23 }
 0x239   : > { %3495 = vadd.xlane.f32.xlu0 %v3473_v61  ;;  %3851 = vadd.xlane.f32.xlu1 %v3822_v6  ;;  %v3475_v6 = vmul.f32 %v7644_v62, %v7644_v62 }
 0x23a   : > { %v7749_v33 = vpop.xlane.xlu1 %2482  ;;  %v7751_v40 = vpop.xlane.xlu0 %2815 }
 0x23d   : > { %3837 = vadd.xlane.f32.xlu0 %v3815_v60  ;;  %3513 = vadd.xlane.f32.xlu1 %v3482_v55  ;;  %v3195_v60 = vadd.f32 1e-06, %v3179_v28  ;;  %v2164_v55 = vmul.f32 0.0078125, %v2134_v57  ;;  %v3819_v57 = vmul.f32 %v7679_v12, %v7679_v12  ;;  %v2859_v28 = vadd.f32 1e-06, %v2843_v26 }
 0x23e   : > { %v7759_v16 = vpop.xlane.xlu1 %3156  ;;  %v7761_v61 = vpop.xlane.xlu0 %2478 }
 0x23f   : > { %v6119_v30 = vpop.eup %6118  ;;  %6124 = vrsqrt.f32 %v3195_v60 }
 0x240   : > { %v2211_v31 = vmul.f32 %v6119_v30, %v7366_v36  ;;  %v6121_v15 = vpop.eup %6120 }
 0x241   : > { %3499 = vadd.xlane.f32.xlu0 %v3475_v6  ;;  %3855 = vadd.xlane.f32.xlu1 %v3824_v41  ;;  %v2180_v41 = vadd.f32 1e-06, %v2164_v55  ;;  %v3479_v55 = vmul.f32 %v7701_v34, %v7701_v34  ;;  %v2890_v30 = vmul.f32 %v6121_v15, %v7368_v32  ;;  %v3821_v34 = vmul.f32 %v7709_v4, %v7709_v4 }
 0x242   : > { %v7767_v45 = vpop.xlane.xlu1 %2143  ;;  %v7769_v46 = vpop.xlane.xlu0 %3152 }
 0x243   : > { %6126 = vrsqrt.f32 %v2180_v41  ;;  %v6123_v41 = vpop.eup %6122  ;;  %v7812_v32 = vmul.f32 %v7793_v59, %v2890_v30 }
 0x244   : > { %6128 = vrsqrt.f32 %v2859_v28  ;;  %v2165_v28 = vmul.f32 0.0078125, %v7725_v42  ;;  %v2553_v15 = vmul.f32 %v6123_v41, %v7374_v9  ;;  %v2841_v41 = vmul.f32 0.0078125, %v7695_v52 }
 0x245   : > { %3841 = vadd.xlane.f32.xlu0 %v3817_v35  ;;  %v2506_v35 = vmul.f32 0.0078125, %v2477_v24  ;;  %v3180_v24 = vmul.f32 0.0078125, %v3151_v37 }
 0x246   : > { %v7773_v62 = vpop.xlane.xlu1 %2823  ;;  %v7775_v63 = vpop.xlane.xlu0 %2137  ;;  %v7825_v30 = vmul.f32 %v7793_v59, %v2553_v15  ;;  %v2857_v15 = vadd.f32 1e-06, %v2841_v41 }
 0x247   : > { %v2522_v36 = vadd.f32 1e-06, %v2506_v35  ;;  %v3196_v37 = vadd.f32 1e-06, %v3180_v24  ;;  %v2181_v24 = vadd.f32 1e-06, %v2165_v28 }
 0x248   : > { %v2507_v28 = vmul.f32 0.0078125, %v7761_v61  ;;  %v3181_v61 = vmul.f32 0.0078125, %v7769_v46 }
 0x249   : > { %3503 = vadd.xlane.f32.xlu0 %v3477_v49  ;;  %v7798_v49 = vmul.f32 %v7793_v59, %v2211_v31  ;;  %v2162_v31 = vmul.f32 0.0078125, %v7687_v8  ;;  %6130 = vrsqrt.f32 %v2522_v36  ;;  %v3481_v8 = vmul.f32 %v7731_v50, %v7731_v50 }
 0x24a   : > { %v7779_v6 = vpop.xlane.xlu1 %2486  ;;  %v7781_v0 = vpop.xlane.xlu0 %2817  ;;  %v2844_v36 = vmul.f32 0.0078125, %v7751_v40  ;;  %6132 = vrsqrt.f32 %v3196_v37  ;;  %v3823_v40 = vmul.f32 %v7739_v44, %v7739_v44  ;;  %v3197_v46 = vadd.f32 1e-06, %v3181_v61 }
 0x24b   : > { %v2178_v42 = vadd.f32 1e-06, %v2162_v31  ;;  %v2846_v61 = vmul.f32 0.0078125, %v7741_v1  ;;  %v2509_v44 = vmul.f32 0.0078125, %v7749_v33 }
 0x24c   : > { %v6125_v35 = vpop.eup %6124  ;;  %v2860_v31 = vadd.f32 1e-06, %v2844_v36  ;;  %v2523_v36 = vadd.f32 1e-06, %v2507_v28 }
 0x24d   : > { %3845 = vadd.xlane.f32.xlu0 %v3819_v57  ;;  %v3227_v9 = vmul.f32 %v6125_v35, %v7376_v21  ;;  %6134 = vrsqrt.f32 %v2178_v42  ;;  %v2504_v35 = vmul.f32 0.0078125, %v7703_v54 }
 0x24e   : > { %v7786_v23 = vpop.xlane.xlu1 %3160  ;;  %v7788_v60 = vpop.xlane.xlu0 %2480  ;;  %6136 = vrsqrt.f32 %v2181_v24 }
 0x24f   : > { %v7839_v21 = vmul.f32 %v7793_v59, %v3227_v9  ;;  %6138 = vrsqrt.f32 %v2860_v31  ;;  %v2520_v54 = vadd.f32 1e-06, %v2504_v35  ;;  %v2167_v31 = vmul.f32 0.0078125, %v7733_v22 }
 0x250   : > { %6140 = vrsqrt.f32 %v2857_v15 }
 0x251   : > { %3507 = vadd.xlane.f32.xlu0 %v3479_v55  ;;  %6142 = vrsqrt.f32 %v2523_v36  ;;  %v2183_v22 = vadd.f32 1e-06, %v2167_v31 }
 0x252   : > { %v7801_v26 = vpop.xlane.xlu1 %2147  ;;  %2266 = vrot.lane.b32.xlu1 %v7798_v49, %s6377_s30  ;;  %v7805_v57 = vpop.xlane.xlu0 %3154  ;;  %6144 = vrsqrt.f32 %v2520_v54  ;;  %v2845_v54 = vmul.f32 0.0078125, %v7781_v0 }
 0x253   : > { %6146 = vrsqrt.f32 %v3197_v46 }
 0x254   : > { %v2861_v0 = vadd.f32 1e-06, %v2845_v54 }
 0x255   : > { %3849 = vadd.xlane.f32.xlu0 %v3821_v34  ;;  %v6127_v34 = vpop.eup %6126 }
 0x256   : > { %v7815_v55 = vpop.xlane.xlu1 %2827  ;;  %2939 = vrot.lane.b32.xlu1 %v7812_v32, %s6377_s30  ;;  %v7819_v12 = vpop.xlane.xlu0 %2141  ;;  %v2212_v52 = vmul.f32 %v6127_v34, %v7378_v20  ;;  %v3178_v34 = vmul.f32 0.0078125, %v7711_v39  ;;  %v2166_v39 = vmul.f32 0.0078125, %v7775_v63 }
 0x257   : > { %v6129_v37 = vpop.eup %6128 }
 0x258   : > { %v7851_v24 = vmul.f32 %v7793_v59, %v2212_v52  ;;  %v2891_v20 = vmul.f32 %v6129_v37, %v7380_v10  ;;  %v6131_v9 = vpop.eup %6130  ;;  %v3194_v37 = vadd.f32 1e-06, %v3178_v34  ;;  %v2182_v63 = vadd.f32 1e-06, %v2166_v39 }
 0x259   : > { %3511 = vadd.xlane.f32.xlu0 %v3481_v8  ;;  %v2554_v10 = vmul.f32 %v6131_v9, %v7386_v17  ;;  %v6133_v52 = vpop.eup %6132 }
 0x25a   : > { %v7829_v4 = vpop.xlane.xlu1 %2490  ;;  %2602 = vrot.lane.b32.xlu1 %v7825_v30, %s6377_s30  ;;  %v7833_v50 = vpop.xlane.xlu0 %2821  ;;  %v7863_v28 = vmul.f32 %v7793_v59, %v2891_v20  ;;  %v3228_v17 = vmul.f32 %v6133_v52, %v7388_v43  ;;  %6148 = vrsqrt.f32 %v3194_v37  ;;  %v2508_v37 = vmul.f32 0.0078125, %v7788_v60 }
 0x25b   : > { %v6135_v36 = vpop.eup %6134  ;;  %v7875_v20 = vmul.f32 %v7793_v59, %v2554_v10  ;;  %6150 = vrsqrt.f32 %v2183_v22  ;;  %v2862_v10 = vadd.f32 1e-06, %v2846_v61  ;;  %v3183_v22 = vmul.f32 0.0078125, %v7759_v16 }
 0x25c   : > { %v6137_v9 = vpop.eup %6136  ;;  %v2210_v1 = vmul.f32 %v6135_v36, %v7356_v53  ;;  %v7888_v43 = vmul.f32 %v7793_v59, %v3228_v17  ;;  %6152 = vrsqrt.f32 %v2182_v63  ;;  %v2525_v36 = vadd.f32 1e-06, %v2509_v44 }
 0x25d   : > { %3853 = vadd.xlane.f32.xlu0 %v3823_v40  ;;  %9503 = vst [vmem:[#allocation80_spill] sm:$0xff] %v7875_v20  ;;  %v6139_v46 = vpop.eup %6138  ;;  %v2213_v52 = vmul.f32 %v6137_v9, %v7390_v51  ;;  %6154 = vrsqrt.f32 %v2862_v10  ;;  %v2524_v17 = vadd.f32 1e-06, %v2508_v37  ;;  %v3182_v9 = vmul.f32 0.0078125, %v7805_v57 }
 0x25e   : > { %v7843_v8 = vpop.xlane.xlu1 %3164  ;;  %3276 = vrot.lane.b32.xlu1 %v7839_v21, %s6377_s30  ;;  %v7847_v42 = vpop.xlane.xlu0 %2484  ;;  %9504 = vst [vmem:[#allocation81_spill] sm:$0xff] %v7888_v43  ;;  %v7900_v33 = vmul.f32 %v7793_v59, %v2210_v1  ;;  %v2892_v60 = vmul.f32 %v6139_v46, %v7392_v58  ;;  %6156 = vrsqrt.f32 %v2861_v0  ;;  %v3199_v44 = vadd.f32 1e-06, %v3183_v22 }
 0x25f   : > { %v6141_v39 = vpop.eup %6140  ;;  %v7903_v51 = vmul.f32 %v7793_v59, %v2213_v52  ;;  %v2169_v1 = vmul.f32 0.0078125, %v7767_v45  ;;  %6158 = vrsqrt.f32 %v2525_v36  ;;  %v2168_v58 = vmul.f32 0.0078125, %v7819_v12 }
 0x260   : > { %v6143_v61 = vpop.eup %6142  ;;  %v2889_v63 = vmul.f32 %v6141_v39, %v7358_v56  ;;  %v7919_v57 = vmul.f32 %v7793_v59, %v2892_v60  ;;  %6160 = vrsqrt.f32 %v2524_v17  ;;  %v3198_v10 = vadd.f32 1e-06, %v3182_v9 }
 0x261   : > { %v6145_v54 = vpop.eup %6144  ;;  %v2555_v56 = vmul.f32 %v6143_v61, %v7398_v19  ;;  %6162 = vrsqrt.f32 %v3199_v44  ;;  %v2185_v39 = vadd.f32 1e-06, %v2169_v1  ;;  %v2848_v19 = vmul.f32 0.0078125, %v7773_v62 }
 0x262   : > { %v7855_v41 = vpop.xlane.xlu1 %2151  ;;  %2268 = vrot.lane.b32.xlu1 %v7851_v24, %s6377_s30  ;;  %v7859_v40 = vpop.xlane.xlu0 %3158  ;;  %v7923_v52 = vmul.f32 %v7793_v59, %v2889_v63  ;;  %v2552_v0 = vmul.f32 %v6145_v54, %v7362_v29  ;;  %v2184_v36 = vadd.f32 1e-06, %v2168_v58  ;;  %6164 = vrsqrt.f32 %v3198_v10 }
 0x263   : > { %v6147_v46 = vpop.eup %6146  ;;  %v7936_v60 = vmul.f32 %v7793_v59, %v2555_v56  ;;  %v2847_v61 = vmul.f32 0.0078125, %v7833_v50  ;;  %6166 = vrsqrt.f32 %v2185_v39  ;;  %v2864_v44 = vadd.f32 1e-06, %v2848_v19 }
 0x264   : > { %v3229_v29 = vmul.f32 %v6147_v46, %v7400_v38  ;;  %v7941_v17 = vmul.f32 %v7793_v59, %v2552_v0  ;;  %v2511_v38 = vmul.f32 0.0078125, %v7779_v6  ;;  %6168 = vrsqrt.f32 %v2184_v36 }
 0x265   : > { %9505 = vst [vmem:[#allocation82_spill] sm:$0xff] %v7936_v60  ;;  %v2510_v50 = vmul.f32 0.0078125, %v7847_v42  ;;  %v2863_v56 = vadd.f32 1e-06, %v2847_v61  ;;  %6170 = vrsqrt.f32 %v2864_v44  ;;  %v3185_v39 = vmul.f32 0.0078125, %v7786_v23 }
 0x266   : > { %v7867_v15 = vpop.xlane.xlu1 %2831  ;;  %2941 = vrot.lane.b32.xlu1 %v7863_v28, %s6377_s30  ;;  %v7871_v35 = vpop.xlane.xlu0 %2145  ;;  %v2527_v42 = vadd.f32 1e-06, %v2511_v38 }
 0x267   : > { %v6149_v45 = vpop.eup %6148  ;;  %6172 = vrsqrt.f32 %v2863_v56 }
 0x268   : > { %v6151_v22 = vpop.eup %6150  ;;  %v3226_v9 = vmul.f32 %v6149_v45, %v7364_v7  ;;  %v7955_v7 = vmul.f32 %v7793_v59, %v3229_v29  ;;  %v3184_v29 = vmul.f32 0.0078125, %v7859_v40  ;;  %6174 = vrsqrt.f32 %v2527_v42  ;;  %v9514_v42 = vld [vmem:[#allocation12_spill] sm:$0xff] }
 0x269   : > { %v6153_v63 = vpop.eup %6152  ;;  %v2215_v1 = vmul.f32 %v6151_v22, %v7414_v27  ;;  %v2526_v27 = vadd.f32 1e-06, %v2510_v50  ;;  %v3201_v50 = vadd.f32 1e-06, %v3185_v39 }
 0x26a   : > { %v7879_v34 = vpop.xlane.xlu1 %2494  ;;  %2604 = vrot.lane.b32.xlu1 %v7875_v20, %s6377_s30  ;;  %v7883_v31 = vpop.xlane.xlu0 %2825  ;;  %9506 = vst [vmem:[#allocation83_spill] sm:$0xff] %v7955_v7  ;;  %v7959_v46 = vmul.f32 %v7793_v59, %v3226_v9  ;;  %v2214_v10 = vmul.f32 %v6153_v63, %v7402_v47  ;;  %v9508_v47 = vld [vmem:[#allocation14_spill] sm:$0xff]  ;;  %v9510_v9 = vld [vmem:[#allocation11_spill] sm:$0xff] }
 0x26b   : > { %v6155_v58 = vpop.eup %6154  ;;  %v7972_v19 = vmul.f32 %v7793_v59, %v2215_v1  ;;  %v2171_v1 = vmul.f32 0.0078125, %v7801_v26  ;;  %6176 = vrsqrt.f32 %v2526_v27 }
 0x26c   : > { %v6157_v0 = vpop.eup %6156  ;;  %v2894_v22 = vmul.f32 %v6155_v58, %v9508_v47  ;;  %v7977_v61 = vmul.f32 %v7793_v59, %v2214_v10  ;;  %v2170_v58 = vmul.f32 0.0078125, %v7871_v35  ;;  %v9512_v10 = vld [vmem:[#allocation15_spill] sm:$0xff]  ;;  %v3200_v47 = vadd.f32 1e-06, %v3184_v29 }
 0x26d   : > { %9507 = vst [vmem:[#allocation84_spill] sm:$0xff] %v7972_v19  ;;  %v6159_v36 = vpop.eup %6158  ;;  %v2893_v63 = vmul.f32 %v6157_v0, %v9510_v9  ;;  %6178 = vrsqrt.f32 %v3201_v50  ;;  %v2187_v35 = vadd.f32 1e-06, %v2171_v1  ;;  %v9518_v50 = vld [vmem:[#allocation13_spill] sm:$0xff] }
 0x26e   : > { %v7892_v20 = vpop.xlane.xlu1 %3168  ;;  %3278 = vrot.lane.b32.xlu1 %v7888_v43, %s6377_s30  ;;  %v7896_v53 = vpop.xlane.xlu0 %2488  ;;  %9509 = vst [vmem:[#allocation14_spill] sm:$0xff] %v7977_v61  ;;  %v7991_v56 = vmul.f32 %v7793_v59, %v2894_v22  ;;  %v2557_v0 = vmul.f32 %v6159_v36, %v9512_v10  ;;  %v9515_v22 = vld [vmem:[#allocation16_spill] sm:$0xff]  ;;  %v2186_v10 = vadd.f32 1e-06, %v2170_v58  ;;  %6180 = vrsqrt.f32 %v3200_v47 }
 0x26f   : > { %v6161_v44 = vpop.eup %6160  ;;  %v7995_v9 = vmul.f32 %v7793_v59, %v2893_v63  ;;  %v2850_v63 = vmul.f32 0.0078125, %v7815_v55  ;;  %6182 = vrsqrt.f32 %v2187_v35 }
 0x270   : > { %v6163_v40 = vpop.eup %6162  ;;  %9511 = vst [vmem:[#allocation11_spill] sm:$0xff] %v7991_v56  ;;  %v2556_v39 = vmul.f32 %v6161_v44, %v9514_v42  ;;  %v8009_v44 = vmul.f32 %v7793_v59, %v2557_v0  ;;  %6184 = vrsqrt.f32 %v2186_v10  ;;  %v3187_v10 = vmul.f32 0.0078125, %v7843_v8 }
 0x271   : > { %9513 = vst [vmem:[#allocation15_spill] sm:$0xff] %v7995_v9  ;;  %v3231_v36 = vmul.f32 %v6163_v40, %v9515_v22  ;;  %v2866_v47 = vadd.f32 1e-06, %v2850_v63 }
 0x272   : > { %v7908_v43 = vpop.xlane.xlu1 %2155  ;;  %2270 = vrot.lane.b32.xlu1 %v7903_v51, %s6377_s30  ;;  %v7912_v16 = vpop.xlane.xlu0 %3162  ;;  %9516 = vst [vmem:[#allocation12_spill] sm:$0xff] %v8009_v44 }
 0x273   : > { %2264 = vrot.lane.b32.xlu0 %v7900_v33, %s6377_s30  ;;  %v8025_v55 = vmul.f32 %v7793_v59, %v3231_v36  ;;  %6186 = vrsqrt.f32 %v2866_v47 }
 0x275   : > { %9519 = vst [vmem:[#allocation13_spill] sm:$0xff] %v8025_v55 }
 0x276   : > { %v7926_v37 = vpop.xlane.xlu1 %2835  ;;  %2943 = vrot.lane.b32.xlu1 %v7919_v57, %s6377_s30  ;;  %v7930_v12 = vpop.xlane.xlu0 %2149 }
 0x277   : > { %2937 = vrot.lane.b32.xlu0 %v7923_v52, %s6377_s30 }
 0x27a   : > { %v7944_v62 = vpop.xlane.xlu1 %2498  ;;  %2606 = vrot.lane.b32.xlu1 %v7936_v60, %s6377_s30  ;;  %v7948_v54 = vpop.xlane.xlu0 %2829 }
 0x27b   : > { %2600 = vrot.lane.b32.xlu0 %v7941_v17, %s6377_s30 }
 0x27e   : > { %v7962_v6 = vpop.xlane.xlu1 %3172  ;;  %3280 = vrot.lane.b32.xlu1 %v7955_v7, %s6377_s30  ;;  %v7966_v45 = vpop.xlane.xlu0 %2492 }
 0x27f   : > { %3274 = vrot.lane.b32.xlu0 %v7959_v46, %s6377_s30 }
 0x282   : > { %v7980_v23 = vpop.xlane.xlu1 %2159  ;;  %2274 = vrot.lane.b32.xlu1 %v7972_v19, %s6377_s30  ;;  %v7984_v38 = vpop.xlane.xlu0 %3166 }
 0x283   : > { %2272 = vrot.lane.b32.xlu0 %v7977_v61, %s6377_s30  ;;  %v6165_v19 = vpop.eup %6164  ;;  %v8013_v61 = vmul.f32 %v7793_v59, %v2556_v39  ;;  %v9521_v39 = vld [vmem:[#allocation17_spill] sm:$0xff] }
 0x284   : > { %v6167_v29 = vpop.eup %6166  ;;  %v3230_v1 = vmul.f32 %v6165_v19, %v9518_v50  ;;  %v2513_v19 = vmul.f32 0.0078125, %v7829_v4 }
 0x285   : > { %v6169_v42 = vpop.eup %6168  ;;  %9517 = vst [vmem:[#allocation16_spill] sm:$0xff] %v8013_v61 }
 0x286   : > { %v7998_v26 = vpop.xlane.xlu1 %2839  ;;  %2947 = vrot.lane.b32.xlu1 %v7991_v56, %s6377_s30  ;;  %v8002_v27 = vpop.xlane.xlu0 %2153  ;;  %v2849_v56 = vmul.f32 0.0078125, %v7883_v31  ;;  %v9520_v31 = vld [vmem:[#allocation21_spill] sm:$0xff]  ;;  %v2216_v22 = vmul.f32 %v6169_v42, %v9521_v39  ;;  %v8032_v35 = vmul.f32 %v7793_v59, %v3230_v1  ;;  %v2529_v63 = vadd.f32 1e-06, %v2513_v19 }
 0x287   : > { %2945 = vrot.lane.b32.xlu0 %v7995_v9, %s6377_s30  ;;  %v2217_v58 = vmul.f32 %v6167_v29, %v9520_v31  ;;  %v6171_v0 = vpop.eup %6170  ;;  %v3186_v39 = vmul.f32 0.0078125, %v7912_v16  ;;  %v3203_v16 = vadd.f32 1e-06, %v3187_v10  ;;  %v2852_v10 = vmul.f32 0.0078125, %v7867_v15 }
 0x288   : > { %v2865_v50 = vadd.f32 1e-06, %v2849_v56  ;;  %9522 = vst [vmem:[#allocation21_spill] sm:$0xff] %v8032_v35  ;;  %v6173_v9 = vpop.eup %6172  ;;  %v9524_v56 = vld [vmem:[#allocation22_spill] sm:$0xff]  ;;  %v8048_v42 = vmul.f32 %v7793_v59, %v2216_v22 }
 0x289   : > { %v8043_v4 = vmul.f32 %v7793_v59, %v2217_v58  ;;  %v2896_v29 = vmul.f32 %v6171_v0, %v9524_v56  ;;  %v9528_v0 = vld [vmem:[#allocation23_spill] sm:$0xff]  ;;  %v3202_v22 = vadd.f32 1e-06, %v3186_v39 }
 0x28a   : > { %v8016_v7 = vpop.xlane.xlu1 %2502  ;;  %2610 = vrot.lane.b32.xlu1 %v8009_v44, %s6377_s30  ;;  %v8020_v40 = vpop.xlane.xlu0 %2833  ;;  %v2512_v44 = vmul.f32 0.0078125, %v7896_v53  ;;  %9525 = vst [vmem:[#allocation22_spill] sm:$0xff] %v8048_v42  ;;  %6188 = vrsqrt.f32 %v2865_v50  ;;  %v2172_v50 = vmul.f32 0.0078125, %v7930_v12 }
 0x28b   : > { %2608 = vrot.lane.b32.xlu0 %v8013_v61, %s6377_s30  ;;  %9523 = vst [vmem:[#allocation17_spill] sm:$0xff] %v8043_v4  ;;  %v6175_v53 = vpop.eup %6174  ;;  %v8061_v8 = vmul.f32 %v7793_v59, %v2896_v29  ;;  %6190 = vrsqrt.f32 %v2529_v63 }
 0x28c   : > { %v6177_v1 = vpop.eup %6176  ;;  %v2528_v31 = vadd.f32 1e-06, %v2512_v44  ;;  %v2559_v47 = vmul.f32 %v6175_v53, %v9528_v0  ;;  %v9532_v53 = vld [vmem:[#allocation24_spill] sm:$0xff]  ;;  %v2188_v39 = vadd.f32 1e-06, %v2172_v50  ;;  %v2851_v0 = vmul.f32 0.0078125, %v7948_v54 }
 0x28d   : > { %v6179_v44 = vpop.eup %6178  ;;  %v2515_v54 = vmul.f32 0.0078125, %v7879_v34  ;;  %v3189_v34 = vmul.f32 0.0078125, %v7892_v20 }
 0x28e   : > { %v8034_v61 = vpop.xlane.xlu1 %3176  ;;  %3284 = vrot.lane.b32.xlu1 %v8025_v55, %s6377_s30  ;;  %v8038_v36 = vpop.xlane.xlu0 %2496  ;;  %v9526_v55 = vld [vmem:[#allocation18_spill] sm:$0xff]  ;;  %6192 = vrsqrt.f32 %v2528_v31  ;;  %v3233_v63 = vmul.f32 %v6179_v44, %v9532_v53  ;;  %v2867_v50 = vadd.f32 1e-06, %v2851_v0  ;;  %v2514_v53 = vmul.f32 0.0078125, %v7966_v45 }
 0x28f   : > { %3282 = vrot.lane.b32.xlu0 %v8032_v35, %s6377_s30  ;;  %v2895_v35 = vmul.f32 %v6173_v9, %v9526_v55  ;;  %9527 = vst [vmem:[#allocation18_spill] sm:$0xff] %v8061_v8  ;;  %v2173_v9 = vmul.f32 0.0078125, %v7855_v41  ;;  %v9529_v55 = vld [vmem:[#allocation19_spill] sm:$0xff]  ;;  %v8079_v41 = vmul.f32 %v7793_v59, %v2559_v47  ;;  %6194 = vrsqrt.f32 %v3203_v16  ;;  %v9535_v44 = vld [vmem:[#allocation26_spill] sm:$0xff] }
 0x290   : > { %v2558_v19 = vmul.f32 %v6177_v1, %v9529_v55  ;;  %6196 = vrsqrt.f32 %v3202_v22  ;;  %v9534_v55 = vld [vmem:[#allocation20_spill] sm:$0xff]  ;;  %v8097_v15 = vmul.f32 %v7793_v59, %v3233_v63  ;;  %v2531_v45 = vadd.f32 1e-06, %v2515_v54 }
 0x291   : > { %v8068_v56 = vmul.f32 %v7793_v59, %v2895_v35  ;;  %9531 = vst [vmem:[#allocation19_spill] sm:$0xff] %v8079_v41  ;;  %v2189_v35 = vadd.f32 1e-06, %v2173_v9  ;;  %v2868_v9 = vadd.f32 1e-06, %v2852_v10  ;;  %v3188_v0 = vmul.f32 0.0078125, %v7984_v38 }
 0x292   : > { %v8052_v60 = vpop.xlane.xlu1 %3485  ;;  %2278 = vrot.lane.b32.xlu1 %v8043_v4, %s6377_s30  ;;  %v8056_v58 = vpop.xlane.xlu0 %3170  ;;  %v8084_v1 = vmul.f32 %v7793_v59, %v2558_v19  ;;  %v2175_v54 = vmul.f32 0.0078125, %v7908_v43 }
 0x293   : > { %2276 = vrot.lane.b32.xlu0 %v8048_v42, %s6377_s30  ;;  %9530 = vst [vmem:[#allocation23_spill] sm:$0xff] %v8068_v56  ;;  %v6181_v4 = vpop.eup %6180  ;;  %6198 = vrsqrt.f32 %v2189_v35  ;;  %v9538_v35 = vld [vmem:[#allocation27_spill] sm:$0xff] }
 0x294   : > { %v6183_v12 = vpop.eup %6182  ;;  %9533 = vst [vmem:[#allocation24_spill] sm:$0xff] %v8084_v1  ;;  %6200 = vrsqrt.f32 %v2188_v39  ;;  %v2530_v39 = vadd.f32 1e-06, %v2514_v53 }
 0x295   : > { %v6185_v31 = vpop.eup %6184  ;;  %v2219_v16 = vmul.f32 %v6183_v12, %v9535_v44  ;;  %6202 = vrsqrt.f32 %v2868_v9  ;;  %v3205_v9 = vadd.f32 1e-06, %v3189_v34 }
 0x296   : > { %v8070_v42 = vpop.xlane.xlu1 %3827  ;;  %2951 = vrot.lane.b32.xlu1 %v8061_v8, %s6377_s30  ;;  %v8074_v29 = vpop.xlane.xlu0 %2157  ;;  %v3232_v8 = vmul.f32 %v6181_v4, %v9534_v55  ;;  %v9536_v4 = vld [vmem:[#allocation25_spill] sm:$0xff]  ;;  %6204 = vrsqrt.f32 %v2867_v50  ;;  %v3204_v50 = vadd.f32 1e-06, %v3188_v0 }
 0x297   : > { %2949 = vrot.lane.b32.xlu0 %v8068_v56, %s6377_s30  ;;  %v2218_v19 = vmul.f32 %v6185_v31, %v9536_v4  ;;  %v6187_v22 = vpop.eup %6186  ;;  %v8116_v12 = vmul.f32 %v7793_v59, %v2219_v16  ;;  %6206 = vrsqrt.f32 %v2531_v45  ;;  %v2191_v45 = vadd.f32 1e-06, %v2175_v54 }
 0x298   : > { %v8104_v55 = vmul.f32 %v7793_v59, %v3232_v8  ;;  %v2898_v10 = vmul.f32 %v6187_v22, %v9538_v35  ;;  %6208 = vrsqrt.f32 %v2530_v39 }
 0x299   : > { %9537 = vst [vmem:[#allocation20_spill] sm:$0xff] %v8116_v12  ;;  %v8119_v8 = vmul.f32 %v7793_v59, %v2218_v19  ;;  %v2174_v19 = vmul.f32 0.0078125, %v8002_v27  ;;  %6210 = vrsqrt.f32 %v3205_v9 }
 0x29a   : > { %v8088_v56 = vpop.xlane.xlu1 %3831  ;;  %2614 = vrot.lane.b32.xlu1 %v8079_v41, %s6377_s30  ;;  %v8092_v47 = vpop.xlane.xlu0 %2837  ;;  %v8135_v38 = vmul.f32 %v7793_v59, %v2898_v10  ;;  %v2854_v10 = vmul.f32 0.0078125, %v7926_v37  ;;  %6212 = vrsqrt.f32 %v3204_v50  ;;  %v9546_v50 = vld [vmem:[#allocation30_spill] sm:$0xff] }
 0x29b   : > { %2612 = vrot.lane.b32.xlu0 %v8084_v1, %s6377_s30  ;;  %v6189_v41 = vpop.eup %6188  ;;  %6214 = vrsqrt.f32 %v2191_v45 }
 0x29c   : > { %v6191_v31 = vpop.eup %6190  ;;  %v2897_v20 = vmul.f32 %v6189_v41, %v7452_v2  ;;  %9539 = vst [vmem:[#allocation26_spill] sm:$0xff] %v8135_v38  ;;  %v9540_v2 = vld [vmem:[#allocation28_spill] sm:$0xff] }
 0x29d   : > { %v6193_v44 = vpop.eup %6192  ;;  %v2561_v41 = vmul.f32 %v6191_v31, %v9540_v2  ;;  %v2190_v31 = vadd.f32 1e-06, %v2174_v19 }
 0x29e   : > { %v8106_v1 = vpop.xlane.xlu1 %3493  ;;  %3288 = vrot.lane.b32.xlu1 %v8097_v15, %s6377_s30  ;;  %v8110_v63 = vpop.xlane.xlu0 %2500  ;;  %v8139_v53 = vmul.f32 %v7793_v59, %v2897_v20  ;;  %v2560_v34 = vmul.f32 %v6193_v44, %v7458_v5  ;;  %v9543_v5 = vld [vmem:[#allocation29_spill] sm:$0xff]  ;;  %v2853_v44 = vmul.f32 0.0078125, %v8020_v40  ;;  %v2516_v40 = vmul.f32 0.0078125, %v8038_v36 }
 0x29f   : > { %3286 = vrot.lane.b32.xlu0 %v8104_v55, %s6377_s30  ;;  %v6195_v22 = vpop.eup %6194  ;;  %v8152_v39 = vmul.f32 %v7793_v59, %v2561_v41  ;;  %v2870_v41 = vadd.f32 1e-06, %v2854_v10  ;;  %6216 = vrsqrt.f32 %v2190_v31 }
 0x2a0   : > { %9541 = vst [vmem:[#allocation25_spill] sm:$0xff] %v8139_v53  ;;  %v6197_v43 = vpop.eup %6196  ;;  %v3235_v0 = vmul.f32 %v6195_v22, %v9543_v5  ;;  %v8157_v2 = vmul.f32 %v7793_v59, %v2560_v34  ;;  %v2517_v22 = vmul.f32 0.0078125, %v7944_v62  ;;  %v2869_v5 = vadd.f32 1e-06, %v2853_v44 }
 0x2a1   : > { %9542 = vst [vmem:[#allocation27_spill] sm:$0xff] %v8152_v39  ;;  %v6199_v20 = vpop.eup %6198  ;;  %v3234_v9 = vmul.f32 %v6197_v43, %v7460_v14  ;;  %6218 = vrsqrt.f32 %v2870_v41 }
 0x2a2   : > { %v8124_v4 = vpop.xlane.xlu1 %3835  ;;  %2282 = vrot.lane.b32.xlu1 %v8116_v12, %s6377_s30  ;;  %v8128_v16 = vpop.xlane.xlu0 %3174  ;;  %9544 = vst [vmem:[#allocation28_spill] sm:$0xff] %v8157_v2  ;;  %v8171_v14 = vmul.f32 %v7793_v59, %v3235_v0  ;;  %v2221_v34 = vmul.f32 %v6199_v20, %v9546_v50  ;;  %v2533_v36 = vadd.f32 1e-06, %v2517_v22  ;;  %v3191_v0 = vmul.f32 0.0078125, %v7962_v6 }
 0x2a3   : > { %2280 = vrot.lane.b32.xlu0 %v8119_v8, %s6377_s30  ;;  %v6201_v54 = vpop.eup %6200  ;;  %v2532_v20 = vadd.f32 1e-06, %v2516_v40  ;;  %6220 = vrsqrt.f32 %v2869_v5  ;;  %v3190_v50 = vmul.f32 0.0078125, %v8056_v58  ;;  %v2176_v5 = vmul.f32 0.0078125, %v8074_v29 }
 0x2a4   : > { %9545 = vst [vmem:[#allocation29_spill] sm:$0xff] %v8171_v14  ;;  %v6203_v43 = vpop.eup %6202  ;;  %v2220_v45 = vmul.f32 %v6201_v54, %v7474_v11  ;;  %v8188_v44 = vmul.f32 %v7793_v59, %v2221_v34  ;;  %v9549_v11 = vld [vmem:[#allocation31_spill] sm:$0xff]  ;;  %6222 = vrsqrt.f32 %v2533_v36  ;;  %v3207_v34 = vadd.f32 1e-06, %v3191_v0 }
 0x2a5   : > { %v6205_v10 = vpop.eup %6204  ;;  %6224 = vrsqrt.f32 %v2532_v20 }
 0x2a6   : > { %v8142_v35 = vpop.xlane.xlu1 %3497  ;;  %2955 = vrot.lane.b32.xlu1 %v8135_v38, %s6377_s30  ;;  %v8146_v27 = vpop.xlane.xlu0 %3483  ;;  %9548 = vst [vmem:[#allocation85_spill] sm:$0xff] %v8188_v44  ;;  %v2899_v41 = vmul.f32 %v6205_v10, %v7476_v13  ;;  %6226 = vrsqrt.f32 %v3207_v34  ;;  %v9605_v38 = vld [vmem:[#allocation59_spill] sm:$0xff] }
 0x2a7   : > { %2953 = vrot.lane.b32.xlu0 %v8139_v53, %s6377_s30  ;;  %v6207_v54 = vpop.eup %6206 }
 0x2a8   : > { %v6209_v22 = vpop.eup %6208 }
 0x2a9   : > { %v6211_v58 = vpop.eup %6210  ;;  %v2562_v36 = vmul.f32 %v6209_v22, %v7482_v3 }
 0x2aa   : > { %v8160_v37 = vpop.xlane.xlu1 %3839  ;;  %2618 = vrot.lane.b32.xlu1 %v8152_v39, %s6377_s30  ;;  %v8164_v19 = vpop.xlane.xlu0 %3825  ;;  %v8175_v39 = vmul.f32 %v7793_v59, %v3234_v9  ;;  %v2900_v9 = vmul.f32 %v6203_v43, %v9549_v11  ;;  %v2177_v43 = vmul.f32 0.0078125, %v7980_v23  ;;  %v3206_v11 = vadd.f32 1e-06, %v3190_v50 }
 0x2ab   : > { %2616 = vrot.lane.b32.xlu0 %v8157_v2, %s6377_s30  ;;  %v6213_v0 = vpop.eup %6212  ;;  %v9602_v2 = vld [vmem:[#allocation82_spill] sm:$0xff] }
 0x2ac   : > { %9547 = vst [vmem:[#allocation30_spill] sm:$0xff] %v8175_v39  ;;  %v8207_v13 = vmul.f32 %v7793_v59, %v2900_v9  ;;  %v2193_v29 = vadd.f32 1e-06, %v2177_v43  ;;  %v2856_v9 = vmul.f32 0.0078125, %v7998_v26  ;;  %6228 = vrsqrt.f32 %v3206_v11 }
 0x2ad   : > { %v3236_v34 = vmul.f32 %v6213_v0, %v7484_v48  ;;  %v9558_v48 = vld [vmem:[#allocation36_spill] sm:$0xff] }
 0x2ae   : > { %v8178_v62 = vpop.xlane.xlu1 %3501  ;;  %3292 = vrot.lane.b32.xlu1 %v8171_v14, %s6377_s30  ;;  %v8182_v31 = vpop.xlane.xlu0 %3487  ;;  %v8193_v14 = vmul.f32 %v7793_v59, %v2220_v45  ;;  %9551 = vst [vmem:[#allocation86_spill] sm:$0xff] %v8207_v13  ;;  %v9552_v45 = vld [vmem:[#allocation32_spill] sm:$0xff]  ;;  %6230 = vrsqrt.f32 %v2193_v29 }
 0x2af   : > { %3290 = vrot.lane.b32.xlu0 %v8175_v39, %s6377_s30  ;;  %v2563_v10 = vmul.f32 %v6207_v54, %v9552_v45  ;;  %v9554_v54 = vld [vmem:[#allocation33_spill] sm:$0xff]  ;;  %v2192_v45 = vadd.f32 1e-06, %v2176_v5  ;;  %v8248_v29 = vmul.f32 %v7793_v59, %v3236_v34 }
 0x2b0   : > { %9550 = vst [vmem:[#allocation31_spill] sm:$0xff] %v8193_v14  ;;  %v3237_v50 = vmul.f32 %v6211_v58, %v9554_v54  ;;  %v2872_v58 = vadd.f32 1e-06, %v2856_v9  ;;  %v2518_v54 = vmul.f32 0.0078125, %v8110_v63  ;;  %v3193_v63 = vmul.f32 0.0078125, %v8034_v61 }
 0x2b1   : > { %v8225_v3 = vmul.f32 %v7793_v59, %v2563_v10  ;;  %v2519_v10 = vmul.f32 0.0078125, %v8016_v7  ;;  %6232 = vrsqrt.f32 %v2192_v45  ;;  %9559 = vst [vmem:[#allocation36_spill] sm:$0xff] %v8248_v29  ;;  %v9560_v7 = vld [vmem:[#allocation37_spill] sm:$0xff] }
 0x2b2   : > { %v8196_v6 = vpop.xlane.xlu1 %3843  ;;  %2286 = vrot.lane.b32.xlu1 %v8188_v44, %s6377_s30  ;;  %v8200_v40 = vpop.xlane.xlu0 %3829  ;;  %v8211_v44 = vmul.f32 %v7793_v59, %v2899_v41  ;;  %v8241_v5 = vmul.f32 %v7793_v59, %v3237_v50  ;;  %6234 = vrsqrt.f32 %v2872_v58  ;;  %v3192_v58 = vmul.f32 0.0078125, %v8128_v16 }
 0x2b3   : > { %2284 = vrot.lane.b32.xlu0 %v8193_v14, %s6377_s30  ;;  %v6215_v41 = vpop.eup %6214  ;;  %9555 = vst [vmem:[#allocation33_spill] sm:$0xff] %v8225_v3  ;;  %v8229_v14 = vmul.f32 %v7793_v59, %v2562_v36  ;;  %v3209_v16 = vadd.f32 1e-06, %v3193_v63  ;;  %v3858_v63 = vmul.f32 0.0078125, %v8070_v42 }
 0x2b4   : > { %9553 = vst [vmem:[#allocation32_spill] sm:$0xff] %v8211_v44  ;;  %v6217_v22 = vpop.eup %6216  ;;  %9557 = vst [vmem:[#allocation88_spill] sm:$0xff] %v8241_v5  ;;  %v2223_v11 = vmul.f32 %v6215_v41, %v9558_v48  ;;  %v2535_v41 = vadd.f32 1e-06, %v2519_v10  ;;  %v2534_v48 = vadd.f32 1e-06, %v2518_v54 }
 0x2b5   : > { %9556 = vst [vmem:[#allocation87_spill] sm:$0xff] %v8229_v14  ;;  %v2222_v36 = vmul.f32 %v6217_v22, %v7498_v25  ;;  %v9564_v10 = vld [vmem:[#allocation38_spill] sm:$0xff] }
 0x2b6   : > { %v8214_v23 = vpop.xlane.xlu1 %3505  ;;  %2959 = vrot.lane.b32.xlu1 %v8207_v13, %s6377_s30  ;;  %v8218_v20 = vpop.xlane.xlu0 %3489  ;;  %v2855_v13 = vmul.f32 0.0078125, %v8092_v47  ;;  %v8261_v45 = vmul.f32 %v7793_v59, %v2223_v11 }
 0x2b7   : > { %2957 = vrot.lane.b32.xlu0 %v8211_v44, %s6377_s30  ;;  %v6219_v47 = vpop.eup %6218  ;;  %v8264_v22 = vmul.f32 %v7793_v59, %v2222_v36 }
 0x2b8   : > { %v2871_v0 = vadd.f32 1e-06, %v2855_v13  ;;  %v6221_v9 = vpop.eup %6220  ;;  %v2902_v25 = vmul.f32 %v6219_v47, %v9560_v7  ;;  %9561 = vst [vmem:[#allocation37_spill] sm:$0xff] %v8261_v45  ;;  %v3515_v7 = vmul.f32 0.0078125, %v8146_v27 }
 0x2b9   : > { %v6223_v13 = vpop.eup %6222  ;;  %9562 = vst [vmem:[#allocation89_spill] sm:$0xff] %v8264_v22 }
 0x2ba   : > { %v8232_v26 = vpop.xlane.xlu1 %3847  ;;  %2622 = vrot.lane.b32.xlu1 %v8225_v3, %s6377_s30  ;;  %v8236_v43 = vpop.xlane.xlu0 %3491  ;;  %6236 = vrsqrt.f32 %v2871_v0  ;;  %v8277_v61 = vmul.f32 %v7793_v59, %v2902_v25  ;;  %v2565_v11 = vmul.f32 %v6223_v13, %v9564_v10  ;;  %v9565_v0 = vld [vmem:[#allocation34_spill] sm:$0xff]  ;;  %v9568_v13 = vld [vmem:[#allocation39_spill] sm:$0xff]  ;;  %v3857_v10 = vmul.f32 0.0078125, %v8164_v19 }
 0x2bb   : > { %2620 = vrot.lane.b32.xlu0 %v8229_v14, %s6377_s30  ;;  %v6225_v34 = vpop.eup %6224  ;;  %6238 = vrsqrt.f32 %v2535_v41 }
 0x2bc   : > { %9563 = vst [vmem:[#allocation90_spill] sm:$0xff] %v8277_v61  ;;  %v6227_v36 = vpop.eup %6226  ;;  %v2564_v54 = vmul.f32 %v6225_v34, %v9565_v0  ;;  %6240 = vrsqrt.f32 %v2534_v48  ;;  %v9570_v0 = vld [vmem:[#allocation35_spill] sm:$0xff] }
 0x2bd   : > { %v3239_v41 = vmul.f32 %v6227_v36, %v9568_v13  ;;  %6242 = vrsqrt.f32 %v3209_v16  ;;  %v3517_v36 = vmul.f32 0.0078125, %v8182_v31  ;;  %v9572_v16 = vld [vmem:[#allocation44_spill] sm:$0xff]  ;;  %v3873_v13 = vadd.f32 1e-06, %v3857_v10 }
 0x2be   : > { %v8250_v3 = vpop.xlane.xlu1 %3509  ;;  %3296 = vrot.lane.b32.xlu1 %v8241_v5, %s6377_s30  ;;  %v8254_v50 = vpop.xlane.xlu0 %3833  ;;  %v2901_v5 = vmul.f32 %v6221_v9, %v7500_v18  ;;  %v3516_v18 = vmul.f32 0.0078125, %v8052_v60  ;;  %v3208_v9 = vadd.f32 1e-06, %v3192_v58  ;;  %v8295_v60 = vmul.f32 %v7793_v59, %v2565_v11 }
 0x2bf   : > { %3294 = vrot.lane.b32.xlu0 %v8248_v29, %s6377_s30  ;;  %v8300_v34 = vmul.f32 %v7793_v59, %v2564_v54  ;;  %v3531_v58 = vadd.f32 1e-06, %v3515_v7  ;;  %v8314_v42 = vmul.f32 %v7793_v59, %v3239_v41  ;;  %v3860_v54 = vmul.f32 0.0078125, %v8088_v56 }
 0x2c0   : > { %9567 = vst [vmem:[#allocation34_spill] sm:$0xff] %v8295_v60  ;;  %6244 = vrsqrt.f32 %v3208_v9  ;;  %v9573_v9 = vld [vmem:[#allocation40_spill] sm:$0xff]  ;;  %v3520_v41 = vmul.f32 0.0078125, %v8106_v1  ;;  %v3862_v56 = vmul.f32 0.0078125, %v8124_v4  ;;  %v3519_v4 = vmul.f32 0.0078125, %v8236_v43 }
 0x2c1   : > { %9569 = vst [vmem:[#allocation39_spill] sm:$0xff] %v8300_v34  ;;  %9571 = vst [vmem:[#allocation35_spill] sm:$0xff] %v8314_v42  ;;  %v3876_v1 = vadd.f32 1e-06, %v3860_v54 }
 0x2c2   : > { %v8268_v29 = vpop.xlane.xlu1 %3851  ;;  %2290 = vrot.lane.b32.xlu1 %v8261_v45, %s6377_s30  ;;  %v8272_v47 = vpop.xlane.xlu0 %3495  ;;  %v8284_v45 = vmul.f32 %v7793_v59, %v2901_v5  ;;  %v3532_v5 = vadd.f32 1e-06, %v3516_v18 }
 0x2c3   : > { %2288 = vrot.lane.b32.xlu0 %v8264_v22, %s6377_s30  ;;  %v6229_v22 = vpop.eup %6228 }
 0x2c4   : > { %9566 = vst [vmem:[#allocation38_spill] sm:$0xff] %v8284_v45  ;;  %v6231_v27 = vpop.eup %6230  ;;  %6246 = vrsqrt.f32 %v3532_v5  ;;  %v3533_v5 = vadd.f32 1e-06, %v3517_v36  ;;  %v9578_v36 = vld [vmem:[#allocation41_spill] sm:$0xff] }
 0x2c5   : > { %v6233_v48 = vpop.eup %6232  ;;  %v2225_v18 = vmul.f32 %v6231_v27, %v9572_v16  ;;  %6248 = vrsqrt.f32 %v3531_v58 }
 0x2c6   : > { %v8286_v14 = vpop.xlane.xlu1 %3513  ;;  %2963 = vrot.lane.b32.xlu1 %v8277_v61, %s6377_s30  ;;  %v8290_v25 = vpop.xlane.xlu0 %3837  ;;  %v3238_v61 = vmul.f32 %v6229_v22, %v9570_v0  ;;  %v3874_v22 = vadd.f32 1e-06, %v3858_v63  ;;  %v2224_v7 = vmul.f32 %v6233_v48, %v9573_v9  ;;  %v3859_v0 = vmul.f32 0.0078125, %v8200_v40 }
 0x2c7   : > { %2961 = vrot.lane.b32.xlu0 %v8284_v45, %s6377_s30  ;;  %v6235_v19 = vpop.eup %6234  ;;  %v8334_v40 = vmul.f32 %v7793_v59, %v2225_v18  ;;  %v3518_v48 = vmul.f32 0.0078125, %v8218_v20  ;;  %v3861_v18 = vmul.f32 0.0078125, %v8254_v50 }
 0x2c8   : > { %v8321_v31 = vmul.f32 %v7793_v59, %v3238_v61  ;;  %v9576_v61 = vld [vmem:[#allocation45_spill] sm:$0xff]  ;;  %6250 = vrsqrt.f32 %v3874_v22  ;;  %v8339_v58 = vmul.f32 %v7793_v59, %v2224_v7  ;;  %v3875_v16 = vadd.f32 1e-06, %v3859_v0  ;;  %v9580_v22 = vld [vmem:[#allocation46_spill] sm:$0xff]  ;;  %v6310_v0 = vld [vmem:[%s9280_s3] ss:$0 sm:$0xff] }
 0x2c9   : > { %9575 = vst [vmem:[#allocation40_spill] sm:$0xff] %v8334_v40  ;;  %v2904_v63 = vmul.f32 %v6235_v19, %v9576_v61  ;;  %6252 = vrsqrt.f32 %v3873_v13  ;;  %v3878_v19 = vadd.f32 1e-06, %v3862_v56  ;;  %v3534_v50 = vadd.f32 1e-06, %v3518_v48  ;;  %v9582_v56 = vld [vmem:[#allocation42_spill] sm:$0xff] }
 0x2ca   : > { %v8304_v45 = vpop.xlane.xlu1 %3855  ;;  %2626 = vrot.lane.b32.xlu1 %v8295_v60, %s6377_s30  ;;  %v8308_v11 = vpop.xlane.xlu0 %3499  ;;  %9574 = vst [vmem:[#allocation44_spill] sm:$0xff] %v8321_v31  ;;  %9577 = vst [vmem:[#allocation45_spill] sm:$0xff] %v8339_v58  ;;  %6254 = vrsqrt.f32 %v3533_v5  ;;  %v3535_v13 = vadd.f32 1e-06, %v3519_v4  ;;  %v9586_v4 = vld [vmem:[#allocation43_spill] sm:$0xff] }
 0x2cb   : > { %2624 = vrot.lane.b32.xlu0 %v8300_v34, %s6377_s30  ;;  %v6237_v60 = vpop.eup %6236  ;;  %v8353_v43 = vmul.f32 %v7793_v59, %v2904_v63  ;;  %6256 = vrsqrt.f32 %v3876_v1  ;;  %v3877_v59 = vadd.f32 1e-06, %v3861_v18 }
 0x2cc   : > { %v6239_v10 = vpop.eup %6238  ;;  %v2903_v9 = vmul.f32 %v6237_v60, %v9578_v36  ;;  %v3522_v60 = vmul.f32 0.0078125, %v8142_v35  ;;  %6258 = vrsqrt.f32 %v3875_v16  ;;  %v3521_v35 = vmul.f32 0.0078125, %v8272_v47 }
 0x2cd   : > { %9579 = vst [vmem:[#allocation41_spill] sm:$0xff] %v8353_v43  ;;  %v2567_v54 = vmul.f32 %v6239_v10, %v9580_v22 }
 0x2ce   : > { %v8324_v34 = vpop.permute.xlu1 %2266  ;;  %3300 = vrot.lane.b32.xlu1 %v8314_v42, %s6377_s30  ;;  %v8328_v27 = vpop.xlane.xlu0 %3841  ;;  %v3538_v16 = vadd.f32 1e-06, %v3522_v60  ;;  %v3537_v22 = vadd.f32 1e-06, %v3521_v35  ;;  %v9590_v35 = vld [vmem:[#allocation48_spill] sm:$0xff] }
 0x2cf   : > { %3298 = vrot.lane.b32.xlu0 %v8321_v31, %s6377_s30  ;;  %v6241_v42 = vpop.eup %6240  ;;  %v3536_v31 = vadd.f32 1e-06, %v3520_v41  ;;  %v8360_v41 = vmul.f32 %v6310_v0, %v2903_v9  ;;  %v2063_v9 = vld [vmem:[%s8367_s20] sm:$0xff] }
 0x2d0   : > { %v6243_v7 = vpop.eup %6242  ;;  %v2566_v5 = vmul.f32 %v6241_v42, %v9582_v56  ;;  %v8378_v42 = vmul.f32 %v6310_v0, %v2567_v54  ;;  %v2064_v56 = vld [vmem:[%s8367_s20 + $0x8] sm:$0xff]  ;;  %v9588_v54 = vld [vmem:[#allocation50_spill] sm:$0xff] }
 0x2d1   : > { %9581 = vst [vmem:[#allocation46_spill] sm:$0xff] %v8360_v41  ;;  %v6245_v61 = vpop.eup %6244  ;;  %6260 = vrsqrt.f32 %v3536_v31  ;;  %v9584_v31 = vld [vmem:[#allocation47_spill] sm:$0xff] }
 0x2d2   : > { %v8344_v44 = vpop.permute.xlu1 %2939  ;;  %2294 = vrot.lane.b32.xlu1 %v8334_v40, %s6377_s30  ;;  %v8348_v20 = vpop.xlane.xlu0 %3503  ;;  %6262 = vrsqrt.f32 %v3878_v19  ;;  %9583 = vst [vmem:[#allocation42_spill] sm:$0xff] %v8378_v42  ;;  %v3241_v48 = vmul.f32 %v6243_v7, %v9584_v31  ;;  %v8381_v47 = vmul.f32 %v6310_v0, %v2566_v5  ;;  %v3240_v36 = vmul.f32 %v6245_v61, %v9586_v4  ;;  %v2065_v4 = vld [vmem:[%s8367_s20 + $0x10] sm:$0xff] }
 0x2d3   : > { %2292 = vrot.lane.b32.xlu0 %v8339_v58, %s6377_s30  ;;  %6264 = vrsqrt.f32 %v3534_v50  ;;  %v6247_v10 = vpop.eup %6246  ;;  %v3863_v19 = vmul.f32 0.0078125, %v8290_v25  ;;  %v8402_v5 = vmul.f32 %v7798_v49, %v2064_v56  ;;  %v3525_v12 = vmul.f32 0.0078125, %v8348_v20  ;;  %v8532_v20 = vld [vmem:[%s8474_s15 + $0x10] sm:$0xff] }
 0x2d4   : > { %6266 = vrsqrt.f32 %v3535_v13  ;;  %9585 = vst [vmem:[#allocation47_spill] sm:$0xff] %v8381_v47  ;;  %v6249_v18 = vpop.eup %6248  ;;  %v8395_v60 = vmul.f32 %v6310_v0, %v3241_v48  ;;  %v3564_v7 = vmul.f32 %v6247_v10, %v9588_v54  ;;  %v8399_v13 = vmul.f32 %v7900_v33, %v2063_v9 }
 0x2d5   : > { %6268 = vrsqrt.f32 %v3877_v59  ;;  %v6251_v25 = vpop.eup %6250  ;;  %v8404_v61 = vmul.f32 %v6310_v0, %v3240_v36  ;;  %v8409_v59 = vld [vmem:[%s9281_s4] ss:$0 sm:$0xff]  ;;  %v3563_v31 = vmul.f32 %v6249_v18, %v9590_v35  ;;  %v3879_v10 = vadd.f32 1e-06, %v3863_v19  ;;  %v2066_v0 = vld [vmem:[%s8367_s20 + $0x18] sm:$0xff] }
 0x2d6   : > { %v8370_v63 = vpop.permute.xlu1 %2602  ;;  %2967 = vrot.lane.b32.xlu1 %v8353_v43, %s6377_s30  ;;  %v8374_v1 = vpop.xlane.xlu0 %3845  ;;  %9587 = vst [vmem:[#allocation43_spill] sm:$0xff] %v8395_v60  ;;  %6270 = vrsqrt.f32 %v3538_v16  ;;  %v8413_v33 = vmul.f32 %v7812_v32, %v2064_v56  ;;  %v8424_v36 = vmul.f32 %v7923_v52, %v2063_v9  ;;  %v3864_v18 = vmul.f32 0.0078125, %v8160_v37 }
 0x2d7   : > { %2965 = vrot.lane.b32.xlu0 %v8360_v41, %s6377_s30  ;;  %9589 = vst [vmem:[#allocation50_spill] sm:$0xff] %v8404_v61  ;;  %v6253_v48 = vpop.eup %6252  ;;  %6272 = vrsqrt.f32 %v3537_v22  ;;  %v8428_v22 = vmul.f32 %v7825_v30, %v2064_v56  ;;  %v8433_v32 = vmul.f32 %v7941_v17, %v2063_v9  ;;  %v8436_v19 = vmul.f32 %v7959_v46, %v2063_v9  ;;  %v9592_v30 = vld [vmem:[#allocation51_spill] sm:$0xff]  ;;  %v9594_v46 = vld [vmem:[#allocation49_spill] sm:$0xff] }
 0x2d8   : > { %v6255_v54 = vpop.eup %6254  ;;  %v3523_v35 = vmul.f32 0.0078125, %v8308_v11  ;;  %v8440_v52 = vmul.f32 %v7839_v21, %v2064_v56  ;;  %v8443_v37 = vmul.f32 %v8409_v59, %v3564_v7  ;;  %v8450_v17 = vmul.f32 %v8409_v59, %v3563_v31  ;;  %v9595_v31 = vld [vmem:[#allocation80_spill] sm:$0xff] }
 0x2d9   : > { %v3905_v9 = vmul.f32 %v6253_v48, %v9594_v46  ;;  %v8454_v11 = vmul.f32 %v7903_v51, %v2066_v0  ;;  %v3524_v56 = vmul.f32 0.0078125, %v8178_v62  ;;  %6274 = vrsqrt.f32 %v3879_v10  ;;  %v9597_v10 = vld [vmem:[#allocation52_spill] sm:$0xff] }
 0x2da   : > { %v8387_v43 = vpop.permute.xlu1 %3276  ;;  %2630 = vrot.lane.b32.xlu1 %v8378_v42, %s6377_s30  ;;  %v8391_v50 = vpop.xlane.xlu0 %3507  ;;  %9591 = vst [vmem:[#allocation48_spill] sm:$0xff] %v8443_v37  ;;  %9593 = vst [vmem:[#allocation51_spill] sm:$0xff] %v8450_v17  ;;  %v3880_v51 = vadd.f32 1e-06, %v3864_v18  ;;  %v3866_v46 = vmul.f32 0.0078125, %v8196_v6  ;;  %v3865_v18 = vmul.f32 0.0078125, %v8328_v27  ;;  %v8487_v41 = vmul.f32 %v7919_v57, %v2066_v0 }
 0x2db   : > { %2628 = vrot.lane.b32.xlu0 %v8381_v47, %s6377_s30  ;;  %v6257_v42 = vpop.eup %6256  ;;  %v3539_v47 = vadd.f32 1e-06, %v3523_v35  ;;  %v8490_v58 = vmul.f32 %v8409_v59, %v3905_v9  ;;  %v3526_v27 = vmul.f32 0.0078125, %v8214_v23 }
 0x2dc   : > { %v6259_v21 = vpop.eup %6258  ;;  %6276 = vrsqrt.f32 %v3880_v51 }
 0x2dd   : > { %9599 = vst [vmem:[#allocation80_spill] sm:$0xff] %v8490_v58  ;;  %6278 = vrsqrt.f32 %v3539_v47  ;;  %v3542_v47 = vadd.f32 1e-06, %v3526_v27 }
 0x2de   : > { %v8416_v16 = vpop.permute.xlu1 %2268  ;;  %3304 = vrot.lane.b32.xlu1 %v8395_v60, %s6377_s30  ;;  %v8420_v49 = vpop.xlane.xlu0 %3849  ;;  %v3906_v60 = vmul.f32 %v6251_v25, %v9592_v30  ;;  %v8460_v25 = vmul.f32 %v7863_v28, %v2065_v4  ;;  %v8467_v30 = vmul.f32 %v9595_v31, %v2065_v4  ;;  %v9596_v28 = vld [vmem:[#allocation81_spill] sm:$0xff] }
 0x2df   : > { %3302 = vrot.lane.b32.xlu0 %v8404_v61, %s6377_s30  ;;  %v8447_v61 = vmul.f32 %v7851_v24, %v2065_v4  ;;  %v6261_v48 = vpop.eup %6260  ;;  %v8479_v62 = vmul.f32 %v9596_v28, %v2065_v4  ;;  %v9601_v4 = vld [vmem:[#allocation55_spill] sm:$0xff] }
 0x2e0   : > { %v6263_v31 = vpop.eup %6262  ;;  %v8484_v6 = vmul.f32 %v8409_v59, %v3906_v60  ;;  %v3908_v28 = vmul.f32 %v6257_v42, %v9601_v4  ;;  %v8499_v60 = vld [vmem:[%s8474_s15 + $0x8] sm:$0xff]  ;;  %v9604_v42 = vld [vmem:[#allocation83_spill] sm:$0xff] }
 0x2e1   : > { %v6265_v40 = vpop.eup %6264  ;;  %v8509_v4 = vmul.f32 %v9604_v42, %v2066_v0  ;;  %v3910_v53 = vmul.f32 %v6263_v31, %v9605_v38  ;;  %v2329_v51 = vmul.f32 %v8324_v34, %v8499_v60  ;;  %v9608_v42 = vld [vmem:[#allocation56_spill] sm:$0xff] }
 0x2e2   : > { %v8457_v7 = vpop.permute.xlu1 %2941  ;;  %3619 = vrot.lane.b32.xlu1 %v8443_v37, %s6377_s30  ;;  %v8464_v24 = vpop.xlane.xlu0 %3511  ;;  %v3565_v37 = vmul.f32 %v6255_v54, %v9597_v10  ;;  %9598 = vst [vmem:[#allocation49_spill] sm:$0xff] %v8484_v6  ;;  %v8495_v54 = vmul.f32 %v9602_v2, %v2066_v0  ;;  %v3540_v10 = vadd.f32 1e-06, %v3524_v56  ;;  %v3882_v56 = vadd.f32 1e-06, %v3866_v46  ;;  %v9606_v0 = vld [vmem:[#allocation54_spill] sm:$0xff] }
 0x2e3   : > { %3617 = vrot.lane.b32.xlu0 %v8450_v17, %s6377_s30  ;;  %v9600_v17 = vld [vmem:[#allocation53_spill] sm:$0xff]  ;;  %v6267_v35 = vpop.eup %6266  ;;  %v8549_v27 = vmul.f32 %v8409_v59, %v3910_v53 }
 0x2e4   : > { %v3907_v39 = vmul.f32 %v6259_v21, %v9600_v17  ;;  %v9603_v17 = vld [vmem:[#allocation58_spill] sm:$0xff]  ;;  %v6269_v2 = vpop.eup %6268  ;;  %v8514_v23 = vmul.f32 %v8409_v59, %v3565_v37  ;;  %v3567_v37 = vmul.f32 %v6267_v35, %v9608_v42  ;;  %6280 = vrsqrt.f32 %v3540_v10 }
 0x2e5   : > { %v3568_v21 = vmul.f32 %v6261_v48, %v9603_v17  ;;  %v8519_v48 = vld [vmem:[%s8474_s15] sm:$0xff]  ;;  %v3566_v17 = vmul.f32 %v6265_v40, %v9606_v0  ;;  %v6271_v38 = vpop.eup %6270  ;;  %v9609_v40 = vld [vmem:[#allocation57_spill] sm:$0xff]  ;;  %6282 = vrsqrt.f32 %v3882_v56  ;;  %v3541_v0 = vadd.f32 1e-06, %v3525_v12 }
 0x2e6   : > { %v8501_v57 = vpop.permute.xlu1 %2604  ;;  %3955 = vrot.lane.b32.xlu1 %v8484_v6, %s6377_s30  ;;  %v8505_v9 = vpop.xlane.xlu0 %3853  ;;  %v3881_v6 = vadd.f32 1e-06, %v3865_v18  ;;  %v8525_v46 = vmul.f32 %v8409_v59, %v3907_v39  ;;  %v3909_v39 = vmul.f32 %v6269_v2, %v9609_v40  ;;  %v3867_v2 = vmul.f32 0.0078125, %v8374_v1 }
 0x2e7   : > { %3953 = vrot.lane.b32.xlu0 %v8490_v58, %s6377_s30  ;;  %v8529_v58 = vmul.f32 %v8409_v59, %v3908_v28  ;;  %v8540_v18 = vmul.f32 %v8409_v59, %v3568_v21  ;;  %v6273_v35 = vpop.eup %6272  ;;  %v3002_v28 = vmul.f32 %v8344_v44, %v8499_v60  ;;  %v8553_v21 = vld [vmem:[%s8474_s15 + $0x18] sm:$0xff]  ;;  %v8556_v42 = vmul.f32 %v8409_v59, %v3566_v17 }
 0x2e8   : > { %9607 = vst [vmem:[#allocation81_spill] sm:$0xff] %v8525_v46  ;;  %6284 = vrsqrt.f32 %v3881_v6  ;;  %v2345_v56 = vadd.f32 %v2329_v51, %v8402_v5  ;;  %v2330_v44 = vmul.f32 %v8416_v16, %v8532_v20  ;;  %v8563_v40 = vmul.f32 %v8409_v59, %v3567_v37  ;;  %v9610_v6 = vld [vmem:[#allocation60_spill] sm:$0xff]  ;;  %v9611_v17 = vld [vmem:[#allocation62_spill] sm:$0xff]  ;;  %v6275_v16 = vpop.eup %6274 }
 0x2e9   : > { %6286 = vrsqrt.f32 %v3542_v47  ;;  %v8568_v1 = vmul.f32 %v8409_v59, %v3909_v39  ;;  %v3569_v5 = vmul.f32 %v6273_v35, %v9610_v6  ;;  %v8572_v51 = vmul.f32 %v6271_v38, %v9611_v17 }
 0x2ea   : > { %v8534_v31 = vpop.permute.xlu1 %3278  ;;  %3621 = vrot.lane.b32.xlu1 %v8514_v23, %s6377_s30  ;;  %v2265_v34 = vpop.permute.xlu0 %2264  ;;  %6288 = vrsqrt.f32 %v3541_v0  ;;  %v2665_v39 = vmul.f32 %v8370_v63, %v8499_v60  ;;  %v3527_v35 = vmul.f32 0.0078125, %v8391_v50  ;;  %v2346_v38 = vadd.f32 %v2330_v44, %v8447_v61 }
 0x2eb   : > { %v2328_v10 = vmul.f32 %v2265_v34, %v8519_v48  ;;  %3957 = vrot.lane.b32.xlu0 %v8525_v46, %s6377_s30  ;;  %v3883_v46 = vadd.f32 1e-06, %v3867_v2  ;;  %v3339_v63 = vmul.f32 %v8387_v43, %v8499_v60  ;;  %v9612_v2 = vld [vmem:[#allocation61_spill] sm:$0xff]  ;;  %v6277_v43 = vpop.eup %6276  ;;  %v3869_v6 = vmul.f32 0.0078125, %v8420_v49 }
 0x2ec   : > { %v3911_v44 = vmul.f32 %v6275_v16, %v9612_v2  ;;  %v2666_v16 = vmul.f32 %v8501_v57, %v8532_v20 }
 0x2ed   : > { %v2344_v34 = vadd.f32 %v2328_v10, %v8399_v13  ;;  %v3018_v13 = vadd.f32 %v3002_v28, %v8413_v33  ;;  %v3003_v33 = vmul.f32 %v8457_v7, %v8532_v20  ;;  %v8598_v7 = vmul.f32 %v8409_v59, %v3569_v5  ;;  %v6279_v5 = vpop.eup %6278 }
 0x2ee   : > { %v2271_v53 = vpop.permute.xlu1 %2270  ;;  %3623 = vrot.lane.b32.xlu1 %v8556_v42, %s6377_s30  ;;  %v2938_v12 = vpop.permute.xlu0 %2937  ;;  %6290 = vrsqrt.f32 %v3883_v46 }
 0x2ef   : > { %v5666_v37 = vpack.c.bf16 %v2345_v56, %v2344_v34  ;;  %v2331_v47 = vmul.f32 %v2271_v53, %v8553_v21  ;;  %v3001_v10 = vmul.f32 %v2938_v12, %v8519_v48  ;;  %3625 = vrot.lane.b32.xlu0 %v8563_v40, %s6377_s30  ;;  %v3868_v56 = vmul.f32 0.0078125, %v8232_v26 }
 0x2f0   : > { %v2681_v53 = vadd.f32 %v2665_v39, %v8428_v22  ;;  %v3543_v12 = vadd.f32 1e-06, %v3527_v35  ;;  %v3019_v17 = vadd.f32 %v3003_v33, %v8460_v25  ;;  %v3355_v22 = vadd.f32 %v3339_v63, %v8440_v52  ;;  %v9613_v33 = vld [vmem:[#allocation64_spill] sm:$0xff] }
 0x2f1   : > { %5667 = vst [vmem:[%s8587_s11] sm:$0xff] %v5666_v37   ;;  %v2347_v28 = vadd.f32 %v2331_v47, %v8454_v11  ;;  %v3017_v0 = vadd.f32 %v3001_v10, %v8424_v36  ;;  %v3884_v47 = vadd.f32 1e-06, %v3868_v56  ;;  %v3528_v10 = vmul.f32 0.0078125, %v8250_v3  ;;  %v6281_v57 = vpop.eup %6280 }
 0x2f2   : > { %v2944_v50 = vpop.permute.xlu1 %2943  ;;  %3959 = vrot.lane.b32.xlu1 %v8529_v58, %s6377_s30  ;;  %v2601_v61 = vpop.permute.xlu0 %2600  ;;  %v8619_v25 = vmul.f32 %v8409_v59, %v3911_v44  ;;  %6292 = vrsqrt.f32 %v3543_v12  ;;  %v3885_v52 = vadd.f32 1e-06, %v3869_v6  ;;  %v2682_v56 = vadd.f32 %v2666_v16, %v8467_v30  ;;  %v8651_v12 = vld [vmem:[%s8367_s20 + $0x20] sm:$0xff]  ;;  %v8656_v6 = vld [vmem:[%s8367_s20 + $0x28] sm:$0xff] }
 0x2f3   : > { %v5671_v11 = vpack.c.bf16 %v2347_v28, %v2346_v38  ;;  %v5746_v34 = vpack.c.bf16 %v3018_v13, %v3017_v0  ;;  %v3004_v36 = vmul.f32 %v2944_v50, %v8553_v21  ;;  %v2664_v26 = vmul.f32 %v2601_v61, %v8519_v48  ;;  %3961 = vrot.lane.b32.xlu0 %v8568_v1, %s6377_s30  ;;  %v8625_v3 = vpop.eup %6282 }
 0x2f4   : > { %v3529_v38 = vmul.f32 0.0078125, %v8464_v24  ;;  %v3571_v28 = vmul.f32 %v6279_v5, %v9613_v33  ;;  %v3340_v63 = vmul.f32 %v8534_v31, %v8532_v20  ;;  %6294 = vrsqrt.f32 %v3884_v47  ;;  %v8639_v24 = vld [vmem:[%s8474_s15 + $0x20] sm:$0xff] }
 0x2f5   : > { %5983 = vst [vmem:[%s8587_s11 + $0x8] sm:$0xff] %v5671_v11   ;;  %5998 = vst [vmem:[%s8587_s11 + $0x80] sm:$0xff] %v5746_v34   ;;  %v3020_v13 = vadd.f32 %v3004_v36, %v8487_v41  ;;  %v2680_v37 = vadd.f32 %v2664_v26, %v8433_v32  ;;  %v6285_v0 = vpop.eup %6284  ;;  %v3544_v2 = vadd.f32 1e-06, %v3528_v10  ;;  %v8643_v31 = vmul.f32 %v8409_v59, %v8572_v51  ;;  %v9614_v11 = vld [vmem:[#allocation63_spill] sm:$0xff] }
 0x2f6   : > { %v2607_v46 = vpop.permute.xlu1 %2606  ;;  %3627 = vrot.lane.b32.xlu1 %v8540_v18, %s6377_s30  ;;  %v3275_v49 = vpop.permute.xlu0 %3274  ;;  %v3912_v34 = vmul.f32 %v6277_v43, %v9614_v11  ;;  %6296 = vrsqrt.f32 %v3885_v52  ;;  %v3545_v51 = vadd.f32 1e-06, %v3529_v38  ;;  %v8659_v43 = vld [vmem:[%s8474_s15 + $0x28] sm:$0xff]  ;;  %v8662_v5 = vmul.f32 %v8409_v59, %v3571_v28  ;;  %v9621_v11 = vld [vmem:[#allocation11_spill] sm:$0xff] }
 0x2f7   : > { %v5751_v39 = vpack.c.bf16 %v3020_v13, %v3019_v17  ;;  %v5706_v41 = vpack.c.bf16 %v2681_v53, %v2680_v37  ;;  %v2667_v32 = vmul.f32 %v2607_v46, %v8553_v21  ;;  %v3338_v35 = vmul.f32 %v3275_v49, %v8519_v48  ;;  %3629 = vrot.lane.b32.xlu0 %v8598_v7, %s6377_s30  ;;  %v9617_v49 = vld [vmem:[#allocation84_spill] sm:$0xff] }
 0x2f8   : > { %v3871_v13 = vmul.f32 0.0078125, %v8505_v9  ;;  %v3356_v37 = vadd.f32 %v3340_v63, %v8479_v62  ;;  %v8678_v62 = vmul.f32 %v8409_v59, %v3912_v34  ;;  %6298 = vrsqrt.f32 %v3544_v2 }
 0x2f9   : > { %5999 = vst [vmem:[%s8587_s11 + $0x88] sm:$0xff] %v5751_v39   ;;  %5990 = vst [vmem:[%s8587_s11 + $0x40] sm:$0xff] %v5706_v41   ;;  %v2683_v50 = vadd.f32 %v2667_v32, %v8495_v54  ;;  %v3354_v61 = vadd.f32 %v3338_v35, %v8436_v19  ;;  %v8646_v54 = vpop.eup %6286  ;;  %v3870_v19 = vmul.f32 0.0078125, %v8268_v29  ;;  %v9615_v29 = vld [vmem:[#allocation65_spill] sm:$0xff]  ;;  %v2317_v39 = vmul.f32 %v9617_v49, %v8656_v6  ;;  %v9618_v32 = vld [vmem:[#allocation66_spill] sm:$0xff] }
 0x2fa   : > { %v3281_v44 = vpop.permute.xlu1 %3280  ;;  %3963 = vrot.lane.b32.xlu1 %v8549_v27, %s6377_s30  ;;  %v2273_v30 = vpop.permute.xlu0 %2272  ;;  %v3913_v17 = vmul.f32 %v6285_v0, %v9615_v29  ;;  %v3572_v35 = vmul.f32 %v6281_v57, %v9618_v32  ;;  %v3530_v33 = vmul.f32 0.0078125, %v8286_v14  ;;  %6300 = vrsqrt.f32 %v3545_v51  ;;  %v9619_v0 = vld [vmem:[#allocation68_spill] sm:$0xff]  ;;  %v9622_v51 = vld [vmem:[#allocation67_spill] sm:$0xff] }
 0x2fb   : > { %v5711_v36 = vpack.c.bf16 %v2683_v50, %v2682_v56  ;;  %v5786_v26 = vpack.c.bf16 %v3355_v22, %v3354_v61  ;;  %v3341_v53 = vmul.f32 %v3281_v44, %v8553_v21  ;;  %3965 = vrot.lane.b32.xlu0 %v8619_v25, %s6377_s30  ;;  %v6289_v16 = vpop.eup %6288  ;;  %v2332_v10 = vmul.f32 %v2273_v30, %v8639_v24  ;;  %v9616_v22 = vld [vmem:[#allocation14_spill] sm:$0xff]  ;;  %v9620_v44 = vld [vmem:[#allocation15_spill] sm:$0xff] }
 0x2fc   : > { %v2316_v46 = vmul.f32 %v9616_v22, %v8651_v12  ;;  %v8686_v28 = vmul.f32 %v8409_v59, %v3913_v17  ;;  %v3573_v56 = vmul.f32 %v6289_v16, %v9619_v0  ;;  %v6291_v63 = vpop.eup %6290  ;;  %v3887_v50 = vadd.f32 1e-06, %v3871_v13  ;;  %v9626_v0 = vld [vmem:[#allocation70_spill] sm:$0xff] }
 0x2fd   : > { %5991 = vst [vmem:[%s8587_s11 + $0x48] sm:$0xff] %v5711_v36   ;;  %6006 = vst [vmem:[%s8587_s11 + $0xc0] sm:$0xff] %v5786_v26   ;;  %v3357_v47 = vadd.f32 %v3341_v53, %v8509_v4  ;;  %v3886_v4 = vadd.f32 1e-06, %v3870_v19  ;;  %v2989_v30 = vmul.f32 %v9620_v44, %v8651_v12  ;;  %v2990_v34 = vmul.f32 %v9621_v11, %v8656_v6 }
 0x2fe   : > { %v2275_v41 = vpop.permute.xlu1 %2274  ;;  %3631 = vrot.lane.b32.xlu1 %v8643_v31, %s6377_s30  ;;  %v2946_v9 = vpop.permute.xlu0 %2945  ;;  %v2348_v57 = vadd.f32 %v2332_v10, %v2316_v46  ;;  %v8698_v36 = vmul.f32 %v8409_v59, %v3572_v35  ;;  %v3914_v29 = vmul.f32 %v8625_v3, %v9622_v51  ;;  %v3546_v17 = vadd.f32 1e-06, %v3530_v33  ;;  %v9625_v35 = vld [vmem:[#allocation16_spill] sm:$0xff] }
 0x2ff   : > { %v5791_v52 = vpack.c.bf16 %v3357_v47, %v3356_v37  ;;  %v2333_v38 = vmul.f32 %v2275_v41, %v8659_v43  ;;  %3633 = vrot.lane.b32.xlu0 %v8662_v5, %s6377_s30  ;;  %v3005_v2 = vmul.f32 %v2946_v9, %v8639_v24  ;;  %6302 = vrsqrt.f32 %v3886_v4  ;;  %v9623_v37 = vld [vmem:[#allocation69_spill] sm:$0xff]  ;;  %v6293_v10 = vpop.eup %6292 }
 0x300   : > { %v3872_v16 = vmul.f32 0.0078125, %v8304_v45  ;;  %v8707_v13 = vmul.f32 %v8409_v59, %v3573_v56  ;;  %v3915_v47 = vmul.f32 %v6291_v63, %v9623_v37  ;;  %6304 = vrsqrt.f32 %v3887_v50  ;;  %v9627_v63 = vld [vmem:[#allocation72_spill] sm:$0xff]  ;;  %v8748_v37 = vld [vmem:[%s8367_s20 + $0x38] sm:$0xff] }
 0x301   : > { %6007 = vst [vmem:[%s8587_s11 + $0xc8] sm:$0xff] %v5791_v52   ;;  %v2349_v61 = vadd.f32 %v2333_v38, %v2317_v39  ;;  %v3021_v22 = vadd.f32 %v3005_v2, %v2989_v30  ;;  %v9624_v39 = vld [vmem:[#allocation12_spill] sm:$0xff]  ;;  %v6295_v9 = vpop.eup %6294  ;;  %v2652_v4 = vmul.f32 %v9625_v35, %v8651_v12  ;;  %v8722_v38 = vmul.f32 %v8409_v59, %v3914_v29 }
 0x302   : > { %v2948_v14 = vpop.permute.xlu1 %2947  ;;  %3967 = vrot.lane.b32.xlu1 %v8678_v62, %s6377_s30  ;;  %v2609_v19 = vpop.permute.xlu0 %2608  ;;  %v2653_v41 = vmul.f32 %v9624_v39, %v8656_v6  ;;  %6306 = vrsqrt.f32 %v3546_v17  ;;  %v3888_v33 = vadd.f32 1e-06, %v3872_v16  ;;  %v3574_v56 = vmul.f32 %v8646_v54, %v9626_v0  ;;  %v8745_v16 = vld [vmem:[%s8367_s20 + $0x30] sm:$0xff]  ;;  %v9633_v0 = vld [vmem:[#allocation22_spill] sm:$0xff] }
 0x303   : > { %v5676_v26 = vpack.c.bf16 %v2349_v61, %v2348_v57  ;;  %v3006_v53 = vmul.f32 %v2948_v14, %v8659_v43  ;;  %3969 = vrot.lane.b32.xlu0 %v8686_v28, %s6377_s30  ;;  %v2668_v49 = vmul.f32 %v2609_v19, %v8639_v24  ;;  %v3575_v50 = vmul.f32 %v6293_v10, %v9627_v63  ;;  %v6297_v57 = vpop.eup %6296  ;;  %v9628_v19 = vld [vmem:[#allocation21_spill] sm:$0xff] }
 0x304   : > { %v8730_v30 = vmul.f32 %v8409_v59, %v3915_v47  ;;  %6308 = vrsqrt.f32 %v3888_v33  ;;  %v8751_v47 = vld [vmem:[%s8474_s15 + $0x38] sm:$0xff]  ;;  %v8754_v10 = vmul.f32 %v8409_v59, %v3574_v56  ;;  %v2318_v56 = vmul.f32 %v9633_v0, %v8745_v16 }
 0x305   : > { %5984 = vst [vmem:[%s8587_s11 + $0x10] sm:$0xff] %v5676_v26   ;;  %v3022_v46 = vadd.f32 %v3006_v53, %v2990_v34  ;;  %v2684_v61 = vadd.f32 %v2668_v49, %v2652_v4  ;;  %v8735_v34 = vld [vmem:[%s8474_s15 + $0x30] sm:$0xff]  ;;  %v3326_v26 = vmul.f32 %v9628_v19, %v8651_v12  ;;  %v6299_v17 = vpop.eup %6298 }
 0x306   : > { %v2611_v3 = vpop.permute.xlu1 %2610  ;;  %3635 = vrot.lane.b32.xlu1 %v8698_v36, %s6377_s30  ;;  %v3283_v45 = vpop.permute.xlu0 %3282  ;;  %v9629_v53 = vld [vmem:[#allocation13_spill] sm:$0xff] }
 0x307   : > { %v5756_v32 = vpack.c.bf16 %v3022_v46, %v3021_v22  ;;  %v2669_v52 = vmul.f32 %v2611_v3, %v8659_v43  ;;  %3637 = vrot.lane.b32.xlu0 %v8707_v13, %s6377_s30  ;;  %v3342_v44 = vmul.f32 %v3283_v45, %v8639_v24  ;;  %v3327_v51 = vmul.f32 %v9629_v53, %v8656_v6  ;;  %v9631_v46 = vld [vmem:[#allocation71_spill] sm:$0xff]  ;;  %v6301_v39 = vpop.eup %6300 }
 0x308   : > { %v8757_v22 = vmul.f32 %v8409_v59, %v3575_v50  ;;  %v3916_v49 = vmul.f32 %v6295_v9, %v9631_v46  ;;  %v9634_v9 = vld [vmem:[#allocation17_spill] sm:$0xff] }
 0x309   : > { %6000 = vst [vmem:[%s8587_s11 + $0x90] sm:$0xff] %v5756_v32   ;;  %v2685_v2 = vadd.f32 %v2669_v52, %v2653_v41  ;;  %v3358_v41 = vadd.f32 %v3342_v44, %v3326_v26  ;;  %v9632_v32 = vld [vmem:[#allocation73_spill] sm:$0xff]  ;;  %v2319_v63 = vmul.f32 %v9634_v9, %v8748_v37 }
 0x30a   : > { %v3285_v11 = vpop.permute.xlu1 %3284  ;;  %3971 = vrot.lane.b32.xlu1 %v8722_v38, %s6377_s30  ;;  %v2277_v54 = vpop.permute.xlu0 %2276  ;;  %9630 = vst [vmem:[#allocation52_spill] sm:$0xff] %v8757_v22  ;;  %v3917_v35 = vmul.f32 %v6297_v57, %v9632_v32  ;;  %v8773_v57 = vmul.f32 %v8409_v59, %v3916_v49 }
 0x30b   : > { %v5716_v14 = vpack.c.bf16 %v2685_v2, %v2684_v61  ;;  %v3343_v29 = vmul.f32 %v3285_v11, %v8659_v43  ;;  %3973 = vrot.lane.b32.xlu0 %v8730_v30, %s6377_s30  ;;  %v2334_v45 = vmul.f32 %v2277_v54, %v8735_v34  ;;  %v9635_v2 = vld [vmem:[#allocation74_spill] sm:$0xff]  ;;  %v9636_v11 = vld [vmem:[#allocation76_spill] sm:$0xff] }
 0x30c   : > { %v6303_v61 = vpop.eup %6302  ;;  %v3576_v44 = vmul.f32 %v6299_v17, %v9635_v2  ;;  %v3577_v54 = vmul.f32 %v6301_v39, %v9636_v11  ;;  %v8780_v53 = vmul.f32 %v8409_v59, %v3917_v35  ;;  %v9638_v17 = vld [vmem:[#allocation23_spill] sm:$0xff]  ;;  %v9639_v39 = vld [vmem:[#allocation18_spill] sm:$0xff] }
 0x30d   : > { %5992 = vst [vmem:[%s8587_s11 + $0x50] sm:$0xff] %v5716_v14   ;;  %v3359_v3 = vadd.f32 %v3343_v29, %v3327_v51  ;;  %v2350_v14 = vadd.f32 %v2334_v45, %v2318_v56  ;;  %v6305_v51 = vpop.eup %6304 }
 0x30e   : > { %v2279_v4 = vpop.permute.xlu1 %2278  ;;  %3639 = vrot.lane.b32.xlu1 %v8754_v10, %s6377_s30  ;;  %v2950_v52 = vpop.permute.xlu0 %2949  ;;  %9637 = vst [vmem:[#allocation53_spill] sm:$0xff] %v8780_v53  ;;  %v8792_v32 = vmul.f32 %v8409_v59, %v3576_v44  ;;  %v8795_v35 = vmul.f32 %v8409_v59, %v3577_v54  ;;  %v9644_v54 = vld [vmem:[#allocation24_spill] sm:$0xff] }
 0x30f   : > { %v5796_v33 = vpack.c.bf16 %v3359_v3, %v3358_v41  ;;  %v2335_v50 = vmul.f32 %v2279_v4, %v8751_v47  ;;  %3641 = vrot.lane.b32.xlu0 %v8757_v22, %s6377_s30  ;;  %v3007_v26 = vmul.f32 %v2950_v52, %v8735_v34  ;;  %v2991_v41 = vmul.f32 %v9638_v17, %v8745_v16  ;;  %v9642_v4 = vld [vmem:[#allocation75_spill] sm:$0xff] }
 0x310   : > { %v2992_v3 = vmul.f32 %v9639_v39, %v8748_v37  ;;  %9640 = vst [vmem:[#allocation55_spill] sm:$0xff] %v8792_v32  ;;  %9641 = vst [vmem:[#allocation82_spill] sm:$0xff] %v8795_v35  ;;  %v3918_v52 = vmul.f32 %v6303_v61, %v9642_v4  ;;  %v9645_v61 = vld [vmem:[#allocation19_spill] sm:$0xff] }
 0x311   : > { %6008 = vst [vmem:[%s8587_s11 + $0xd0] sm:$0xff] %v5796_v33   ;;  %v2351_v19 = vadd.f32 %v2335_v50, %v2319_v63  ;;  %v6307_v33 = vpop.eup %6306  ;;  %v3023_v0 = vadd.f32 %v3007_v26, %v2991_v41  ;;  %v9643_v63 = vld [vmem:[#allocation77_spill] sm:$0xff]  ;;  %v8822_v4 = vld [vmem:[%s8474_s15 + $0x40] sm:$0xff] }
 0x312   : > { %v2952_v29 = vpop.permute.xlu1 %2951  ;;  %3975 = vrot.lane.b32.xlu1 %v8773_v57, %s6377_s30  ;;  %v2613_v46 = vpop.permute.xlu0 %2612  ;;  %v3919_v50 = vmul.f32 %v6305_v51, %v9643_v63  ;;  %v8811_v51 = vmul.f32 %v8409_v59, %v3918_v52  ;;  %v8832_v63 = vld [vmem:[%s8367_s20 + $0x40] sm:$0xff] }
 0x313   : > { %v5681_v49 = vpack.c.bf16 %v2351_v19, %v2350_v14  ;;  %v3008_v45 = vmul.f32 %v2952_v29, %v8751_v47  ;;  %3977 = vrot.lane.b32.xlu0 %v8780_v53, %s6377_s30  ;;  %v2670_v9 = vmul.f32 %v2613_v46, %v8735_v34  ;;  %v2654_v14 = vmul.f32 %v9644_v54, %v8745_v16  ;;  %v9647_v29 = vld [vmem:[#allocation78_spill] sm:$0xff] }
 0x314   : > { %v2655_v19 = vmul.f32 %v9645_v61, %v8748_v37  ;;  %9646 = vst [vmem:[#allocation58_spill] sm:$0xff] %v8811_v51  ;;  %v3578_v46 = vmul.f32 %v6307_v33, %v9647_v29  ;;  %v2320_v29 = vmul.f32 %v8119_v8, %v8832_v63 }
 0x315   : > { %5985 = vst [vmem:[%s8587_s11 + $0x18] sm:$0xff] %v5681_v49   ;;  %v3024_v56 = vadd.f32 %v3008_v45, %v2992_v3  ;;  %v6309_v49 = vpop.eup %6308  ;;  %v2686_v17 = vadd.f32 %v2670_v9, %v2654_v14  ;;  %v8817_v3 = vmul.f32 %v8409_v59, %v3919_v50  ;;  %v8835_v50 = vld [vmem:[%s8367_s20 + $0x48] sm:$0xff] }
 0x316   : > { %v2615_v2 = vpop.permute.xlu1 %2614  ;;  %3643 = vrot.lane.b32.xlu1 %v8792_v32, %s6377_s30  ;;  %v3287_v44 = vpop.permute.xlu0 %3286 }
 0x317   : > { %v5761_v11 = vpack.c.bf16 %v3024_v56, %v3023_v0  ;;  %v2671_v26 = vmul.f32 %v2615_v2, %v8751_v47  ;;  %3645 = vrot.lane.b32.xlu0 %v8795_v35, %s6377_s30  ;;  %v3344_v39 = vmul.f32 %v3287_v44, %v8735_v34  ;;  %9648 = vst [vmem:[#allocation83_spill] sm:$0xff] %v8817_v3  ;;  %v8838_v2 = vld [vmem:[%s8474_s15 + $0x48] sm:$0xff] }
 0x318   : > { %v3328_v0 = vmul.f32 %v8104_v55, %v8745_v16  ;;  %v3329_v56 = vmul.f32 %v8097_v15, %v8748_v37  ;;  %v8841_v44 = vmul.f32 %v8409_v59, %v3578_v46  ;;  %v9651_v46 = vld [vmem:[#allocation20_spill] sm:$0xff] }
 0x319   : > { %6001 = vst [vmem:[%s8587_s11 + $0x98] sm:$0xff] %v5761_v11   ;;  %v2687_v41 = vadd.f32 %v2671_v26, %v2655_v19  ;;  %v9650_v11 = vld [vmem:[#allocation79_spill] sm:$0xff] }
 0x31a   : > { %v3289_v45 = vpop.permute.xlu1 %3288  ;;  %3979 = vrot.lane.b32.xlu1 %v8811_v51, %s6377_s30  ;;  %v2281_v52 = vpop.permute.xlu0 %2280  ;;  %9649 = vst [vmem:[#allocation59_spill] sm:$0xff] %v8841_v44  ;;  %v3920_v55 = vmul.f32 %v6309_v49, %v9650_v11  ;;  %v3360_v54 = vadd.f32 %v3344_v39, %v3328_v0  ;;  %v9654_v11 = vld [vmem:[#allocation26_spill] sm:$0xff] }
 0x31b   : > { %v5721_v33 = vpack.c.bf16 %v2687_v41, %v2686_v17  ;;  %v3345_v9 = vmul.f32 %v3289_v45, %v8751_v47  ;;  %3981 = vrot.lane.b32.xlu0 %v8817_v3, %s6377_s30  ;;  %v2336_v14 = vmul.f32 %v2281_v52, %v8822_v4  ;;  %v2321_v17 = vmul.f32 %v9651_v46, %v8835_v50 }
 0x31c   : > { %v8854_v41 = vmul.f32 %v8409_v59, %v3920_v55 }
 0x31d   : > { %5993 = vst [vmem:[%s8587_s11 + $0x58] sm:$0xff] %v5721_v33   ;;  %v3361_v15 = vadd.f32 %v3345_v9, %v3329_v56  ;;  %v2352_v39 = vadd.f32 %v2336_v14, %v2320_v29  ;;  %v9653_v56 = vld [vmem:[#allocation25_spill] sm:$0xff]  ;;  %v9655_v29 = vld [vmem:[#allocation28_spill] sm:$0xff] }
 0x31e   : > { %v2283_v61 = vpop.permute.xlu1 %2282  ;;  %3647 = vrot.lane.b32.xlu1 %v8841_v44, %s6377_s30  ;;  %v2954_v19 = vpop.permute.xlu0 %2953  ;;  %9652 = vst [vmem:[#allocation54_spill] sm:$0xff] %v8854_v41  ;;  %v2993_v9 = vmul.f32 %v9653_v56, %v8832_v63  ;;  %v2656_v46 = vmul.f32 %v9655_v29, %v8832_v63 }
 0x31f   : > { %v5801_v26 = vpack.c.bf16 %v3361_v15, %v3360_v54  ;;  %v2337_v49 = vmul.f32 %v2283_v61, %v8838_v2  ;;  %v3009_v52 = vmul.f32 %v2954_v19, %v8822_v4  ;;  %v2994_v54 = vmul.f32 %v9654_v11, %v8835_v50  ;;  %v9657_v11 = vld [vmem:[#allocation30_spill] sm:$0xff] }
 0x321   : > { %6009 = vst [vmem:[%s8587_s11 + $0xd8] sm:$0xff] %v5801_v26   ;;  %v2353_v45 = vadd.f32 %v2337_v49, %v2321_v17  ;;  %v3025_v55 = vadd.f32 %v3009_v52, %v2993_v9  ;;  %v9656_v17 = vld [vmem:[#allocation27_spill] sm:$0xff] }
 0x322   : > { %v2956_v33 = vpop.permute.xlu1 %2955  ;;  %3983 = vrot.lane.b32.xlu1 %v8854_v41, %s6377_s30  ;;  %v2617_v0 = vpop.permute.xlu0 %2616  ;;  %v2657_v49 = vmul.f32 %v9656_v17, %v8835_v50  ;;  %s9012_s30 = scalar_lea.vmem [#allocation4], %s6533_s22  ;;  %s4336_s22 = scalar_lea.sflag [#allocation7], %s6495_s12 }
 0x323   : > { %v5686_v8 = vpack.c.bf16 %v2353_v45, %v2352_v39  ;;  %v3010_v59 = vmul.f32 %v2956_v33, %v8838_v2  ;;  %v2672_v14 = vmul.f32 %v2617_v0, %v8822_v4 }
 0x325   : > { %5986 = vst [vmem:[%s8587_s11 + $0x20] sm:$0xff] %v5686_v8   ;;  %v3026_v15 = vadd.f32 %v3010_v59, %v2994_v54  ;;  %v2688_v45 = vadd.f32 %v2672_v14, %v2656_v46  ;;  %v8875_v8 = vld [vmem:[%s8474_s15 + $0x50] sm:$0xff]  ;;  %v3330_v54 = vmul.f32 %v9657_v11, %v8832_v63  ;;  %v8886_v14 = vld [vmem:[%s8367_s20 + $0x58] sm:$0xff] }
 0x326   : > { %v2619_v61 = vpop.permute.xlu1 %2618  ;;  %v3291_v19 = vpop.permute.xlu0 %3290  ;;  %v9658_v59 = vld [vmem:[#allocation29_spill] sm:$0xff] }
 0x327   : > { %v5766_v26 = vpack.c.bf16 %v3026_v15, %v3025_v55  ;;  %v2673_v39 = vmul.f32 %v2619_v61, %v8838_v2  ;;  %v3346_v33 = vmul.f32 %v3291_v19, %v8822_v4  ;;  %v3331_v55 = vmul.f32 %v9658_v59, %v8835_v50  ;;  %v8883_v61 = vld [vmem:[%s8367_s20 + $0x50] sm:$0xff] }
 0x329   : > { %6002 = vst [vmem:[%s8587_s11 + $0xa0] sm:$0xff] %v5766_v26   ;;  %v2689_v52 = vadd.f32 %v2673_v39, %v2657_v49  ;;  %v8889_v26 = vld [vmem:[%s8474_s15 + $0x58] sm:$0xff]  ;;  %v3362_v19 = vadd.f32 %v3346_v33, %v3330_v54 }
 0x32a   : > { %v3293_v0 = vpop.permute.xlu1 %3292  ;;  %v2285_v56 = vpop.permute.xlu0 %2284 }
 0x32b   : > { %v5726_v9 = vpack.c.bf16 %v2689_v52, %v2688_v45  ;;  %v3347_v15 = vmul.f32 %v3293_v0, %v8838_v2  ;;  %v2338_v46 = vmul.f32 %v2285_v56, %v8875_v8  ;;  %v9659_v45 = vld [vmem:[#allocation31_spill] sm:$0xff]  ;;  %v9660_v0 = vld [vmem:[#allocation85_spill] sm:$0xff] }
 0x32c   : > { %v2322_v52 = vmul.f32 %v9659_v45, %v8883_v61  ;;  %v2323_v11 = vmul.f32 %v9660_v0, %v8886_v14 }
 0x32d   : > { %5994 = vst [vmem:[%s8587_s11 + $0x60] sm:$0xff] %v5726_v9   ;;  %v3363_v29 = vadd.f32 %v3347_v15, %v3331_v55  ;;  %v9661_v55 = vld [vmem:[#allocation32_spill] sm:$0xff] }
 0x32e   : > { %v2287_v17 = vpop.permute.xlu1 %2286  ;;  %v2958_v49 = vpop.permute.xlu0 %2957  ;;  %v2354_v41 = vadd.f32 %v2338_v46, %v2322_v52  ;;  %v2995_v15 = vmul.f32 %v9661_v55, %v8883_v61 }
 0x32f   : > { %v5806_v39 = vpack.c.bf16 %v3363_v29, %v3362_v19  ;;  %v2339_v59 = vmul.f32 %v2287_v17, %v8889_v26  ;;  %v3011_v33 = vmul.f32 %v2958_v49, %v8875_v8  ;;  %v9662_v19 = vld [vmem:[#allocation86_spill] sm:$0xff] }
 0x330   : > { %v2996_v29 = vmul.f32 %v9662_v19, %v8886_v14 }
 0x331   : > { %6010 = vst [vmem:[%s8587_s11 + $0xe0] sm:$0xff] %v5806_v39   ;;  %v2355_v3 = vadd.f32 %v2339_v59, %v2323_v11  ;;  %v3027_v17 = vadd.f32 %v3011_v33, %v2995_v15  ;;  %v9664_v11 = vld [vmem:[#allocation33_spill] sm:$0xff]  ;;  %v8915_v15 = vld [vmem:[%s8474_s15 + $0x60] sm:$0xff] }
 0x332   : > { %v2960_v9 = vpop.permute.xlu1 %2959  ;;  %v2621_v56 = vpop.permute.xlu0 %2620  ;;  %v2659_v59 = vmul.f32 %v9664_v11, %v8886_v14 }
 0x333   : > { %v5691_v54 = vpack.c.bf16 %v2355_v3, %v2354_v41  ;;  %v3012_v45 = vmul.f32 %v2960_v9, %v8889_v26  ;;  %v2674_v46 = vmul.f32 %v2621_v56, %v8875_v8  ;;  %v9663_v3 = vld [vmem:[#allocation87_spill] sm:$0xff] }
 0x334   : > { %v2658_v41 = vmul.f32 %v9663_v3, %v8883_v61 }
 0x335   : > { %5987 = vst [vmem:[%s8587_s11 + $0x28] sm:$0xff] %v5691_v54   ;;  %v3028_v39 = vadd.f32 %v3012_v45, %v2996_v29  ;;  %v9665_v45 = vld [vmem:[#allocation36_spill] sm:$0xff] }
 0x336   : > { %v2623_v52 = vpop.permute.xlu1 %2622  ;;  %v3295_v49 = vpop.permute.xlu0 %3294  ;;  %v2690_v33 = vadd.f32 %v2674_v46, %v2658_v41  ;;  %v8926_v46 = vld [vmem:[%s8367_s20 + $0x68] sm:$0xff] }
 0x337   : > { %v5771_v0 = vpack.c.bf16 %v3028_v39, %v3027_v17  ;;  %v2675_v9 = vmul.f32 %v2623_v52, %v8889_v26  ;;  %v3348_v56 = vmul.f32 %v3295_v49, %v8875_v8  ;;  %v3332_v17 = vmul.f32 %v9665_v45, %v8883_v61  ;;  %v9666_v39 = vld [vmem:[#allocation88_spill] sm:$0xff]  ;;  %v8923_v52 = vld [vmem:[%s8367_s20 + $0x60] sm:$0xff]  ;;  %9667 = vst [vmem:[#allocation56_spill] sm:$0xff] %v8926_v46  ;;  %v9669_v45 = vld [vmem:[#allocation89_spill] sm:$0xff] }
 0x338   : > { %v3333_v3 = vmul.f32 %v9666_v39, %v8886_v14  ;;  %v2324_v39 = vmul.f32 %v9669_v45, %v8923_v52 }
 0x339   : > { %6003 = vst [vmem:[%s8587_s11 + $0xa8] sm:$0xff] %v5771_v0   ;;  %v2691_v54 = vadd.f32 %v2675_v9, %v2659_v59  ;;  %v8929_v0 = vld [vmem:[%s8474_s15 + $0x68] sm:$0xff]  ;;  %v3364_v49 = vadd.f32 %v3348_v56, %v3332_v17 }
 0x33a   : > { %v3297_v55 = vpop.permute.xlu1 %3296  ;;  %v2289_v19 = vpop.permute.xlu0 %2288  ;;  %9668 = vst [vmem:[#allocation57_spill] sm:$0xff] %v8929_v0 }
 0x33b   : > { %v5731_v29 = vpack.c.bf16 %v2691_v54, %v2690_v33  ;;  %v3349_v11 = vmul.f32 %v3297_v55, %v8889_v26  ;;  %v2340_v59 = vmul.f32 %v2289_v19, %v8915_v15  ;;  %v9670_v55 = vld [vmem:[#allocation37_spill] sm:$0xff] }
 0x33c   : > { %v2325_v44 = vmul.f32 %v9670_v55, %v8926_v46 }
 0x33d   : > { %5995 = vst [vmem:[%s8587_s11 + $0x68] sm:$0xff] %v5731_v29   ;;  %v3365_v41 = vadd.f32 %v3349_v11, %v3333_v3  ;;  %v2356_v51 = vadd.f32 %v2340_v59, %v2324_v39  ;;  %v9671_v3 = vld [vmem:[#allocation38_spill] sm:$0xff] }
 0x33e   : > { %v2291_v9 = vpop.permute.xlu1 %2290  ;;  %v2962_v33 = vpop.permute.xlu0 %2961  ;;  %v2997_v11 = vmul.f32 %v9671_v3, %v8923_v52  ;;  %v9674_v39 = vld [vmem:[#allocation34_spill] sm:$0xff] }
 0x33f   : > { %v5811_v54 = vpack.c.bf16 %v3365_v41, %v3364_v49  ;;  %v2341_v35 = vmul.f32 %v2291_v9, %v8929_v0  ;;  %v3013_v56 = vmul.f32 %v2962_v33, %v8915_v15  ;;  %v9672_v49 = vld [vmem:[#allocation90_spill] sm:$0xff]  ;;  %v2661_v55 = vmul.f32 %v9674_v39, %v8926_v46 }
 0x340   : > { %v2998_v41 = vmul.f32 %v9672_v49, %v8926_v46 }
 0x341   : > { %6011 = vst [vmem:[%s8587_s11 + $0xe8] sm:$0xff] %v5811_v54   ;;  %v2357_v53 = vadd.f32 %v2341_v35, %v2325_v44  ;;  %v3029_v9 = vadd.f32 %v3013_v56, %v2997_v11  ;;  %v8955_v11 = vld [vmem:[%s8474_s15 + $0x70] sm:$0xff] }
 0x342   : > { %v2964_v29 = vpop.permute.xlu1 %2963  ;;  %v2625_v19 = vpop.permute.xlu0 %2624  ;;  %9675 = vst [vmem:[#allocation60_spill] sm:$0xff] %v8955_v11 }
 0x343   : > { %v5696_v17 = vpack.c.bf16 %v2357_v53, %v2356_v51  ;;  %v3014_v45 = vmul.f32 %v2964_v29, %v8929_v0  ;;  %v2676_v35 = vmul.f32 %v2625_v19, %v8915_v15  ;;  %v9673_v53 = vld [vmem:[#allocation39_spill] sm:$0xff] }
 0x344   : > { %v2660_v51 = vmul.f32 %v9673_v53, %v8923_v52 }
 0x345   : > { %5988 = vst [vmem:[%s8587_s11 + $0x30] sm:$0xff] %v5696_v17   ;;  %v3030_v54 = vadd.f32 %v3014_v45, %v2998_v41  ;;  %v9676_v45 = vld [vmem:[#allocation44_spill] sm:$0xff] }
 0x346   : > { %v2627_v44 = vpop.permute.xlu1 %2626  ;;  %v3299_v59 = vpop.permute.xlu0 %3298  ;;  %v2692_v56 = vadd.f32 %v2676_v35, %v2660_v51  ;;  %v8966_v35 = vld [vmem:[%s8367_s20 + $0x78] sm:$0xff] }
 0x347   : > { %v5776_v33 = vpack.c.bf16 %v3030_v54, %v3029_v9  ;;  %v2677_v29 = vmul.f32 %v2627_v44, %v8929_v0  ;;  %v3350_v19 = vmul.f32 %v3299_v59, %v8915_v15  ;;  %v3334_v9 = vmul.f32 %v9676_v45, %v8923_v52  ;;  %v9677_v54 = vld [vmem:[#allocation35_spill] sm:$0xff]  ;;  %v8963_v44 = vld [vmem:[%s8367_s20 + $0x70] sm:$0xff] }
 0x348   : > { %v3335_v53 = vmul.f32 %v9677_v54, %v8926_v46  ;;  %9678 = vst [vmem:[#allocation62_spill] sm:$0xff] %v8963_v44  ;;  %v9679_v45 = vld [vmem:[#allocation45_spill] sm:$0xff] }
 0x349   : > { %6004 = vst [vmem:[%s8587_s11 + $0xb0] sm:$0xff] %v5776_v33   ;;  %v2693_v17 = vadd.f32 %v2677_v29, %v2661_v55  ;;  %v8969_v33 = vld [vmem:[%s8474_s15 + $0x78] sm:$0xff]  ;;  %v3366_v59 = vadd.f32 %v3350_v19, %v3334_v9  ;;  %v2326_v54 = vmul.f32 %v9679_v45, %v8963_v44 }
 0x34a   : > { %v3301_v3 = vpop.permute.xlu1 %3300  ;;  %v2293_v49 = vpop.permute.xlu0 %2292 }
 0x34b   : > { %v5736_v41 = vpack.c.bf16 %v2693_v17, %v2692_v56  ;;  %v3351_v39 = vmul.f32 %v3301_v3, %v8929_v0  ;;  %v2342_v55 = vmul.f32 %v2293_v49, %v8955_v11  ;;  %v9680_v3 = vld [vmem:[#allocation40_spill] sm:$0xff] }
 0x34c   : > { %v2327_v0 = vmul.f32 %v9680_v3, %v8966_v35 }
 0x34d   : > { %5996 = vst [vmem:[%s8587_s11 + $0x70] sm:$0xff] %v5736_v41   ;;  %v3367_v51 = vadd.f32 %v3351_v39, %v3335_v53  ;;  %v2358_v46 = vadd.f32 %v2342_v55, %v2326_v54  ;;  %v9681_v53 = vld [vmem:[#allocation46_spill] sm:$0xff] }
 0x34e   : > { %v2295_v29 = vpop.permute.xlu1 %2294  ;;  %v2966_v56 = vpop.permute.xlu0 %2965  ;;  %v2999_v39 = vmul.f32 %v9681_v53, %v8963_v44 }
 0x34f   : > { %v5816_v17 = vpack.c.bf16 %v3367_v51, %v3366_v59  ;;  %v2343_v32 = vmul.f32 %v2295_v29, %v8969_v33  ;;  %v3015_v19 = vmul.f32 %v2966_v56, %v8955_v11  ;;  %v9682_v59 = vld [vmem:[#allocation41_spill] sm:$0xff] }
 0x350   : > { %v3000_v51 = vmul.f32 %v9682_v59, %v8966_v35 }
 0x351   : > { %6012 = vst [vmem:[%s8587_s11 + $0xf0] sm:$0xff] %v5816_v17   ;;  %v2359_v22 = vadd.f32 %v2343_v32, %v2327_v0  ;;  %v3031_v3 = vadd.f32 %v3015_v19, %v2999_v39  ;;  %v9683_v17 = vld [vmem:[#allocation47_spill] sm:$0xff] }
 0x352   : > { %v2968_v41 = vpop.permute.xlu1 %2967  ;;  %v2629_v49 = vpop.permute.xlu0 %2628 }
 0x353   : > { %v5701_v9 = vpack.c.bf16 %v2359_v22, %v2358_v46  ;;  %v3016_v45 = vmul.f32 %v2968_v41, %v8969_v33  ;;  %v2678_v55 = vmul.f32 %v2629_v49, %v8955_v11  ;;  %v2662_v22 = vmul.f32 %v9683_v17, %v8963_v44  ;;  %v9684_v46 = vld [vmem:[#allocation42_spill] sm:$0xff] }
 0x354   : > { %v2663_v54 = vmul.f32 %v9684_v46, %v8966_v35 }
 0x355   : > { %5989 = vst [vmem:[%s8587_s11 + $0x38] sm:$0xff] %v5701_v9   ;;  %v3032_v29 = vadd.f32 %v3016_v45, %v3000_v51  ;;  %v2694_v59 = vadd.f32 %v2678_v55, %v2662_v22  ;;  %v9685_v51 = vld [vmem:[#allocation50_spill] sm:$0xff] }
 0x356   : > { %v2631_v32 = vpop.permute.xlu1 %2630  ;;  %v3303_v0 = vpop.permute.xlu0 %3302  ;;  %v3336_v45 = vmul.f32 %v9685_v51, %v8963_v44 }
 0x357   : > { %v5781_v56 = vpack.c.bf16 %v3032_v29, %v3031_v3  ;;  %v2679_v53 = vmul.f32 %v2631_v32, %v8969_v33  ;;  %v3352_v19 = vmul.f32 %v3303_v0, %v8955_v11  ;;  %v9686_v3 = vld [vmem:[#allocation43_spill] sm:$0xff]  ;;  %v9688_v11 = vld [vmem:[#allocation48_spill] sm:$0xff] }
 0x358   : > { %v3337_v29 = vmul.f32 %v9686_v3, %v8966_v35 }
 0x359   : > { %6005 = vst [vmem:[%s8587_s11 + $0xb8] sm:$0xff] %v5781_v56   ;;  %v2695_v41 = vadd.f32 %v2679_v53, %v2663_v54  ;;  %v3368_v32 = vadd.f32 %v3352_v19, %v3336_v45  ;;  %v6311_v54 = vld [vmem:[%s8367_s20] sm:$0xff] }
 0x35a   : > { %v3305_v49 = vpop.permute.xlu1 %3304  ;;  %v3618_v9 = vpop.permute.xlu0 %3617  ;;  %v9687_v53 = vld [vmem:[#allocation51_spill] sm:$0xff] }
 0x35b   : > { %v5741_v39 = vpack.c.bf16 %v2695_v41, %v2694_v59  ;;  %v3353_v17 = vmul.f32 %v3305_v49, %v8969_v33  ;;  %v3681_v56 = vmul.f32 %v3618_v9, %v8519_v48  ;;  %v3665_v59 = vmul.f32 %v6311_v54, %v9687_v53  ;;  %v6312_v41 = vld [vmem:[%s8367_s20 + $0x8] sm:$0xff] }
 0x35c   : > { %v3666_v51 = vmul.f32 %v6312_v41, %v9688_v11 }
 0x35d   : > { %5997 = vst [vmem:[%s8587_s11 + $0x78] sm:$0xff] %v5741_v39   ;;  %v3369_v55 = vadd.f32 %v3353_v17, %v3337_v29  ;;  %v3697_v3 = vadd.f32 %v3681_v56, %v3665_v59  ;;  %v9689_v29 = vld [vmem:[#allocation80_spill] sm:$0xff]  ;;  %v6313_v59 = vld [vmem:[%s8367_s20 + $0x10] sm:$0xff] }
 0x35e   : > { %v3620_v22 = vpop.permute.xlu1 %3619  ;;  %v3954_v0 = vpop.permute.xlu0 %3953  ;;  %v4001_v17 = vmul.f32 %v6311_v54, %v9689_v29 }
 0x35f   : > { %v5821_v46 = vpack.c.bf16 %v3369_v55, %v3368_v32  ;;  %v3682_v44 = vmul.f32 %v3620_v22, %v8499_v60  ;;  %v4017_v19 = vmul.f32 %v3954_v0, %v8519_v48  ;;  %v9690_v32 = vld [vmem:[#allocation49_spill] sm:$0xff] }
 0x360   : > { %v4002_v55 = vmul.f32 %v6312_v41, %v9690_v32  ;;  %v3667_v41 = vmul.f32 %v6313_v59, %v8514_v23 }
 0x361   : > { %6013 = vst [vmem:[%s8587_s11 + $0xf8] sm:$0xff] %v5821_v46   ;;  %v3698_v49 = vadd.f32 %v3682_v44, %v3666_v51  ;;  %v4033_v11 = vadd.f32 %v4017_v19, %v4001_v17  ;;  %v9691_v17 = vld [vmem:[#allocation81_spill] sm:$0xff] }
 0x362   : > { %v3956_v39 = vpop.permute.xlu1 %3955  ;;  %v3958_v45 = vpop.permute.xlu0 %3957  ;;  %v4003_v32 = vmul.f32 %v6313_v59, %v9691_v17 }
 0x363   : > { %v5826_v9 = vpack.c.bf16 %v3698_v49, %v3697_v3  ;;  %v4018_v53 = vmul.f32 %v3956_v39, %v8499_v60  ;;  %v6314_v60 = vld [vmem:[%s8367_s20 + $0x18] sm:$0xff]  ;;  %v4019_v49 = vmul.f32 %v3958_v45, %v8532_v20 }
 0x364   : > { %v3668_v51 = vmul.f32 %v6314_v60, %v8556_v42 }
 0x365   : > { %5827 = vst [vmem:[%s9012_s30] sm:$0xff] %v5826_v9   ;;  %v4034_v44 = vadd.f32 %v4018_v53, %v4002_v55  ;;  %v4004_v53 = vmul.f32 %v6314_v60, %v8529_v58  ;;  %v4035_v23 = vadd.f32 %v4019_v49, %v4003_v32  ;;  %v4005_v60 = vmul.f32 %v8568_v1, %v8651_v12 }
 0x366   : > { %v3622_v56 = vpop.permute.xlu1 %3621  ;;  %v3626_v48 = vpop.permute.xlu0 %3625  ;;  %v3672_v1 = vmul.f32 %v8643_v31, %v8748_v37  ;;  %v4007_v32 = vmul.f32 %v8619_v25, %v8745_v16  ;;  %v3674_v25 = vmul.f32 %v8698_v36, %v8835_v50 }
 0x367   : > { %v5866_v22 = vpack.c.bf16 %v4034_v44, %v4033_v11  ;;  %v3683_v0 = vmul.f32 %v3622_v56, %v8532_v20  ;;  %v3685_v44 = vmul.f32 %v3626_v48, %v8639_v24  ;;  %v3669_v20 = vmul.f32 %v8563_v40, %v8651_v12 }
 0x368   : > { %v4006_v40 = vmul.f32 %v8549_v27, %v8656_v6 }
 0x369   : > { %6021 = vst [vmem:[%s9012_s30 + $0x40] sm:$0xff] %v5866_v22   ;;  %v3699_v19 = vadd.f32 %v3683_v0, %v3667_v41  ;;  %v3670_v0 = vmul.f32 %v8540_v18, %v8656_v6  ;;  %v3701_v58 = vadd.f32 %v3685_v44, %v3669_v20  ;;  %v4009_v20 = vmul.f32 %v8686_v28, %v8832_v63 }
 0x36a   : > { %v3624_v46 = vpop.permute.xlu1 %3623  ;;  %v3962_v54 = vpop.permute.xlu0 %3961  ;;  %v3676_v28 = vmul.f32 %v8754_v10, %v8886_v14 }
 0x36b   : > { %v3684_v3 = vmul.f32 %v3624_v46, %v8553_v21 }
 0x36d   : > { %v3700_v39 = vadd.f32 %v3684_v3, %v3668_v51 }
 0x36e   : > { %v3960_v9 = vpop.permute.xlu1 %3959  ;;  %v3630_v29 = vpop.permute.xlu0 %3629 }
 0x36f   : > { %v5831_v55 = vpack.c.bf16 %v3700_v39, %v3699_v19  ;;  %v4020_v11 = vmul.f32 %v3960_v9, %v8553_v21  ;;  %v4021_v21 = vmul.f32 %v3962_v54, %v8639_v24  ;;  %v3687_v49 = vmul.f32 %v3630_v29, %v8735_v34 }
 0x370   : > { %v3671_v39 = vmul.f32 %v8598_v7, %v8745_v16  ;;  %v4008_v7 = vmul.f32 %v8678_v62, %v8748_v37 }
 0x371   : > { %6014 = vst [vmem:[%s9012_s30 + $0x8] sm:$0xff] %v5831_v55   ;;  %v4036_v42 = vadd.f32 %v4020_v11, %v4004_v53  ;;  %v4037_v18 = vadd.f32 %v4021_v21, %v4005_v60 }
 0x372   : > { %v3628_v56 = vpop.permute.xlu1 %3627  ;;  %v3966_v22 = vpop.permute.xlu0 %3965  ;;  %v3703_v27 = vadd.f32 %v3687_v49, %v3671_v39  ;;  %v9693_v39 = vld [vmem:[#allocation56_spill] sm:$0xff] }
 0x373   : > { %v5871_v45 = vpack.c.bf16 %v4036_v42, %v4035_v23  ;;  %v3686_v46 = vmul.f32 %v3628_v56, %v8659_v43  ;;  %v4023_v6 = vmul.f32 %v3966_v22, %v8735_v34  ;;  %v3673_v42 = vmul.f32 %v8662_v5, %v8832_v63 }
 0x374   : > { %v4010_v5 = vmul.f32 %v8722_v38, %v8835_v50 }
 0x375   : > { %6022 = vst [vmem:[%s9012_s30 + $0x48] sm:$0xff] %v5871_v45   ;;  %v3702_v59 = vadd.f32 %v3686_v46, %v3670_v0  ;;  %v4039_v31 = vadd.f32 %v4023_v6, %v4007_v32  ;;  %v9696_v6 = vld [vmem:[#allocation53_spill] sm:$0xff] }
 0x376   : > { %v3964_v48 = vpop.permute.xlu1 %3963  ;;  %v3634_v41 = vpop.permute.xlu0 %3633 }
 0x377   : > { %v5836_v51 = vpack.c.bf16 %v3702_v59, %v3701_v58  ;;  %v4022_v3 = vmul.f32 %v3964_v48, %v8659_v43  ;;  %v3689_v11 = vmul.f32 %v3634_v41, %v8822_v4  ;;  %v3675_v59 = vmul.f32 %v8707_v13, %v8883_v61 }
 0x378   : > { %v4012_v13 = vmul.f32 %v8773_v57, %v8886_v14 }
 0x379   : > { %6015 = vst [vmem:[%s9012_s30 + $0x10] sm:$0xff] %v5836_v51   ;;  %v4038_v19 = vadd.f32 %v4022_v3, %v4006_v40  ;;  %v3705_v62 = vadd.f32 %v3689_v11, %v3673_v42  ;;  %v4011_v51 = vmul.f32 %v8730_v30, %v8883_v61  ;;  %v9694_v30 = vld [vmem:[#allocation55_spill] sm:$0xff] }
 0x37a   : > { %v3632_v24 = vpop.permute.xlu1 %3631  ;;  %v3970_v54 = vpop.permute.xlu0 %3969  ;;  %v3678_v61 = vmul.f32 %v9694_v30, %v9693_v39  ;;  %v4454_v30 = vld [vmem:[%s8587_s11 + $0xb8] sm:$0xff] (%p6474_p5)  }
 0x37b   : > { %v5876_v9 = vpack.c.bf16 %v4038_v19, %v4037_v18  ;;  %v3688_v12 = vmul.f32 %v3632_v24, %v8751_v47  ;;  %v4025_v37 = vmul.f32 %v3970_v54, %v8822_v4  ;;  %v9692_v19 = vld [vmem:[#allocation52_spill] sm:$0xff]  ;;  %4455 = vst [vmem:[%s9122_s27 + $0x138] sm:$0xff] (%p6474_p5), %v4454_v30  }
 0x37c   : > { %v3677_v24 = vmul.f32 %v9692_v19, %v8923_v52  ;;  %v4438_v19 = vld [vmem:[%s8587_s11 + $0x98] sm:$0xff] (%p6474_p5)  }
 0x37d   : > { %6023 = vst [vmem:[%s9012_s30 + $0x50] sm:$0xff] %v5876_v9   ;;  %v3704_v43 = vadd.f32 %v3688_v12, %v3672_v1  ;;  %v4041_v36 = vadd.f32 %v4025_v37, %v4009_v20  ;;  %v9695_v9 = vld [vmem:[#allocation57_spill] sm:$0xff]  ;;  %v9702_v20 = vld [vmem:[#allocation83_spill] sm:$0xff]  ;;  %4439 = vst [vmem:[%s9122_s27 + $0x118] sm:$0xff] (%p6474_p5), %v4438_v19  }
 0x37e   : > { %v3968_v29 = vpop.permute.xlu1 %3967  ;;  %v3638_v17 = vpop.permute.xlu0 %3637 }
 0x37f   : > { %v5841_v55 = vpack.c.bf16 %v3704_v43, %v3703_v27  ;;  %v4024_v53 = vmul.f32 %v3968_v29, %v8751_v47  ;;  %v3691_v58 = vmul.f32 %v3638_v17, %v8875_v8  ;;  %v4013_v43 = vmul.f32 %v9696_v6, %v8923_v52  ;;  %v9697_v17 = vld [vmem:[#allocation58_spill] sm:$0xff]  ;;  %v9701_v52 = vld [vmem:[#allocation59_spill] sm:$0xff] }
 0x380   : > { %v4014_v32 = vmul.f32 %v9697_v17, %v9693_v39  ;;  %v4450_v39 = vld [vmem:[%s8587_s11 + $0xb0] sm:$0xff] (%p6474_p5)  }
 0x381   : > { %6016 = vst [vmem:[%s9012_s30 + $0x18] sm:$0xff] %v5841_v55   ;;  %v4040_v23 = vadd.f32 %v4024_v53, %v4008_v7  ;;  %v3707_v38 = vadd.f32 %v3691_v58, %v3675_v59  ;;  %v9698_v53 = vld [vmem:[#allocation60_spill] sm:$0xff]  ;;  %v4370_v59 = vld [vmem:[%s8587_s11 + $0x10] sm:$0xff] (%p6474_p5)   ;;  %4451 = vst [vmem:[%s9122_s27 + $0x130] sm:$0xff] (%p6474_p5), %v4450_v39  }
 0x382   : > { %v3636_v34 = vpop.permute.xlu1 %3635  ;;  %v3974_v44 = vpop.permute.xlu0 %3973  ;;  %4371 = vst [vmem:[%s9122_s27 + $0x10] sm:$0xff] (%p6474_p5), %v4370_v59  }
 0x383   : > { %v5881_v56 = vpack.c.bf16 %v4040_v23, %v4039_v31  ;;  %v3690_v16 = vmul.f32 %v3636_v34, %v8838_v2  ;;  %v4027_v50 = vmul.f32 %v3974_v44, %v8875_v8  ;;  %v9699_v34 = vld [vmem:[#allocation62_spill] sm:$0xff] }
 0x384   : > { %v9700_v44 = vld [vmem:[#allocation82_spill] sm:$0xff] }
 0x385   : > { %6024 = vst [vmem:[%s9012_s30 + $0x58] sm:$0xff] %v5881_v56   ;;  %v3706_v47 = vadd.f32 %v3690_v16, %v3674_v25  ;;  %v4043_v10 = vadd.f32 %v4027_v50, %v4011_v51  ;;  %v3679_v42 = vmul.f32 %v9700_v44, %v9699_v34  ;;  %v3680_v25 = vmul.f32 %v9701_v52, %v8966_v35  ;;  %v4390_v50 = vld [vmem:[%s8587_s11 + $0x38] sm:$0xff] (%p6474_p5)  }
 0x386   : > { %v3972_v22 = vpop.permute.xlu1 %3971  ;;  %v3642_v46 = vpop.permute.xlu0 %3641  ;;  %4391 = vst [vmem:[%s9122_s27 + $0x38] sm:$0xff] (%p6474_p5), %v4390_v50   ;;  %v4406_v51 = vld [vmem:[%s8587_s11 + $0x58] sm:$0xff] (%p6474_p5)  }
 0x387   : > { %v5846_v45 = vpack.c.bf16 %v3706_v47, %v3705_v62  ;;  %v4026_v0 = vmul.f32 %v3972_v22, %v8838_v2  ;;  %v3693_v18 = vmul.f32 %v3642_v46, %v8915_v15  ;;  %4407 = vst [vmem:[%s9122_s27 + $0x98] sm:$0xff] (%p6474_p5), %v4406_v51  }
 0x389   : > { %6017 = vst [vmem:[%s9012_s30 + $0x20] sm:$0xff] %v5846_v45   ;;  %v4042_v21 = vadd.f32 %v4026_v0, %v4010_v5  ;;  %v3709_v57 = vadd.f32 %v3693_v18, %v3677_v24  ;;  %v4015_v45 = vmul.f32 %v9702_v20, %v9699_v34  ;;  %v9703_v0 = vld [vmem:[#allocation54_spill] sm:$0xff]  ;;  %v4426_v18 = vld [vmem:[%s8587_s11 + $0x80] sm:$0xff] (%p6474_p5)  }
 0x38a   : > { %v3640_v4 = vpop.permute.xlu1 %3639  ;;  %v3978_v41 = vpop.permute.xlu0 %3977  ;;  %v4016_v46 = vmul.f32 %v9703_v0, %v8966_v35  ;;  %v4362_v35 = vld [vmem:[%s8587_s11] sm:$0xff] (%p6474_p5)   ;;  %4427 = vst [vmem:[%s9122_s27 + $0x100] sm:$0xff] (%p6474_p5), %v4426_v18  }
 0x38b   : > { %v5886_v48 = vpack.c.bf16 %v4042_v21, %v4041_v36  ;;  %v3692_v63 = vmul.f32 %v3640_v4, %v8889_v26  ;;  %v4029_v14 = vmul.f32 %v3978_v41, %v8915_v15  ;;  %4363 = vst [vmem:[%s9122_s27] sm:$0xff] (%p6474_p5), %v4362_v35   ;;  %v4398_v41 = vld [vmem:[%s8587_s11 + $0x48] sm:$0xff] (%p6474_p5)   ;;  %v4442_v24 = vld [vmem:[%s8587_s11 + $0xa0] sm:$0xff] (%p6474_p5)  }
 0x38c   : > { %4399 = vst [vmem:[%s9122_s27 + $0x88] sm:$0xff] (%p6474_p5), %v4398_v41   ;;  %4443 = vst [vmem:[%s9122_s27 + $0x120] sm:$0xff] (%p6474_p5), %v4442_v24  }
 0x38d   : > { %6025 = vst [vmem:[%s9012_s30 + $0x60] sm:$0xff] %v5886_v48   ;;  %v3708_v2 = vadd.f32 %v3692_v63, %v3676_v28  ;;  %v4045_v7 = vadd.f32 %v4029_v14, %v4013_v43  ;;  %v4374_v48 = vld [vmem:[%s8587_s11 + $0x18] sm:$0xff] (%p6474_p5)   ;;  %v4378_v28 = vld [vmem:[%s8587_s11 + $0x20] sm:$0xff] (%p6474_p5)   ;;  %v4382_v63 = vld [vmem:[%s8587_s11 + $0x28] sm:$0xff] (%p6474_p5)  }
 0x38e   : > { %v3976_v60 = vpop.permute.xlu1 %3975  ;;  %v3646_v12 = vpop.permute.xlu0 %3645  ;;  %4375 = vst [vmem:[%s9122_s27 + $0x18] sm:$0xff] (%p6474_p5), %v4374_v48   ;;  %4379 = vst [vmem:[%s9122_s27 + $0x20] sm:$0xff] (%p6474_p5), %v4378_v28   ;;  %v4478_v14 = vld [vmem:[%s8587_s11 + $0xe8] sm:$0xff] (%p6474_p5)  }
 0x38f   : > { %v5851_v40 = vpack.c.bf16 %v3708_v2, %v3707_v38  ;;  %v4028_v3 = vmul.f32 %v3976_v60, %v8889_v26  ;;  %v3695_v31 = vmul.f32 %v3646_v12, %v9698_v53  ;;  %4383 = vst [vmem:[%s9122_s27 + $0x28] sm:$0xff] (%p6474_p5), %v4382_v63   ;;  %v4386_v38 = vld [vmem:[%s8587_s11 + $0x30] sm:$0xff] (%p6474_p5)   ;;  %v4394_v2 = vld [vmem:[%s8587_s11 + $0x40] sm:$0xff] (%p6474_p5)   ;;  %v4470_v12 = vld [vmem:[%s8587_s11 + $0xd8] sm:$0xff] (%p6474_p5)  }
 0x390   : > { %4387 = vst [vmem:[%s9122_s27 + $0x30] sm:$0xff] (%p6474_p5), %v4386_v38   ;;  %4395 = vst [vmem:[%s9122_s27 + $0x80] sm:$0xff] (%p6474_p5), %v4394_v2   ;;  %v4402_v60 = vld [vmem:[%s8587_s11 + $0x50] sm:$0xff] (%p6474_p5)  }
 0x391   : > { %6018 = vst [vmem:[%s9012_s30 + $0x28] sm:$0xff] %v5851_v40   ;;  %v4044_v49 = vadd.f32 %v4028_v3, %v4012_v13  ;;  %v3711_v62 = vadd.f32 %v3695_v31, %v3679_v42  ;;  %4403 = vst [vmem:[%s9122_s27 + $0x90] sm:$0xff] (%p6474_p5), %v4402_v60   ;;  %v4410_v40 = vld [vmem:[%s8587_s11 + $0x60] sm:$0xff] (%p6474_p5)   ;;  %v4414_v13 = vld [vmem:[%s8587_s11 + $0x68] sm:$0xff] (%p6474_p5)  }
 0x392   : > { %v3644_v8 = vpop.permute.xlu1 %3643  ;;  %v3982_v23 = vpop.permute.xlu0 %3981  ;;  %v4418_v3 = vld [vmem:[%s8587_s11 + $0x70] sm:$0xff] (%p6474_p5)   ;;  %4411 = vst [vmem:[%s9122_s27 + $0xa0] sm:$0xff] (%p6474_p5), %v4410_v40   ;;  %4415 = vst [vmem:[%s9122_s27 + $0xa8] sm:$0xff] (%p6474_p5), %v4414_v13  }
 0x393   : > { %v5891_v54 = vpack.c.bf16 %v4044_v49, %v4043_v10  ;;  %v3694_v1 = vmul.f32 %v3644_v8, %v9695_v9  ;;  %v4031_v37 = vmul.f32 %v3982_v23, %v9698_v53  ;;  %4419 = vst [vmem:[%s9122_s27 + $0xb0] sm:$0xff] (%p6474_p5), %v4418_v3   ;;  %v4422_v10 = vld [vmem:[%s8587_s11 + $0x78] sm:$0xff] (%p6474_p5)   ;;  %v4430_v49 = vld [vmem:[%s8587_s11 + $0x88] sm:$0xff] (%p6474_p5)   ;;  %v4434_v8 = vld [vmem:[%s8587_s11 + $0x90] sm:$0xff] (%p6474_p5)  }
 0x394   : > { %4423 = vst [vmem:[%s9122_s27 + $0xb8] sm:$0xff] (%p6474_p5), %v4422_v10   ;;  %4431 = vst [vmem:[%s9122_s27 + $0x108] sm:$0xff] (%p6474_p5), %v4430_v49  }
 0x395   : > { %6026 = vst [vmem:[%s9012_s30 + $0x68] sm:$0xff] %v5891_v54   ;;  %v3710_v26 = vadd.f32 %v3694_v1, %v3678_v61  ;;  %v4047_v58 = vadd.f32 %v4031_v37, %v4015_v45  ;;  %4435 = vst [vmem:[%s9122_s27 + $0x110] sm:$0xff] (%p6474_p5), %v4434_v8   ;;  %v4446_v54 = vld [vmem:[%s8587_s11 + $0xa8] sm:$0xff] (%p6474_p5)   ;;  %v4458_v61 = vld [vmem:[%s8587_s11 + $0xc0] sm:$0xff] (%p6474_p5)  }
 0x396   : > { %v3980_v27 = vpop.permute.xlu1 %3979  ;;  %4447 = vst [vmem:[%s9122_s27 + $0x128] sm:$0xff] (%p6474_p5), %v4446_v54   ;;  %v4466_v1 = vld [vmem:[%s8587_s11 + $0xd0] sm:$0xff] (%p6474_p5)   ;;  %4459 = vst [vmem:[%s9122_s27 + $0x180] sm:$0xff] (%p6474_p5), %v4458_v61  }
 0x397   : > { %v5856_v29 = vpack.c.bf16 %v3710_v26, %v3709_v57  ;;  %v4030_v55 = vmul.f32 %v3980_v27, %v9695_v9  ;;  %v4462_v9 = vld [vmem:[%s8587_s11 + $0xc8] sm:$0xff] (%p6474_p5)   ;;  %4467 = vst [vmem:[%s9122_s27 + $0x190] sm:$0xff] (%p6474_p5), %v4466_v1   ;;  %v4474_v57 = vld [vmem:[%s8587_s11 + $0xe0] sm:$0xff] (%p6474_p5)   ;;  %4471 = vst [vmem:[%s9122_s27 + $0x198] sm:$0xff] (%p6474_p5), %v4470_v12  }
 0x398   : > { %4463 = vst [vmem:[%s9122_s27 + $0x188] sm:$0xff] (%p6474_p5), %v4462_v9   ;;  %4475 = vst [vmem:[%s9122_s27 + $0x1a0] sm:$0xff] (%p6474_p5), %v4474_v57   ;;  %v4482_v26 = vld [vmem:[%s8587_s11 + $0xf0] sm:$0xff] (%p6474_p5)   ;;  %v4486_v27 = vld [vmem:[%s8587_s11 + $0xf8] sm:$0xff] (%p6474_p5)  }
 0x399   : > { %6019 = vst [vmem:[%s9012_s30 + $0x30] sm:$0xff] %v5856_v29   ;;  %v4046_v11 = vadd.f32 %v4030_v55, %v4014_v32  ;;  %4479 = vst [vmem:[%s9122_s27 + $0x1a8] sm:$0xff] (%p6474_p5), %v4478_v14  }
 0x39a   : > { %v3648_v15 = vpop.permute.xlu1 %3647  ;;  %4483 = vst [vmem:[%s9122_s27 + $0x1b0] sm:$0xff] (%p6474_p5), %v4482_v26   ;;  %4487 = vst [vmem:[%s9122_s27 + $0x1b8] sm:$0xff] (%p6474_p5), %v4486_v27  }
 0x39b   : > { %v5896_v56 = vpack.c.bf16 %v4046_v11, %v4045_v7  ;;  %v3696_v16 = vmul.f32 %v3648_v15, %v8969_v33 }
 0x39d   : > { %6027 = vst [vmem:[%s9012_s30 + $0x70] sm:$0xff] %v5896_v56   ;;  %v3712_v47 = vadd.f32 %v3696_v16, %v3680_v25 }
 0x39e   : > { %v3984_v22 = vpop.permute.xlu1 %3983 }
 0x39f   : > { %v5861_v5 = vpack.c.bf16 %v3712_v47, %v3711_v62  ;;  %v4032_v36 = vmul.f32 %v3984_v22, %v8969_v33  ;;  %v4366_v33 = vld [vmem:[%s8587_s11 + $0x8] sm:$0xff] (%p6474_p5)  }
 0x3a0   : > { %4367 = vst [vmem:[%s9122_s27 + $0x8] sm:$0xff] (%p6474_p5), %v4366_v33  }
 0x3a1   : > { %6020 = vst [vmem:[%s9012_s30 + $0x38] sm:$0xff] %v5861_v5   ;;  %v4048_v21 = vadd.f32 %v4032_v36, %v4016_v46  ;;  %4342 = sbr.rel (!%p6474_p5) target bundleno = 934 (0x3a6), region = 52 }
 0x3a3   : > { %v5901_v4 = vpack.c.bf16 %v4048_v21, %v4047_v58 }
 0x3a5   : > { %6028 = vst [vmem:[%s9012_s30 + $0x78] sm:$0xff] %v5901_v4  }
 0x3a6 PF: > { %4641 = sbr.rel (!%p6474_p5) target bundleno = 944 (0x3b0), region = 93  ;;  %s5659_s29 = sshll.u32 (%p6474_p5), %s6457_s17, 6  ;;  %v4661_v6 = vld [vmem:[%s9012_s30] sm:$0xff] (%p6474_p5)   ;;  %v4665_v43 = vld [vmem:[%s9012_s30 + $0x8] sm:$0xff] (%p6474_p5)   ;;  %v4669_v29 = vld [vmem:[%s9012_s30 + $0x10] sm:$0xff] (%p6474_p5)  }
 0x3a7   : > { %s4644_s28 = scalar_lea.vmem (%p6474_p5), %s9285_s8, %s5659_s29  ;;  %v4673_v17 = vld [vmem:[%s9012_s30 + $0x18] sm:$0xff] (%p6474_p5)   ;;  %v4677_v32 = vld [vmem:[%s9012_s30 + $0x20] sm:$0xff] (%p6474_p5)   ;;  %v4681_v55 = vld [vmem:[%s9012_s30 + $0x28] sm:$0xff] (%p6474_p5)  }
 0x3a8   : > { %4662 = vst [vmem:[%s4644_s28] sm:$0xff] (%p6474_p5), %v4661_v6   ;;  %4666 = vst [vmem:[%s4644_s28 + $0x8] sm:$0xff] (%p6474_p5), %v4665_v43   ;;  %v4685_v7 = vld [vmem:[%s9012_s30 + $0x30] sm:$0xff] (%p6474_p5)   ;;  %v4689_v53 = vld [vmem:[%s9012_s30 + $0x38] sm:$0xff] (%p6474_p5)  }
 0x3a9   : > { %4670 = vst [vmem:[%s4644_s28 + $0x10] sm:$0xff] (%p6474_p5), %v4669_v29   ;;  %4674 = vst [vmem:[%s4644_s28 + $0x18] sm:$0xff] (%p6474_p5), %v4673_v17   ;;  %v4693_v31 = vld [vmem:[%s9012_s30 + $0x40] sm:$0xff] (%p6474_p5)   ;;  %v4697_v11 = vld [vmem:[%s9012_s30 + $0x48] sm:$0xff] (%p6474_p5)  }
 0x3aa   : > { %4678 = vst [vmem:[%s4644_s28 + $0x20] sm:$0xff] (%p6474_p5), %v4677_v32   ;;  %4682 = vst [vmem:[%s4644_s28 + $0x28] sm:$0xff] (%p6474_p5), %v4681_v55   ;;  %v4701_v23 = vld [vmem:[%s9012_s30 + $0x50] sm:$0xff] (%p6474_p5)   ;;  %v4705_v15 = vld [vmem:[%s9012_s30 + $0x58] sm:$0xff] (%p6474_p5)  }
 0x3ab   : > { %4686 = vst [vmem:[%s4644_s28 + $0x30] sm:$0xff] %v4685_v7   ;;  %4690 = vst [vmem:[%s4644_s28 + $0x38] sm:$0xff] %v4689_v53   ;;  %v4709_v34 = vld [vmem:[%s9012_s30 + $0x60] sm:$0xff]   ;;  %v4713_v44 = vld [vmem:[%s9012_s30 + $0x68] sm:$0xff]  }
 0x3ac   : > { %4694 = vst [vmem:[%s4644_s28 + $0x80] sm:$0xff] %v4693_v31   ;;  %4698 = vst [vmem:[%s4644_s28 + $0x88] sm:$0xff] %v4697_v11   ;;  %v4717_v42 = vld [vmem:[%s9012_s30 + $0x70] sm:$0xff]   ;;  %v4721_v56 = vld [vmem:[%s9012_s30 + $0x78] sm:$0xff]  }
 0x3ad   : > { %4702 = vst [vmem:[%s4644_s28 + $0x90] sm:$0xff] %v4701_v23   ;;  %4706 = vst [vmem:[%s4644_s28 + $0x98] sm:$0xff] %v4705_v15  }
 0x3ae   : > { %4710 = vst [vmem:[%s4644_s28 + $0xa0] sm:$0xff] %v4709_v34   ;;  %4714 = vst [vmem:[%s4644_s28 + $0xa8] sm:$0xff] %v4713_v44  }
 0x3af   : > { %4718 = vst [vmem:[%s4644_s28 + $0xb0] sm:$0xff] %v4717_v42   ;;  %4722 = vst [vmem:[%s4644_s28 + $0xb8] sm:$0xff] %v4721_v56  }
 0x3b0 PF: > { %4812 = sbr.rel (!%p6474_p5) target bundleno = 954 (0x3ba), region = 134  ;;  %s5660_s11 = sshll.u32 (%p6474_p5), %s6457_s17, 6  ;;  %v4832_v52 = vld [vmem:[%s7563_s26] sm:$0xff] (%p6474_p5)   ;;  %v4836_v25 = vld [vmem:[%s7563_s26 + $0x8] sm:$0xff] (%p6474_p5)   ;;  %v4840_v16 = vld [vmem:[%s7563_s26 + $0x10] sm:$0xff] (%p6474_p5)  }
 0x3b1   : > { %s4815_s20 = scalar_lea.vmem (%p6474_p5), %s9286_s9, %s5660_s11  ;;  %v4844_v62 = vld [vmem:[%s7563_s26 + $0x18] sm:$0xff] (%p6474_p5)   ;;  %v4848_v37 = vld [vmem:[%s7563_s26 + $0x20] sm:$0xff] (%p6474_p5)   ;;  %v4852_v47 = vld [vmem:[%s7563_s26 + $0x28] sm:$0xff] (%p6474_p5)  }
 0x3b2   : > { %4833 = vst [vmem:[%s4815_s20] sm:$0xff] (%p6474_p5), %v4832_v52   ;;  %4837 = vst [vmem:[%s4815_s20 + $0x8] sm:$0xff] (%p6474_p5), %v4836_v25   ;;  %v4856_v22 = vld [vmem:[%s7563_s26 + $0x30] sm:$0xff] (%p6474_p5)   ;;  %v4860_v20 = vld [vmem:[%s7563_s26 + $0x38] sm:$0xff] (%p6474_p5)  }
 0x3b3   : > { %4841 = vst [vmem:[%s4815_s20 + $0x10] sm:$0xff] (%p6474_p5), %v4840_v16   ;;  %4845 = vst [vmem:[%s4815_s20 + $0x18] sm:$0xff] (%p6474_p5), %v4844_v62   ;;  %v4864_v45 = vld [vmem:[%s7563_s26 + $0x40] sm:$0xff] (%p6474_p5)   ;;  %v4868_v5 = vld [vmem:[%s7563_s26 + $0x48] sm:$0xff] (%p6474_p5)  }
 0x3b4   : > { %4849 = vst [vmem:[%s4815_s20 + $0x20] sm:$0xff] (%p6474_p5), %v4848_v37   ;;  %4853 = vst [vmem:[%s4815_s20 + $0x28] sm:$0xff] (%p6474_p5), %v4852_v47   ;;  %v4872_v0 = vld [vmem:[%s7563_s26 + $0x50] sm:$0xff] (%p6474_p5)   ;;  %v4876_v46 = vld [vmem:[%s7563_s26 + $0x58] sm:$0xff] (%p6474_p5)  }
 0x3b5   : > { %4857 = vst [vmem:[%s4815_s20 + $0x30] sm:$0xff] %v4856_v22   ;;  %4861 = vst [vmem:[%s4815_s20 + $0x38] sm:$0xff] %v4860_v20   ;;  %v4880_v36 = vld [vmem:[%s7563_s26 + $0x60] sm:$0xff]   ;;  %v4884_v58 = vld [vmem:[%s7563_s26 + $0x68] sm:$0xff]  }
 0x3b6   : > { %4865 = vst [vmem:[%s4815_s20 + $0x80] sm:$0xff] %v4864_v45   ;;  %4869 = vst [vmem:[%s4815_s20 + $0x88] sm:$0xff] %v4868_v5   ;;  %v4888_v21 = vld [vmem:[%s7563_s26 + $0x70] sm:$0xff]   ;;  %v4892_v4 = vld [vmem:[%s7563_s26 + $0x78] sm:$0xff]  }
 0x3b7   : > { %4873 = vst [vmem:[%s4815_s20 + $0x90] sm:$0xff] %v4872_v0   ;;  %4877 = vst [vmem:[%s4815_s20 + $0x98] sm:$0xff] %v4876_v46  }
 0x3b8   : > { %4881 = vst [vmem:[%s4815_s20 + $0xa0] sm:$0xff] %v4880_v36   ;;  %4885 = vst [vmem:[%s4815_s20 + $0xa8] sm:$0xff] %v4884_v58  }
 0x3b9   : > { %4889 = vst [vmem:[%s4815_s20 + $0xb0] sm:$0xff] %v4888_v21   ;;  %4893 = vst [vmem:[%s4815_s20 + $0xb8] sm:$0xff] %v4892_v4  }
 0x3ba PF: > { %s5662_s21 = sshll.u32 %s6457_s17, 11  ;;  %s4991_s27 = sshll.u32 %s6611_s25, 4  ;;  %s9236_s27 = int_to_ptr.vmem [resolvable:$true] %s4991_s27 }
 0x3bb   : > { %s9234_s15 = scalar_lea.hbm %s9287_s10, %s5662_s21  ;;  %s6315_s28 = scalar_lea.vmem %s9236_s27, 2048 }
 0x3bc   : > { %p6316_p11 = scmp.ne.s32.totalorder %s9236_s27, %s6315_s28  ;;  %s6378_s26 = smov [#allocation6]  }
 0x3bd   : > { %s6319_s11 = sshll.u32 %s6378_s26, 4  ;;  %s6320_s11 = int_to_ptr.vmem [resolvable:$false] %s6319_s11 }
 0x3be   : > { %p6317_p12 = pnand %p6316_p11, %p6474_p5  ;;  %s6321_s17 = scalar_lea.vmem %s6320_s11, 4096 }
 0x3bf   : > { %p6322_p0 = scmp.lt.s32.totalorder %s9236_s27, %s6320_s11  ;;  %p6323_p1 = scmp.lt.s32.totalorder %s6321_s17, %s6315_s28 }
 0x3c0   : > { %p6318_p13 = pneg %p6317_p12 }
 0x3c1   : > { %p6324_p2 = por %p6323_p1, %p6322_p0 }
 0x3c3   : > { %p6325_p3 = pnand %p6324_p2, %p6318_p13 }
 0x3c5   : > { %6328 = shalt.err (!%p6325_p3)
}
 0x3c6   : > { %s6329_s25 = scalar_lea.hbm %s9234_s15, 2048  ;;  %s6333_s20 = scalar_lea.hbm %s9287_s10, 4096 }
 0x3c7   : > { %p6330_p4 = scmp.ne.s32.totalorder %s9234_s15, %s6329_s25  ;;  %p6334_p9 = scmp.lt.s32.totalorder %s9234_s15, %s9287_s10 }
 0x3c8   : > { %p6335_p10 = scmp.lt.s32.totalorder %s6333_s20, %s6329_s25 }
 0x3c9   : > { %p6331_p7 = pnand %p6330_p4, %p6474_p5 }
 0x3ca   : > { %p6336_p11 = por %p6335_p10, %p6334_p9 }
 0x3cb   : > { %p6332_p8 = pneg %p6331_p7 }
 0x3cd   : > { %p6337_p12 = pnand %p6336_p11, %p6332_p8 }
 0x3cf   : > { %6340 = shalt.err (!%p6337_p12)
}
 0x3d0   : > { %s6379_s0 = smov 128   ;;  %s6380_s28 = smov 8  }
 0x3d1   : > { %6044 = dma.vmem_to_hbm [thread:$0]  (%p6474_p5), %s9236_s27, 2048, %s9234_s15, %s4336_s22, %s6379_s0, %s6379_s0, %s6380_s28  }
 0x3d2 PF: > { %p6050_p13 = scmp.ge.s32.totalorder %s6375_s16, 2  ;;  %s5027_s26 = sand.u32 1, %s6363_s13  }
 0x3d3   : > { %s5028_s11 = scalar_lea.sflag [#allocation7], %s5027_s26 }
 0x3d4   : > { %p6047_p0 = pnand %p6050_p13, %p6478_p6 }
 0x3d6   : > { %p6048_p1 = pneg %p6047_p0 }
 0x3d8   : > { %6358 = dma.done.wait (%p6048_p1), %s5028_s11, 2048  }
 0x3d9   : > { %6360 = vsyncadd (%p6048_p1), %s5028_s11, 4294965248  ;;  %s9704_s17 = sld [smem:[#allocation9_spill]]  ;;  %p21_p2 = scmp.ge.s32.totalorder %s6461_s19, 4  }
 0x3da   : > { %s9705_s15 = sld [smem:[#allocation10_spill]]  ;;  %s9706_s13 = smov %s6367_s14 }
 0x3db   : > { %s9708_s16 = smov %s6461_s19  ;;  %23 = sbr.rel (!%p21_p2) target bundleno = 5 (0x5), region = 253 }
 0x3df   : > { %s9707_s14 = smov %s9704_s17 }
 0x3e0   :  { %5033 = vsyncpa [#allocation7], 1 }
 0x3e1   :  { %5035 = vsyncpa [#allocation7 + $0x1], 1 }

</bundles_post_ra>
